<compile_context>
chip_gen: v7x
topology: tpu7x:2x2x1
jax: 0.10.0
libtpu: 0.0.40
codegen_flags: <defaults>
</compile_context>

<pallas_src>
import functools

import jax
import jax.numpy as jnp
from jax.experimental import pallas as pl
from jax.experimental.pallas import tpu as pltpu


def _round_up(v, m):
    return (v + m - 1) // m * m


def _vmem_spec():
    # Whole-array blocks; full-extent blocks satisfy the (8, 128) tiling rule
    # because block_shape == array shape.
    return pl.BlockSpec(memory_space=pltpu.MemorySpace.VMEM)


# ----------------------------------------------------------------------------
# Fused kernel: all pred_steps and all GGNN layers in one invocation.
# ----------------------------------------------------------------------------
def fused_ggsnn_kernel(adj_ref, x_ref, ggnn_w_ref, w_ih_ref, w_hh_ref,
                       b_i_ref, b_hn_ref, ep_wh_ref, ep_wx_ref, ep_b_ref,
                       out_ref, *, num_layers, pred_steps, Dp, Op):
    def mm(a, b):
        # MXU path: bf16 operands, f32 accumulation.  Operands are zero-padded
        # to 128-lane multiples, so the bf16 cast / padding is numerically
        # exact on the padded region and the MXU tiles are fully aligned.
        return jnp.dot(a.astype(jnp.bfloat16), b.astype(jnp.bfloat16),
                       preferred_element_type=jnp.float32)

    x = x_ref[...]                         # [Np, Dp] f32 (zero-padded lanes)

    # pred_steps / num_layers are small compile-time constants: static Python
    # loops == full unroll.  Weight/bias reads stay inside the loops, next to
    # their uses, so no huge operand is live across the whole unrolled body
    # (avoids vreg spills when D >= 128).
    for k in range(pred_steps):
        h = x                              # hidden_state == 0 => pad is identity
        for layer in range(num_layers):
            hw = mm(h, ggnn_w_ref[layer])                  # [Np, Dp]
            m = mm(adj_ref[...], hw)                       # sum aggregation
            # Packed GRU gates (torch.nn.GRUCell order r|z|n), each gate block
            # Dp-wide => all slices below are 128-lane aligned (no XLU shuffles).
            gi = mm(m, w_ih_ref[...]) + b_i_ref[...]       # [Np, 3*Dp]
            gh = mm(h, w_hh_ref[...])
            r = jax.nn.sigmoid(gi[:, 0:Dp] + gh[:, 0:Dp])
            z = jax.nn.sigmoid(gi[:, Dp:2 * Dp] + gh[:, Dp:2 * Dp])
            n = jnp.tanh(gi[:, 2 * Dp:] + r * (gh[:, 2 * Dp:] + b_hn_ref[...]))
            h = (1.0 - z) * n + z * h

        # Fused epilogue: concat(h, x) @ [[prop_w | out_w]] + [prop_b | out_b]
        # (concat avoided by row-splitting the weights; prop part first so both
        # result slices sit on 128-lane boundaries).
        ep = mm(h, ep_wh_ref[...]) + mm(x, ep_wx_ref[...]) + ep_b_ref[...]
        # Lane-dense, 128-aligned, unmasked store (Op is a multiple of 128);
        # storing per step keeps out_k's live range short.
        out_ref[:, k * Op:(k + 1) * Op] = ep[:, Dp:]
        x = ep[:, 0:Dp]


# ----------------------------------------------------------------------------
# Wrapper
# ----------------------------------------------------------------------------
def per_node_ggsnn_forward(x, adj, packed, pred_steps, num_layers, output_size):
    N, D = x.shape
    Dp = packed["b_hn"].shape[1]
    Op = packed["ep_b"].shape[1] - Dp
    Np = _round_up(N, 8)
    O = output_size

    # Zero padding is exact: padded weight rows/cols are zero, so padded
    # feature lanes never leak into real outputs; padded node rows never
    # contribute because their adjacency rows/cols are zero.
    x_p = jnp.pad(x, ((0, Np - N), (0, Dp - D)))
    adj_p = jnp.pad(adj, ((0, Np - N), (0, Np - N))).astype(jnp.bfloat16)  # integer counts: exact

    args = (adj_p, x_p, packed["ggnn_w"], packed["w_ih"], packed["w_hh"],
            packed["b_i"], packed["b_hn"],
            packed["ep_wh"], packed["ep_wx"], packed["ep_b"])

    # Advisory cost estimate for XLA's scheduler around the custom call.
    flops = 2 * pred_steps * (
        num_layers * (Np * Dp * Dp + Np * Np * Dp + 2 * Np * Dp * 3 * Dp)
        + 2 * Np * Dp * (Dp + Op))
    transcendentals = pred_steps * num_layers * Np * 3 * Dp
    bytes_accessed = (sum(int(a.size) * a.dtype.itemsize for a in args)
                      + Np * pred_steps * Op * 4)

    kernel = functools.partial(fused_ggsnn_kernel, num_layers=num_layers,
                               pred_steps=pred_steps, Dp=Dp, Op=Op)
    out_flat = pl.pallas_call(
        kernel,
        out_shape=jax.ShapeDtypeStruct((Np, pred_steps * Op), jnp.float32),
        in_specs=[_vmem_spec()] * len(args),
        out_specs=_vmem_spec(),
        cost_estimate=pl.CostEstimate(flops=flops,
                                      transcendentals=transcendentals,
                                      bytes_accessed=bytes_accessed),
        compiler_params=pltpu.CompilerParams(vmem_limit_bytes=32 * 1024 * 1024),
    )(*args)

    # torch.stack(outputs, dim=1): strip the lane/row padding in the wrapper.
    out = out_flat.reshape(Np, pred_steps, Op)
    return out[:N, :, :O]
    # TODO(synk): separate_propagation=True branch (second GGNN stack) not
    # emitted since the default configuration shares the propagation GGNN.


# ----------------------------------------------------------------------------
# Parameters: logical (torch-shaped) init + packing/padding for the kernel.
# ----------------------------------------------------------------------------
def init_params(key, annotation_size, output_size, num_layers):
    D, O = annotation_size, output_size
    ks = jax.random.split(key, 8)
    s = 0.1
    return dict(
        # GatedGraphConv per-layer propagation weight [L, D, D]
        ggnn_w=s * jax.random.normal(ks[0], (num_layers, D, D), jnp.float32),
        # Shared GRUCell (weights stored transposed [D, 3D], gate order r|z|n)
        w_ih=s * jax.random.normal(ks[1], (D, 3 * D), jnp.float32),
        w_hh=s * jax.random.normal(ks[2], (D, 3 * D), jnp.float32),
        b_ih=s * jax.random.normal(ks[3], (3 * D,), jnp.float32),
        b_hh=s * jax.random.normal(ks[4], (3 * D,), jnp.float32),
        # output_hidden_layer: Linear(2D -> O); rows split [h part; x part]
        out_w=s * jax.random.normal(ks[5], (2 * D, O), jnp.float32),
        out_b=s * jax.random.normal(ks[6], (O,), jnp.float32),
        # propagation_hidden_layer: Linear(2D -> D)
        prop_w=s * jax.random.normal(ks[7], (2 * D, D), jnp.float32),
        prop_b=jnp.zeros((D,), jnp.float32),
    )


def pack_params(params, annotation_size, output_size, lane=128,
                w_dtype=jnp.bfloat16):
    """One-time packing: lane padding, gate alignment, bias pre-sums, epilogue
    fusion, bf16 weight storage."""
    D, O = annotation_size, output_size
    Dp, Op = _round_up(D, lane), _round_up(O, lane)
    L = params["ggnn_w"].shape[0]

    def pad2(w, rows, cols):
        return jnp.pad(w, ((0, rows - w.shape[0]), (0, cols - w.shape[1])))

    def pad1(b, cols):
        return jnp.pad(b, (0, cols - b.shape[0]))

    ggnn_w = jnp.stack([pad2(params["ggnn_w"][l], Dp, Dp)
                        for l in range(L)]).astype(w_dtype)

    def pack_gates(w):  # [D, 3D] -> [Dp, 3*Dp], each gate on a 128-lane boundary
        return jnp.concatenate(
            [pad2(w[:, g * D:(g + 1) * D], Dp, Dp) for g in range(3)], axis=1)

    w_ih = pack_gates(params["w_ih"]).astype(w_dtype)
    w_hh = pack_gates(params["w_hh"]).astype(w_dtype)

    b_ih, b_hh = params["b_ih"], params["b_hh"]
    # Pre-sum r/z biases; b_in stays on the input side, b_hn stays separate
    # because it sits inside r * (...), matching torch.nn.GRUCell exactly.
    b_i = jnp.concatenate([pad1(b_ih[0:D] + b_hh[0:D], Dp),
                           pad1(b_ih[D:2 * D] + b_hh[D:2 * D], Dp),
                           pad1(b_ih[2 * D:3 * D], Dp)]).reshape(1, 3 * Dp)
    b_hn = pad1(b_hh[2 * D:3 * D], Dp).reshape(1, Dp)

    out_w, prop_w = params["out_w"], params["prop_w"]
    # Fused epilogue weights: [prop | out] so 4 matmuls/step become 2 and both
    # result slices are lane-aligned.
    ep_wh = jnp.concatenate([pad2(prop_w[:D], Dp, Dp),
                             pad2(out_w[:D], Dp, Op)], axis=1).astype(w_dtype)
    ep_wx = jnp.concatenate([pad2(prop_w[D:], Dp, Dp),
                             pad2(out_w[D:], Dp, Op)], axis=1).astype(w_dtype)
    ep_b = jnp.concatenate([pad1(params["prop_b"], Dp),
                            pad1(params["out_b"], Op)]).reshape(1, Dp + Op)

    return dict(ggnn_w=ggnn_w, w_ih=w_ih, w_hh=w_hh,
                b_i=b_i.astype(jnp.float32), b_hn=b_hn.astype(jnp.float32),
                ep_wh=ep_wh, ep_wx=ep_wx, ep_b=ep_b.astype(jnp.float32))


# ----------------------------------------------------------------------------
# Pure-JAX reference (logical shapes; optional bf16 matmul-operand policy).
# ----------------------------------------------------------------------------
def reference_forward(x, adj, params, pred_steps, num_layers, matmul_dtype=None):
    D = x.shape[1]

    def dot(a, b):
        if matmul_dtype is not None:
            a = a.astype(matmul_dtype)
            b = b.astype(matmul_dtype)
        return jnp.dot(a, b, preferred_element_type=jnp.float32)

    b_i = jnp.concatenate([params["b_ih"][:2 * D] + params["b_hh"][:2 * D],
                           params["b_ih"][2 * D:]])
    b_hn = params["b_hh"][2 * D:]
    outs = []
    for _ in range(pred_steps):
        h = x
        for layer in range(num_layers):
            hw = dot(h, params["ggnn_w"][layer])
            m = dot(adj, hw)
            gi = dot(m, params["w_ih"]) + b_i
            gh = dot(h, params["w_hh"])
            r = jax.nn.sigmoid(gi[:, :D] + gh[:, :D])
            z = jax.nn.sigmoid(gi[:, D:2 * D] + gh[:, D:2 * D])
            n = jnp.tanh(gi[:, 2 * D:] + r * (gh[:, 2 * D:] + b_hn))
            h = (1.0 - z) * n + z * h
        out = (dot(h, params["out_w"][:D]) + dot(x, params["out_w"][D:])
               + params["out_b"])
        outs.append(out)
        x = (dot(h, params["prop_w"][:D]) + dot(x, params["prop_w"][D:])
             + params["prop_b"])
    return jnp.stack(outs, axis=1)


if __name__ == "__main__":
    N = 128                # nodes: fills the sublane/M dim of every matmul
    annotation_size = 32
    output_size = 8
    num_layers = 2
    pred_steps = 3

    key = jax.random.PRNGKey(0)
    k_x, k_p = jax.random.split(key)

    x = jax.random.normal(k_x, (N, annotation_size), jnp.float32)

    # Deterministic bidirectional ring graph: edges i->(i+1)%N and (i+1)%N->i.
    src = jnp.concatenate([jnp.arange(N), (jnp.arange(N) + 1) % N])
    dst = jnp.concatenate([(jnp.arange(N) + 1) % N, jnp.arange(N)])
    edge_index = jnp.stack([src, dst], axis=0)             # [2, E]
    adj = jnp.zeros((N, N), jnp.float32).at[edge_index[1], edge_index[0]].add(1.0)

    params = init_params(k_p, annotation_size, output_size, num_layers)
    packed = pack_params(params, annotation_size, output_size)

    out = jax.block_until_ready(
        per_node_ggsnn_forward(x, adj, packed, pred_steps, num_layers,
                               output_size))

    assert out.shape == (N, pred_steps, output_size), out.shape
    assert bool(jnp.all(jnp.isfinite(out)))

    # Tight check: pure-JAX reference with the SAME bf16-operand / f32-accumulate
    # matmul policy as the kernel (validates the Pallas plumbing precisely).
    ref_mixed = jax.block_until_ready(
        reference_forward(x, adj, params, pred_steps, num_layers,
                          matmul_dtype=jnp.bfloat16))
    assert jnp.allclose(out, ref_mixed, atol=1e-4, rtol=1e-4), float(
        jnp.max(jnp.abs(out - ref_mixed)))

    # Loose check: full-f32 reference, bounding the mixed-precision deviation
    # from the original module's f32 semantics.
    ref_f32 = jax.block_until_ready(
        reference_forward(x, adj, params, pred_steps, num_layers))
    assert jnp.allclose(out, ref_f32, atol=5e-2, rtol=5e-2), float(
        jnp.max(jnp.abs(out - ref_f32)))

    print("KERNEL_OK")
</pallas_src>

<mosaic_0001>
module attributes {stable_mosaic.version = 11 : i64} {
  func.func @fused_ggsnn_kernel(%arg0: memref<128x128xbf16, #tpu.memory_space<vmem>>, %arg1: memref<128x128xf32, #tpu.memory_space<vmem>>, %arg2: memref<2x128x128xbf16, #tpu.memory_space<vmem>>, %arg3: memref<128x384xbf16, #tpu.memory_space<vmem>>, %arg4: memref<128x384xbf16, #tpu.memory_space<vmem>>, %arg5: memref<1x384xf32, #tpu.memory_space<vmem>>, %arg6: memref<1x128xf32, #tpu.memory_space<vmem>>, %arg7: memref<128x256xbf16, #tpu.memory_space<vmem>>, %arg8: memref<128x256xbf16, #tpu.memory_space<vmem>>, %arg9: memref<1x256xf32, #tpu.memory_space<vmem>>, %arg10: memref<128x384xf32, #tpu.memory_space<vmem>>) attributes {dimension_semantics = [], scalar_prefetch = 0 : i64, scratch_operands = 0 : i64, tpu.core_type = #tpu.core_type<tc>} {
    %c0 = arith.constant 0 : index
    %c0_0 = arith.constant 0 : index
    %0 = vector.load %arg1[%c0, %c0_0] : memref<128x128xf32, #tpu.memory_space<vmem>>, vector<128x128xf32>
    %c0_1 = arith.constant 0 : index
    %c0_2 = arith.constant 0 : index
    %c0_3 = arith.constant 0 : index
    %1 = vector.load %arg2[%c0_1, %c0_2, %c0_3] : memref<2x128x128xbf16, #tpu.memory_space<vmem>>, vector<1x128x128xbf16>
    %2 = vector.shape_cast %1 : vector<1x128x128xbf16> to vector<128x128xbf16>
    %3 = arith.truncf %0 : vector<128x128xf32> to vector<128x128xbf16>
    %cst = arith.constant dense<0.000000e+00> : vector<128x128xf32>
    %4 = tpu.matmul %3, %2, %cst {dimension_numbers = #tpu.dot_dimension_numbers<[1], [0], [0], [1], [0, 0, 1, 1], [], []>} : vector<128x128xbf16>, vector<128x128xbf16>, vector<128x128xf32> -> vector<128x128xf32>
    %c0_4 = arith.constant 0 : index
    %c0_5 = arith.constant 0 : index
    %5 = vector.load %arg0[%c0_4, %c0_5] : memref<128x128xbf16, #tpu.memory_space<vmem>>, vector<128x128xbf16>
    %6 = arith.truncf %4 : vector<128x128xf32> to vector<128x128xbf16>
    %cst_6 = arith.constant dense<0.000000e+00> : vector<128x128xf32>
    %7 = tpu.matmul %5, %6, %cst_6 {dimension_numbers = #tpu.dot_dimension_numbers<[1], [0], [0], [1], [0, 0, 1, 1], [], []>} : vector<128x128xbf16>, vector<128x128xbf16>, vector<128x128xf32> -> vector<128x128xf32>
    %c0_7 = arith.constant 0 : index
    %c0_8 = arith.constant 0 : index
    %8 = vector.load %arg3[%c0_7, %c0_8] : memref<128x384xbf16, #tpu.memory_space<vmem>>, vector<128x384xbf16>
    %9 = arith.truncf %7 : vector<128x128xf32> to vector<128x128xbf16>
    %cst_9 = arith.constant dense<0.000000e+00> : vector<128x384xf32>
    %10 = tpu.matmul %9, %8, %cst_9 {dimension_numbers = #tpu.dot_dimension_numbers<[1], [0], [0], [1], [0, 0, 1, 1], [], []>} : vector<128x128xbf16>, vector<128x384xbf16>, vector<128x384xf32> -> vector<128x384xf32>
    %c0_10 = arith.constant 0 : index
    %c0_11 = arith.constant 0 : index
    %11 = vector.load %arg5[%c0_10, %c0_11] : memref<1x384xf32, #tpu.memory_space<vmem>>, vector<1x384xf32>
    %12 = vector.broadcast %11 : vector<1x384xf32> to vector<128x384xf32>
    %13 = arith.addf %10, %12 : vector<128x384xf32>
    %c0_12 = arith.constant 0 : index
    %c0_13 = arith.constant 0 : index
    %14 = vector.load %arg4[%c0_12, %c0_13] : memref<128x384xbf16, #tpu.memory_space<vmem>>, vector<128x384xbf16>
    %15 = arith.truncf %0 : vector<128x128xf32> to vector<128x128xbf16>
    %cst_14 = arith.constant dense<0.000000e+00> : vector<128x384xf32>
    %16 = tpu.matmul %15, %14, %cst_14 {dimension_numbers = #tpu.dot_dimension_numbers<[1], [0], [0], [1], [0, 0, 1, 1], [], []>} : vector<128x128xbf16>, vector<128x384xbf16>, vector<128x384xf32> -> vector<128x384xf32>
    %17 = vector.extract_strided_slice %13 {offsets = [0, 0], sizes = [128, 128], strides = [1, 1]} : vector<128x384xf32> to vector<128x128xf32>
    %18 = vector.extract_strided_slice %16 {offsets = [0, 0], sizes = [128, 128], strides = [1, 1]} : vector<128x384xf32> to vector<128x128xf32>
    %19 = arith.addf %17, %18 : vector<128x128xf32>
    %20 = arith.negf %19 : vector<128x128xf32>
    %21 = math.exp %20 : vector<128x128xf32>
    %cst_15 = arith.constant 1.000000e+00 : f32
    %22 = vector.broadcast %cst_15 : f32 to vector<128x128xf32>
    %23 = arith.addf %22, %21 : vector<128x128xf32>
    %24 = arith.divf %22, %23 : vector<128x128xf32>
    %25 = vector.extract_strided_slice %13 {offsets = [0, 128], sizes = [128, 128], strides = [1, 1]} : vector<128x384xf32> to vector<128x128xf32>
    %26 = vector.extract_strided_slice %16 {offsets = [0, 128], sizes = [128, 128], strides = [1, 1]} : vector<128x384xf32> to vector<128x128xf32>
    %27 = arith.addf %25, %26 : vector<128x128xf32>
    %28 = arith.negf %27 : vector<128x128xf32>
    %29 = math.exp %28 : vector<128x128xf32>
    %cst_16 = arith.constant 1.000000e+00 : f32
    %30 = vector.broadcast %cst_16 : f32 to vector<128x128xf32>
    %31 = arith.addf %30, %29 : vector<128x128xf32>
    %32 = arith.divf %30, %31 : vector<128x128xf32>
    %33 = vector.extract_strided_slice %13 {offsets = [0, 256], sizes = [128, 128], strides = [1, 1]} : vector<128x384xf32> to vector<128x128xf32>
    %34 = vector.extract_strided_slice %16 {offsets = [0, 256], sizes = [128, 128], strides = [1, 1]} : vector<128x384xf32> to vector<128x128xf32>
    %c0_17 = arith.constant 0 : index
    %c0_18 = arith.constant 0 : index
    %35 = vector.load %arg6[%c0_17, %c0_18] : memref<1x128xf32, #tpu.memory_space<vmem>>, vector<1x128xf32>
    %36 = vector.broadcast %35 : vector<1x128xf32> to vector<128x128xf32>
    %37 = arith.addf %34, %36 : vector<128x128xf32>
    %38 = arith.mulf %24, %37 : vector<128x128xf32>
    %39 = arith.addf %33, %38 : vector<128x128xf32>
    %40 = math.tanh %39 : vector<128x128xf32>
    %cst_19 = arith.constant 1.000000e+00 : f32
    %41 = vector.broadcast %cst_19 : f32 to vector<128x128xf32>
    %42 = arith.subf %41, %32 : vector<128x128xf32>
    %43 = arith.mulf %42, %40 : vector<128x128xf32>
    %44 = arith.mulf %32, %0 : vector<128x128xf32>
    %45 = arith.addf %43, %44 : vector<128x128xf32>
    %c1 = arith.constant 1 : index
    %c0_20 = arith.constant 0 : index
    %c0_21 = arith.constant 0 : index
    %46 = vector.load %arg2[%c1, %c0_20, %c0_21] : memref<2x128x128xbf16, #tpu.memory_space<vmem>>, vector<1x128x128xbf16>
    %47 = vector.shape_cast %46 : vector<1x128x128xbf16> to vector<128x128xbf16>
    %48 = arith.truncf %45 : vector<128x128xf32> to vector<128x128xbf16>
    %cst_22 = arith.constant dense<0.000000e+00> : vector<128x128xf32>
    %49 = tpu.matmul %48, %47, %cst_22 {dimension_numbers = #tpu.dot_dimension_numbers<[1], [0], [0], [1], [0, 0, 1, 1], [], []>} : vector<128x128xbf16>, vector<128x128xbf16>, vector<128x128xf32> -> vector<128x128xf32>
    %c0_23 = arith.constant 0 : index
    %c0_24 = arith.constant 0 : index
    %50 = vector.load %arg0[%c0_23, %c0_24] : memref<128x128xbf16, #tpu.memory_space<vmem>>, vector<128x128xbf16>
    %51 = arith.truncf %49 : vector<128x128xf32> to vector<128x128xbf16>
    %cst_25 = arith.constant dense<0.000000e+00> : vector<128x128xf32>
    %52 = tpu.matmul %50, %51, %cst_25 {dimension_numbers = #tpu.dot_dimension_numbers<[1], [0], [0], [1], [0, 0, 1, 1], [], []>} : vector<128x128xbf16>, vector<128x128xbf16>, vector<128x128xf32> -> vector<128x128xf32>
    %c0_26 = arith.constant 0 : index
    %c0_27 = arith.constant 0 : index
    %53 = vector.load %arg3[%c0_26, %c0_27] : memref<128x384xbf16, #tpu.memory_space<vmem>>, vector<128x384xbf16>
    %54 = arith.truncf %52 : vector<128x128xf32> to vector<128x128xbf16>
    %cst_28 = arith.constant dense<0.000000e+00> : vector<128x384xf32>
    %55 = tpu.matmul %54, %53, %cst_28 {dimension_numbers = #tpu.dot_dimension_numbers<[1], [0], [0], [1], [0, 0, 1, 1], [], []>} : vector<128x128xbf16>, vector<128x384xbf16>, vector<128x384xf32> -> vector<128x384xf32>
    %c0_29 = arith.constant 0 : index
    %c0_30 = arith.constant 0 : index
    %56 = vector.load %arg5[%c0_29, %c0_30] : memref<1x384xf32, #tpu.memory_space<vmem>>, vector<1x384xf32>
    %57 = vector.broadcast %56 : vector<1x384xf32> to vector<128x384xf32>
    %58 = arith.addf %55, %57 : vector<128x384xf32>
    %c0_31 = arith.constant 0 : index
    %c0_32 = arith.constant 0 : index
    %59 = vector.load %arg4[%c0_31, %c0_32] : memref<128x384xbf16, #tpu.memory_space<vmem>>, vector<128x384xbf16>
    %60 = arith.truncf %45 : vector<128x128xf32> to vector<128x128xbf16>
    %cst_33 = arith.constant dense<0.000000e+00> : vector<128x384xf32>
    %61 = tpu.matmul %60, %59, %cst_33 {dimension_numbers = #tpu.dot_dimension_numbers<[1], [0], [0], [1], [0, 0, 1, 1], [], []>} : vector<128x128xbf16>, vector<128x384xbf16>, vector<128x384xf32> -> vector<128x384xf32>
    %62 = vector.extract_strided_slice %58 {offsets = [0, 0], sizes = [128, 128], strides = [1, 1]} : vector<128x384xf32> to vector<128x128xf32>
    %63 = vector.extract_strided_slice %61 {offsets = [0, 0], sizes = [128, 128], strides = [1, 1]} : vector<128x384xf32> to vector<128x128xf32>
    %64 = arith.addf %62, %63 : vector<128x128xf32>
    %65 = arith.negf %64 : vector<128x128xf32>
    %66 = math.exp %65 : vector<128x128xf32>
    %cst_34 = arith.constant 1.000000e+00 : f32
    %67 = vector.broadcast %cst_34 : f32 to vector<128x128xf32>
    %68 = arith.addf %67, %66 : vector<128x128xf32>
    %69 = arith.divf %67, %68 : vector<128x128xf32>
    %70 = vector.extract_strided_slice %58 {offsets = [0, 128], sizes = [128, 128], strides = [1, 1]} : vector<128x384xf32> to vector<128x128xf32>
    %71 = vector.extract_strided_slice %61 {offsets = [0, 128], sizes = [128, 128], strides = [1, 1]} : vector<128x384xf32> to vector<128x128xf32>
    %72 = arith.addf %70, %71 : vector<128x128xf32>
    %73 = arith.negf %72 : vector<128x128xf32>
    %74 = math.exp %73 : vector<128x128xf32>
    %cst_35 = arith.constant 1.000000e+00 : f32
    %75 = vector.broadcast %cst_35 : f32 to vector<128x128xf32>
    %76 = arith.addf %75, %74 : vector<128x128xf32>
    %77 = arith.divf %75, %76 : vector<128x128xf32>
    %78 = vector.extract_strided_slice %58 {offsets = [0, 256], sizes = [128, 128], strides = [1, 1]} : vector<128x384xf32> to vector<128x128xf32>
    %79 = vector.extract_strided_slice %61 {offsets = [0, 256], sizes = [128, 128], strides = [1, 1]} : vector<128x384xf32> to vector<128x128xf32>
    %c0_36 = arith.constant 0 : index
    %c0_37 = arith.constant 0 : index
    %80 = vector.load %arg6[%c0_36, %c0_37] : memref<1x128xf32, #tpu.memory_space<vmem>>, vector<1x128xf32>
    %81 = vector.broadcast %80 : vector<1x128xf32> to vector<128x128xf32>
    %82 = arith.addf %79, %81 : vector<128x128xf32>
    %83 = arith.mulf %69, %82 : vector<128x128xf32>
    %84 = arith.addf %78, %83 : vector<128x128xf32>
    %85 = math.tanh %84 : vector<128x128xf32>
    %cst_38 = arith.constant 1.000000e+00 : f32
    %86 = vector.broadcast %cst_38 : f32 to vector<128x128xf32>
    %87 = arith.subf %86, %77 : vector<128x128xf32>
    %88 = arith.mulf %87, %85 : vector<128x128xf32>
    %89 = arith.mulf %77, %45 : vector<128x128xf32>
    %90 = arith.addf %88, %89 : vector<128x128xf32>
    %c0_39 = arith.constant 0 : index
    %c0_40 = arith.constant 0 : index
    %91 = vector.load %arg7[%c0_39, %c0_40] : memref<128x256xbf16, #tpu.memory_space<vmem>>, vector<128x256xbf16>
    %92 = arith.truncf %90 : vector<128x128xf32> to vector<128x128xbf16>
    %cst_41 = arith.constant dense<0.000000e+00> : vector<128x256xf32>
    %93 = tpu.matmul %92, %91, %cst_41 {dimension_numbers = #tpu.dot_dimension_numbers<[1], [0], [0], [1], [0, 0, 1, 1], [], []>} : vector<128x128xbf16>, vector<128x256xbf16>, vector<128x256xf32> -> vector<128x256xf32>
    %c0_42 = arith.constant 0 : index
    %c0_43 = arith.constant 0 : index
    %94 = vector.load %arg8[%c0_42, %c0_43] : memref<128x256xbf16, #tpu.memory_space<vmem>>, vector<128x256xbf16>
    %95 = arith.truncf %0 : vector<128x128xf32> to vector<128x128xbf16>
    %cst_44 = arith.constant dense<0.000000e+00> : vector<128x256xf32>
    %96 = tpu.matmul %95, %94, %cst_44 {dimension_numbers = #tpu.dot_dimension_numbers<[1], [0], [0], [1], [0, 0, 1, 1], [], []>} : vector<128x128xbf16>, vector<128x256xbf16>, vector<128x256xf32> -> vector<128x256xf32>
    %97 = arith.addf %93, %96 : vector<128x256xf32>
    %c0_45 = arith.constant 0 : index
    %c0_46 = arith.constant 0 : index
    %98 = vector.load %arg9[%c0_45, %c0_46] : memref<1x256xf32, #tpu.memory_space<vmem>>, vector<1x256xf32>
    %99 = vector.broadcast %98 : vector<1x256xf32> to vector<128x256xf32>
    %100 = arith.addf %97, %99 : vector<128x256xf32>
    %101 = vector.extract_strided_slice %100 {offsets = [0, 128], sizes = [128, 128], strides = [1, 1]} : vector<128x256xf32> to vector<128x128xf32>
    %c0_47 = arith.constant 0 : index
    %c0_48 = arith.constant 0 : index
    %102 = vector.load %arg10[%c0_47, %c0_48] : memref<128x384xf32, #tpu.memory_space<vmem>>, vector<128x128xf32>
    tpu.vector_store %arg10[%c0_47, %c0_48], %101 {strides = array<i32>} : memref<128x384xf32, #tpu.memory_space<vmem>>, vector<128x128xf32>,
    %103 = vector.extract_strided_slice %100 {offsets = [0, 0], sizes = [128, 128], strides = [1, 1]} : vector<128x256xf32> to vector<128x128xf32>
    %c0_49 = arith.constant 0 : index
    %c0_50 = arith.constant 0 : index
    %c0_51 = arith.constant 0 : index
    %104 = vector.load %arg2[%c0_49, %c0_50, %c0_51] : memref<2x128x128xbf16, #tpu.memory_space<vmem>>, vector<1x128x128xbf16>
    %105 = vector.shape_cast %104 : vector<1x128x128xbf16> to vector<128x128xbf16>
    %106 = arith.truncf %103 : vector<128x128xf32> to vector<128x128xbf16>
    %cst_52 = arith.constant dense<0.000000e+00> : vector<128x128xf32>
    %107 = tpu.matmul %106, %105, %cst_52 {dimension_numbers = #tpu.dot_dimension_numbers<[1], [0], [0], [1], [0, 0, 1, 1], [], []>} : vector<128x128xbf16>, vector<128x128xbf16>, vector<128x128xf32> -> vector<128x128xf32>
    %c0_53 = arith.constant 0 : index
    %c0_54 = arith.constant 0 : index
    %108 = vector.load %arg0[%c0_53, %c0_54] : memref<128x128xbf16, #tpu.memory_space<vmem>>, vector<128x128xbf16>
    %109 = arith.truncf %107 : vector<128x128xf32> to vector<128x128xbf16>
    %cst_55 = arith.constant dense<0.000000e+00> : vector<128x128xf32>
    %110 = tpu.matmul %108, %109, %cst_55 {dimension_numbers = #tpu.dot_dimension_numbers<[1], [0], [0], [1], [0, 0, 1, 1], [], []>} : vector<128x128xbf16>, vector<128x128xbf16>, vector<128x128xf32> -> vector<128x128xf32>
    %c0_56 = arith.constant 0 : index
    %c0_57 = arith.constant 0 : index
    %111 = vector.load %arg3[%c0_56, %c0_57] : memref<128x384xbf16, #tpu.memory_space<vmem>>, vector<128x384xbf16>
    %112 = arith.truncf %110 : vector<128x128xf32> to vector<128x128xbf16>
    %cst_58 = arith.constant dense<0.000000e+00> : vector<128x384xf32>
    %113 = tpu.matmul %112, %111, %cst_58 {dimension_numbers = #tpu.dot_dimension_numbers<[1], [0], [0], [1], [0, 0, 1, 1], [], []>} : vector<128x128xbf16>, vector<128x384xbf16>, vector<128x384xf32> -> vector<128x384xf32>
    %c0_59 = arith.constant 0 : index
    %c0_60 = arith.constant 0 : index
    %114 = vector.load %arg5[%c0_59, %c0_60] : memref<1x384xf32, #tpu.memory_space<vmem>>, vector<1x384xf32>
    %115 = vector.broadcast %114 : vector<1x384xf32> to vector<128x384xf32>
    %116 = arith.addf %113, %115 : vector<128x384xf32>
    %c0_61 = arith.constant 0 : index
    %c0_62 = arith.constant 0 : index
    %117 = vector.load %arg4[%c0_61, %c0_62] : memref<128x384xbf16, #tpu.memory_space<vmem>>, vector<128x384xbf16>
    %118 = arith.truncf %103 : vector<128x128xf32> to vector<128x128xbf16>
    %cst_63 = arith.constant dense<0.000000e+00> : vector<128x384xf32>
    %119 = tpu.matmul %118, %117, %cst_63 {dimension_numbers = #tpu.dot_dimension_numbers<[1], [0], [0], [1], [0, 0, 1, 1], [], []>} : vector<128x128xbf16>, vector<128x384xbf16>, vector<128x384xf32> -> vector<128x384xf32>
    %120 = vector.extract_strided_slice %116 {offsets = [0, 0], sizes = [128, 128], strides = [1, 1]} : vector<128x384xf32> to vector<128x128xf32>
    %121 = vector.extract_strided_slice %119 {offsets = [0, 0], sizes = [128, 128], strides = [1, 1]} : vector<128x384xf32> to vector<128x128xf32>
    %122 = arith.addf %120, %121 : vector<128x128xf32>
    %123 = arith.negf %122 : vector<128x128xf32>
    %124 = math.exp %123 : vector<128x128xf32>
    %cst_64 = arith.constant 1.000000e+00 : f32
    %125 = vector.broadcast %cst_64 : f32 to vector<128x128xf32>
    %126 = arith.addf %125, %124 : vector<128x128xf32>
    %127 = arith.divf %125, %126 : vector<128x128xf32>
    %128 = vector.extract_strided_slice %116 {offsets = [0, 128], sizes = [128, 128], strides = [1, 1]} : vector<128x384xf32> to vector<128x128xf32>
    %129 = vector.extract_strided_slice %119 {offsets = [0, 128], sizes = [128, 128], strides = [1, 1]} : vector<128x384xf32> to vector<128x128xf32>
    %130 = arith.addf %128, %129 : vector<128x128xf32>
    %131 = arith.negf %130 : vector<128x128xf32>
    %132 = math.exp %131 : vector<128x128xf32>
    %cst_65 = arith.constant 1.000000e+00 : f32
    %133 = vector.broadcast %cst_65 : f32 to vector<128x128xf32>
    %134 = arith.addf %133, %132 : vector<128x128xf32>
    %135 = arith.divf %133, %134 : vector<128x128xf32>
    %136 = vector.extract_strided_slice %116 {offsets = [0, 256], sizes = [128, 128], strides = [1, 1]} : vector<128x384xf32> to vector<128x128xf32>
    %137 = vector.extract_strided_slice %119 {offsets = [0, 256], sizes = [128, 128], strides = [1, 1]} : vector<128x384xf32> to vector<128x128xf32>
    %c0_66 = arith.constant 0 : index
    %c0_67 = arith.constant 0 : index
    %138 = vector.load %arg6[%c0_66, %c0_67] : memref<1x128xf32, #tpu.memory_space<vmem>>, vector<1x128xf32>
    %139 = vector.broadcast %138 : vector<1x128xf32> to vector<128x128xf32>
    %140 = arith.addf %137, %139 : vector<128x128xf32>
    %141 = arith.mulf %127, %140 : vector<128x128xf32>
    %142 = arith.addf %136, %141 : vector<128x128xf32>
    %143 = math.tanh %142 : vector<128x128xf32>
    %cst_68 = arith.constant 1.000000e+00 : f32
    %144 = vector.broadcast %cst_68 : f32 to vector<128x128xf32>
    %145 = arith.subf %144, %135 : vector<128x128xf32>
    %146 = arith.mulf %145, %143 : vector<128x128xf32>
    %147 = arith.mulf %135, %103 : vector<128x128xf32>
    %148 = arith.addf %146, %147 : vector<128x128xf32>
    %c1_69 = arith.constant 1 : index
    %c0_70 = arith.constant 0 : index
    %c0_71 = arith.constant 0 : index
    %149 = vector.load %arg2[%c1_69, %c0_70, %c0_71] : memref<2x128x128xbf16, #tpu.memory_space<vmem>>, vector<1x128x128xbf16>
    %150 = vector.shape_cast %149 : vector<1x128x128xbf16> to vector<128x128xbf16>
    %151 = arith.truncf %148 : vector<128x128xf32> to vector<128x128xbf16>
    %cst_72 = arith.constant dense<0.000000e+00> : vector<128x128xf32>
    %152 = tpu.matmul %151, %150, %cst_72 {dimension_numbers = #tpu.dot_dimension_numbers<[1], [0], [0], [1], [0, 0, 1, 1], [], []>} : vector<128x128xbf16>, vector<128x128xbf16>, vector<128x128xf32> -> vector<128x128xf32>
    %c0_73 = arith.constant 0 : index
    %c0_74 = arith.constant 0 : index
    %153 = vector.load %arg0[%c0_73, %c0_74] : memref<128x128xbf16, #tpu.memory_space<vmem>>, vector<128x128xbf16>
    %154 = arith.truncf %152 : vector<128x128xf32> to vector<128x128xbf16>
    %cst_75 = arith.constant dense<0.000000e+00> : vector<128x128xf32>
    %155 = tpu.matmul %153, %154, %cst_75 {dimension_numbers = #tpu.dot_dimension_numbers<[1], [0], [0], [1], [0, 0, 1, 1], [], []>} : vector<128x128xbf16>, vector<128x128xbf16>, vector<128x128xf32> -> vector<128x128xf32>
    %c0_76 = arith.constant 0 : index
    %c0_77 = arith.constant 0 : index
    %156 = vector.load %arg3[%c0_76, %c0_77] : memref<128x384xbf16, #tpu.memory_space<vmem>>, vector<128x384xbf16>
    %157 = arith.truncf %155 : vector<128x128xf32> to vector<128x128xbf16>
    %cst_78 = arith.constant dense<0.000000e+00> : vector<128x384xf32>
    %158 = tpu.matmul %157, %156, %cst_78 {dimension_numbers = #tpu.dot_dimension_numbers<[1], [0], [0], [1], [0, 0, 1, 1], [], []>} : vector<128x128xbf16>, vector<128x384xbf16>, vector<128x384xf32> -> vector<128x384xf32>
    %c0_79 = arith.constant 0 : index
    %c0_80 = arith.constant 0 : index
    %159 = vector.load %arg5[%c0_79, %c0_80] : memref<1x384xf32, #tpu.memory_space<vmem>>, vector<1x384xf32>
    %160 = vector.broadcast %159 : vector<1x384xf32> to vector<128x384xf32>
    %161 = arith.addf %158, %160 : vector<128x384xf32>
    %c0_81 = arith.constant 0 : index
    %c0_82 = arith.constant 0 : index
    %162 = vector.load %arg4[%c0_81, %c0_82] : memref<128x384xbf16, #tpu.memory_space<vmem>>, vector<128x384xbf16>
    %163 = arith.truncf %148 : vector<128x128xf32> to vector<128x128xbf16>
    %cst_83 = arith.constant dense<0.000000e+00> : vector<128x384xf32>
    %164 = tpu.matmul %163, %162, %cst_83 {dimension_numbers = #tpu.dot_dimension_numbers<[1], [0], [0], [1], [0, 0, 1, 1], [], []>} : vector<128x128xbf16>, vector<128x384xbf16>, vector<128x384xf32> -> vector<128x384xf32>
    %165 = vector.extract_strided_slice %161 {offsets = [0, 0], sizes = [128, 128], strides = [1, 1]} : vector<128x384xf32> to vector<128x128xf32>
    %166 = vector.extract_strided_slice %164 {offsets = [0, 0], sizes = [128, 128], strides = [1, 1]} : vector<128x384xf32> to vector<128x128xf32>
    %167 = arith.addf %165, %166 : vector<128x128xf32>
    %168 = arith.negf %167 : vector<128x128xf32>
    %169 = math.exp %168 : vector<128x128xf32>
    %cst_84 = arith.constant 1.000000e+00 : f32
    %170 = vector.broadcast %cst_84 : f32 to vector<128x128xf32>
    %171 = arith.addf %170, %169 : vector<128x128xf32>
    %172 = arith.divf %170, %171 : vector<128x128xf32>
    %173 = vector.extract_strided_slice %161 {offsets = [0, 128], sizes = [128, 128], strides = [1, 1]} : vector<128x384xf32> to vector<128x128xf32>
    %174 = vector.extract_strided_slice %164 {offsets = [0, 128], sizes = [128, 128], strides = [1, 1]} : vector<128x384xf32> to vector<128x128xf32>
    %175 = arith.addf %173, %174 : vector<128x128xf32>
    %176 = arith.negf %175 : vector<128x128xf32>
    %177 = math.exp %176 : vector<128x128xf32>
    %cst_85 = arith.constant 1.000000e+00 : f32
    %178 = vector.broadcast %cst_85 : f32 to vector<128x128xf32>
    %179 = arith.addf %178, %177 : vector<128x128xf32>
    %180 = arith.divf %178, %179 : vector<128x128xf32>
    %181 = vector.extract_strided_slice %161 {offsets = [0, 256], sizes = [128, 128], strides = [1, 1]} : vector<128x384xf32> to vector<128x128xf32>
    %182 = vector.extract_strided_slice %164 {offsets = [0, 256], sizes = [128, 128], strides = [1, 1]} : vector<128x384xf32> to vector<128x128xf32>
    %c0_86 = arith.constant 0 : index
    %c0_87 = arith.constant 0 : index
    %183 = vector.load %arg6[%c0_86, %c0_87] : memref<1x128xf32, #tpu.memory_space<vmem>>, vector<1x128xf32>
    %184 = vector.broadcast %183 : vector<1x128xf32> to vector<128x128xf32>
    %185 = arith.addf %182, %184 : vector<128x128xf32>
    %186 = arith.mulf %172, %185 : vector<128x128xf32>
    %187 = arith.addf %181, %186 : vector<128x128xf32>
    %188 = math.tanh %187 : vector<128x128xf32>
    %cst_88 = arith.constant 1.000000e+00 : f32
    %189 = vector.broadcast %cst_88 : f32 to vector<128x128xf32>
    %190 = arith.subf %189, %180 : vector<128x128xf32>
    %191 = arith.mulf %190, %188 : vector<128x128xf32>
    %192 = arith.mulf %180, %148 : vector<128x128xf32>
    %193 = arith.addf %191, %192 : vector<128x128xf32>
    %c0_89 = arith.constant 0 : index
    %c0_90 = arith.constant 0 : index
    %194 = vector.load %arg7[%c0_89, %c0_90] : memref<128x256xbf16, #tpu.memory_space<vmem>>, vector<128x256xbf16>
    %195 = arith.truncf %193 : vector<128x128xf32> to vector<128x128xbf16>
    %cst_91 = arith.constant dense<0.000000e+00> : vector<128x256xf32>
    %196 = tpu.matmul %195, %194, %cst_91 {dimension_numbers = #tpu.dot_dimension_numbers<[1], [0], [0], [1], [0, 0, 1, 1], [], []>} : vector<128x128xbf16>, vector<128x256xbf16>, vector<128x256xf32> -> vector<128x256xf32>
    %c0_92 = arith.constant 0 : index
    %c0_93 = arith.constant 0 : index
    %197 = vector.load %arg8[%c0_92, %c0_93] : memref<128x256xbf16, #tpu.memory_space<vmem>>, vector<128x256xbf16>
    %198 = arith.truncf %103 : vector<128x128xf32> to vector<128x128xbf16>
    %cst_94 = arith.constant dense<0.000000e+00> : vector<128x256xf32>
    %199 = tpu.matmul %198, %197, %cst_94 {dimension_numbers = #tpu.dot_dimension_numbers<[1], [0], [0], [1], [0, 0, 1, 1], [], []>} : vector<128x128xbf16>, vector<128x256xbf16>, vector<128x256xf32> -> vector<128x256xf32>
    %200 = arith.addf %196, %199 : vector<128x256xf32>
    %c0_95 = arith.constant 0 : index
    %c0_96 = arith.constant 0 : index
    %201 = vector.load %arg9[%c0_95, %c0_96] : memref<1x256xf32, #tpu.memory_space<vmem>>, vector<1x256xf32>
    %202 = vector.broadcast %201 : vector<1x256xf32> to vector<128x256xf32>
    %203 = arith.addf %200, %202 : vector<128x256xf32>
    %204 = vector.extract_strided_slice %203 {offsets = [0, 128], sizes = [128, 128], strides = [1, 1]} : vector<128x256xf32> to vector<128x128xf32>
    %c0_97 = arith.constant 0 : index
    %c128 = arith.constant 128 : index
    %205 = vector.load %arg10[%c0_97, %c128] : memref<128x384xf32, #tpu.memory_space<vmem>>, vector<128x128xf32>
    tpu.vector_store %arg10[%c0_97, %c128], %204 {strides = array<i32>} : memref<128x384xf32, #tpu.memory_space<vmem>>, vector<128x128xf32>,
    %206 = vector.extract_strided_slice %203 {offsets = [0, 0], sizes = [128, 128], strides = [1, 1]} : vector<128x256xf32> to vector<128x128xf32>
    %c0_98 = arith.constant 0 : index
    %c0_99 = arith.constant 0 : index
    %c0_100 = arith.constant 0 : index
    %207 = vector.load %arg2[%c0_98, %c0_99, %c0_100] : memref<2x128x128xbf16, #tpu.memory_space<vmem>>, vector<1x128x128xbf16>
    %208 = vector.shape_cast %207 : vector<1x128x128xbf16> to vector<128x128xbf16>
    %209 = arith.truncf %206 : vector<128x128xf32> to vector<128x128xbf16>
    %cst_101 = arith.constant dense<0.000000e+00> : vector<128x128xf32>
    %210 = tpu.matmul %209, %208, %cst_101 {dimension_numbers = #tpu.dot_dimension_numbers<[1], [0], [0], [1], [0, 0, 1, 1], [], []>} : vector<128x128xbf16>, vector<128x128xbf16>, vector<128x128xf32> -> vector<128x128xf32>
    %c0_102 = arith.constant 0 : index
    %c0_103 = arith.constant 0 : index
    %211 = vector.load %arg0[%c0_102, %c0_103] : memref<128x128xbf16, #tpu.memory_space<vmem>>, vector<128x128xbf16>
    %212 = arith.truncf %210 : vector<128x128xf32> to vector<128x128xbf16>
    %cst_104 = arith.constant dense<0.000000e+00> : vector<128x128xf32>
    %213 = tpu.matmul %211, %212, %cst_104 {dimension_numbers = #tpu.dot_dimension_numbers<[1], [0], [0], [1], [0, 0, 1, 1], [], []>} : vector<128x128xbf16>, vector<128x128xbf16>, vector<128x128xf32> -> vector<128x128xf32>
    %c0_105 = arith.constant 0 : index
    %c0_106 = arith.constant 0 : index
    %214 = vector.load %arg3[%c0_105, %c0_106] : memref<128x384xbf16, #tpu.memory_space<vmem>>, vector<128x384xbf16>
    %215 = arith.truncf %213 : vector<128x128xf32> to vector<128x128xbf16>
    %cst_107 = arith.constant dense<0.000000e+00> : vector<128x384xf32>
    %216 = tpu.matmul %215, %214, %cst_107 {dimension_numbers = #tpu.dot_dimension_numbers<[1], [0], [0], [1], [0, 0, 1, 1], [], []>} : vector<128x128xbf16>, vector<128x384xbf16>, vector<128x384xf32> -> vector<128x384xf32>
    %c0_108 = arith.constant 0 : index
    %c0_109 = arith.constant 0 : index
    %217 = vector.load %arg5[%c0_108, %c0_109] : memref<1x384xf32, #tpu.memory_space<vmem>>, vector<1x384xf32>
    %218 = vector.broadcast %217 : vector<1x384xf32> to vector<128x384xf32>
    %219 = arith.addf %216, %218 : vector<128x384xf32>
    %c0_110 = arith.constant 0 : index
    %c0_111 = arith.constant 0 : index
    %220 = vector.load %arg4[%c0_110, %c0_111] : memref<128x384xbf16, #tpu.memory_space<vmem>>, vector<128x384xbf16>
    %221 = arith.truncf %206 : vector<128x128xf32> to vector<128x128xbf16>
    %cst_112 = arith.constant dense<0.000000e+00> : vector<128x384xf32>
    %222 = tpu.matmul %221, %220, %cst_112 {dimension_numbers = #tpu.dot_dimension_numbers<[1], [0], [0], [1], [0, 0, 1, 1], [], []>} : vector<128x128xbf16>, vector<128x384xbf16>, vector<128x384xf32> -> vector<128x384xf32>
    %223 = vector.extract_strided_slice %219 {offsets = [0, 0], sizes = [128, 128], strides = [1, 1]} : vector<128x384xf32> to vector<128x128xf32>
    %224 = vector.extract_strided_slice %222 {offsets = [0, 0], sizes = [128, 128], strides = [1, 1]} : vector<128x384xf32> to vector<128x128xf32>
    %225 = arith.addf %223, %224 : vector<128x128xf32>
    %226 = arith.negf %225 : vector<128x128xf32>
    %227 = math.exp %226 : vector<128x128xf32>
    %cst_113 = arith.constant 1.000000e+00 : f32
    %228 = vector.broadcast %cst_113 : f32 to vector<128x128xf32>
    %229 = arith.addf %228, %227 : vector<128x128xf32>
    %230 = arith.divf %228, %229 : vector<128x128xf32>
    %231 = vector.extract_strided_slice %219 {offsets = [0, 128], sizes = [128, 128], strides = [1, 1]} : vector<128x384xf32> to vector<128x128xf32>
    %232 = vector.extract_strided_slice %222 {offsets = [0, 128], sizes = [128, 128], strides = [1, 1]} : vector<128x384xf32> to vector<128x128xf32>
    %233 = arith.addf %231, %232 : vector<128x128xf32>
    %234 = arith.negf %233 : vector<128x128xf32>
    %235 = math.exp %234 : vector<128x128xf32>
    %cst_114 = arith.constant 1.000000e+00 : f32
    %236 = vector.broadcast %cst_114 : f32 to vector<128x128xf32>
    %237 = arith.addf %236, %235 : vector<128x128xf32>
    %238 = arith.divf %236, %237 : vector<128x128xf32>
    %239 = vector.extract_strided_slice %219 {offsets = [0, 256], sizes = [128, 128], strides = [1, 1]} : vector<128x384xf32> to vector<128x128xf32>
    %240 = vector.extract_strided_slice %222 {offsets = [0, 256], sizes = [128, 128], strides = [1, 1]} : vector<128x384xf32> to vector<128x128xf32>
    %c0_115 = arith.constant 0 : index
    %c0_116 = arith.constant 0 : index
    %241 = vector.load %arg6[%c0_115, %c0_116] : memref<1x128xf32, #tpu.memory_space<vmem>>, vector<1x128xf32>
    %242 = vector.broadcast %241 : vector<1x128xf32> to vector<128x128xf32>
    %243 = arith.addf %240, %242 : vector<128x128xf32>
    %244 = arith.mulf %230, %243 : vector<128x128xf32>
    %245 = arith.addf %239, %244 : vector<128x128xf32>
    %246 = math.tanh %245 : vector<128x128xf32>
    %cst_117 = arith.constant 1.000000e+00 : f32
    %247 = vector.broadcast %cst_117 : f32 to vector<128x128xf32>
    %248 = arith.subf %247, %238 : vector<128x128xf32>
    %249 = arith.mulf %248, %246 : vector<128x128xf32>
    %250 = arith.mulf %238, %206 : vector<128x128xf32>
    %251 = arith.addf %249, %250 : vector<128x128xf32>
    %c1_118 = arith.constant 1 : index
    %c0_119 = arith.constant 0 : index
    %c0_120 = arith.constant 0 : index
    %252 = vector.load %arg2[%c1_118, %c0_119, %c0_120] : memref<2x128x128xbf16, #tpu.memory_space<vmem>>, vector<1x128x128xbf16>
    %253 = vector.shape_cast %252 : vector<1x128x128xbf16> to vector<128x128xbf16>
    %254 = arith.truncf %251 : vector<128x128xf32> to vector<128x128xbf16>
    %cst_121 = arith.constant dense<0.000000e+00> : vector<128x128xf32>
    %255 = tpu.matmul %254, %253, %cst_121 {dimension_numbers = #tpu.dot_dimension_numbers<[1], [0], [0], [1], [0, 0, 1, 1], [], []>} : vector<128x128xbf16>, vector<128x128xbf16>, vector<128x128xf32> -> vector<128x128xf32>
    %c0_122 = arith.constant 0 : index
    %c0_123 = arith.constant 0 : index
    %256 = vector.load %arg0[%c0_122, %c0_123] : memref<128x128xbf16, #tpu.memory_space<vmem>>, vector<128x128xbf16>
    %257 = arith.truncf %255 : vector<128x128xf32> to vector<128x128xbf16>
    %cst_124 = arith.constant dense<0.000000e+00> : vector<128x128xf32>
    %258 = tpu.matmul %256, %257, %cst_124 {dimension_numbers = #tpu.dot_dimension_numbers<[1], [0], [0], [1], [0, 0, 1, 1], [], []>} : vector<128x128xbf16>, vector<128x128xbf16>, vector<128x128xf32> -> vector<128x128xf32>
    %c0_125 = arith.constant 0 : index
    %c0_126 = arith.constant 0 : index
    %259 = vector.load %arg3[%c0_125, %c0_126] : memref<128x384xbf16, #tpu.memory_space<vmem>>, vector<128x384xbf16>
    %260 = arith.truncf %258 : vector<128x128xf32> to vector<128x128xbf16>
    %cst_127 = arith.constant dense<0.000000e+00> : vector<128x384xf32>
    %261 = tpu.matmul %260, %259, %cst_127 {dimension_numbers = #tpu.dot_dimension_numbers<[1], [0], [0], [1], [0, 0, 1, 1], [], []>} : vector<128x128xbf16>, vector<128x384xbf16>, vector<128x384xf32> -> vector<128x384xf32>
    %c0_128 = arith.constant 0 : index
    %c0_129 = arith.constant 0 : index
    %262 = vector.load %arg5[%c0_128, %c0_129] : memref<1x384xf32, #tpu.memory_space<vmem>>, vector<1x384xf32>
    %263 = vector.broadcast %262 : vector<1x384xf32> to vector<128x384xf32>
    %264 = arith.addf %261, %263 : vector<128x384xf32>
    %c0_130 = arith.constant 0 : index
    %c0_131 = arith.constant 0 : index
    %265 = vector.load %arg4[%c0_130, %c0_131] : memref<128x384xbf16, #tpu.memory_space<vmem>>, vector<128x384xbf16>
    %266 = arith.truncf %251 : vector<128x128xf32> to vector<128x128xbf16>
    %cst_132 = arith.constant dense<0.000000e+00> : vector<128x384xf32>
    %267 = tpu.matmul %266, %265, %cst_132 {dimension_numbers = #tpu.dot_dimension_numbers<[1], [0], [0], [1], [0, 0, 1, 1], [], []>} : vector<128x128xbf16>, vector<128x384xbf16>, vector<128x384xf32> -> vector<128x384xf32>
    %268 = vector.extract_strided_slice %264 {offsets = [0, 0], sizes = [128, 128], strides = [1, 1]} : vector<128x384xf32> to vector<128x128xf32>
    %269 = vector.extract_strided_slice %267 {offsets = [0, 0], sizes = [128, 128], strides = [1, 1]} : vector<128x384xf32> to vector<128x128xf32>
    %270 = arith.addf %268, %269 : vector<128x128xf32>
    %271 = arith.negf %270 : vector<128x128xf32>
    %272 = math.exp %271 : vector<128x128xf32>
    %cst_133 = arith.constant 1.000000e+00 : f32
    %273 = vector.broadcast %cst_133 : f32 to vector<128x128xf32>
    %274 = arith.addf %273, %272 : vector<128x128xf32>
    %275 = arith.divf %273, %274 : vector<128x128xf32>
    %276 = vector.extract_strided_slice %264 {offsets = [0, 128], sizes = [128, 128], strides = [1, 1]} : vector<128x384xf32> to vector<128x128xf32>
    %277 = vector.extract_strided_slice %267 {offsets = [0, 128], sizes = [128, 128], strides = [1, 1]} : vector<128x384xf32> to vector<128x128xf32>
    %278 = arith.addf %276, %277 : vector<128x128xf32>
    %279 = arith.negf %278 : vector<128x128xf32>
    %280 = math.exp %279 : vector<128x128xf32>
    %cst_134 = arith.constant 1.000000e+00 : f32
    %281 = vector.broadcast %cst_134 : f32 to vector<128x128xf32>
    %282 = arith.addf %281, %280 : vector<128x128xf32>
    %283 = arith.divf %281, %282 : vector<128x128xf32>
    %284 = vector.extract_strided_slice %264 {offsets = [0, 256], sizes = [128, 128], strides = [1, 1]} : vector<128x384xf32> to vector<128x128xf32>
    %285 = vector.extract_strided_slice %267 {offsets = [0, 256], sizes = [128, 128], strides = [1, 1]} : vector<128x384xf32> to vector<128x128xf32>
    %c0_135 = arith.constant 0 : index
    %c0_136 = arith.constant 0 : index
    %286 = vector.load %arg6[%c0_135, %c0_136] : memref<1x128xf32, #tpu.memory_space<vmem>>, vector<1x128xf32>
    %287 = vector.broadcast %286 : vector<1x128xf32> to vector<128x128xf32>
    %288 = arith.addf %285, %287 : vector<128x128xf32>
    %289 = arith.mulf %275, %288 : vector<128x128xf32>
    %290 = arith.addf %284, %289 : vector<128x128xf32>
    %291 = math.tanh %290 : vector<128x128xf32>
    %cst_137 = arith.constant 1.000000e+00 : f32
    %292 = vector.broadcast %cst_137 : f32 to vector<128x128xf32>
    %293 = arith.subf %292, %283 : vector<128x128xf32>
    %294 = arith.mulf %293, %291 : vector<128x128xf32>
    %295 = arith.mulf %283, %251 : vector<128x128xf32>
    %296 = arith.addf %294, %295 : vector<128x128xf32>
    %c0_138 = arith.constant 0 : index
    %c0_139 = arith.constant 0 : index
    %297 = vector.load %arg7[%c0_138, %c0_139] : memref<128x256xbf16, #tpu.memory_space<vmem>>, vector<128x256xbf16>
    %298 = arith.truncf %296 : vector<128x128xf32> to vector<128x128xbf16>
    %cst_140 = arith.constant dense<0.000000e+00> : vector<128x256xf32>
    %299 = tpu.matmul %298, %297, %cst_140 {dimension_numbers = #tpu.dot_dimension_numbers<[1], [0], [0], [1], [0, 0, 1, 1], [], []>} : vector<128x128xbf16>, vector<128x256xbf16>, vector<128x256xf32> -> vector<128x256xf32>
    %c0_141 = arith.constant 0 : index
    %c0_142 = arith.constant 0 : index
    %300 = vector.load %arg8[%c0_141, %c0_142] : memref<128x256xbf16, #tpu.memory_space<vmem>>, vector<128x256xbf16>
    %301 = arith.truncf %206 : vector<128x128xf32> to vector<128x128xbf16>
    %cst_143 = arith.constant dense<0.000000e+00> : vector<128x256xf32>
    %302 = tpu.matmul %301, %300, %cst_143 {dimension_numbers = #tpu.dot_dimension_numbers<[1], [0], [0], [1], [0, 0, 1, 1], [], []>} : vector<128x128xbf16>, vector<128x256xbf16>, vector<128x256xf32> -> vector<128x256xf32>
    %303 = arith.addf %299, %302 : vector<128x256xf32>
    %c0_144 = arith.constant 0 : index
    %c0_145 = arith.constant 0 : index
    %304 = vector.load %arg9[%c0_144, %c0_145] : memref<1x256xf32, #tpu.memory_space<vmem>>, vector<1x256xf32>
    %305 = vector.broadcast %304 : vector<1x256xf32> to vector<128x256xf32>
    %306 = arith.addf %303, %305 : vector<128x256xf32>
    %307 = vector.extract_strided_slice %306 {offsets = [0, 128], sizes = [128, 128], strides = [1, 1]} : vector<128x256xf32> to vector<128x128xf32>
    %c0_146 = arith.constant 0 : index
    %c256 = arith.constant 256 : index
    %308 = vector.load %arg10[%c0_146, %c256] : memref<128x384xf32, #tpu.memory_space<vmem>>, vector<128x128xf32>
    tpu.vector_store %arg10[%c0_146, %c256], %307 {strides = array<i32>} : memref<128x384xf32, #tpu.memory_space<vmem>>, vector<128x128xf32>,
    return
  }
}

</mosaic_0001>

<bundles_post_ra>
// kernel: tpu_custom_call.1
= control target key start
LH: loop header
LB: loop body
LE: loop exit
PB: predicated region body
PF: predicated region fallthrough
CT: control target
= control target key end

     0   :  { %15 = vsyncpa [#allocation3], 0  ;;  %s15392_s0 = inlined_call_operand.hbm [shape: bf16[128,128], index: 0, kind: input, shape index: {}]   ;;  %s15393_s1 = inlined_call_operand.hbm [shape: f32[128,128], index: 1, kind: input, shape index: {}]   ;;  %s15394_s2 = inlined_call_operand.hbm [shape: bf16[2,128,128], index: 2, kind: input, shape index: {}]   ;;  %s15395_s3 = inlined_call_operand.hbm [shape: bf16[128,384], index: 3, kind: input, shape index: {}]   ;;  %s15396_s4 = inlined_call_operand.hbm [shape: bf16[128,384], index: 4, kind: input, shape index: {}]   ;;  %s15397_s5 = inlined_call_operand.vmem [shape: f32[1,384], index: 5, kind: input, shape index: {}]   ;;  %s15398_s6 = inlined_call_operand.vmem [shape: f32[1,128], index: 6, kind: input, shape index: {}]   ;;  %s15399_s7 = inlined_call_operand.hbm [shape: bf16[128,256], index: 7, kind: input, shape index: {}]   ;;  %s15400_s8 = inlined_call_operand.hbm [shape: bf16[128,256], index: 8, kind: input, shape index: {}]   ;;  %s15401_s9 = inlined_call_operand.vmem [shape: f32[1,256], index: 9, kind: input, shape index: {}]   ;;  %s15402_s10 = inlined_call_operand.hbm [shape: f32[128,384], index: 10, kind: output, shape index: {}]  }
   0x1   :  { %16 = vsyncpa [#allocation6], 0 }
   0x2   :  { %17 = vsyncpa [#allocation9], 0 }
   0x3   :  { %18 = vsyncpa [#allocation12], 0 }
   0x4   :  { %19 = vsyncpa [#allocation4], 0  ;;  %s12936_s13 = smov [#allocation5]   ;;  %s12750_s17 = scalar_lea.hbm %s15393_s1, 2048 }
   0x5   :  { %s37_s14 = sshll.u32 %s12936_s13, 4  ;;  %p12751_p0 = scmp.ne.s32.totalorder %s15393_s1, %s12750_s17  ;;  %s38_s14 = int_to_ptr.vmem [resolvable:$true] %s37_s14 }
   0x6   :  { %p12754_p1 = scmp.lt.u32.totalorder %s12750_s17, %s15393_s1 }
   0x8   :  { %p12756_p2 = pnand %p12754_p1, %p12751_p0 }
   0xa   :  { %12759 = shalt.err (!%p12756_p2)
}
   0xb   :  { %s12760_s22 = scalar_lea.vmem %s38_s14, 2048  ;;  %p12765_p4 = scmp.lt.s32.totalorder %s38_s14, %s38_s14 }
   0xc   :  { %p12761_p3 = scmp.ne.s32.totalorder %s38_s14, %s12760_s22  ;;  %p12766_p5 = scmp.lt.s32.totalorder %s12760_s22, %s12760_s22 }
   0xe   :  { %p12767_p6 = por %p12766_p5, %p12765_p4 }
  0x10   :  { %p12768_p7 = pnand %p12767_p6, %p12761_p3 }
  0x12   :  { %12771 = shalt.err (!%p12768_p7)
}
  0x13   :  { %s12937_s23 = smov 128   ;;  %s12938_s24 = smov 8  }
  0x14   :  { %43 = dma.hbm_to_vmem [thread:$0]  %s15393_s1, 2048, %s38_s14, [#allocation6], %s12937_s23, %s12937_s23, %s12938_s24  }
  0x15   :  { %s12939_s27 = smov [#allocation8]   ;;  %s12772_s11 = scalar_lea.hbm %s15395_s3, 3072 }
  0x16   :  { %s61_s28 = sshll.u32 %s12939_s27, 4  ;;  %p12773_p8 = scmp.ne.s32.totalorder %s15395_s3, %s12772_s11  ;;  %s62_s28 = int_to_ptr.vmem [resolvable:$true] %s61_s28 }
  0x17   :  { %p12776_p9 = scmp.lt.u32.totalorder %s12772_s11, %s15395_s3 }
  0x19   :  { %p12778_p10 = pnand %p12776_p9, %p12773_p8 }
  0x1b   :  { %12781 = shalt.err (!%p12778_p10)
}
  0x1c   :  { %s12782_s17 = scalar_lea.vmem %s62_s28, 3072  ;;  %p12787_p12 = scmp.lt.s32.totalorder %s62_s28, %s62_s28 }
  0x1d   :  { %p12783_p11 = scmp.ne.s32.totalorder %s62_s28, %s12782_s17  ;;  %p12788_p13 = scmp.lt.s32.totalorder %s12782_s17, %s12782_s17 }
  0x1f   :  { %p12789_p0 = por %p12788_p13, %p12787_p12 }
  0x21   :  { %p12790_p1 = pnand %p12789_p0, %p12783_p11 }
  0x23   :  { %12793 = shalt.err (!%p12790_p1)
}
  0x24   :  { %s12940_s1 = smov 192   ;;  %s12941_s14 = smov 12  }
  0x25   :  { %67 = dma.hbm_to_vmem [thread:$0]  %s15395_s3, 3072, %s62_s28, [#allocation9], %s12940_s1, %s12940_s1, %s12941_s14  }
  0x26   :  { %s12942_s20 = smov [#allocation11]   ;;  %s12943_s22 = smov [#allocation2]  }
  0x27   :  { %s89_s21 = sshll.u32 %s12942_s20, 4  ;;  %s25_s25 = sshll.u32 %s12943_s22, 4  ;;  %s90_s21 = int_to_ptr.vmem [resolvable:$true] %s89_s21  ;;  %s13038_s25 = int_to_ptr.vmem [resolvable:$true] %s25_s25 }
  0x28   :  { %s12794_s29 = scalar_lea.hbm %s15399_s7, 2048 }
  0x29   :  { %p12795_p2 = scmp.ne.s32.totalorder %s15399_s7, %s12794_s29  ;;  %p12798_p3 = scmp.lt.u32.totalorder %s12794_s29, %s15399_s7 }
  0x2b   :  { %p12800_p4 = pnand %p12798_p3, %p12795_p2 }
  0x2d   :  { %12803 = shalt.err (!%p12800_p4)
}
  0x2e   :  { %s12804_s3 = scalar_lea.vmem %s90_s21, 2048  ;;  %p12809_p6 = scmp.lt.s32.totalorder %s90_s21, %s90_s21 }
  0x2f   :  { %p12805_p5 = scmp.ne.s32.totalorder %s90_s21, %s12804_s3  ;;  %p12810_p7 = scmp.lt.s32.totalorder %s12804_s3, %s12804_s3 }
  0x31   :  { %p12811_p8 = por %p12810_p7, %p12809_p6 }
  0x33   :  { %p12812_p9 = pnand %p12811_p8, %p12805_p5 }
  0x35   :  { %12815 = shalt.err (!%p12812_p9)
}
  0x36   :  { %95 = dma.hbm_to_vmem [thread:$0]  %s15399_s7, 2048, %s90_s21, [#allocation12], %s12937_s23, %s12937_s23, %s12938_s24  }
  0x37   :  { %s12816_s18 = scalar_lea.hbm %s15392_s0, 1024 }
  0x38   :  { %p12817_p10 = scmp.ne.s32.totalorder %s15392_s0, %s12816_s18  ;;  %p12820_p11 = scmp.lt.u32.totalorder %s12816_s18, %s15392_s0 }
  0x3a   :  { %p12822_p12 = pnand %p12820_p11, %p12817_p10 }
  0x3c   :  { %12825 = shalt.err (!%p12822_p12)
}
  0x3d   :  { %s12826_s27 = scalar_lea.vmem %s13038_s25, 1024  ;;  %p12831_p0 = scmp.lt.s32.totalorder %s13038_s25, %s13038_s25 }
  0x3e   :  { %p12827_p13 = scmp.ne.s32.totalorder %s13038_s25, %s12826_s27  ;;  %p12832_p1 = scmp.lt.s32.totalorder %s12826_s27, %s12826_s27 }
  0x40   :  { %p12833_p2 = por %p12832_p1, %p12831_p0 }
  0x42   :  { %p12834_p3 = pnand %p12833_p2, %p12827_p13 }
  0x44   :  { %12837 = shalt.err (!%p12834_p3)
}
  0x45   :  { %s12944_s7 = smov 64   ;;  %s12945_s21 = smov 4  }
  0x46   :  { %31 = dma.hbm_to_vmem [thread:$0]  %s15392_s0, 1024, %s13038_s25, [#allocation3], %s12944_s7, %s12944_s7, %s12945_s21  }
  0x47   :  { %s12946_s11 = smov [#allocation7]   ;;  %s12947_s13 = smov [#allocation10]  }
  0x48   :  { %s49_s12 = sshll.u32 %s12946_s11, 4  ;;  %s73_s3 = sshll.u32 %s12947_s13, 4  ;;  %s50_s12 = int_to_ptr.vmem [resolvable:$true] %s49_s12  ;;  %s13072_s3 = int_to_ptr.vmem [resolvable:$true] %s73_s3 }
  0x49   :  { %s12838_s16 = scalar_lea.hbm %s15394_s2, 2048 }
  0x4a   :  { %p12839_p4 = scmp.ne.s32.totalorder %s15394_s2, %s12838_s16  ;;  %p12842_p5 = scmp.lt.u32.totalorder %s12838_s16, %s15394_s2 }
  0x4c   :  { %p12844_p6 = pnand %p12842_p5, %p12839_p4 }
  0x4e   :  { %12847 = shalt.err (!%p12844_p6)
}
  0x4f   :  { %s12848_s0 = scalar_lea.vmem %s50_s12, 2048  ;;  %p12853_p8 = scmp.lt.s32.totalorder %s50_s12, %s50_s12 }
  0x50   :  { %p12849_p7 = scmp.ne.s32.totalorder %s50_s12, %s12848_s0  ;;  %p12854_p9 = scmp.lt.s32.totalorder %s12848_s0, %s12848_s0 }
  0x52   :  { %p12855_p10 = por %p12854_p9, %p12853_p8 }
  0x54   :  { %p12856_p11 = pnand %p12855_p10, %p12849_p7 }
  0x56   :  { %12859 = shalt.err (!%p12856_p11)
}
  0x57   :  { %55 = dma.hbm_to_vmem [thread:$0]  %s15394_s2, 2048, %s50_s12, [#allocation6], %s12944_s7, %s12944_s7, %s12945_s21  }
  0x58   :  { %s12860_s29 = scalar_lea.hbm %s15396_s4, 3072 }
  0x59   :  { %p12861_p12 = scmp.ne.s32.totalorder %s15396_s4, %s12860_s29  ;;  %p12864_p13 = scmp.lt.u32.totalorder %s12860_s29, %s15396_s4 }
  0x5b   :  { %p12866_p0 = pnand %p12864_p13, %p12861_p12 }
  0x5d   :  { %12869 = shalt.err (!%p12866_p0)
}
  0x5e   :  { %s12870_s15 = scalar_lea.vmem %s13072_s3, 3072  ;;  %p12875_p2 = scmp.lt.s32.totalorder %s13072_s3, %s13072_s3 }
  0x5f   :  { %p12871_p1 = scmp.ne.s32.totalorder %s13072_s3, %s12870_s15  ;;  %p12876_p3 = scmp.lt.s32.totalorder %s12870_s15, %s12870_s15 }
  0x61   :  { %p12877_p4 = por %p12876_p3, %p12875_p2 }
  0x63   :  { %p12878_p5 = pnand %p12877_p4, %p12871_p1 }
  0x65   :  { %12881 = shalt.err (!%p12878_p5)
}
  0x66   :  { %79 = dma.hbm_to_vmem [thread:$0]  %s15396_s4, 3072, %s13072_s3, [#allocation9], %s12940_s1, %s12940_s1, %s12941_s14  }
  0x67   :  { %s12948_s21 = smov [#allocation13]   ;;  %s12882_s18 = scalar_lea.hbm %s15400_s8, 2048 }
  0x68   :  { %s101_s12 = sshll.u32 %s12948_s21, 4  ;;  %p12883_p6 = scmp.ne.s32.totalorder %s15400_s8, %s12882_s18  ;;  %s102_s12 = int_to_ptr.vmem [resolvable:$true] %s101_s12 }
  0x69   :  { %p12886_p7 = scmp.lt.u32.totalorder %s12882_s18, %s15400_s8 }
  0x6b   :  { %p12888_p8 = pnand %p12886_p7, %p12883_p6 }
  0x6d   :  { %12891 = shalt.err (!%p12888_p8)
}
  0x6e   :  { %s12892_s22 = scalar_lea.vmem %s102_s12, 2048  ;;  %p12897_p10 = scmp.lt.s32.totalorder %s102_s12, %s102_s12 }
  0x6f   :  { %p12893_p9 = scmp.ne.s32.totalorder %s102_s12, %s12892_s22  ;;  %p12898_p11 = scmp.lt.s32.totalorder %s12892_s22, %s12892_s22 }
  0x71   :  { %p12899_p12 = por %p12898_p11, %p12897_p10 }
  0x73   :  { %p12900_p13 = pnand %p12899_p12, %p12893_p9 }
  0x75   :  { %12903 = shalt.err (!%p12900_p13)
}
  0x76   :  { %107 = dma.hbm_to_vmem [thread:$0]  %s15400_s8, 2048, %s102_s12, [#allocation12], %s12937_s23, %s12937_s23, %s12938_s24  }
  0x77   :  { %12926 = dma.done.wait [#allocation3], 1024  }
  0x78   :  { %12927 = vsyncadd [#allocation3], 4294966272 }
  0x79   :  { %12928 = dma.done.wait [#allocation6], 4096  }
  0x7a   :  { %12929 = vsyncadd [#allocation6], 4294963200 }
  0x7b   :  { %12930 = dma.done.wait [#allocation9], 6144  }
  0x7c   :  { %12931 = vsyncadd [#allocation9], 4294961152 }
  0x7d   :  { %12932 = dma.done.wait [#allocation12], 4096  }
  0x7e   :  { %12933 = vsyncadd [#allocation12], 4294963200  ;;  %v11246_v0 = vld [vmem:[#allocation7] sm:$0xff]   ;;  %v11247_v1 = vld [vmem:[#allocation7 + $0x8] sm:$0xff]  }
  0x7f   :  { %10013 = vmatprep.subr.bf16.mxu1 %v11246_v0  ;;  %v11248_v2 = vld [vmem:[#allocation7 + $0x10] sm:$0xff]   ;;  %v11249_v3 = vld [vmem:[#allocation7 + $0x18] sm:$0xff]   ;;  %v132_v4 = vld [vmem:[#allocation5] sm:$0xff] }
  0x80   :  { %10014 = vmatpush3.bf16.msra.mxu1 %v11246_v0  ;;  %v133_v5 = vld [vmem:[#allocation5 + $0x8] sm:$0xff]  ;;  %v11250_v7 = vld [vmem:[#allocation7 + $0x20] sm:$0xff]   ;;  %v11252_v9 = vld [vmem:[#allocation7 + $0x30] sm:$0xff]  }
  0x81   :  { %10015 = vmatprep.subr.bf16.mxu1 %v11247_v1  ;;  %v13121_v6 = vpack.c.bf16 %v133_v5, %v132_v4  ;;  %v11251_v8 = vld [vmem:[#allocation7 + $0x28] sm:$0xff]   ;;  %v11253_v10 = vld [vmem:[#allocation7 + $0x38] sm:$0xff]   ;;  %v134_v11 = vld [vmem:[#allocation5 + $0x10] sm:$0xff] }
  0x82   :  { %v135_v12 = vld [vmem:[#allocation5 + $0x18] sm:$0xff]  ;;  %v136_v13 = vld [vmem:[#allocation5 + $0x20] sm:$0xff]  ;;  %v137_v14 = vld [vmem:[#allocation5 + $0x28] sm:$0xff] }
  0x83   :  { %10029 = vmatprep.mubr.bf16.mxu1 %v13121_v6  ;;  %v13124_v15 = vpack.c.bf16 %v135_v12, %v134_v11  ;;  %v13126_v16 = vpack.c.bf16 %v137_v14, %v136_v13  ;;  %v138_v17 = vld [vmem:[#allocation5 + $0x30] sm:$0xff]  ;;  %v139_v18 = vld [vmem:[#allocation5 + $0x38] sm:$0xff]  ;;  %v140_v19 = vld [vmem:[#allocation5 + $0x40] sm:$0xff] }
  0x84   :  { %10016 = vmatpush3.bf16.msra.mxu1 %v11247_v1  ;;  %v141_v20 = vld [vmem:[#allocation5 + $0x48] sm:$0xff]  ;;  %v13130_v21 = vpack.c.bf16 %v139_v18, %v138_v17  ;;  %v142_v23 = vld [vmem:[#allocation5 + $0x50] sm:$0xff]  ;;  %v143_v24 = vld [vmem:[#allocation5 + $0x58] sm:$0xff] }
  0x85   :  { %10017 = vmatprep.subr.bf16.mxu1 %v11248_v2  ;;  %v13132_v22 = vpack.c.bf16 %v141_v20, %v140_v19  ;;  %v144_v25 = vld [vmem:[#allocation5 + $0x60] sm:$0xff]  ;;  %v145_v26 = vld [vmem:[#allocation5 + $0x68] sm:$0xff]  ;;  %v13136_v27 = vpack.c.bf16 %v143_v24, %v142_v23  ;;  %v146_v29 = vld [vmem:[#allocation5 + $0x70] sm:$0xff] }
  0x86   :  { %v13138_v28 = vpack.c.bf16 %v145_v26, %v144_v25  ;;  %v147_v30 = vld [vmem:[#allocation5 + $0x78] sm:$0xff]  ;;  %v11254_v32 = vld [vmem:[#allocation2] sm:$0xff]   ;;  %v13165_v40 = vld [vmem:[#allocation8 + $0x48] ss:$12 sps:$4 sm:$0xff]  }
  0x87   :  { %v13142_v31 = vpack.c.bf16 %v147_v30, %v146_v29  ;;  %v13145_v33 = vld [vmem:[#allocation8 + $0x4] ss:$12 sps:$4 sm:$0xff]   ;;  %v13147_v34 = vld [vmem:[#allocation8] ss:$12 sps:$4 sm:$0xff]   ;;  %v13149_v35 = vld [vmem:[#allocation8 + $0x1c] ss:$12 sps:$4 sm:$0xff]  }
  0x88   :  { %10018 = vmatpush3.bf16.msra.mxu1 %v11248_v2  ;;  %671 = vmatprep.subr.bf16.mxu0 %v13145_v33  ;;  %v13153_v36 = vld [vmem:[#allocation8 + $0x18] ss:$12 sps:$4 sm:$0xff]   ;;  %v13156_v37 = vld [vmem:[#allocation8 + $0x34] ss:$12 sps:$4 sm:$0xff]   ;;  %v13159_v38 = vld [vmem:[#allocation8 + $0x30] ss:$12 sps:$4 sm:$0xff]  }
  0x89   :  { %10019 = vmatprep.subr.bf16.mxu1 %v11249_v3  ;;  %672 = vmatpush1.bf16.msra.mxu0 %v13147_v34  ;;  %v13162_v39 = vld [vmem:[#allocation8 + $0x4c] ss:$12 sps:$4 sm:$0xff]   ;;  %v13168_v41 = vld [vmem:[#allocation8 + $0x64] ss:$12 sps:$4 sm:$0xff]   ;;  %v13174_v43 = vld [vmem:[#allocation8 + $0x7c] ss:$12 sps:$4 sm:$0xff]  }
  0x8a   :  { %673 = vmatprep.subr.bf16.mxu0 %v13149_v35  ;;  %v13171_v42 = vld [vmem:[#allocation8 + $0x60] ss:$12 sps:$4 sm:$0xff]   ;;  %v13177_v44 = vld [vmem:[#allocation8 + $0x78] ss:$12 sps:$4 sm:$0xff]   ;;  %v13183_v46 = vld [vmem:[#allocation8 + $0x90] ss:$12 sps:$4 sm:$0xff]  }
  0x8b   :  { %v13180_v45 = vld [vmem:[#allocation8 + $0x94] ss:$12 sps:$4 sm:$0xff]   ;;  %v11273_v12 = vld [vmem:[#allocation8 + $0x38] ss:$12 sps:$4 sm:$0xff]   ;;  %v11277_v17 = vld [vmem:[#allocation8 + $0x50] ss:$12 sps:$4 sm:$0xff]  }
  0x8c   :  { %10020 = vmatpush3.bf16.msra.mxu1 %v11249_v3  ;;  %v11269_v11 = vld [vmem:[#allocation8 + $0x20] ss:$12 sps:$4 sm:$0xff]   ;;  %v11257_v13 = vld [vmem:[#allocation2 + $0x18] sm:$0xff]   ;;  %v11281_v18 = vld [vmem:[#allocation8 + $0x68] ss:$12 sps:$4 sm:$0xff]  }
  0x8d   :  { %10021 = vmatprep.subr.bf16.mxu1 %v11250_v7  ;;  %674 = vmatpush1.bf16.msra.mxu0 %v13153_v36  ;;  %v11258_v14 = vld [vmem:[#allocation2 + $0x20] sm:$0xff]   ;;  %v11259_v19 = vld [vmem:[#allocation2 + $0x28] sm:$0xff]   ;;  %v11260_v20 = vld [vmem:[#allocation2 + $0x30] sm:$0xff]  }
  0x8e   :  { %675 = vmatprep.subr.bf16.mxu0 %v13156_v37  ;;  %v11285_v23 = vld [vmem:[#allocation8 + $0x80] ss:$12 sps:$4 sm:$0xff]   ;;  %v11289_v24 = vld [vmem:[#allocation8 + $0x98] ss:$12 sps:$4 sm:$0xff]   ;;  %v13189_v29 = vld [vmem:[#allocation8 + $0xa8] ss:$12 sps:$4 sm:$0xff]  }
  0x8f   :  { %v11261_v25 = vld [vmem:[#allocation2 + $0x38] sm:$0xff]  }
  0x90   :  { %10022 = vmatpush3.bf16.msra.mxu1 %v11250_v7  ;;  %v13187_v26 = vld [vmem:[#allocation8 + $0xac] ss:$12 sps:$4 sm:$0xff]   ;;  %v11293_v30 = vld [vmem:[#allocation8 + $0xb0] ss:$12 sps:$4 sm:$0xff]  }
  0x91   :  { %10023 = vmatprep.subr.bf16.mxu1 %v11251_v8  ;;  %676 = vmatpush1.bf16.msra.mxu0 %v13159_v38 }
  0x92   :  { %677 = vmatprep.subr.bf16.mxu0 %v13162_v39 }
  0x94   :  { %10024 = vmatpush3.bf16.msra.mxu1 %v11251_v8  ;;  %v11265_v8 = vld [vmem:[#allocation8 + $0x8] ss:$12 sps:$4 sm:$0xff]  }
  0x95   :  { %10025 = vmatprep.subr.bf16.mxu1 %v11252_v9  ;;  %678 = vmatpush1.bf16.msra.mxu0 %v13165_v40 }
  0x96   :  { %679 = vmatprep.subr.bf16.mxu0 %v13168_v41 }
  0x98   :  { %10026 = vmatpush3.bf16.msra.mxu1 %v11252_v9  ;;  %v11255_v9 = vld [vmem:[#allocation2 + $0x8] sm:$0xff]  }
  0x99   :  { %10027 = vmatprep.subr.bf16.mxu1 %v11253_v10  ;;  %680 = vmatpush1.bf16.msra.mxu0 %v13171_v42 }
  0x9a   :  { %681 = vmatprep.subr.bf16.mxu0 %v13174_v43 }
  0x9c   :  { %10028 = vmatpush3.bf16.msra.mxu1 %v11253_v10  ;;  %v11256_v10 = vld [vmem:[#allocation2 + $0x10] sm:$0xff]  }
  0x9d   :  { %682 = vmatpush1.bf16.msra.mxu0 %v13177_v44 }
  0x9e   :  { %683 = vmatprep.subr.bf16.mxu0 %v13180_v45 }
  0x9f   :  { %10030 = vmatmul.mubr.bf16.vlgmr.msra.gmra.mrb[0].mxu1 %v13124_v15 }
  0xa0   :  { %10033 = vmatprep.mubr.bf16.mxu1 %v13126_v16 }
  0xa1   :  { %684 = vmatpush1.bf16.msra.mxu0 %v13183_v46 }
  0xa2   :  { %685 = vmatprep.subr.bf16.mxu0 %v13187_v26 }
  0xa5   :  { %686 = vmatpush1.bf16.msra.mxu0 %v13189_v29 }
  0xa7   :  { %10034 = vmatmul.mubr.bf16.gmra.mrb[4].mxu1 %v13130_v21 }
  0xa8   :  { %10037 = vmatprep.mubr.bf16.mxu1 %v13132_v22 }
  0xaf   :  { %10038 = vmatmul.mubr.bf16.gmra.mrb[8].mxu1 %v13136_v27 }
  0xb0   :  { %10041 = vmatprep.mubr.bf16.mxu1 %v13138_v28 }
  0xb7   :  { %10042 = vmatmul.mubr.bf16.gmra.mrb[12].mxu1 %v13142_v31 }
  0xb8   :  { %10061 = vmatprep.mubr.bf16.mxu1 %v11254_v32  ;;  %v15403_v32 = vmov 0  }
  0xb9   :  { %703 = vmatprep.mubr.bf16.mxu0 %v15403_v32 }
 0x172   :  { %v10031_v47 = vpop.f32.mrb[0].mxu1 }
 0x173   :  { %v254_v48 = vpop.f32.mrb[1].mxu1 }
 0x174   :  { %v10032_v49 = vpop.f32.mrb[2].mxu1 }
 0x175   :  { %v257_v50 = vpop.f32.mrb[3].mxu1  ;;  %v334_v51 = vpack.c.bf16 %v10032_v49, %v10031_v47  ;;  %v13194_v47 = vld [vmem:[#allocation10 + $0x4] ss:$12 sps:$4 sm:$0xff]  }
 0x176   :  { %v333_v52 = vpack.c.bf16 %v257_v50, %v254_v48  ;;  %1041 = vmatprep.subr.bf16.mxu0 %v13194_v47  ;;  %v11318_v48 = vld [vmem:[#allocation10 + $0x8] ss:$12 sps:$4 sm:$0xff]  }
 0x178   :  { %10045 = vmatprep.subr.bf16.mxu1 %v333_v52 }
 0x179   :  { %10046 = vmatpush3.bf16.msra.mxu1 %v333_v52 }
 0x17a   :  { %v10035_v53 = vpop.f32.mrb[4].mxu1  ;;  %10047 = vmatprep.subr.bf16.mxu1 %v334_v51 }
 0x17b   :  { %v270_v54 = vpop.f32.mrb[5].mxu1 }
 0x17c   :  { %v10036_v55 = vpop.f32.mrb[6].mxu1 }
 0x17d   :  { %v273_v56 = vpop.f32.mrb[7].mxu1  ;;  %10048 = vmatpush3.bf16.msra.mxu1 %v334_v51  ;;  %v336_v57 = vpack.c.bf16 %v10036_v55, %v10035_v53 }
 0x17e   :  { %v335_v58 = vpack.c.bf16 %v273_v56, %v270_v54  ;;  %v11294_v54 = vld [vmem:[#allocation10] ss:$12 sps:$4 sm:$0xff]   ;;  %v11299_v56 = vld [vmem:[#allocation10 + $0x1c] ss:$12 sps:$4 sm:$0xff]  }
 0x180   :  { %10049 = vmatprep.subr.bf16.mxu1 %v335_v58 }
 0x181   :  { %10050 = vmatpush3.bf16.msra.mxu1 %v335_v58  ;;  %v11297_v58 = vld [vmem:[#allocation10 + $0x18] ss:$12 sps:$4 sm:$0xff]  }
 0x182   :  { %v10039_v59 = vpop.f32.mrb[8].mxu1  ;;  %10051 = vmatprep.subr.bf16.mxu1 %v336_v57 }
 0x183   :  { %v286_v60 = vpop.f32.mrb[9].mxu1 }
 0x184   :  { %v10040_v61 = vpop.f32.mrb[10].mxu1 }
 0x185   :  { %v289_v62 = vpop.f32.mrb[11].mxu1  ;;  %10052 = vmatpush3.bf16.msra.mxu1 %v336_v57  ;;  %v338_v63 = vpack.c.bf16 %v10040_v61, %v10039_v59  ;;  %v11319_v57 = vld [vmem:[#allocation10 + $0x20] ss:$12 sps:$4 sm:$0xff]  }
 0x186   :  { %v337_v0 = vpack.c.bf16 %v289_v62, %v286_v60  ;;  %v11302_v60 = vld [vmem:[#allocation10 + $0x34] ss:$12 sps:$4 sm:$0xff]  }
 0x188   :  { %10053 = vmatprep.subr.bf16.mxu1 %v337_v0 }
 0x189   :  { %10054 = vmatpush3.bf16.msra.mxu1 %v337_v0 }
 0x18a   :  { %v10043_v1 = vpop.f32.mrb[12].mxu1  ;;  %10055 = vmatprep.subr.bf16.mxu1 %v338_v63 }
 0x18b   :  { %v302_v2 = vpop.f32.mrb[13].mxu1 }
 0x18c   :  { %v10044_v3 = vpop.f32.mrb[14].mxu1 }
 0x18d   :  { %v305_v4 = vpop.f32.mrb[15].mxu1  ;;  %10056 = vmatpush3.bf16.msra.mxu1 %v338_v63  ;;  %v340_v5 = vpack.c.bf16 %v10044_v3, %v10043_v1  ;;  %v11320_v3 = vld [vmem:[#allocation10 + $0x38] ss:$12 sps:$4 sm:$0xff]  }
 0x18e   :  { %v339_v7 = vpack.c.bf16 %v305_v4, %v302_v2  ;;  %v11300_v2 = vld [vmem:[#allocation10 + $0x30] ss:$12 sps:$4 sm:$0xff]   ;;  %v11305_v4 = vld [vmem:[#allocation10 + $0x4c] ss:$12 sps:$4 sm:$0xff]  }
 0x190   :  { %10057 = vmatprep.subr.bf16.mxu1 %v339_v7 }
 0x191   :  { %10058 = vmatpush3.bf16.msra.mxu1 %v339_v7 }
 0x192   :  { %10059 = vmatprep.subr.bf16.mxu1 %v340_v5 }
 0x195   :  { %10060 = vmatpush3.bf16.msra.mxu1 %v340_v5  ;;  %v11321_v5 = vld [vmem:[#allocation10 + $0x50] ss:$12 sps:$4 sm:$0xff]  }
 0x196   :  { %10077 = vmatprep.subr.bf16.mxu1 %v11265_v8 }
 0x198   :  { %10062 = vmatmul.mubr.bf16.vlgmr.msra.gmra.mrb[16].mxu1 %v11255_v9 }
 0x199   :  { %10065 = vmatprep.mubr.bf16.mxu1 %v11256_v10  ;;  %10078 = vmatpush3.bf16.msra.mxu1 %v11265_v8  ;;  %v11303_v8 = vld [vmem:[#allocation10 + $0x48] ss:$12 sps:$4 sm:$0xff]   ;;  %v11308_v10 = vld [vmem:[#allocation10 + $0x64] ss:$12 sps:$4 sm:$0xff]  }
 0x19a   :  { %10079 = vmatprep.subr.bf16.mxu1 %v11269_v11 }
 0x19d   :  { %10080 = vmatpush3.bf16.msra.mxu1 %v11269_v11 }
 0x19e   :  { %10081 = vmatprep.subr.bf16.mxu1 %v11273_v12 }
 0x1a0   :  { %10066 = vmatmul.mubr.bf16.gmra.mrb[20].mxu1 %v11257_v13 }
 0x1a1   :  { %10069 = vmatprep.mubr.bf16.mxu1 %v11258_v14  ;;  %10082 = vmatpush3.bf16.msra.mxu1 %v11273_v12 }
 0x1a2   :  { %10083 = vmatprep.subr.bf16.mxu1 %v11277_v17 }
 0x1a5   :  { %10084 = vmatpush3.bf16.msra.mxu1 %v11277_v17  ;;  %v11306_v17 = vld [vmem:[#allocation10 + $0x60] ss:$12 sps:$4 sm:$0xff]  }
 0x1a6   :  { %10085 = vmatprep.subr.bf16.mxu1 %v11281_v18 }
 0x1a8   :  { %10070 = vmatmul.mubr.bf16.gmra.mrb[24].mxu1 %v11259_v19  ;;  %v11311_v19 = vld [vmem:[#allocation10 + $0x7c] ss:$12 sps:$4 sm:$0xff]  }
 0x1a9   :  { %10073 = vmatprep.mubr.bf16.mxu1 %v11260_v20  ;;  %10086 = vmatpush3.bf16.msra.mxu1 %v11281_v18  ;;  %v11322_v18 = vld [vmem:[#allocation10 + $0x68] ss:$12 sps:$4 sm:$0xff]   ;;  %v11323_v20 = vld [vmem:[#allocation10 + $0x80] ss:$12 sps:$4 sm:$0xff]  }
 0x1aa   :  { %10087 = vmatprep.subr.bf16.mxu1 %v11285_v23 }
 0x1ad   :  { %10088 = vmatpush3.bf16.msra.mxu1 %v11285_v23 }
 0x1ae   :  { %10089 = vmatprep.subr.bf16.mxu1 %v11289_v24 }
 0x1b0   :  { %10074 = vmatmul.mubr.bf16.gmra.mrb[28].mxu1 %v11261_v25 }
 0x1b1   :  { %10090 = vmatpush3.bf16.msra.mxu1 %v11289_v24  ;;  %v11309_v24 = vld [vmem:[#allocation10 + $0x78] ss:$12 sps:$4 sm:$0xff]  }
 0x1b2   :  { %10091 = vmatprep.subr.bf16.mxu1 %v11293_v30 }
 0x1b5   :  { %10092 = vmatpush3.bf16.msra.mxu1 %v11293_v30  ;;  %v11314_v30 = vld [vmem:[#allocation10 + $0x94] ss:$12 sps:$4 sm:$0xff]  }
 0x1b6   :  { %10109 = vmatprep.subr.bf16.mxu1 %v11318_v48 }
 0x26b   :  { %v10063_v49 = vpop.f32.mrb[16].mxu1 }
 0x26c   :  { %v423_v50 = vpop.f32.mrb[17].mxu1 }
 0x26d   :  { %v10064_v51 = vpop.f32.mrb[18].mxu1 }
 0x26e   :  { %v519_v52 = vpack.c.bf16 %v10064_v51, %v10063_v49  ;;  %v426_v53 = vpop.f32.mrb[19].mxu1 }
 0x26f   :  { %v518_v55 = vpack.c.bf16 %v426_v53, %v423_v50  ;;  %v11324_v53 = vld [vmem:[#allocation10 + $0x98] ss:$12 sps:$4 sm:$0xff]  }
 0x271   :  { %704 = vmatmul.mubr.bf16.vlgmr.msra.gmra.mrb[0].mxu0 %v518_v55  ;;  %10093 = vmatprep.mubr.bf16.mxu1 %v518_v55  ;;  %v11325_v55 = vld [vmem:[#allocation10 + $0xb0] ss:$12 sps:$4 sm:$0xff]  }
 0x272   :  { %10094 = vmatmul.mubr.bf16.vlgmr.msra.gmra.mrb[32].mxu1 %v519_v52  ;;  %1042 = vmatpush1.bf16.msra.mxu0 %v11294_v54  ;;  %v11317_v54 = vld [vmem:[#allocation10 + $0xac] ss:$12 sps:$4 sm:$0xff]  }
 0x273   :  { %v10067_v59 = vpop.f32.mrb[20].mxu1  ;;  %713 = vmatprep.mubr.bf16.mxu0 %v15403_v32  ;;  %1043 = vmatprep.subr.bf16.mxu0 %v11299_v56  ;;  %v11315_v56 = vld [vmem:[#allocation10 + $0xa8] ss:$12 sps:$4 sm:$0xff]  }
 0x274   :  { %v439_v61 = vpop.f32.mrb[21].mxu1  ;;  %10110 = vmatpush3.bf16.msra.mxu1 %v11318_v48 }
 0x275   :  { %v10068_v62 = vpop.f32.mrb[22].mxu1  ;;  %10111 = vmatprep.subr.bf16.mxu1 %v11319_v57 }
 0x276   :  { %v442_v63 = vpop.f32.mrb[23].mxu1  ;;  %1044 = vmatpush1.bf16.msra.mxu0 %v11297_v58  ;;  %v521_v0 = vpack.c.bf16 %v10068_v62, %v10067_v59 }
 0x277   :  { %v520_v1 = vpack.c.bf16 %v442_v63, %v439_v61  ;;  %1045 = vmatprep.subr.bf16.mxu0 %v11302_v60 }
 0x278   :  { %10112 = vmatpush3.bf16.msra.mxu1 %v11319_v57 }
 0x279   :  { %714 = vmatmul.mubr.bf16.gmra.mrb[4].mxu0 %v519_v52  ;;  %10097 = vmatprep.mubr.bf16.mxu1 %v520_v1  ;;  %v11312_v52 = vld [vmem:[#allocation10 + $0x90] ss:$12 sps:$4 sm:$0xff]  }
 0x27a   :  { %10098 = vmatmul.mubr.bf16.gmra.mrb[36].mxu1 %v521_v0  ;;  %723 = vmatprep.mubr.bf16.mxu0 %v15403_v32 }
 0x27b   :  { %1046 = vmatpush1.bf16.msra.mxu0 %v11300_v2  ;;  %v10071_v7 = vpop.f32.mrb[24].mxu1  ;;  %10113 = vmatprep.subr.bf16.mxu1 %v11320_v3 }
 0x27c   :  { %v455_v9 = vpop.f32.mrb[25].mxu1  ;;  %1047 = vmatprep.subr.bf16.mxu0 %v11305_v4  ;;  %10114 = vmatpush3.bf16.msra.mxu1 %v11320_v3 }
 0x27d   :  { %v10072_v11 = vpop.f32.mrb[26].mxu1  ;;  %10115 = vmatprep.subr.bf16.mxu1 %v11321_v5 }
 0x27e   :  { %v458_v12 = vpop.f32.mrb[27].mxu1  ;;  %v523_v13 = vpack.c.bf16 %v10072_v11, %v10071_v7 }
 0x27f   :  { %v522_v14 = vpack.c.bf16 %v458_v12, %v455_v9  ;;  %1048 = vmatpush1.bf16.msra.mxu0 %v11303_v8 }
 0x280   :  { %1049 = vmatprep.subr.bf16.mxu0 %v11308_v10  ;;  %10116 = vmatpush3.bf16.msra.mxu1 %v11321_v5  ;;  %v528_v10 = vlaneseq }
 0x281   :  { %724 = vmatmul.mubr.bf16.gmra.mrb[8].mxu0 %v520_v1  ;;  %10101 = vmatprep.mubr.bf16.mxu1 %v522_v14 }
 0x282   :  { %733 = vmatprep.mubr.bf16.mxu0 %v15403_v32  ;;  %10102 = vmatmul.mubr.bf16.gmra.mrb[40].mxu1 %v523_v13 }
 0x283   :  { %1050 = vmatpush1.bf16.msra.mxu0 %v11306_v17  ;;  %v10075_v23 = vpop.f32.mrb[28].mxu1  ;;  %10117 = vmatprep.subr.bf16.mxu1 %v11322_v18 }
 0x284   :  { %v471_v25 = vpop.f32.mrb[29].mxu1  ;;  %1051 = vmatprep.subr.bf16.mxu0 %v11311_v19  ;;  %10118 = vmatpush3.bf16.msra.mxu1 %v11322_v18 }
 0x285   :  { %v10076_v48 = vpop.f32.mrb[30].mxu1  ;;  %10119 = vmatprep.subr.bf16.mxu1 %v11323_v20 }
 0x286   :  { %v474_v49 = vpop.f32.mrb[31].mxu1  ;;  %v525_v50 = vpack.c.bf16 %v10076_v48, %v10075_v23  ;;  %v13313_v23 = vld [vmem:[%s15397_s5] sm:$0x7] }
 0x287   :  { %v524_v51 = vpack.c.bf16 %v474_v49, %v471_v25  ;;  %1052 = vmatpush1.bf16.msra.mxu0 %v11309_v24 }
 0x288   :  { %1053 = vmatprep.subr.bf16.mxu0 %v11314_v30  ;;  %10120 = vmatpush3.bf16.msra.mxu1 %v11323_v20 }
 0x289   :  { %734 = vmatmul.mubr.bf16.gmra.mrb[12].mxu0 %v521_v0  ;;  %10105 = vmatprep.mubr.bf16.mxu1 %v524_v51 }
 0x28a   :  { %743 = vmatprep.mubr.bf16.mxu0 %v15403_v32  ;;  %10106 = vmatmul.mubr.bf16.gmra.mrb[44].mxu1 %v525_v50 }
 0x28b   :  { %1054 = vmatpush1.bf16.msra.mxu0 %v11312_v52  ;;  %10121 = vmatprep.subr.bf16.mxu1 %v11324_v53 }
 0x28c   :  { %1055 = vmatprep.subr.bf16.mxu0 %v11317_v54  ;;  %10122 = vmatpush3.bf16.msra.mxu1 %v11324_v53 }
 0x28d   :  { %10123 = vmatprep.subr.bf16.mxu1 %v11325_v55  ;;  %10125 = vmatprep.mubr.bf16.mxu1 %v13121_v6 }
 0x28f   :  { %1056 = vmatpush1.bf16.msra.mxu0 %v11315_v56 }
 0x290   :  { %10124 = vmatpush3.bf16.msra.mxu1 %v11325_v55  ;;  %1893 = vmatprep.subr.bf16.mxu0 %v13145_v33  ;;  %v11326_v33 = vld [vmem:[#allocation7 + $0x40] sm:$0xff]  }
 0x291   :  { %744 = vmatmul.mubr.bf16.gmra.mrb[16].mxu0 %v522_v14  ;;  %10141 = vmatprep.subr.bf16.mxu1 %v11326_v33  ;;  %v529_v14 = vshrl.u32 %v528_v10, 7 }
 0x292   :  { %753 = vmatprep.mubr.bf16.mxu0 %v15403_v32 }
 0x293   :  { %10126 = vmatmul.mubr.bf16.vlgmr.msra.gmra.mrb[48].mxu1 %v13124_v15  ;;  %v13302_v17 = vsub.s32 0, %v529_v14  ;;  %v13304_v18 = vsub.s32 1, %v529_v14 }
 0x294   :  { %10129 = vmatprep.mubr.bf16.mxu1 %v13126_v16  ;;  %10142 = vmatpush3.bf16.msra.mxu1 %v11326_v33 }
 0x295   :  { %15458 = vst [vmem:[#allocation20_spill] sm:$0xff] %v13302_v17  ;;  %15459 = vst [vmem:[#allocation21_spill] sm:$0xff] %v13304_v18  ;;  %v13319_v25 = vrot.slane %v13313_v23, %v13302_v17  ;;  %v13325_v48 = vrot.slane %v13313_v23, %v13304_v18 }
 0x299   :  { %754 = vmatmul.mubr.bf16.gmra.mrb[20].mxu0 %v523_v13 }
 0x29a   :  { %763 = vmatprep.mubr.bf16.mxu0 %v15403_v32 }
 0x29b   :  { %10130 = vmatmul.mubr.bf16.gmra.mrb[52].mxu1 %v13130_v21 }
 0x29c   :  { %10133 = vmatprep.mubr.bf16.mxu1 %v13132_v22 }
 0x2a1   :  { %764 = vmatmul.mubr.bf16.gmra.mrb[24].mxu0 %v524_v51 }
 0x2a2   :  { %773 = vmatprep.mubr.bf16.mxu0 %v15403_v32 }
 0x2a3   :  { %10134 = vmatmul.mubr.bf16.gmra.mrb[56].mxu1 %v13136_v27 }
 0x2a4   :  { %10137 = vmatprep.mubr.bf16.mxu1 %v13138_v28 }
 0x2a9   :  { %774 = vmatmul.mubr.bf16.gmra.mrb[28].mxu0 %v525_v50 }
 0x2aa   :  { %1073 = vmatprep.mubr.bf16.mxu0 %v15403_v32 }
 0x2ab   :  { %10138 = vmatmul.mubr.bf16.gmra.mrb[60].mxu1 %v13142_v31 }
 0x2b1   :  { %1074 = vmatmul.mubr.bf16.vlgmr.msra.gmra.mrb[0].mxu0 %v13121_v6 }
 0x2b2   :  { %1083 = vmatprep.mubr.bf16.mxu0 %v15403_v32  ;;  %1894 = vmatpush1.bf16.msra.mxu0 %v13147_v34  ;;  %v11327_v34 = vld [vmem:[#allocation7 + $0x48] sm:$0xff]  }
 0x2b3   :  { %1895 = vmatprep.subr.bf16.mxu0 %v13149_v35  ;;  %10143 = vmatprep.subr.bf16.mxu1 %v11327_v34  ;;  %v11328_v35 = vld [vmem:[#allocation7 + $0x50] sm:$0xff]  }
 0x2b4   :  { %10144 = vmatpush3.bf16.msra.mxu1 %v11327_v34 }
 0x2b5   :  { %10145 = vmatprep.subr.bf16.mxu1 %v11328_v35 }
 0x2b6   :  { %1896 = vmatpush1.bf16.msra.mxu0 %v13153_v36  ;;  %v11329_v36 = vld [vmem:[#allocation7 + $0x58] sm:$0xff]  }
 0x2b7   :  { %1897 = vmatprep.subr.bf16.mxu0 %v13156_v37  ;;  %v11330_v37 = vld [vmem:[#allocation7 + $0x60] sm:$0xff]  }
 0x2b8   :  { %10146 = vmatpush3.bf16.msra.mxu1 %v11328_v35 }
 0x2b9   :  { %1084 = vmatmul.mubr.bf16.gmra.mrb[4].mxu0 %v13124_v15  ;;  %10147 = vmatprep.subr.bf16.mxu1 %v11329_v36 }
 0x2ba   :  { %1093 = vmatprep.mubr.bf16.mxu0 %v15403_v32  ;;  %1898 = vmatpush1.bf16.msra.mxu0 %v13159_v38  ;;  %v11331_v38 = vld [vmem:[#allocation7 + $0x68] sm:$0xff]  }
 0x2bb   :  { %1899 = vmatprep.subr.bf16.mxu0 %v13162_v39  ;;  %v11332_v39 = vld [vmem:[#allocation7 + $0x70] sm:$0xff]  }
 0x2bc   :  { %10148 = vmatpush3.bf16.msra.mxu1 %v11329_v36 }
 0x2bd   :  { %10149 = vmatprep.subr.bf16.mxu1 %v11330_v37 }
 0x2be   :  { %1900 = vmatpush1.bf16.msra.mxu0 %v13165_v40 }
 0x2bf   :  { %1901 = vmatprep.subr.bf16.mxu0 %v13168_v41 }
 0x2c0   :  { %10150 = vmatpush3.bf16.msra.mxu1 %v11330_v37 }
 0x2c1   :  { %1094 = vmatmul.mubr.bf16.gmra.mrb[8].mxu0 %v13126_v16  ;;  %10151 = vmatprep.subr.bf16.mxu1 %v11331_v38 }
 0x2c2   :  { %1103 = vmatprep.mubr.bf16.mxu0 %v15403_v32  ;;  %1902 = vmatpush1.bf16.msra.mxu0 %v13171_v42  ;;  %v11333_v42 = vld [vmem:[#allocation7 + $0x78] sm:$0xff]  }
 0x2c3   :  { %1903 = vmatprep.subr.bf16.mxu0 %v13174_v43 }
 0x2c4   :  { %10152 = vmatpush3.bf16.msra.mxu1 %v11331_v38 }
 0x2c5   :  { %10153 = vmatprep.subr.bf16.mxu1 %v11332_v39 }
 0x2c6   :  { %1904 = vmatpush1.bf16.msra.mxu0 %v13177_v44 }
 0x2c7   :  { %1905 = vmatprep.subr.bf16.mxu0 %v13180_v45 }
 0x2c8   :  { %10154 = vmatpush3.bf16.msra.mxu1 %v11332_v39 }
 0x2c9   :  { %1104 = vmatmul.mubr.bf16.gmra.mrb[12].mxu0 %v13130_v21  ;;  %10155 = vmatprep.subr.bf16.mxu1 %v11333_v42 }
 0x2ca   :  { %1113 = vmatprep.mubr.bf16.mxu0 %v15403_v32  ;;  %1906 = vmatpush1.bf16.msra.mxu0 %v13183_v46 }
 0x2cb   :  { %1907 = vmatprep.subr.bf16.mxu0 %v13187_v26 }
 0x2cc   :  { %10156 = vmatpush3.bf16.msra.mxu1 %v11333_v42 }
 0x2ce   :  { %1908 = vmatpush1.bf16.msra.mxu0 %v13189_v29 }
 0x2cf   :  { %2103 = vmatprep.subr.bf16.mxu0 %v13194_v47 }
 0x2d1   :  { %1114 = vmatmul.mubr.bf16.gmra.mrb[16].mxu0 %v13132_v22 }
 0x2d2   :  { %1123 = vmatprep.mubr.bf16.mxu0 %v15403_v32 }
 0x2d9   :  { %1124 = vmatmul.mubr.bf16.gmra.mrb[20].mxu0 %v13136_v27 }
 0x2da   :  { %1133 = vmatprep.mubr.bf16.mxu0 %v15403_v32 }
 0x2e1   :  { %1134 = vmatmul.mubr.bf16.gmra.mrb[24].mxu0 %v13138_v28 }
 0x2e2   :  { %1143 = vmatprep.mubr.bf16.mxu0 %v15403_v32 }
 0x2e9   :  { %1144 = vmatmul.mubr.bf16.gmra.mrb[28].mxu0 %v13142_v31 }
 0x2ea   :  { %1925 = vmatprep.mubr.bf16.mxu0 %v15403_v32 }
 0x345   :  { %v13246_v40 = vpop.f32.mrb[32].mxu1 }
 0x346   :  { %v13248_v41 = vpop.f32.mrb[33].mxu1 }
 0x347   :  { %v13250_v43 = vpop.f32.mrb[34].mxu1 }
 0x348   :  { %v13252_v44 = vpop.f32.mrb[35].mxu1 }
 0x34d   :  { %v13254_v45 = vpop.f32.mrb[36].mxu1 }
 0x34e   :  { %v13256_v46 = vpop.f32.mrb[37].mxu1 }
 0x34f   :  { %v13258_v26 = vpop.f32.mrb[38].mxu1 }
 0x350   :  { %v13260_v29 = vpop.f32.mrb[39].mxu1 }
 0x355   :  { %v13262_v47 = vpop.f32.mrb[40].mxu1 }
 0x356   :  { %v13264_v57 = vpop.f32.mrb[41].mxu1 }
 0x357   :  { %v13266_v58 = vpop.f32.mrb[42].mxu1 }
 0x358   :  { %v13268_v59 = vpop.f32.mrb[43].mxu1 }
 0x35d   :  { %v13270_v60 = vpop.f32.mrb[44].mxu1 }
 0x35e   :  { %v13272_v61 = vpop.f32.mrb[45].mxu1 }
 0x35f   :  { %v13274_v62 = vpop.f32.mrb[46].mxu1 }
 0x360   :  { %v13276_v63 = vpop.f32.mrb[47].mxu1 }
 0x366   :  { %v13278_v0 = vpop.f32.mrb[48].mxu1 }
 0x367   :  { %v13280_v1 = vpop.f32.mrb[49].mxu1 }
 0x368   :  { %v13282_v2 = vpop.f32.mrb[50].mxu1 }
 0x369   :  { %v13284_v3 = vpop.f32.mrb[51].mxu1 }
 0x36e   :  { %v13286_v4 = vpop.f32.mrb[52].mxu1 }
 0x36f   :  { %v13288_v5 = vpop.f32.mrb[53].mxu1 }
 0x370   :  { %v13290_v7 = vpop.f32.mrb[54].mxu1 }
 0x371   :  { %v13292_v8 = vpop.f32.mrb[55].mxu1 }
 0x376   :  { %v13294_v9 = vpop.f32.mrb[56].mxu1 }
 0x377   :  { %v13296_v11 = vpop.f32.mrb[57].mxu1 }
 0x378   :  { %v13298_v12 = vpop.f32.mrb[58].mxu1 }
 0x379   :  { %v13300_v13 = vpop.f32.mrb[59].mxu1 }
 0x37e   :  { %v13306_v19 = vpop.f32.mrb[60].mxu1 }
 0x37f   :  { %v13308_v20 = vpop.f32.mrb[61].mxu1 }
 0x380   :  { %v13315_v24 = vpop.f32.mrb[62].mxu1 }
 0x381   :  { %v13321_v30 = vpop.f32.mrb[63].mxu1 }
 0x384   :  { %v1075_v49 = vpop.f32.mrb[0].mxu0 }
 0x385   :  { %v10781_v50 = vadd.f32 %v1075_v49, %v13319_v25  ;;  %v1077_v51 = vpop.f32.mrb[1].mxu0 }
 0x386   :  { %v10782_v52 = vadd.f32 %v1077_v51, %v13325_v48  ;;  %v1079_v53 = vpop.f32.mrb[2].mxu0 }
 0x387   :  { %v9186_v54 = vmul.f32 -1.442695, %v10781_v50  ;;  %v10783_v55 = vadd.f32 %v1079_v53, %v13319_v25  ;;  %v1081_v56 = vpop.f32.mrb[3].mxu0 }
 0x388   :  { %v9202_v33 = vmul.f32 -1.442695, %v10782_v52  ;;  %v10784_v34 = vadd.f32 %v1081_v56, %v13325_v48 }
 0x389   :  { %11654 = vpow2.f32 %v9186_v54  ;;  %v9187_v35 = vmul.f32 -1.442695, %v10783_v55 }
 0x38a   :  { %11656 = vpow2.f32 %v9202_v33  ;;  %v9203_v36 = vmul.f32 -1.442695, %v10784_v34 }
 0x38b   :  { %11658 = vpow2.f32 %v9187_v35 }
 0x38c   :  { %v1085_v37 = vpop.f32.mrb[4].mxu0  ;;  %11660 = vpow2.f32 %v9203_v36 }
 0x38d   :  { %v10785_v38 = vadd.f32 %v1085_v37, %v13319_v25  ;;  %v1087_v39 = vpop.f32.mrb[5].mxu0 }
 0x38e   :  { %v10786_v42 = vadd.f32 %v1087_v39, %v13325_v48  ;;  %v1089_v10 = vpop.f32.mrb[6].mxu0 }
 0x38f   :  { %v9188_v49 = vmul.f32 -1.442695, %v10785_v38  ;;  %v10787_v50 = vadd.f32 %v1089_v10, %v13319_v25  ;;  %v1091_v51 = vpop.f32.mrb[7].mxu0 }
 0x390   :  { %v9204_v52 = vmul.f32 -1.442695, %v10786_v42  ;;  %v10788_v53 = vadd.f32 %v1091_v51, %v13325_v48 }
 0x391   :  { %11662 = vpow2.f32 %v9188_v49  ;;  %v9189_v54 = vmul.f32 -1.442695, %v10787_v50 }
 0x392   :  { %11664 = vpow2.f32 %v9204_v52  ;;  %v9205_v55 = vmul.f32 -1.442695, %v10788_v53 }
 0x393   :  { %v11655_v56 = vpop.eup %11654  ;;  %11666 = vpow2.f32 %v9189_v54  ;;  %v13338_v54 = vsub.s32 2, %v529_v14 }
 0x394   :  { %v11657_v33 = vpop.eup %11656  ;;  %v1315_v34 = vadd.f32 1.0, %v11655_v56  ;;  %v1095_v35 = vpop.f32.mrb[8].mxu0  ;;  %11668 = vpow2.f32 %v9205_v55 }
 0x395   :  { %v11659_v36 = vpop.eup %11658  ;;  %v1427_v37 = vadd.f32 1.0, %v11657_v33  ;;  %v10789_v38 = vadd.f32 %v1095_v35, %v13319_v25  ;;  %v1097_v39 = vpop.f32.mrb[9].mxu0  ;;  %15460 = vst [vmem:[#allocation22_spill] sm:$0xff] %v13338_v54  ;;  %v13348_v14 = vrot.slane %v13313_v23, %v13338_v54 }
 0x396   :  { %11670 = vrcp.f32 %v1315_v34  ;;  %v1316_v10 = vadd.f32 1.0, %v11659_v36  ;;  %v10790_v42 = vadd.f32 %v1097_v39, %v13325_v48  ;;  %v1099_v51 = vpop.f32.mrb[10].mxu0  ;;  %v11661_v53 = vpop.eup %11660  ;;  %v13344_v34 = vld [vmem:[%s15398_s6] ss:$0 sm:$0xff] }
 0x397   :  { %v9190_v49 = vmul.f32 -1.442695, %v10789_v38  ;;  %v10791_v50 = vadd.f32 %v1099_v51, %v13319_v25  ;;  %v1101_v52 = vpop.f32.mrb[11].mxu0  ;;  %v1428_v38 = vadd.f32 1.0, %v11661_v53 }
 0x398   :  { %11672 = vrcp.f32 %v1316_v10  ;;  %v9206_v56 = vmul.f32 -1.442695, %v10790_v42  ;;  %v10792_v33 = vadd.f32 %v1101_v52, %v13325_v48  ;;  %v1482_v52 = vadd.f32 %v13344_v34, %v13280_v1 }
 0x399   :  { %11674 = vrcp.f32 %v1427_v37  ;;  %v9191_v55 = vmul.f32 -1.442695, %v10791_v50  ;;  %v819_v1 = vadd.f32 %v13248_v41, %v13348_v14 }
 0x39a   :  { %11676 = vpow2.f32 %v9190_v49  ;;  %v9207_v35 = vmul.f32 -1.442695, %v10792_v33 }
 0x39b   :  { %v11663_v36 = vpop.eup %11662  ;;  %11678 = vpow2.f32 %v9206_v56 }
 0x39c   :  { %v11665_v39 = vpop.eup %11664  ;;  %v1317_v10 = vadd.f32 1.0, %v11663_v36  ;;  %11680 = vpow2.f32 %v9191_v55  ;;  %v1105_v42 = vpop.f32.mrb[12].mxu0 }
 0x39d   :  { %v11667_v37 = vpop.eup %11666  ;;  %v1429_v51 = vadd.f32 1.0, %v11665_v39  ;;  %11682 = vpow2.f32 %v9207_v35  ;;  %v10793_v49 = vadd.f32 %v1105_v42, %v13319_v25  ;;  %v1107_v50 = vpop.f32.mrb[13].mxu0  ;;  %v1483_v35 = vadd.f32 %v13344_v34, %v13284_v3 }
 0x39e   :  { %11684 = vrcp.f32 %v1317_v10  ;;  %v1318_v53 = vadd.f32 1.0, %v11667_v37  ;;  %v10794_v56 = vadd.f32 %v1107_v50, %v13325_v48  ;;  %v1109_v33 = vpop.f32.mrb[14].mxu0  ;;  %v11669_v32 = vpop.eup %11668 }
 0x39f   :  { %11686 = vrcp.f32 %v1428_v38  ;;  %v9192_v23 = vmul.f32 -1.442695, %v10793_v49  ;;  %v10795_v55 = vadd.f32 %v1109_v33, %v13319_v25  ;;  %v1111_v36 = vpop.f32.mrb[15].mxu0  ;;  %v1430_v38 = vadd.f32 1.0, %v11669_v32 }
 0x3a0   :  { %v11671_v39 = vpop.eup %11670  ;;  %11688 = vrcp.f32 %v1318_v53  ;;  %v9208_v42 = vmul.f32 -1.442695, %v10794_v56  ;;  %v10796_v54 = vadd.f32 %v1111_v36, %v13325_v48  ;;  %v822_v33 = vadd.f32 %v13252_v44, %v13348_v14 }
 0x3a1   :  { %11690 = vrcp.f32 %v1429_v51  ;;  %v9193_v10 = vmul.f32 -1.442695, %v10795_v55  ;;  %v1498_v37 = vmul.f32 %v11671_v39, %v1482_v52  ;;  %v1484_v36 = vadd.f32 %v13278_v0, %v13344_v34 }
 0x3a2   :  { %v11673_v50 = vpop.eup %11672  ;;  %11692 = vpow2.f32 %v9192_v23  ;;  %v9209_v41 = vmul.f32 -1.442695, %v10796_v54  ;;  %v1485_v0 = vadd.f32 %v13282_v2, %v13344_v34 }
 0x3a3   :  { %v13360_v49 = vpop.eup %11674  ;;  %11694 = vpow2.f32 %v9208_v42  ;;  %v1514_v3 = vadd.f32 %v1498_v37, %v819_v1  ;;  %v1499_v53 = vmul.f32 %v11673_v50, %v1483_v35 }
 0x3a4   :  { %v11677_v56 = vpop.eup %11676  ;;  %11696 = vpow2.f32 %v9193_v10  ;;  %v1115_v51 = vpop.f32.mrb[16].mxu0 }
 0x3a5   :  { %v11679_v55 = vpop.eup %11678  ;;  %v1319_v52 = vadd.f32 1.0, %v11677_v56  ;;  %11698 = vtanh.f32 %v1514_v3  ;;  %v1515_v32 = vadd.f32 %v1499_v53, %v822_v33  ;;  %v10797_v23 = vadd.f32 %v1115_v51, %v13319_v25  ;;  %v1117_v39 = vpop.f32.mrb[17].mxu0 }
 0x3a6   :  { %v11681_v17 = vpop.eup %11680  ;;  %11700 = vrcp.f32 %v1430_v38  ;;  %v1431_v44 = vadd.f32 1.0, %v11679_v55  ;;  %v1119_v42 = vpop.f32.mrb[18].mxu0  ;;  %v10798_v50 = vadd.f32 %v1117_v39, %v13325_v48  ;;  %v827_v3 = vadd.f32 %v13246_v40, %v13348_v14 }
 0x3a7   :  { %v11683_v1 = vpop.eup %11682  ;;  %11702 = vrcp.f32 %v1319_v52  ;;  %v1320_v35 = vadd.f32 1.0, %v11681_v17  ;;  %v1121_v10 = vpop.f32.mrb[19].mxu0  ;;  %v9194_v37 = vmul.f32 -1.442695, %v10797_v23  ;;  %v830_v17 = vadd.f32 %v13250_v43, %v13348_v14 }
 0x3a8   :  { %v11685_v54 = vpop.eup %11684  ;;  %11704 = vpow2.f32 %v9209_v41  ;;  %v1432_v56 = vadd.f32 1.0, %v11683_v1  ;;  %v1486_v55 = vadd.f32 %v13344_v34, %v13288_v5  ;;  %v9210_v23 = vmul.f32 -1.442695, %v10798_v50  ;;  %v12614_v50 = vld [vmem:[#allocation5] sm:$0xff] }
 0x3a9   :  { %v13370_v33 = vpop.eup %11686  ;;  %11706 = vrcp.f32 %v1320_v35  ;;  %v1500_v38 = vmul.f32 %v11685_v54, %v1484_v36  ;;  %v10799_v40 = vadd.f32 %v1119_v42, %v13319_v25  ;;  %v1487_v39 = vadd.f32 %v13344_v34, %v13292_v8 }
 0x3aa   :  { %v11689_v53 = vpop.eup %11688  ;;  %11708 = vrcp.f32 %v1431_v44  ;;  %v10800_v35 = vadd.f32 %v1121_v10, %v13325_v48  ;;  %v1578_v42 = vmul.f32 %v12614_v50, %v13360_v49 }
 0x3ab   :  { %v13376_v2 = vpop.eup %11690  ;;  %v1516_v51 = vadd.f32 %v1500_v38, %v827_v3  ;;  %v1501_v41 = vmul.f32 %v11689_v53, %v1485_v0  ;;  %11710 = vtanh.f32 %v1515_v32  ;;  %v9195_v10 = vmul.f32 -1.442695, %v10799_v40 }
 0x3ac   :  { %v11693_v52 = vpop.eup %11692  ;;  %11712 = vpow2.f32 %v9194_v37  ;;  %v1125_v36 = vpop.f32.mrb[20].mxu0  ;;  %v1546_v37 = vsub.f32 1.0, %v13360_v49  ;;  %v838_v49 = vadd.f32 %v13260_v29, %v13348_v14 }
 0x3ad   :  { %v11695_v43 = vpop.eup %11694  ;;  %v1321_v44 = vadd.f32 1.0, %v11693_v52  ;;  %11714 = vtanh.f32 %v1516_v51  ;;  %v1517_v1 = vadd.f32 %v1501_v41, %v830_v17  ;;  %v1127_v0 = vpop.f32.mrb[21].mxu0  ;;  %v10801_v5 = vadd.f32 %v1125_v36, %v13319_v25 }
 0x3ae   :  { %v11697_v32 = vpop.eup %11696  ;;  %11716 = vrcp.f32 %v1432_v56  ;;  %v1129_v54 = vpop.f32.mrb[22].mxu0  ;;  %v1433_v8 = vadd.f32 1.0, %v11695_v43  ;;  %v10802_v53 = vadd.f32 %v1127_v0, %v13325_v48  ;;  %v835_v36 = vadd.f32 %v13256_v46, %v13348_v14 }
 0x3af   :  { %v11699_v3 = vpop.eup %11698  ;;  %11718 = vrcp.f32 %v1321_v44  ;;  %v1322_v38 = vadd.f32 1.0, %v11697_v32  ;;  %v1131_v17 = vpop.f32.mrb[23].mxu0  ;;  %v10803_v56 = vadd.f32 %v1129_v54, %v13319_v25  ;;  %v9211_v43 = vmul.f32 -1.442695, %v10800_v35 }
 0x3b0   :  { %v13388_v51 = vpop.eup %11700  ;;  %11720 = vpow2.f32 %v9210_v23  ;;  %v1562_v41 = vmul.f32 %v11699_v3, %v1546_v37  ;;  %v9196_v0 = vmul.f32 -1.442695, %v10801_v5  ;;  %v9212_v40 = vmul.f32 -1.442695, %v10802_v53  ;;  %v12615_v5 = vld [vmem:[#allocation5 + $0x8] sm:$0xff] }
 0x3b1   :  { %v11703_v52 = vpop.eup %11702  ;;  %11722 = vrcp.f32 %v1322_v38  ;;  %v10804_v54 = vadd.f32 %v1131_v17, %v13325_v48  ;;  %v1547_v37 = vsub.f32 1.0, %v13370_v33  ;;  %v9197_v46 = vmul.f32 -1.442695, %v10803_v56 }
 0x3b2   :  { %v11705_v44 = vpop.eup %11704  ;;  %11724 = vtanh.f32 %v1517_v1  ;;  %v1502_v32 = vmul.f32 %v11703_v52, %v1486_v55  ;;  %v13395_v50 = vadd.f32 %v1578_v42, %v1562_v41  ;;  %v1488_v55 = vadd.f32 %v13286_v4, %v13344_v34 }
 0x3b3   :  { %v11707_v23 = vpop.eup %11706  ;;  %11726 = vrcp.f32 %v1433_v8  ;;  %v1579_v42 = vmul.f32 %v12615_v5, %v13370_v33  ;;  %v1434_v52 = vadd.f32 1.0, %v11705_v44  ;;  %v9213_v4 = vmul.f32 -1.442695, %v10804_v54 }
 0x3b4   :  { %v13399_v3 = vpop.eup %11708  ;;  %11728 = vpow2.f32 %v9195_v10  ;;  %v1518_v29 = vadd.f32 %v1502_v32, %v835_v36  ;;  %v1503_v38 = vmul.f32 %v11707_v23, %v1487_v39  ;;  %v1135_v35 = vpop.f32.mrb[24].mxu0  ;;  %v1548_v10 = vsub.f32 1.0, %v13376_v2  ;;  %v12616_v23 = vld [vmem:[#allocation5 + $0x10] sm:$0xff] }
 0x3b5   :  { %v11711_v18 = vpop.eup %11710  ;;  %11730 = vpow2.f32 %v9211_v43  ;;  %v1137_v1 = vpop.f32.mrb[25].mxu0  ;;  %v10805_v36 = vadd.f32 %v1135_v35, %v13319_v25  ;;  %v1489_v33 = vadd.f32 %v13290_v7, %v13344_v34 }
 0x3b6   :  { %v11713_v8 = vpop.eup %11712  ;;  %11732 = vpow2.f32 %v9196_v0  ;;  %v1519_v53 = vadd.f32 %v1503_v38, %v838_v49  ;;  %v1139_v17 = vpop.f32.mrb[26].mxu0  ;;  %v1563_v41 = vmul.f32 %v11711_v18, %v1547_v37  ;;  %v843_v18 = vadd.f32 %v13254_v45, %v13348_v14 }
 0x3b7   :  { %v11715_v56 = vpop.eup %11714  ;;  %v1323_v39 = vadd.f32 1.0, %v11713_v8  ;;  %11734 = vpow2.f32 %v9212_v40  ;;  %v1141_v43 = vpop.f32.mrb[27].mxu0  ;;  %v1580_v40 = vmul.f32 %v12616_v23, %v13376_v2  ;;  %v846_v38 = vadd.f32 %v13258_v26, %v13348_v14 }
 0x3b8   :  { %v13406_v32 = vpop.eup %11716  ;;  %11736 = vpow2.f32 %v9197_v46  ;;  %v13410_v0 = vadd.f32 %v1579_v42, %v1563_v41  ;;  %v1564_v44 = vmul.f32 %v11715_v56, %v1548_v10  ;;  %v9198_v35 = vmul.f32 -1.442695, %v10805_v36 }
 0x3b9   :  { %v11719_v49 = vpop.eup %11718  ;;  %11738 = vrcp.f32 %v1323_v39  ;;  %v1549_v45 = vsub.f32 1.0, %v13388_v51  ;;  %v851_v2 = vadd.f32 %v13264_v57, %v13348_v14  ;;  %v13431_v41 = vadd.f32 %v13268_v59, %v13348_v14 }
 0x3ba   :  { %v11721_v37 = vpop.eup %11720  ;;  %v1504_v46 = vmul.f32 %v11719_v49, %v1488_v55  ;;  %11740 = vtanh.f32 %v1518_v29  ;;  %v13419_v7 = vpack.c.bf16 %v13410_v0, %v13395_v50  ;;  %v13422_v5 = vadd.f32 %v1580_v40, %v1564_v44  ;;  %v12617_v44 = vld [vmem:[#allocation5 + $0x18] sm:$0xff] }
 0x3bb   :  { %v11723_v54 = vpop.eup %11722  ;;  %11742 = vrcp.f32 %v1434_v52  ;;  %v13435_v56 = vadd.f32 %v13294_v9, %v13344_v34  ;;  %v10806_v36 = vadd.f32 %v1137_v1, %v13325_v48  ;;  %v10807_v59 = vadd.f32 %v1139_v17, %v13319_v25 }
 0x3bc   :  { %v11725_v42 = vpop.eup %11724  ;;  %v1520_v8 = vadd.f32 %v1504_v46, %v843_v18  ;;  %11744 = vpow2.f32 %v9213_v4  ;;  %v1505_v26 = vmul.f32 %v11723_v54, %v1489_v33  ;;  %10157 = vmatprep.mubr.bf16.mxu1 %v13419_v7  ;;  %v1145_v29 = vpop.f32.mrb[28].mxu0  ;;  %v1490_v33 = vadd.f32 %v13344_v34, %v13296_v11 }
 0x3bd   :  { %v13427_v55 = vpop.eup %11726  ;;  %11746 = vtanh.f32 %v1519_v53  ;;  %v1147_v10 = vpop.f32.mrb[29].mxu0  ;;  %v1565_v52 = vmul.f32 %v11725_v42, %v1549_v45  ;;  %v1581_v9 = vmul.f32 %v12617_v44, %v13388_v51  ;;  %v1435_v40 = vadd.f32 1.0, %v11721_v37  ;;  %v12619_v44 = vld [vmem:[#allocation5 + $0x28] sm:$0xff] }
 0x3be   :  { %v11729_v57 = vpop.eup %11728  ;;  %11748 = vtanh.f32 %v1520_v8  ;;  %v1521_v39 = vadd.f32 %v1505_v26, %v846_v38  ;;  %v1149_v4 = vpop.f32.mrb[30].mxu0  ;;  %v13444_v38 = vadd.f32 %v13344_v34, %v13300_v13  ;;  %v1550_v1 = vsub.f32 1.0, %v13399_v3 }
 0x3bf   :  { %v11731_v49 = vpop.eup %11730  ;;  %v1324_v18 = vadd.f32 1.0, %v11729_v57  ;;  %11750 = vpow2.f32 %v9198_v35  ;;  %v1151_v53 = vpop.f32.mrb[31].mxu0  ;;  %v13447_v54 = vadd.f32 %v1581_v9, %v1565_v52  ;;  %v12618_v35 = vld [vmem:[#allocation5 + $0x20] sm:$0xff]  ;;  %v9214_v42 = vmul.f32 -1.442695, %v10806_v36 }
 0x3c0   :  { %v11733_v23 = vpop.eup %11732  ;;  %11752 = vtanh.f32 %v1521_v39  ;;  %v1582_v17 = vmul.f32 %v12618_v35, %v13399_v3  ;;  %v10808_v51 = vadd.f32 %v1141_v43, %v13325_v48  ;;  %v10809_v37 = vadd.f32 %v1145_v29, %v13319_v25 }
 0x3c1   :  { %v11735_v46 = vpop.eup %11734  ;;  %11754 = vrcp.f32 %v1324_v18  ;;  %v1325_v11 = vadd.f32 1.0, %v11733_v23  ;;  %15461 = vst [vmem:[#allocation23_spill] sm:$0xff] %v13447_v54  ;;  %v1551_v8 = vsub.f32 1.0, %v13406_v32  ;;  %v9199_v57 = vmul.f32 -1.442695, %v10807_v59 }
 0x3c2   :  { %v11737_v45 = vpop.eup %11736  ;;  %v13455_v39 = vpack.c.bf16 %v13447_v54, %v13422_v5  ;;  %v1436_v18 = vadd.f32 1.0, %v11731_v49  ;;  %v1583_v36 = vmul.f32 %v12619_v44, %v13406_v32  ;;  %v1437_v9 = vadd.f32 1.0, %v11735_v46  ;;  %v12620_v32 = vld [vmem:[#allocation5 + $0x30] sm:$0xff] }
 0x3c3   :  { %v11739_v13 = vpop.eup %11738  ;;  %11756 = vrcp.f32 %v1325_v11  ;;  %v1326_v26 = vadd.f32 1.0, %v11737_v45  ;;  %v10811_v29 = vadd.f32 %v1149_v4, %v13319_v25  ;;  %v9215_v11 = vmul.f32 -1.442695, %v10808_v51 }
 0x3c4   :  { %v11741_v52 = vpop.eup %11740  ;;  %11758 = vrcp.f32 %v1435_v40  ;;  %v1506_v3 = vmul.f32 %v11739_v13, %v1490_v33  ;;  %10158 = vmatmul.mubr.bf16.vlgmr.msra.gmra.mrb[64].mxu1 %v13455_v39  ;;  %v9200_v35 = vmul.f32 -1.442695, %v10809_v37  ;;  %v1552_v33 = vsub.f32 1.0, %v13427_v55 }
 0x3c5   :  { %v11743_v43 = vpop.eup %11742  ;;  %11760 = vrcp.f32 %v1326_v26  ;;  %v1566_v23 = vmul.f32 %v11741_v52, %v1550_v1  ;;  %v1584_v40 = vmul.f32 %v12620_v32, %v13427_v55  ;;  %v10810_v4 = vadd.f32 %v1147_v10, %v13325_v48  ;;  %v12621_v52 = vld [vmem:[#allocation5 + $0x38] sm:$0xff] }
 0x3c6   :  { %v11745_v59 = vpop.eup %11744  ;;  %11762 = vpow2.f32 %v9214_v42  ;;  %v1522_v45 = vadd.f32 %v1506_v3, %v851_v2  ;;  %v1553_v1 = vsub.f32 1.0, %v11743_v43  ;;  %v9201_v42 = vmul.f32 -1.442695, %v10811_v29 }
 0x3c7   :  { %v11747_v54 = vpop.eup %11746  ;;  %11764 = vpow2.f32 %v9199_v57  ;;  %v13460_v49 = vadd.f32 %v1582_v17, %v1566_v23  ;;  %v10812_v2 = vadd.f32 %v1151_v53, %v13325_v48  ;;  %v1585_v3 = vmul.f32 %v12621_v52, %v11743_v43 }
 0x3c8   :  { %v11749_v46 = vpop.eup %11748  ;;  %11766 = vrcp.f32 %v1436_v18  ;;  %v1567_v13 = vmul.f32 %v11747_v54, %v1551_v8  ;;  %v1438_v44 = vadd.f32 1.0, %v11745_v59  ;;  %v1493_v54 = vadd.f32 %v13298_v12, %v13344_v34 }
 0x3c9   :  { %v11751_v26 = vpop.eup %11750  ;;  %11768 = vrcp.f32 %v1437_v9  ;;  %v1568_v51 = vmul.f32 %v11749_v46, %v1552_v33  ;;  %v9216_v9 = vmul.f32 -1.442695, %v10810_v4  ;;  %v859_v23 = vadd.f32 %v13262_v47, %v13348_v14 }
 0x3ca   :  { %v11753_v37 = vpop.eup %11752  ;;  %v1327_v17 = vadd.f32 1.0, %v11751_v26  ;;  %11770 = vpow2.f32 %v9200_v35  ;;  %v13466_v57 = vadd.f32 %v1583_v36, %v1567_v13  ;;  %v862_v32 = vadd.f32 %v13266_v58, %v13348_v14 }
 0x3cb   :  { %v11755_v55 = vpop.eup %11754  ;;  %11772 = vpow2.f32 %v9215_v11  ;;  %v1569_v18 = vmul.f32 %v11753_v37, %v1553_v1  ;;  %v13468_v10 = vadd.f32 %v1584_v40, %v1568_v51  ;;  %v9217_v11 = vmul.f32 -1.442695, %v10812_v2 }
 0x3cc   :  { %11774 = vrcp.f32 %v1327_v17  ;;  %v1507_v53 = vmul.f32 %v11755_v55, %v13444_v38  ;;  %v13475_v8 = vpack.c.bf16 %v13466_v57, %v13460_v49  ;;  %v1494_v1 = vadd.f32 %v13344_v34, %v13308_v20 }
 0x3cd   :  { %v11757_v36 = vpop.eup %11756  ;;  %11776 = vpow2.f32 %v9201_v42  ;;  %v13477_v43 = vadd.f32 %v1585_v3, %v1569_v18  ;;  %v867_v37 = vadd.f32 %v13272_v61, %v13348_v14 }
 0x3ce   :  { %v11759_v29 = vpop.eup %11758  ;;  %v1508_v59 = vmul.f32 %v11757_v36, %v13435_v56  ;;  %11778 = vtanh.f32 %v1522_v45  ;;  %v1523_v12 = vadd.f32 %v1507_v53, %v13431_v41  ;;  %10161 = vmatprep.mubr.bf16.mxu1 %v13475_v8  ;;  %v12622_v53 = vld [vmem:[#allocation5 + $0x40] sm:$0xff] }
 0x3cf   :  { %v11761_v38 = vpop.eup %11760  ;;  %11780 = vrcp.f32 %v1438_v44  ;;  %v13486_v35 = vpack.c.bf16 %v13477_v43, %v13468_v10  ;;  %v1554_v52 = vsub.f32 1.0, %v11759_v29  ;;  %v1586_v36 = vmul.f32 %v12622_v53, %v11759_v29  ;;  %v12624_v29 = vld [vmem:[#allocation5 + $0x50] sm:$0xff] }
 0x3d0   :  { %v11763_v33 = vpop.eup %11762  ;;  %v1524_v40 = vadd.f32 %v1508_v59, %v859_v23  ;;  %v1509_v47 = vmul.f32 %v11761_v38, %v1493_v54  ;;  %11782 = vtanh.f32 %v1523_v12  ;;  %v1495_v23 = vadd.f32 %v13344_v34, %v13321_v30  ;;  %v12623_v59 = vld [vmem:[#allocation5 + $0x48] sm:$0xff] }
 0x3d1   :  { %v11765_v56 = vpop.eup %11764  ;;  %v1439_v45 = vadd.f32 1.0, %v11763_v33  ;;  %11784 = vpow2.f32 %v9216_v9  ;;  %10162 = vmatmul.mubr.bf16.gmra.mrb[68].mxu1 %v13486_v35  ;;  %v870_v30 = vadd.f32 %v13276_v63, %v13348_v14 }
 0x3d2   :  { %v11767_v41 = vpop.eup %11766  ;;  %v1328_v46 = vadd.f32 1.0, %v11765_v56  ;;  %11786 = vtanh.f32 %v1524_v40  ;;  %v1525_v4 = vadd.f32 %v1509_v47, %v862_v32 }
 0x3d3   :  { %v11769_v13 = vpop.eup %11768  ;;  %11788 = vpow2.f32 %v9217_v11  ;;  %v1555_v54 = vsub.f32 1.0, %v11767_v41  ;;  %v1587_v12 = vmul.f32 %v12623_v59, %v11767_v41  ;;  %v878_v59 = vadd.f32 %v13274_v62, %v13348_v14 }
 0x3d4   :  { %v11771_v26 = vpop.eup %11770  ;;  %11790 = vrcp.f32 %v1328_v46  ;;  %v1556_v38 = vsub.f32 1.0, %v11769_v13  ;;  %v1588_v46 = vmul.f32 %v12624_v29, %v11769_v13 }
 0x3d5   :  { %v11773_v58 = vpop.eup %11772  ;;  %11792 = vrcp.f32 %v1439_v45  ;;  %v1329_v42 = vadd.f32 1.0, %v11771_v26 }
 0x3d6   :  { %v11775_v2 = vpop.eup %11774  ;;  %11794 = vtanh.f32 %v1525_v4  ;;  %v1440_v11 = vadd.f32 1.0, %v11773_v58 }
 0x3d7   :  { %v11777_v51 = vpop.eup %11776  ;;  %11796 = vrcp.f32 %v1329_v42  ;;  %v1510_v17 = vmul.f32 %v11775_v2, %v1494_v1 }
 0x3d8   :  { %v11779_v3 = vpop.eup %11778  ;;  %v1330_v55 = vadd.f32 1.0, %v11777_v51 }
 0x3d9   :  { %v11781_v44 = vpop.eup %11780  ;;  %v1526_v18 = vadd.f32 %v1510_v17, %v867_v37  ;;  %v1570_v20 = vmul.f32 %v11779_v3, %v1554_v52  ;;  %v1496_v37 = vadd.f32 %v13306_v19, %v13344_v34  ;;  %v12625_v3 = vld [vmem:[#allocation5 + $0x58] sm:$0xff] }
 0x3da   :  { %v11783_v9 = vpop.eup %11782  ;;  %11798 = vrcp.f32 %v1330_v55  ;;  %v1557_v41 = vsub.f32 1.0, %v11781_v44  ;;  %v1589_v55 = vmul.f32 %v12625_v3, %v11781_v44 }
 0x3db   :  { %v11785_v61 = vpop.eup %11784  ;;  %11800 = vtanh.f32 %v1526_v18  ;;  %v1571_v33 = vmul.f32 %v11783_v9, %v1555_v54  ;;  %v13497_v32 = vadd.f32 %v1586_v36, %v1570_v20  ;;  %v875_v18 = vadd.f32 %v13270_v60, %v13348_v14 }
 0x3dc   :  { %v11787_v40 = vpop.eup %11786  ;;  %v1441_v1 = vadd.f32 1.0, %v11785_v61  ;;  %11802 = vrcp.f32 %v1440_v11  ;;  %v1497_v20 = vadd.f32 %v13315_v24, %v13344_v34 }
 0x3dd   :  { %v11789_v47 = vpop.eup %11788  ;;  %v13499_v56 = vadd.f32 %v1587_v12, %v1571_v33  ;;  %v1572_v45 = vmul.f32 %v11787_v40, %v1556_v38  ;;  %v12626_v38 = vld [vmem:[#allocation5 + $0x60] sm:$0xff] }
 0x3de   :  { %v11791_v4 = vpop.eup %11790  ;;  %v1442_v17 = vadd.f32 1.0, %v11789_v47  ;;  %11804 = vrcp.f32 %v1441_v1 }
 0x3df   :  { %v11793_v26 = vpop.eup %11792  ;;  %v1511_v58 = vmul.f32 %v11791_v4, %v1495_v23  ;;  %v13505_v42 = vpack.c.bf16 %v13499_v56, %v13497_v32  ;;  %v13507_v2 = vadd.f32 %v1588_v46, %v1572_v45  ;;  %v12627_v45 = vld [vmem:[#allocation5 + $0x68] sm:$0xff] }
 0x3e0   :  { %v11795_v51 = vpop.eup %11794  ;;  %v1558_v9 = vsub.f32 1.0, %v11793_v26  ;;  %v1590_v24 = vmul.f32 %v12626_v38, %v11793_v26  ;;  %v12628_v26 = vld [vmem:[#allocation5 + $0x70] sm:$0xff] }
 0x3e1   :  { %v11797_v13 = vpop.eup %11796  ;;  %v1527_v52 = vadd.f32 %v1511_v58, %v870_v30  ;;  %10165 = vmatprep.mubr.bf16.mxu1 %v13505_v42  ;;  %v1573_v63 = vmul.f32 %v11795_v51, %v1557_v41 }
 0x3e2   :  { %v1512_v54 = vmul.f32 %v11797_v13, %v1496_v37 }
 0x3e3   :  { %11806 = vtanh.f32 %v1527_v52  ;;  %v13516_v53 = vadd.f32 %v1589_v55, %v1573_v63  ;;  %v12629_v63 = vld [vmem:[#allocation5 + $0x78] sm:$0xff] }
 0x3e4   :  { %v11799_v19 = vpop.eup %11798  ;;  %v1528_v36 = vadd.f32 %v1512_v54, %v875_v18  ;;  %11808 = vrcp.f32 %v1442_v17  ;;  %v12630_v54 = vld [vmem:[#allocation2] sm:$0xff]  }
 0x3e5   :  { %15462 = vst [vmem:[#allocation24_spill] sm:$0xff] %v13516_v53  ;;  %v11801_v23 = vpop.eup %11800  ;;  %v1513_v44 = vmul.f32 %v11799_v19, %v1497_v20  ;;  %v13522_v60 = vpack.c.bf16 %v13516_v53, %v13507_v2 }
 0x3e6   :  { %11810 = vtanh.f32 %v1528_v36  ;;  %v1574_v12 = vmul.f32 %v11801_v23, %v1558_v9  ;;  %v11803_v11 = vpop.eup %11802 }
 0x3e7   :  { %v1529_v34 = vadd.f32 %v1513_v44, %v878_v59  ;;  %10166 = vmatmul.mubr.bf16.gmra.mrb[72].mxu1 %v13522_v60  ;;  %v1559_v40 = vsub.f32 1.0, %v11803_v11  ;;  %v1591_v29 = vmul.f32 %v12627_v45, %v11803_v11 }
 0x3e8   :  { %v13525_v61 = vadd.f32 %v1590_v24, %v1574_v12  ;;  %v11805_v33 = vpop.eup %11804 }
 0x3e9   :  { %11812 = vtanh.f32 %v1529_v34  ;;  %v1560_v4 = vsub.f32 1.0, %v11805_v33  ;;  %v1592_v58 = vmul.f32 %v12628_v26, %v11805_v33 }
 0x3ea   :  { %15463 = vst [vmem:[#allocation25_spill] sm:$0xff] %v13525_v61 }
 0x3ed   :  { %v11807_v62 = vpop.eup %11806 }
 0x3ee   :  { %v1575_v47 = vmul.f32 %v11807_v62, %v1559_v40  ;;  %v11809_v46 = vpop.eup %11808 }
 0x3ef   :  { %v1561_v37 = vsub.f32 1.0, %v11809_v46  ;;  %v1593_v3 = vmul.f32 %v12629_v63, %v11809_v46  ;;  %v12634_v63 = vld [vmem:[#allocation8 + $0x20] ss:$12 sps:$4 sm:$0xff]  }
 0x3f0   :  { %v11811_v30 = vpop.eup %11810  ;;  %v13527_v1 = vadd.f32 %v1591_v29, %v1575_v47 }
 0x3f1   :  { %v1576_v41 = vmul.f32 %v11811_v30, %v1560_v4 }
 0x3f2   :  { %15464 = vst [vmem:[#allocation26_spill] sm:$0xff] %v13527_v1  ;;  %v13531_v51 = vpack.c.bf16 %v13527_v1, %v13525_v61 }
 0x3f3   :  { %v11813_v13 = vpop.eup %11812  ;;  %v13533_v17 = vadd.f32 %v1592_v58, %v1576_v41 }
 0x3f4   :  { %10169 = vmatprep.mubr.bf16.mxu1 %v13531_v51  ;;  %v1577_v52 = vmul.f32 %v11813_v13, %v1561_v37  ;;  %v12631_v37 = vld [vmem:[#allocation8 + $0x8] ss:$12 sps:$4 sm:$0xff]  }
 0x3f5   :  { %15465 = vst [vmem:[#allocation27_spill] sm:$0xff] %v13533_v17  ;;  %v12632_v13 = vld [vmem:[#allocation2 + $0x8] sm:$0xff]  }
 0x3f6   :  { %v13536_v55 = vadd.f32 %v1593_v3, %v1577_v52  ;;  %v12633_v52 = vld [vmem:[#allocation2 + $0x10] sm:$0xff]   ;;  %v12635_v3 = vld [vmem:[#allocation8 + $0x38] ss:$12 sps:$4 sm:$0xff]  }
 0x3f8   :  { %15466 = vst [vmem:[#allocation28_spill] sm:$0xff] %v13536_v55  ;;  %v13540_v18 = vpack.c.bf16 %v13536_v55, %v13533_v17 }
 0x3fa   :  { %10170 = vmatmul.mubr.bf16.gmra.mrb[76].mxu1 %v13540_v18 }
 0x3fb   :  { %10189 = vmatprep.mubr.bf16.mxu1 %v12630_v54  ;;  %v12636_v54 = vld [vmem:[#allocation2 + $0x18] sm:$0xff]  }
 0x497   :  { %v10159_v20 = vpop.f32.mrb[64].mxu1 }
 0x498   :  { %v1717_v19 = vpop.f32.mrb[65].mxu1 }
 0x499   :  { %v10160_v36 = vpop.f32.mrb[66].mxu1 }
 0x49a   :  { %v1781_v9 = vpack.c.bf16 %v10160_v36, %v10159_v20  ;;  %v1720_v23 = vpop.f32.mrb[67].mxu1  ;;  %v12637_v20 = vld [vmem:[#allocation2 + $0x20] sm:$0xff]   ;;  %v12639_v36 = vld [vmem:[#allocation8 + $0x68] ss:$12 sps:$4 sm:$0xff]  }
 0x49b   :  { %v1780_v59 = vpack.c.bf16 %v1720_v23, %v1717_v19  ;;  %v12638_v19 = vld [vmem:[#allocation8 + $0x50] ss:$12 sps:$4 sm:$0xff]  }
 0x49c   :  { %v12641_v23 = vld [vmem:[#allocation2 + $0x30] sm:$0xff]  }
 0x49d   :  { %10173 = vmatprep.subr.bf16.mxu1 %v1780_v59 }
 0x49e   :  { %10174 = vmatpush3.bf16.msra.mxu1 %v1780_v59  ;;  %v12642_v59 = vld [vmem:[#allocation8 + $0x80] ss:$12 sps:$4 sm:$0xff]  }
 0x49f   :  { %10175 = vmatprep.subr.bf16.mxu1 %v1781_v9 }
 0x4a2   :  { %10176 = vmatpush3.bf16.msra.mxu1 %v1781_v9  ;;  %v12640_v9 = vld [vmem:[#allocation2 + $0x28] sm:$0xff]  }
 0x4a4   :  { %v10163_v44 = vpop.f32.mrb[68].mxu1 }
 0x4a5   :  { %v1733_v12 = vpop.f32.mrb[69].mxu1 }
 0x4a6   :  { %v10164_v38 = vpop.f32.mrb[70].mxu1 }
 0x4a7   :  { %v1783_v24 = vpack.c.bf16 %v10164_v38, %v10163_v44  ;;  %v1736_v34 = vpop.f32.mrb[71].mxu1  ;;  %v12643_v44 = vld [vmem:[#allocation8 + $0x98] ss:$12 sps:$4 sm:$0xff]   ;;  %v12645_v38 = vld [vmem:[#allocation8 + $0xb0] ss:$12 sps:$4 sm:$0xff]  }
 0x4a8   :  { %v1782_v11 = vpack.c.bf16 %v1736_v34, %v1733_v12  ;;  %v12644_v12 = vld [vmem:[#allocation2 + $0x38] sm:$0xff]  }
 0x4aa   :  { %10177 = vmatprep.subr.bf16.mxu1 %v1782_v11 }
 0x4ab   :  { %10178 = vmatpush3.bf16.msra.mxu1 %v1782_v11 }
 0x4ac   :  { %10179 = vmatprep.subr.bf16.mxu1 %v1783_v24 }
 0x4af   :  { %10180 = vmatpush3.bf16.msra.mxu1 %v1783_v24  ;;  %v12646_v24 = vld [vmem:[#allocation10 + $0x8] ss:$12 sps:$4 sm:$0xff]  }
 0x4ba   :  { %v10167_v33 = vpop.f32.mrb[72].mxu1 }
 0x4bb   :  { %v1749_v40 = vpop.f32.mrb[73].mxu1 }
 0x4bc   :  { %v10168_v62 = vpop.f32.mrb[74].mxu1 }
 0x4bd   :  { %v1785_v47 = vpack.c.bf16 %v10168_v62, %v10167_v33  ;;  %v1752_v45 = vpop.f32.mrb[75].mxu1 }
 0x4be   :  { %v1784_v29 = vpack.c.bf16 %v1752_v45, %v1749_v40  ;;  %v12647_v45 = vld [vmem:[#allocation10] ss:$12 sps:$4 sm:$0xff]  }
 0x4c0   :  { %10181 = vmatprep.subr.bf16.mxu1 %v1784_v29 }
 0x4c1   :  { %10182 = vmatpush3.bf16.msra.mxu1 %v1784_v29 }
 0x4c2   :  { %10183 = vmatprep.subr.bf16.mxu1 %v1785_v47 }
 0x4c5   :  { %10184 = vmatpush3.bf16.msra.mxu1 %v1785_v47 }
 0x4cd   :  { %v10171_v46 = vpop.f32.mrb[76].mxu1 }
 0x4ce   :  { %v1765_v4 = vpop.f32.mrb[77].mxu1 }
 0x4cf   :  { %v10172_v30 = vpop.f32.mrb[78].mxu1 }
 0x4d0   :  { %v1787_v41 = vpack.c.bf16 %v10172_v30, %v10171_v46  ;;  %v1768_v26 = vpop.f32.mrb[79].mxu1  ;;  %v15467_v46 = vmov 0   ;;  %v12648_v30 = vld [vmem:[#allocation10 + $0x20] ss:$12 sps:$4 sm:$0xff]  }
 0x4d1   :  { %v1786_v58 = vpack.c.bf16 %v1768_v26, %v1765_v4 }
 0x4d3   :  { %10185 = vmatprep.subr.bf16.mxu1 %v1786_v58 }
 0x4d4   :  { %10186 = vmatpush3.bf16.msra.mxu1 %v1786_v58 }
 0x4d5   :  { %10187 = vmatprep.subr.bf16.mxu1 %v1787_v41 }
 0x4d8   :  { %10188 = vmatpush3.bf16.msra.mxu1 %v1787_v41  ;;  %v12649_v41 = vld [vmem:[#allocation10 + $0x1c] ss:$12 sps:$4 sm:$0xff]  }
 0x4d9   :  { %10205 = vmatprep.subr.bf16.mxu1 %v12631_v37 }
 0x4db   :  { %10190 = vmatmul.mubr.bf16.vlgmr.msra.gmra.mrb[80].mxu1 %v12632_v13  ;;  %v12650_v13 = vld [vmem:[#allocation10 + $0x18] ss:$12 sps:$4 sm:$0xff]  }
 0x4dc   :  { %10193 = vmatprep.mubr.bf16.mxu1 %v12633_v52  ;;  %10206 = vmatpush3.bf16.msra.mxu1 %v12631_v37 }
 0x4dd   :  { %10207 = vmatprep.subr.bf16.mxu1 %v12634_v63 }
 0x4e0   :  { %10208 = vmatpush3.bf16.msra.mxu1 %v12634_v63  ;;  %v12651_v63 = vld [vmem:[#allocation10 + $0x34] ss:$12 sps:$4 sm:$0xff]  }
 0x4e1   :  { %10209 = vmatprep.subr.bf16.mxu1 %v12635_v3 }
 0x4e3   :  { %10194 = vmatmul.mubr.bf16.gmra.mrb[84].mxu1 %v12636_v54 }
 0x4e4   :  { %10197 = vmatprep.mubr.bf16.mxu1 %v12637_v20  ;;  %10210 = vmatpush3.bf16.msra.mxu1 %v12635_v3  ;;  %v12652_v3 = vld [vmem:[#allocation10 + $0x38] ss:$12 sps:$4 sm:$0xff]   ;;  %v12653_v20 = vld [vmem:[#allocation10 + $0x30] ss:$12 sps:$4 sm:$0xff]  }
 0x4e5   :  { %10211 = vmatprep.subr.bf16.mxu1 %v12638_v19 }
 0x4e8   :  { %10212 = vmatpush3.bf16.msra.mxu1 %v12638_v19 }
 0x4e9   :  { %10213 = vmatprep.subr.bf16.mxu1 %v12639_v36 }
 0x4eb   :  { %10198 = vmatmul.mubr.bf16.gmra.mrb[88].mxu1 %v12640_v9  ;;  %v12655_v9 = vld [vmem:[#allocation10 + $0x4c] ss:$12 sps:$4 sm:$0xff]  }
 0x4ec   :  { %10201 = vmatprep.mubr.bf16.mxu1 %v12641_v23  ;;  %10214 = vmatpush3.bf16.msra.mxu1 %v12639_v36  ;;  %v12654_v36 = vld [vmem:[#allocation10 + $0x50] ss:$12 sps:$4 sm:$0xff]  }
 0x4ed   :  { %10215 = vmatprep.subr.bf16.mxu1 %v12642_v59 }
 0x4f0   :  { %10216 = vmatpush3.bf16.msra.mxu1 %v12642_v59 }
 0x4f1   :  { %10217 = vmatprep.subr.bf16.mxu1 %v12643_v44 }
 0x4f3   :  { %10202 = vmatmul.mubr.bf16.gmra.mrb[92].mxu1 %v12644_v12 }
 0x4f4   :  { %10218 = vmatpush3.bf16.msra.mxu1 %v12643_v44 }
 0x4f5   :  { %10219 = vmatprep.subr.bf16.mxu1 %v12645_v38 }
 0x4f8   :  { %10220 = vmatpush3.bf16.msra.mxu1 %v12645_v38  ;;  %v12656_v38 = vld [vmem:[#allocation10 + $0x48] ss:$12 sps:$4 sm:$0xff]  }
 0x4f9   :  { %10237 = vmatprep.subr.bf16.mxu1 %v12646_v24 }
 0x5ae   :  { %v10191_v34 = vpop.f32.mrb[80].mxu1 }
 0x5af   :  { %v1822_v11 = vpop.f32.mrb[81].mxu1 }
 0x5b0   :  { %v10192_v33 = vpop.f32.mrb[82].mxu1 }
 0x5b1   :  { %v1886_v40 = vpack.c.bf16 %v10192_v33, %v10191_v34  ;;  %v1825_v62 = vpop.f32.mrb[83].mxu1  ;;  %v12658_v34 = vld [vmem:[#allocation10 + $0x64] ss:$12 sps:$4 sm:$0xff]   ;;  %v12659_v33 = vld [vmem:[#allocation10 + $0x60] ss:$12 sps:$4 sm:$0xff]  }
 0x5b2   :  { %v1885_v47 = vpack.c.bf16 %v1825_v62, %v1822_v11  ;;  %v12660_v62 = vld [vmem:[#allocation10 + $0x80] ss:$12 sps:$4 sm:$0xff]  }
 0x5b4   :  { %1926 = vmatmul.mubr.bf16.vlgmr.msra.gmra.mrb[32].mxu0 %v1885_v47  ;;  %10221 = vmatprep.mubr.bf16.mxu1 %v1885_v47  ;;  %v12661_v47 = vld [vmem:[#allocation10 + $0x7c] ss:$12 sps:$4 sm:$0xff]  }
 0x5b5   :  { %10222 = vmatmul.mubr.bf16.vlgmr.msra.gmra.mrb[96].mxu1 %v1886_v40  ;;  %2104 = vmatpush1.bf16.msra.mxu0 %v12647_v45 }
 0x5b6   :  { %v10195_v29 = vpop.f32.mrb[84].mxu1  ;;  %10238 = vmatpush3.bf16.msra.mxu1 %v12646_v24  ;;  %1935 = vmatprep.mubr.bf16.mxu0 %v15467_v46  ;;  %v12657_v24 = vld [vmem:[#allocation10 + $0x68] ss:$12 sps:$4 sm:$0xff]  }
 0x5b7   :  { %v1838_v4 = vpop.f32.mrb[85].mxu1  ;;  %10239 = vmatprep.subr.bf16.mxu1 %v12648_v30  ;;  %2105 = vmatprep.subr.bf16.mxu0 %v12649_v41  ;;  %v12662_v41 = vld [vmem:[#allocation10 + $0x78] ss:$12 sps:$4 sm:$0xff]  }
 0x5b8   :  { %v10196_v26 = vpop.f32.mrb[86].mxu1 }
 0x5b9   :  { %v1888_v58 = vpack.c.bf16 %v10196_v26, %v10195_v29  ;;  %v1841_v37 = vpop.f32.mrb[87].mxu1  ;;  %2106 = vmatpush1.bf16.msra.mxu0 %v12650_v13  ;;  %v12663_v26 = vld [vmem:[#allocation10 + $0x98] ss:$12 sps:$4 sm:$0xff]   ;;  %v12665_v13 = vld [vmem:[#allocation10 + $0xb0] ss:$12 sps:$4 sm:$0xff]  }
 0x5ba   :  { %v1887_v52 = vpack.c.bf16 %v1841_v37, %v1838_v4  ;;  %10240 = vmatpush3.bf16.msra.mxu1 %v12648_v30  ;;  %2107 = vmatprep.subr.bf16.mxu0 %v12651_v63  ;;  %v12664_v37 = vld [vmem:[#allocation10 + $0x94] ss:$12 sps:$4 sm:$0xff]   ;;  %v12667_v63 = vld [vmem:[#allocation10 + $0xac] ss:$12 sps:$4 sm:$0xff]  }
 0x5bb   :  { %10241 = vmatprep.subr.bf16.mxu1 %v12652_v3 }
 0x5bc   :  { %1936 = vmatmul.mubr.bf16.gmra.mrb[36].mxu0 %v1886_v40  ;;  %10225 = vmatprep.mubr.bf16.mxu1 %v1887_v52 }
 0x5bd   :  { %10226 = vmatmul.mubr.bf16.gmra.mrb[100].mxu1 %v1888_v58  ;;  %1945 = vmatprep.mubr.bf16.mxu0 %v15467_v46 }
 0x5be   :  { %v10199_v54 = vpop.f32.mrb[88].mxu1  ;;  %10242 = vmatpush3.bf16.msra.mxu1 %v12652_v3  ;;  %2108 = vmatpush1.bf16.msra.mxu0 %v12653_v20  ;;  %v12668_v3 = vld [vmem:[#allocation10 + $0xa8] ss:$12 sps:$4 sm:$0xff]   ;;  %v11342_v20 = vld [vmem:[#allocation13 + $0x24] ss:$8 sps:$4 sm:$0xff]  }
 0x5bf   :  { %v1854_v19 = vpop.f32.mrb[89].mxu1  ;;  %10243 = vmatprep.subr.bf16.mxu1 %v12654_v36  ;;  %2109 = vmatprep.subr.bf16.mxu0 %v12655_v9  ;;  %v11351_v9 = vld [vmem:[#allocation13 + $0x54] ss:$8 sps:$4 sm:$0xff]  }
 0x5c0   :  { %v10200_v23 = vpop.f32.mrb[90].mxu1 }
 0x5c1   :  { %v1890_v59 = vpack.c.bf16 %v10200_v23, %v10199_v54  ;;  %v1857_v44 = vpop.f32.mrb[91].mxu1  ;;  %v11336_v54 = vld [vmem:[#allocation13 + $0x4] ss:$8 sps:$4 sm:$0xff]  }
 0x5c2   :  { %v1889_v12 = vpack.c.bf16 %v1857_v44, %v1854_v19  ;;  %10244 = vmatpush3.bf16.msra.mxu1 %v12654_v36  ;;  %2110 = vmatpush1.bf16.msra.mxu0 %v12656_v38  ;;  %v11348_v19 = vld [vmem:[#allocation13 + $0x44] ss:$8 sps:$4 sm:$0xff]   ;;  %v11346_v36 = vld [vmem:[#allocation13 + $0x40] ss:$8 sps:$4 sm:$0xff]   ;;  %v11357_v44 = vld [vmem:[#allocation13 + $0x74] ss:$8 sps:$4 sm:$0xff]  }
 0x5c3   :  { %10245 = vmatprep.subr.bf16.mxu1 %v12657_v24  ;;  %2111 = vmatprep.subr.bf16.mxu0 %v12658_v34  ;;  %v11354_v23 = vld [vmem:[#allocation13 + $0x64] ss:$8 sps:$4 sm:$0xff]   ;;  %v11364_v34 = vld [vmem:[#allocation11 + $0x20] ss:$8 sps:$4 sm:$0xff]  }
 0x5c4   :  { %1946 = vmatmul.mubr.bf16.gmra.mrb[40].mxu0 %v1887_v52  ;;  %10229 = vmatprep.mubr.bf16.mxu1 %v1889_v12  ;;  %v12666_v52 = vld [vmem:[#allocation10 + $0x90] ss:$12 sps:$4 sm:$0xff]   ;;  %v11360_v38 = vld [vmem:[#allocation11 + $0x4] ss:$8 sps:$4 sm:$0xff]  }
 0x5c5   :  { %10230 = vmatmul.mubr.bf16.gmra.mrb[104].mxu1 %v1890_v59  ;;  %1955 = vmatprep.mubr.bf16.mxu0 %v15467_v46 }
 0x5c6   :  { %v10203_v11 = vpop.f32.mrb[92].mxu1  ;;  %10246 = vmatpush3.bf16.msra.mxu1 %v12657_v24  ;;  %2112 = vmatpush1.bf16.msra.mxu0 %v12659_v33  ;;  %v11363_v24 = vld [vmem:[#allocation11 + $0x14] ss:$8 sps:$4 sm:$0xff]   ;;  %v11373_v33 = vld [vmem:[#allocation11 + $0x50] ss:$8 sps:$4 sm:$0xff]  }
 0x5c7   :  { %v1870_v40 = vpop.f32.mrb[93].mxu1  ;;  %10247 = vmatprep.subr.bf16.mxu1 %v12660_v62  ;;  %2113 = vmatprep.subr.bf16.mxu0 %v12661_v47  ;;  %v11379_v47 = vld [vmem:[#allocation11 + $0x70] ss:$8 sps:$4 sm:$0xff]  }
 0x5c8   :  { %v10204_v45 = vpop.f32.mrb[94].mxu1 }
 0x5c9   :  { %v1892_v29 = vpack.c.bf16 %v10204_v45, %v10203_v11  ;;  %v1873_v4 = vpop.f32.mrb[95].mxu1  ;;  %v11372_v11 = vld [vmem:[#allocation11 + $0x44] ss:$8 sps:$4 sm:$0xff]  }
 0x5ca   :  { %v1891_v30 = vpack.c.bf16 %v1873_v4, %v1870_v40  ;;  %10248 = vmatpush3.bf16.msra.mxu1 %v12660_v62  ;;  %2114 = vmatpush1.bf16.msra.mxu0 %v12662_v41  ;;  %v11376_v40 = vld [vmem:[#allocation11 + $0x60] ss:$8 sps:$4 sm:$0xff]   ;;  %v11381_v62 = vld [vmem:[#allocation11 + $0x74] ss:$8 sps:$4 sm:$0xff]  }
 0x5cb   :  { %10249 = vmatprep.subr.bf16.mxu1 %v12663_v26  ;;  %2115 = vmatprep.subr.bf16.mxu0 %v12664_v37 }
 0x5cc   :  { %1956 = vmatmul.mubr.bf16.gmra.mrb[44].mxu0 %v1888_v58  ;;  %10233 = vmatprep.mubr.bf16.mxu1 %v1891_v30  ;;  %v11334_v58 = vld [vmem:[#allocation13] ss:$8 sps:$4 sm:$0xff]  }
 0x5cd   :  { %10234 = vmatmul.mubr.bf16.gmra.mrb[108].mxu1 %v1892_v29  ;;  %1965 = vmatprep.mubr.bf16.mxu0 %v15467_v46 }
 0x5ce   :  { %10250 = vmatpush3.bf16.msra.mxu1 %v12663_v26  ;;  %10253 = vmatprep.mubr.bf16.mxu1 %v13419_v7 }
 0x5cf   :  { %10251 = vmatprep.subr.bf16.mxu1 %v12665_v13  ;;  %2116 = vmatpush1.bf16.msra.mxu0 %v12666_v52 }
 0x5d0   :  { %2117 = vmatprep.subr.bf16.mxu0 %v12667_v63 }
 0x5d2   :  { %10252 = vmatpush3.bf16.msra.mxu1 %v12665_v13 }
 0x5d3   :  { %2118 = vmatpush1.bf16.msra.mxu0 %v12668_v3  ;;  %2785 = vmatprep.subr.bf16.mxu1 %v11336_v54 }
 0x5d4   :  { %1966 = vmatmul.mubr.bf16.gmra.mrb[48].mxu0 %v1889_v12  ;;  %v11358_v12 = vld [vmem:[#allocation11] ss:$8 sps:$4 sm:$0xff]  }
 0x5d5   :  { %10254 = vmatmul.mubr.bf16.vlgmr.msra.gmra.mrb[112].mxu1 %v13455_v39  ;;  %1975 = vmatprep.mubr.bf16.mxu0 %v15467_v46 }
 0x5d6   :  { %10257 = vmatprep.mubr.bf16.mxu1 %v13475_v8  ;;  %2786 = vmatpush1.bf16.msra.mxu1 %v11334_v58 }
 0x5dc   :  { %1976 = vmatmul.mubr.bf16.gmra.mrb[52].mxu0 %v1890_v59  ;;  %v11352_v59 = vld [vmem:[#allocation13 + $0x60] ss:$8 sps:$4 sm:$0xff]  }
 0x5dd   :  { %10258 = vmatmul.mubr.bf16.gmra.mrb[116].mxu1 %v13486_v35  ;;  %1985 = vmatprep.mubr.bf16.mxu0 %v15467_v46 }
 0x5de   :  { %10261 = vmatprep.mubr.bf16.mxu1 %v13505_v42 }
 0x5e4   :  { %1986 = vmatmul.mubr.bf16.gmra.mrb[56].mxu0 %v1891_v30 }
 0x5e5   :  { %10262 = vmatmul.mubr.bf16.gmra.mrb[120].mxu1 %v13522_v60  ;;  %1995 = vmatprep.mubr.bf16.mxu0 %v15467_v46 }
 0x5e6   :  { %10265 = vmatprep.mubr.bf16.mxu1 %v13531_v51 }
 0x5ec   :  { %1996 = vmatmul.mubr.bf16.gmra.mrb[60].mxu0 %v1892_v29 }
 0x5ed   :  { %10266 = vmatmul.mubr.bf16.gmra.mrb[124].mxu1 %v13540_v18  ;;  %2135 = vmatprep.mubr.bf16.mxu0 %v15467_v46 }
 0x5ee   :  { %2817 = vmatprep.mubr.bf16.mxu1 %v15467_v46 }
 0x5f4   :  { %2136 = vmatmul.mubr.bf16.vlgmr.msra.gmra.mrb[32].mxu0 %v13419_v7  ;;  %v11339_v7 = vld [vmem:[#allocation13 + $0x14] ss:$8 sps:$4 sm:$0xff]  }
 0x5f5   :  { %2145 = vmatprep.mubr.bf16.mxu0 %v15467_v46  ;;  %2787 = vmatprep.subr.bf16.mxu1 %v11339_v7 }
 0x5fc   :  { %2146 = vmatmul.mubr.bf16.gmra.mrb[36].mxu0 %v13455_v39  ;;  %v11337_v39 = vld [vmem:[#allocation13 + $0x10] ss:$8 sps:$4 sm:$0xff]  }
 0x5fd   :  { %2155 = vmatprep.mubr.bf16.mxu0 %v15467_v46  ;;  %2788 = vmatpush1.bf16.msra.mxu1 %v11337_v39 }
 0x5fe   :  { %2789 = vmatprep.subr.bf16.mxu1 %v11342_v20 }
 0x604   :  { %2156 = vmatmul.mubr.bf16.gmra.mrb[40].mxu0 %v13475_v8  ;;  %v11340_v8 = vld [vmem:[#allocation13 + $0x20] ss:$8 sps:$4 sm:$0xff]  }
 0x605   :  { %2165 = vmatprep.mubr.bf16.mxu0 %v15467_v46  ;;  %2790 = vmatpush1.bf16.msra.mxu1 %v11340_v8 }
 0x60c   :  { %2166 = vmatmul.mubr.bf16.gmra.mrb[44].mxu0 %v13486_v35  ;;  %v11343_v35 = vld [vmem:[#allocation13 + $0x30] ss:$8 sps:$4 sm:$0xff]  }
 0x60d   :  { %2175 = vmatprep.mubr.bf16.mxu0 %v15467_v46 }
 0x614   :  { %2176 = vmatmul.mubr.bf16.gmra.mrb[48].mxu0 %v13505_v42  ;;  %v11345_v42 = vld [vmem:[#allocation13 + $0x34] ss:$8 sps:$4 sm:$0xff]  }
 0x615   :  { %2185 = vmatprep.mubr.bf16.mxu0 %v15467_v46  ;;  %2791 = vmatprep.subr.bf16.mxu1 %v11345_v42 }
 0x616   :  { %2792 = vmatpush1.bf16.msra.mxu1 %v11343_v35 }
 0x617   :  { %2793 = vmatprep.subr.bf16.mxu1 %v11348_v19 }
 0x61a   :  { %2794 = vmatpush1.bf16.msra.mxu1 %v11346_v36 }
 0x61b   :  { %2795 = vmatprep.subr.bf16.mxu1 %v11351_v9 }
 0x61c   :  { %2186 = vmatmul.mubr.bf16.gmra.mrb[52].mxu0 %v13522_v60  ;;  %v11349_v60 = vld [vmem:[#allocation13 + $0x50] ss:$8 sps:$4 sm:$0xff]  }
 0x61d   :  { %2195 = vmatprep.mubr.bf16.mxu0 %v15467_v46 }
 0x61e   :  { %2796 = vmatpush1.bf16.msra.mxu1 %v11349_v60 }
 0x61f   :  { %2797 = vmatprep.subr.bf16.mxu1 %v11354_v23 }
 0x622   :  { %2798 = vmatpush1.bf16.msra.mxu1 %v11352_v59 }
 0x623   :  { %2799 = vmatprep.subr.bf16.mxu1 %v11357_v44 }
 0x624   :  { %2196 = vmatmul.mubr.bf16.gmra.mrb[56].mxu0 %v13531_v51  ;;  %v11355_v51 = vld [vmem:[#allocation13 + $0x70] ss:$8 sps:$4 sm:$0xff]  }
 0x625   :  { %2205 = vmatprep.mubr.bf16.mxu0 %v15467_v46 }
 0x626   :  { %2800 = vmatpush1.bf16.msra.mxu1 %v11355_v51 }
 0x627   :  { %2978 = vmatprep.subr.bf16.mxu1 %v11360_v38  ;;  %v11383_v38 = vld [vmem:[#allocation7 + $0x8] sm:$0xff]  }
 0x629   :  { %2818 = vmatmul.mubr.bf16.vlgmr.msra.gmra.mrb[128].mxu1 %v13121_v6  ;;  %v11366_v6 = vld [vmem:[#allocation11 + $0x24] ss:$8 sps:$4 sm:$0xff]  }
 0x62a   :  { %2827 = vmatprep.mubr.bf16.mxu1 %v15467_v46  ;;  %2979 = vmatpush1.bf16.msra.mxu1 %v11358_v12  ;;  %v11382_v12 = vld [vmem:[#allocation7] sm:$0xff]  }
 0x62b   :  { %2980 = vmatprep.subr.bf16.mxu1 %v11363_v24  ;;  %10269 = vmatprep.subr.bf16.mxu0 %v11382_v12 }
 0x62c   :  { %2206 = vmatmul.mubr.bf16.gmra.mrb[60].mxu0 %v13540_v18  ;;  %v11361_v18 = vld [vmem:[#allocation11 + $0x10] ss:$8 sps:$4 sm:$0xff]  }
 0x62d   :  { %10270 = vmatpush3.bf16.msra.mxu0 %v11382_v12 }
 0x62e   :  { %2981 = vmatpush1.bf16.msra.mxu1 %v11361_v18  ;;  %10271 = vmatprep.subr.bf16.mxu0 %v11383_v38 }
 0x62f   :  { %2982 = vmatprep.subr.bf16.mxu1 %v11366_v6 }
 0x631   :  { %2828 = vmatmul.mubr.bf16.gmra.mrb[132].mxu1 %v13124_v15  ;;  %v11369_v15 = vld [vmem:[#allocation11 + $0x34] ss:$8 sps:$4 sm:$0xff]   ;;  %10272 = vmatpush3.bf16.msra.mxu0 %v11383_v38  ;;  %v11386_v38 = vld [vmem:[#allocation7 + $0x20] sm:$0xff]  }
 0x632   :  { %2837 = vmatprep.mubr.bf16.mxu1 %v15467_v46  ;;  %2983 = vmatpush1.bf16.msra.mxu1 %v11364_v34  ;;  %v11384_v34 = vld [vmem:[#allocation7 + $0x10] sm:$0xff]  }
 0x633   :  { %2984 = vmatprep.subr.bf16.mxu1 %v11369_v15  ;;  %10273 = vmatprep.subr.bf16.mxu0 %v11384_v34 }
 0x635   :  { %10274 = vmatpush3.bf16.msra.mxu0 %v11384_v34 }
 0x639   :  { %2838 = vmatmul.mubr.bf16.gmra.mrb[136].mxu1 %v13126_v16  ;;  %v11367_v16 = vld [vmem:[#allocation11 + $0x30] ss:$8 sps:$4 sm:$0xff]  }
 0x63a   :  { %2847 = vmatprep.mubr.bf16.mxu1 %v15467_v46  ;;  %2985 = vmatpush1.bf16.msra.mxu1 %v11367_v16 }
 0x63b   :  { %2986 = vmatprep.subr.bf16.mxu1 %v11372_v11 }
 0x641   :  { %2848 = vmatmul.mubr.bf16.gmra.mrb[140].mxu1 %v13130_v21  ;;  %v11370_v21 = vld [vmem:[#allocation11 + $0x40] ss:$8 sps:$4 sm:$0xff]  }
 0x642   :  { %2857 = vmatprep.mubr.bf16.mxu1 %v15467_v46  ;;  %2987 = vmatpush1.bf16.msra.mxu1 %v11370_v21  ;;  %v11385_v21 = vld [vmem:[#allocation7 + $0x18] sm:$0xff]  }
 0x643   :  { %10275 = vmatprep.subr.bf16.mxu0 %v11385_v21 }
 0x644   :  { %10276 = vmatpush3.bf16.msra.mxu0 %v11385_v21 }
 0x645   :  { %10277 = vmatprep.subr.bf16.mxu0 %v11386_v38 }
 0x648   :  { %10278 = vmatpush3.bf16.msra.mxu0 %v11386_v38 }
 0x649   :  { %2858 = vmatmul.mubr.bf16.gmra.mrb[144].mxu1 %v13132_v22  ;;  %v11375_v22 = vld [vmem:[#allocation11 + $0x54] ss:$8 sps:$4 sm:$0xff]  }
 0x64a   :  { %2867 = vmatprep.mubr.bf16.mxu1 %v15467_v46  ;;  %2988 = vmatprep.subr.bf16.mxu1 %v11375_v22 }
 0x64b   :  { %2989 = vmatpush1.bf16.msra.mxu1 %v11373_v33 }
 0x651   :  { %2868 = vmatmul.mubr.bf16.gmra.mrb[148].mxu1 %v13136_v27  ;;  %v11378_v27 = vld [vmem:[#allocation11 + $0x64] ss:$8 sps:$4 sm:$0xff]  }
 0x652   :  { %2877 = vmatprep.mubr.bf16.mxu1 %v15467_v46  ;;  %2990 = vmatprep.subr.bf16.mxu1 %v11378_v27 }
 0x653   :  { %2991 = vmatpush1.bf16.msra.mxu1 %v11376_v40 }
 0x654   :  { %2992 = vmatprep.subr.bf16.mxu1 %v11381_v62 }
 0x657   :  { %2993 = vmatpush1.bf16.msra.mxu1 %v11379_v47 }
 0x659   :  { %2878 = vmatmul.mubr.bf16.gmra.mrb[152].mxu1 %v13138_v28 }
 0x65a   :  { %2887 = vmatprep.mubr.bf16.mxu1 %v15467_v46 }
 0x661   :  { %2888 = vmatmul.mubr.bf16.gmra.mrb[156].mxu1 %v13142_v31 }
 0x662   :  { %3010 = vmatprep.mubr.bf16.mxu1 %v15467_v46 }
 0x688   :  { %v13591_v28 = vpop.f32.mrb[96].mxu1 }
 0x689   :  { %v13593_v45 = vpop.f32.mrb[97].mxu1 }
 0x68a   :  { %v13595_v29 = vpop.f32.mrb[98].mxu1 }
 0x68b   :  { %v13597_v4 = vpop.f32.mrb[99].mxu1 }
 0x690   :  { %v13599_v30 = vpop.f32.mrb[100].mxu1 }
 0x691   :  { %v13601_v31 = vpop.f32.mrb[101].mxu1 }
 0x692   :  { %v13603_v41 = vpop.f32.mrb[102].mxu1 }
 0x693   :  { %v13605_v26 = vpop.f32.mrb[103].mxu1 }
 0x698   :  { %v13607_v37 = vpop.f32.mrb[104].mxu1 }
 0x699   :  { %v13609_v13 = vpop.f32.mrb[105].mxu1 }
 0x69a   :  { %v13611_v52 = vpop.f32.mrb[106].mxu1 }
 0x69b   :  { %v13613_v63 = vpop.f32.mrb[107].mxu1 }
 0x6a0   :  { %v13615_v3 = vpop.f32.mrb[108].mxu1 }
 0x6a1   :  { %15468 = vst [vmem:[#allocation29_spill] sm:$0xff] %v13615_v3  ;;  %v13617_v58 = vpop.f32.mrb[109].mxu1 }
 0x6a2   :  { %v13619_v54 = vpop.f32.mrb[110].mxu1 }
 0x6a3   :  { %15469 = vst [vmem:[#allocation30_spill] sm:$0xff] %v13619_v54  ;;  %v13621_v7 = vpop.f32.mrb[111].mxu1 }
 0x6a8   :  { %v13623_v39 = vpop.f32.mrb[112].mxu1 }
 0x6a9   :  { %v13625_v8 = vpop.f32.mrb[113].mxu1 }
 0x6aa   :  { %v13627_v20 = vpop.f32.mrb[114].mxu1 }
 0x6ab   :  { %v13629_v35 = vpop.f32.mrb[115].mxu1 }
 0x6b0   :  { %v13631_v42 = vpop.f32.mrb[116].mxu1 }
 0x6b1   :  { %v13633_v19 = vpop.f32.mrb[117].mxu1 }
 0x6b2   :  { %v13635_v36 = vpop.f32.mrb[118].mxu1 }
 0x6b3   :  { %v13637_v9 = vpop.f32.mrb[119].mxu1 }
 0x6b8   :  { %v13639_v60 = vpop.f32.mrb[120].mxu1 }
 0x6b9   :  { %v13641_v23 = vpop.f32.mrb[121].mxu1 }
 0x6ba   :  { %v13643_v59 = vpop.f32.mrb[122].mxu1 }
 0x6bb   :  { %v13645_v44 = vpop.f32.mrb[123].mxu1 }
 0x6c0   :  { %v13647_v51 = vpop.f32.mrb[124].mxu1 }
 0x6c1   :  { %15470 = vst [vmem:[#allocation31_spill] sm:$0xff] %v13647_v51  ;;  %v13649_v18 = vpop.f32.mrb[125].mxu1 }
 0x6c2   :  { %v13651_v24 = vpop.f32.mrb[126].mxu1 }
 0x6c3   :  { %15471 = vst [vmem:[#allocation32_spill] sm:$0xff] %v13651_v24  ;;  %v13653_v6 = vpop.f32.mrb[127].mxu1 }
 0x6c7   :  { %v2137_v15 = vpop.f32.mrb[32].mxu0 }
 0x6c8   :  { %v10813_v16 = vadd.f32 %v2137_v15, %v13319_v25  ;;  %v2139_v11 = vpop.f32.mrb[33].mxu0 }
 0x6c9   :  { %v10814_v22 = vadd.f32 %v2139_v11, %v13325_v48  ;;  %v2141_v33 = vpop.f32.mrb[34].mxu0 }
 0x6ca   :  { %v9227_v27 = vmul.f32 -1.442695, %v10813_v16  ;;  %v10815_v40 = vadd.f32 %v2141_v33, %v13319_v25  ;;  %v2143_v62 = vpop.f32.mrb[35].mxu0 }
 0x6cb   :  { %v9243_v47 = vmul.f32 -1.442695, %v10814_v22  ;;  %v10816_v55 = vadd.f32 %v2143_v62, %v13325_v48 }
 0x6cc   :  { %11814 = vpow2.f32 %v9227_v27  ;;  %v9228_v12 = vmul.f32 -1.442695, %v10815_v40 }
 0x6cd   :  { %11816 = vpow2.f32 %v9243_v47  ;;  %v9244_v15 = vmul.f32 -1.442695, %v10816_v55 }
 0x6ce   :  { %11818 = vpow2.f32 %v9228_v12 }
 0x6cf   :  { %v2147_v17 = vpop.f32.mrb[36].mxu0  ;;  %11820 = vpow2.f32 %v9244_v15 }
 0x6d0   :  { %v10817_v11 = vadd.f32 %v2147_v17, %v13319_v25  ;;  %v2149_v1 = vpop.f32.mrb[37].mxu0 }
 0x6d1   :  { %v10818_v16 = vadd.f32 %v2149_v1, %v13325_v48  ;;  %v2151_v33 = vpop.f32.mrb[38].mxu0 }
 0x6d2   :  { %v9229_v22 = vmul.f32 -1.442695, %v10817_v11  ;;  %v10819_v62 = vadd.f32 %v2151_v33, %v13319_v25  ;;  %v2153_v34 = vpop.f32.mrb[39].mxu0 }
 0x6d3   :  { %v10820_v27 = vadd.f32 %v2153_v34, %v13325_v48  ;;  %v9245_v40 = vmul.f32 -1.442695, %v10818_v16 }
 0x6d4   :  { %11822 = vpow2.f32 %v9229_v22  ;;  %v9230_v55 = vmul.f32 -1.442695, %v10819_v62 }
 0x6d5   :  { %v9246_v21 = vmul.f32 -1.442695, %v10820_v27 }
 0x6d6   :  { %v11815_v47 = vpop.eup %11814  ;;  %11824 = vpow2.f32 %v9230_v55 }
 0x6d7   :  { %v11817_v17 = vpop.eup %11816  ;;  %v2377_v12 = vadd.f32 1.0, %v11815_v47  ;;  %v2157_v54 = vpop.f32.mrb[40].mxu0  ;;  %11826 = vpow2.f32 %v9245_v40 }
 0x6d8   :  { %v11819_v61 = vpop.eup %11818  ;;  %v10821_v1 = vadd.f32 %v2157_v54, %v13319_v25  ;;  %v2159_v11 = vpop.f32.mrb[41].mxu0  ;;  %v2489_v38 = vadd.f32 1.0, %v11817_v17 }
 0x6d9   :  { %11828 = vrcp.f32 %v2377_v12  ;;  %v2378_v33 = vadd.f32 1.0, %v11819_v61  ;;  %v10822_v15 = vadd.f32 %v2159_v11, %v13325_v48  ;;  %v2161_v34 = vpop.f32.mrb[42].mxu0  ;;  %v11821_v40 = vpop.eup %11820 }
 0x6da   :  { %11830 = vpow2.f32 %v9246_v21  ;;  %v9231_v16 = vmul.f32 -1.442695, %v10821_v1  ;;  %v10823_v22 = vadd.f32 %v2161_v34, %v13319_v25  ;;  %v2163_v62 = vpop.f32.mrb[43].mxu0  ;;  %v2490_v17 = vadd.f32 1.0, %v11821_v40 }
 0x6db   :  { %11832 = vrcp.f32 %v2378_v33  ;;  %v10824_v27 = vadd.f32 %v2163_v62, %v13325_v48  ;;  %v9247_v55 = vmul.f32 -1.442695, %v10822_v15 }
 0x6dc   :  { %v9232_v47 = vmul.f32 -1.442695, %v10823_v22  ;;  %11834 = vpow2.f32 %v9231_v16 }
 0x6dd   :  { %11836 = vrcp.f32 %v2489_v38  ;;  %v9248_v12 = vmul.f32 -1.442695, %v10824_v27  ;;  %v13672_v38 = vld [vmem:[%s15398_s6] ss:$0 sm:$0xff] }
 0x6de   :  { %v11823_v54 = vpop.eup %11822  ;;  %11838 = vpow2.f32 %v9232_v47  ;;  %v2537_v16 = vadd.f32 %v13672_v38, %v13625_v8  ;;  %v2044_v8 = vadd.f32 %v13597_v4, %v13348_v14 }
 0x6df   :  { %v2379_v61 = vadd.f32 1.0, %v11823_v54  ;;  %v2167_v11 = vpop.f32.mrb[44].mxu0  ;;  %11840 = vpow2.f32 %v9247_v55 }
 0x6e0   :  { %v11825_v24 = vpop.eup %11824  ;;  %v10825_v21 = vadd.f32 %v2167_v11, %v13319_v25  ;;  %v2169_v1 = vpop.f32.mrb[45].mxu0 }
 0x6e1   :  { %11842 = vrcp.f32 %v2379_v61  ;;  %v2380_v33 = vadd.f32 1.0, %v11825_v24  ;;  %v10826_v34 = vadd.f32 %v2169_v1, %v13325_v48  ;;  %v2171_v15 = vpop.f32.mrb[46].mxu0  ;;  %v11827_v22 = vpop.eup %11826  ;;  %v2041_v24 = vadd.f32 %v13593_v45, %v13348_v14 }
 0x6e2   :  { %11844 = vpow2.f32 %v9248_v12  ;;  %v9233_v62 = vmul.f32 -1.442695, %v10825_v21  ;;  %v10827_v27 = vadd.f32 %v2171_v15, %v13319_v25  ;;  %v2173_v55 = vpop.f32.mrb[47].mxu0  ;;  %v2538_v61 = vadd.f32 %v13672_v38, %v13629_v35 }
 0x6e3   :  { %v11829_v47 = vpop.eup %11828  ;;  %11846 = vrcp.f32 %v2380_v33  ;;  %v9249_v40 = vmul.f32 -1.442695, %v10826_v34  ;;  %v2491_v12 = vadd.f32 1.0, %v11827_v22  ;;  %v10828_v45 = vadd.f32 %v2173_v55, %v13325_v48 }
 0x6e4   :  { %v11831_v54 = vpop.eup %11830  ;;  %v2553_v11 = vmul.f32 %v11829_v47, %v2537_v16  ;;  %11848 = vrcp.f32 %v2490_v17  ;;  %v9234_v1 = vmul.f32 -1.442695, %v10827_v27 }
 0x6e5   :  { %v11833_v53 = vpop.eup %11832  ;;  %11850 = vpow2.f32 %v9233_v62  ;;  %v2492_v34 = vadd.f32 1.0, %v11831_v54  ;;  %v9250_v47 = vmul.f32 -1.442695, %v10828_v45  ;;  %v2049_v54 = vadd.f32 %v13591_v28, %v13348_v14 }
 0x6e6   :  { %v2569_v21 = vadd.f32 %v2553_v11, %v2041_v24  ;;  %v2554_v15 = vmul.f32 %v11833_v53, %v2538_v61  ;;  %11852 = vpow2.f32 %v9249_v40  ;;  %v11835_v33 = vpop.eup %11834  ;;  %v2539_v53 = vadd.f32 %v13672_v38, %v13623_v39 }
 0x6e7   :  { %11854 = vpow2.f32 %v9234_v1  ;;  %v2177_v3 = vpop.f32.mrb[48].mxu0  ;;  %v13684_v51 = vpop.eup %11836  ;;  %v2381_v17 = vadd.f32 1.0, %v11835_v33  ;;  %v2540_v1 = vadd.f32 %v13672_v38, %v13627_v20  ;;  %v13704_v20 = vadd.f32 %v13605_v26, %v13348_v14 }
 0x6e8   :  { %11856 = vtanh.f32 %v2569_v21  ;;  %v2570_v35 = vadd.f32 %v2554_v15, %v2044_v8  ;;  %v10829_v16 = vadd.f32 %v2177_v3, %v13319_v25  ;;  %v2179_v27 = vpop.f32.mrb[49].mxu0  ;;  %v11839_v4 = vpop.eup %11838  ;;  %v2052_v3 = vadd.f32 %v13595_v29, %v13348_v14 }
 0x6e9   :  { %11858 = vrcp.f32 %v2491_v12  ;;  %v2181_v22 = vpop.f32.mrb[50].mxu0  ;;  %v11841_v62 = vpop.eup %11840  ;;  %v2382_v55 = vadd.f32 1.0, %v11839_v4  ;;  %v13697_v12 = vadd.f32 %v13599_v30, %v13348_v14  ;;  %v2057_v21 = vadd.f32 %v13601_v31, %v13348_v14 }
 0x6ea   :  { %11860 = vtanh.f32 %v2570_v35  ;;  %v2183_v24 = vpop.f32.mrb[51].mxu0  ;;  %v9235_v61 = vmul.f32 -1.442695, %v10829_v16  ;;  %v2493_v28 = vadd.f32 1.0, %v11841_v62  ;;  %v10830_v29 = vadd.f32 %v2179_v27, %v13325_v48 }
 0x6eb   :  { %v11843_v40 = vpop.eup %11842  ;;  %11862 = vrcp.f32 %v2381_v17  ;;  %v13708_v30 = vadd.f32 %v13672_v38, %v13631_v42  ;;  %v10831_v31 = vadd.f32 %v2181_v22, %v13319_v25  ;;  %v2633_v26 = vmul.f32 %v13684_v51, %v13395_v50 }
 0x6ec   :  { %v11845_v11 = vpop.eup %11844  ;;  %v2555_v8 = vmul.f32 %v11843_v40, %v2539_v53  ;;  %11864 = vrcp.f32 %v2492_v34  ;;  %v2541_v50 = vadd.f32 %v13672_v38, %v13633_v19 }
 0x6ed   :  { %v11847_v39 = vpop.eup %11846  ;;  %11866 = vrcp.f32 %v2382_v55  ;;  %v2494_v4 = vadd.f32 1.0, %v11845_v11  ;;  %v2601_v55 = vsub.f32 1.0, %v13684_v51  ;;  %v9236_v11 = vmul.f32 -1.442695, %v10831_v31 }
 0x6ee   :  { %v11849_v15 = vpop.eup %11848  ;;  %v2571_v45 = vadd.f32 %v2555_v8, %v2049_v54  ;;  %v2556_v33 = vmul.f32 %v11847_v39, %v2540_v1  ;;  %11868 = vpow2.f32 %v9250_v47  ;;  %v10832_v8 = vadd.f32 %v2183_v24, %v13325_v48 }
 0x6ef   :  { %v11851_v35 = vpop.eup %11850  ;;  %11870 = vpow2.f32 %v9235_v61  ;;  %v2187_v34 = vpop.f32.mrb[52].mxu0  ;;  %v2602_v54 = vsub.f32 1.0, %v11849_v15  ;;  %v9251_v61 = vmul.f32 -1.442695, %v10830_v29  ;;  %v2634_v51 = vmul.f32 %v11849_v15, %v13410_v0 }
 0x6f0   :  { %v11853_v17 = vpop.eup %11852  ;;  %11872 = vtanh.f32 %v2571_v45  ;;  %v2572_v16 = vadd.f32 %v2556_v33, %v2052_v3  ;;  %v2383_v62 = vadd.f32 1.0, %v11851_v35  ;;  %v2189_v53 = vpop.f32.mrb[53].mxu0  ;;  %v10833_v42 = vadd.f32 %v2187_v34, %v13319_v25 }
 0x6f1   :  { %v11855_v27 = vpop.eup %11854  ;;  %11874 = vrcp.f32 %v2493_v28  ;;  %v2191_v47 = vpop.f32.mrb[54].mxu0  ;;  %v2495_v28 = vadd.f32 1.0, %v11853_v17  ;;  %v2542_v31 = vadd.f32 %v13672_v38, %v13637_v9  ;;  %v10834_v24 = vadd.f32 %v2189_v53, %v13325_v48 }
 0x6f2   :  { %v11857_v40 = vpop.eup %11856  ;;  %11876 = vtanh.f32 %v2572_v16  ;;  %v2384_v22 = vadd.f32 1.0, %v11855_v27  ;;  %v2193_v1 = vpop.f32.mrb[55].mxu0  ;;  %v9237_v35 = vmul.f32 -1.442695, %v10833_v42  ;;  %v9252_v19 = vmul.f32 -1.442695, %v10832_v8 }
 0x6f3   :  { %v11859_v3 = vpop.eup %11858  ;;  %11878 = vrcp.f32 %v2383_v62  ;;  %v2617_v39 = vmul.f32 %v11857_v40, %v2601_v55  ;;  %v10835_v0 = vadd.f32 %v2191_v47, %v13319_v25  ;;  %v2544_v55 = vadd.f32 %v13672_v38, %v13635_v36 }
 0x6f4   :  { %v11861_v45 = vpop.eup %11860  ;;  %11880 = vrcp.f32 %v2494_v4 }
 0x6f5   :  { %v11863_v33 = vpop.eup %11862  ;;  %11882 = vrcp.f32 %v2384_v22  ;;  %v2618_v34 = vmul.f32 %v11861_v45, %v2602_v54  ;;  %v2649_v29 = vadd.f32 %v2633_v26, %v2617_v39  ;;  %v9253_v39 = vmul.f32 -1.442695, %v10834_v24 }
 0x6f6   :  { %v11865_v16 = vpop.eup %11864  ;;  %v2557_v62 = vmul.f32 %v11863_v33, %v2541_v50  ;;  %11884 = vpow2.f32 %v9251_v61  ;;  %v2603_v61 = vsub.f32 1.0, %v11859_v3  ;;  %v10836_v50 = vadd.f32 %v2193_v1, %v13325_v48 }
 0x6f7   :  { %v11867_v27 = vpop.eup %11866  ;;  %11886 = vpow2.f32 %v9236_v11  ;;  %v2197_v15 = vpop.f32.mrb[56].mxu0  ;;  %v2650_v17 = vadd.f32 %v2634_v51, %v2618_v34  ;;  %v2604_v51 = vsub.f32 1.0, %v11865_v16  ;;  %v2635_v34 = vmul.f32 %v11859_v3, %v13422_v5 }
 0x6f8   :  { %v11869_v4 = vpop.eup %11868  ;;  %v2573_v26 = vadd.f32 %v2557_v62, %v2057_v21  ;;  %v2558_v42 = vmul.f32 %v11867_v27, %v2542_v31  ;;  %11888 = vrcp.f32 %v2495_v28  ;;  %v2199_v40 = vpop.f32.mrb[57].mxu0  ;;  %v10837_v54 = vadd.f32 %v2197_v15, %v13319_v25  ;;  %v15472_v62 = vld [vmem:[#allocation23_spill] sm:$0xff] }
 0x6f9   :  { %v11871_v9 = vpop.eup %11870  ;;  %11890 = vpow2.f32 %v9237_v35  ;;  %v2201_v53 = vpop.f32.mrb[58].mxu0  ;;  %v2681_v22 = vpack.c.bf16 %v2650_v17, %v2649_v29  ;;  %v9238_v21 = vmul.f32 -1.442695, %v10835_v0  ;;  %v2496_v33 = vadd.f32 1.0, %v11869_v4 }
 0x6fa   :  { %v11873_v11 = vpop.eup %11872  ;;  %11892 = vtanh.f32 %v2573_v26  ;;  %v2574_v47 = vadd.f32 %v2558_v42, %v13704_v20  ;;  %v2385_v8 = vadd.f32 1.0, %v11871_v9  ;;  %v13727_v45 = vpop.f32.mrb[59].mxu0  ;;  %v9239_v29 = vmul.f32 -1.442695, %v10837_v54 }
 0x6fb   :  { %v11875_v36 = vpop.eup %11874  ;;  %11894 = vpow2.f32 %v9252_v19  ;;  %3011 = vmatmul.mubr.bf16.vlgmr.msra.gmra.mrb[128].mxu1 %v2681_v22  ;;  %v2619_v35 = vmul.f32 %v11873_v11, %v2603_v61  ;;  %v2636_v24 = vmul.f32 %v11865_v16, %v15472_v62  ;;  %v10838_v1 = vadd.f32 %v2199_v40, %v13325_v48 }
 0x6fc   :  { %v11877_v28 = vpop.eup %11876  ;;  %11896 = vtanh.f32 %v2574_v47  ;;  %3020 = vmatprep.mubr.bf16.mxu1 %v15467_v46  ;;  %v9254_v17 = vmul.f32 -1.442695, %v10836_v50  ;;  %v2068_v5 = vadd.f32 %v13603_v41, %v13348_v14 }
 0x6fd   :  { %v11879_v20 = vpop.eup %11878  ;;  %11898 = vrcp.f32 %v2385_v8  ;;  %v2620_v31 = vmul.f32 %v11877_v28, %v2604_v51  ;;  %v2651_v0 = vadd.f32 %v2635_v34, %v2619_v35  ;;  %v9255_v8 = vmul.f32 -1.442695, %v10838_v1 }
 0x6fe   :  { %v11881_v27 = vpop.eup %11880  ;;  %v2559_v19 = vmul.f32 %v11879_v20, %v13708_v30  ;;  %11900 = vpow2.f32 %v9253_v39  ;;  %v10839_v30 = vadd.f32 %v2201_v53, %v13319_v25  ;;  %v2637_v53 = vmul.f32 %v11875_v36, %v13460_v49 }
 0x6ff   :  { %v11883_v15 = vpop.eup %11882  ;;  %11902 = vpow2.f32 %v9238_v21  ;;  %v2207_v4 = vpop.f32.mrb[60].mxu0  ;;  %v2652_v26 = vadd.f32 %v2636_v24, %v2620_v31  ;;  %v2606_v35 = vsub.f32 1.0, %v11881_v27  ;;  %v2638_v31 = vmul.f32 %v11881_v27, %v13466_v57 }
 0x700   :  { %v11885_v42 = vpop.eup %11884  ;;  %v2575_v3 = vadd.f32 %v2559_v19, %v13697_v12  ;;  %v2560_v9 = vmul.f32 %v11883_v15, %v2544_v55  ;;  %11904 = vrcp.f32 %v2496_v33  ;;  %v2209_v16 = vpop.f32.mrb[61].mxu0  ;;  %v10841_v41 = vadd.f32 %v2207_v4, %v13319_v25 }
 0x701   :  { %v11887_v54 = vpop.eup %11886  ;;  %11906 = vpow2.f32 %v9239_v29  ;;  %v2211_v40 = vpop.f32.mrb[62].mxu0  ;;  %v2682_v22 = vpack.c.bf16 %v2652_v26, %v2651_v0  ;;  %v2605_v12 = vsub.f32 1.0, %v11875_v36  ;;  %v2497_v50 = vadd.f32 1.0, %v11885_v42 }
 0x702   :  { %v11889_v61 = vpop.eup %11888  ;;  %11908 = vtanh.f32 %v2575_v3  ;;  %v2576_v11 = vadd.f32 %v2560_v9, %v2068_v5  ;;  %v2386_v47 = vadd.f32 1.0, %v11887_v54  ;;  %v13739_v39 = vpop.f32.mrb[63].mxu0  ;;  %v9240_v33 = vmul.f32 -1.442695, %v10839_v30 }
 0x703   :  { %v11891_v21 = vpop.eup %11890  ;;  %11910 = vpow2.f32 %v9254_v17  ;;  %3021 = vmatmul.mubr.bf16.gmra.mrb[132].mxu1 %v2682_v22  ;;  %v2545_v29 = vadd.f32 %v13672_v38, %v13641_v23  ;;  %v9241_v24 = vmul.f32 -1.442695, %v10841_v41  ;;  %v2073_v49 = vadd.f32 %v13609_v13, %v13348_v14 }
 0x704   :  { %v11893_v55 = vpop.eup %11892  ;;  %11912 = vtanh.f32 %v2576_v11  ;;  %v2387_v51 = vadd.f32 1.0, %v11891_v21  ;;  %3030 = vmatprep.mubr.bf16.mxu1 %v15467_v46  ;;  %v10840_v15 = vadd.f32 %v13727_v45, %v13325_v48  ;;  %v10842_v23 = vadd.f32 %v2209_v16, %v13325_v48 }
 0x705   :  { %v11895_v28 = vpop.eup %11894  ;;  %11914 = vrcp.f32 %v2386_v47  ;;  %v2621_v34 = vmul.f32 %v11893_v55, %v2605_v12  ;;  %v10843_v5 = vadd.f32 %v2211_v40, %v13319_v25  ;;  %v2607_v13 = vsub.f32 1.0, %v11889_v61 }
 0x706   :  { %v11897_v20 = vpop.eup %11896  ;;  %11916 = vpow2.f32 %v9255_v8  ;;  %v2498_v26 = vadd.f32 1.0, %v11895_v28  ;;  %v9256_v45 = vmul.f32 -1.442695, %v10840_v15  ;;  %v2639_v8 = vmul.f32 %v11889_v61, %v13468_v10 }
 0x707   :  { %v11899_v62 = vpop.eup %11898  ;;  %11918 = vrcp.f32 %v2387_v51  ;;  %v2622_v19 = vmul.f32 %v11897_v20, %v2606_v35  ;;  %v2653_v1 = vadd.f32 %v2637_v53, %v2621_v34  ;;  %v2546_v25 = vadd.f32 %v13672_v38, %v13645_v44 }
 0x708   :  { %v11901_v0 = vpop.eup %11900  ;;  %v2561_v36 = vmul.f32 %v11899_v62, %v2545_v29  ;;  %11920 = vrcp.f32 %v2497_v50  ;;  %v9257_v40 = vmul.f32 -1.442695, %v10842_v23  ;;  %v9242_v41 = vmul.f32 -1.442695, %v10843_v5 }
 0x709   :  { %v11903_v17 = vpop.eup %11902  ;;  %11922 = vpow2.f32 %v9240_v33  ;;  %v2654_v4 = vadd.f32 %v2638_v31, %v2622_v19  ;;  %v2499_v30 = vadd.f32 1.0, %v11901_v0  ;;  %v2076_v28 = vadd.f32 %v13613_v63, %v13348_v14 }
 0x70a   :  { %v11905_v57 = vpop.eup %11904  ;;  %v2577_v27 = vadd.f32 %v2561_v36, %v2073_v49  ;;  %v2388_v42 = vadd.f32 1.0, %v11903_v17  ;;  %11924 = vpow2.f32 %v9241_v24  ;;  %v2547_v10 = vadd.f32 %v13672_v38, %v13639_v60 }
 0x70b   :  { %v11907_v3 = vpop.eup %11906  ;;  %v2683_v9 = vpack.c.bf16 %v2654_v4, %v2653_v1  ;;  %v2608_v16 = vsub.f32 1.0, %v11905_v57  ;;  %v2640_v50 = vmul.f32 %v11905_v57, %v13477_v43  ;;  %v2081_v33 = vadd.f32 %v13607_v37, %v13348_v14 }
 0x70c   :  { %v11909_v54 = vpop.eup %11908  ;;  %11926 = vtanh.f32 %v2577_v27  ;;  %v2389_v22 = vadd.f32 1.0, %v11907_v3  ;;  %v10844_v31 = vadd.f32 %v13739_v39, %v13325_v48  ;;  %v2548_v49 = vadd.f32 %v13672_v38, %v13643_v59 }
 0x70d   :  { %v11911_v11 = vpop.eup %11910  ;;  %11928 = vrcp.f32 %v2388_v42  ;;  %3031 = vmatmul.mubr.bf16.gmra.mrb[136].mxu1 %v2683_v9  ;;  %v2623_v47 = vmul.f32 %v11909_v54, %v2607_v13  ;;  %v2084_v4 = vadd.f32 %v13611_v52, %v13348_v14  ;;  %v2549_v57 = vadd.f32 %v13672_v38, %v13649_v18 }
 0x70e   :  { %v11913_v21 = vpop.eup %11912  ;;  %11930 = vrcp.f32 %v2498_v26  ;;  %3040 = vmatprep.mubr.bf16.mxu1 %v15467_v46  ;;  %v2500_v35 = vadd.f32 1.0, %v11911_v11  ;;  %v9258_v15 = vmul.f32 -1.442695, %v10844_v31  ;;  %v2089_v5 = vadd.f32 %v13617_v58, %v13348_v14 }
 0x70f   :  { %v11915_v12 = vpop.eup %11914  ;;  %11932 = vrcp.f32 %v2389_v22  ;;  %v2624_v55 = vmul.f32 %v11913_v21, %v2608_v16  ;;  %v2655_v51 = vadd.f32 %v2639_v8, %v2623_v47  ;;  %v2550_v58 = vadd.f32 %v13672_v38, %v13653_v6 }
 0x710   :  { %v11917_v53 = vpop.eup %11916  ;;  %v2562_v61 = vmul.f32 %v11915_v12, %v2546_v25  ;;  %11934 = vrcp.f32 %v2499_v30 }
 0x711   :  { %v11919_v44 = vpop.eup %11918  ;;  %11936 = vpow2.f32 %v9256_v45  ;;  %v2656_v34 = vadd.f32 %v2640_v50, %v2624_v55  ;;  %v2501_v24 = vadd.f32 1.0, %v11917_v53  ;;  %v15473_v53 = vld [vmem:[#allocation31_spill] sm:$0xff] }
 0x712   :  { %v11921_v20 = vpop.eup %11920  ;;  %v2578_v29 = vadd.f32 %v2562_v61, %v2076_v28  ;;  %v2563_v43 = vmul.f32 %v11919_v44, %v2547_v10  ;;  %11938 = vpow2.f32 %v9242_v41  ;;  %v2551_v28 = vadd.f32 %v13672_v38, %v15473_v53 }
 0x713   :  { %v11923_v63 = vpop.eup %11922  ;;  %11940 = vpow2.f32 %v9257_v40  ;;  %v2684_v62 = vpack.c.bf16 %v2656_v34, %v2655_v51  ;;  %v2609_v37 = vsub.f32 1.0, %v11921_v20  ;;  %v2641_v17 = vmul.f32 %v11921_v20, %v13497_v32 }
 0x714   :  { %11942 = vtanh.f32 %v2578_v29  ;;  %v2579_v60 = vadd.f32 %v2563_v43, %v2081_v33  ;;  %v2390_v19 = vadd.f32 1.0, %v11923_v63  ;;  %v11925_v1 = vpop.eup %11924  ;;  %v2092_v51 = vadd.f32 %v13621_v7, %v13348_v14  ;;  %v15474_v33 = vld [vmem:[#allocation29_spill] sm:$0xff]  ;;  %v15475_v63 = vld [vmem:[#allocation24_spill] sm:$0xff] }
 0x715   :  { %11944 = vrcp.f32 %v2500_v35  ;;  %3041 = vmatmul.mubr.bf16.gmra.mrb[140].mxu1 %v2684_v62  ;;  %v2391_v36 = vadd.f32 1.0, %v11925_v1  ;;  %v2097_v35 = vadd.f32 %v15474_v33, %v13348_v14 }
 0x716   :  { %v11927_v0 = vpop.eup %11926  ;;  %11946 = vtanh.f32 %v2579_v60  ;;  %3050 = vmatprep.mubr.bf16.mxu1 %v15467_v46 }
 0x717   :  { %v11929_v48 = vpop.eup %11928  ;;  %11948 = vrcp.f32 %v2390_v19  ;;  %v2625_v39 = vmul.f32 %v11927_v0, %v2609_v37  ;;  %v15476_v19 = vld [vmem:[#allocation32_spill] sm:$0xff] }
 0x718   :  { %v11931_v23 = vpop.eup %11930  ;;  %v2564_v27 = vmul.f32 %v11929_v48, %v2548_v49  ;;  %11950 = vrcp.f32 %v2501_v24  ;;  %v2552_v1 = vadd.f32 %v13672_v38, %v15476_v19  ;;  %v15477_v49 = vld [vmem:[#allocation25_spill] sm:$0xff]  ;;  %v15478_v48 = vld [vmem:[#allocation30_spill] sm:$0xff] }
 0x719   :  { %v11933_v59 = vpop.eup %11932  ;;  %11952 = vrcp.f32 %v2391_v36  ;;  %v2657_v26 = vadd.f32 %v2641_v17, %v2625_v39  ;;  %v2610_v22 = vsub.f32 1.0, %v11931_v23  ;;  %v2642_v47 = vmul.f32 %v11931_v23, %v13499_v56 }
 0x71a   :  { %v11935_v42 = vpop.eup %11934  ;;  %v2580_v3 = vadd.f32 %v2564_v27, %v2084_v4  ;;  %v2565_v9 = vmul.f32 %v11933_v59, %v2549_v57  ;;  %11954 = vpow2.f32 %v9258_v15  ;;  %v2100_v39 = vadd.f32 %v15478_v48, %v13348_v14 }
 0x71b   :  { %v11937_v32 = vpop.eup %11936  ;;  %v2611_v8 = vsub.f32 1.0, %v11935_v42  ;;  %v2643_v55 = vmul.f32 %v11935_v42, %v13507_v2 }
 0x71c   :  { %v11939_v13 = vpop.eup %11938  ;;  %11956 = vtanh.f32 %v2580_v3  ;;  %v2581_v54 = vadd.f32 %v2565_v9, %v2089_v5  ;;  %v2502_v45 = vadd.f32 1.0, %v11937_v32  ;;  %v15479_v5 = vld [vmem:[#allocation26_spill] sm:$0xff] }
 0x71d   :  { %v11941_v52 = vpop.eup %11940  ;;  %v2392_v30 = vadd.f32 1.0, %v11939_v13 }
 0x71e   :  { %v11943_v18 = vpop.eup %11942  ;;  %11958 = vtanh.f32 %v2581_v54  ;;  %v2503_v25 = vadd.f32 1.0, %v11941_v52  ;;  %v15480_v54 = vld [vmem:[#allocation27_spill] sm:$0xff] }
 0x71f   :  { %v11945_v11 = vpop.eup %11944  ;;  %v2626_v16 = vmul.f32 %v11943_v18, %v2610_v22  ;;  %11960 = vrcp.f32 %v2392_v30 }
 0x720   :  { %v11947_v21 = vpop.eup %11946  ;;  %11962 = vrcp.f32 %v2502_v45  ;;  %v2612_v2 = vsub.f32 1.0, %v11945_v11  ;;  %v2644_v62 = vmul.f32 %v11945_v11, %v15475_v63 }
 0x721   :  { %v11949_v40 = vpop.eup %11948  ;;  %v2658_v41 = vadd.f32 %v2642_v47, %v2626_v16  ;;  %v2627_v12 = vmul.f32 %v11947_v21, %v2611_v8  ;;  %11964 = vrcp.f32 %v2503_v25  ;;  %v15481_v47 = vld [vmem:[#allocation28_spill] sm:$0xff]  ;;  %v11387_v25 = vld [vmem:[#allocation7 + $0x28] sm:$0xff]  }
 0x722   :  { %v11951_v50 = vpop.eup %11950  ;;  %v2566_v56 = vmul.f32 %v11949_v40, %v2550_v58  ;;  %v11388_v40 = vld [vmem:[#allocation7 + $0x30] sm:$0xff]   ;;  %10279 = vmatprep.subr.bf16.mxu0 %v11387_v25 }
 0x723   :  { %v11953_v10 = vpop.eup %11952  ;;  %v2685_v61 = vpack.c.bf16 %v2658_v41, %v2657_v26  ;;  %v2659_v44 = vadd.f32 %v2643_v55, %v2627_v12  ;;  %v2613_v60 = vsub.f32 1.0, %v11951_v50  ;;  %v2645_v36 = vmul.f32 %v11951_v50, %v15477_v49  ;;  %10280 = vmatpush3.bf16.msra.mxu0 %v11387_v25  ;;  %v11389_v41 = vld [vmem:[#allocation7 + $0x38] sm:$0xff]   ;;  %v3091_v12 = vld [vmem:[%s15401_s9] sm:$0x3]  ;;  %v15482_v55 = vld [vmem:[#allocation21_spill] sm:$0xff] }
 0x724   :  { %v11955_v6 = vpop.eup %11954  ;;  %v2582_v34 = vadd.f32 %v2566_v56, %v2092_v51  ;;  %v2567_v20 = vmul.f32 %v11953_v10, %v2551_v28  ;;  %10281 = vmatprep.subr.bf16.mxu0 %v11388_v40  ;;  %v13802_v50 = vrot.slane %v3091_v12, %v15482_v55  ;;  %v15483_v51 = vld [vmem:[#allocation20_spill] sm:$0xff] }
 0x725   :  { %3051 = vmatmul.mubr.bf16.gmra.mrb[144].mxu1 %v2685_v61  ;;  %v2504_v43 = vadd.f32 1.0, %v11955_v6  ;;  %v13805_v53 = vrot.slane %v3091_v12, %v15483_v51 }
 0x726   :  { %v11957_v29 = vpop.eup %11956  ;;  %11966 = vtanh.f32 %v2582_v34  ;;  %v2583_v7 = vadd.f32 %v2567_v20, %v2097_v35  ;;  %3060 = vmatprep.mubr.bf16.mxu1 %v15467_v46 }
 0x727   :  { %v2628_v31 = vmul.f32 %v11957_v29, %v2612_v2  ;;  %10282 = vmatpush3.bf16.msra.mxu0 %v11388_v40 }
 0x728   :  { %v11959_v24 = vpop.eup %11958  ;;  %11968 = vtanh.f32 %v2583_v7  ;;  %10283 = vmatprep.subr.bf16.mxu0 %v11389_v41 }
 0x729   :  { %v2660_v37 = vadd.f32 %v2644_v62, %v2628_v31  ;;  %v2629_v0 = vmul.f32 %v11959_v24, %v2613_v60  ;;  %v11961_v15 = vpop.eup %11960  ;;  %11970 = vrcp.f32 %v2504_v43 }
 0x72a   :  { %v2568_v17 = vmul.f32 %v11961_v15, %v2552_v1  ;;  %v11963_v57 = vpop.eup %11962 }
 0x72b   :  { %v2686_v23 = vpack.c.bf16 %v2660_v37, %v2659_v44  ;;  %v2661_v4 = vadd.f32 %v2645_v36, %v2629_v0  ;;  %v11965_v59 = vpop.eup %11964  ;;  %v2614_v38 = vsub.f32 1.0, %v11963_v57  ;;  %v2646_v3 = vmul.f32 %v11963_v57, %v15479_v5  ;;  %10284 = vmatpush3.bf16.msra.mxu0 %v11389_v41 }
 0x72c   :  { %v2584_v27 = vadd.f32 %v2568_v17, %v2100_v39  ;;  %v2615_v9 = vsub.f32 1.0, %v11965_v59  ;;  %v2647_v52 = vmul.f32 %v11965_v59, %v15480_v54 }
 0x72d   :  { %3061 = vmatmul.mubr.bf16.gmra.mrb[148].mxu1 %v2686_v23 }
 0x72e   :  { %3070 = vmatprep.mubr.bf16.mxu1 %v15467_v46  ;;  %11972 = vtanh.f32 %v2584_v27 }
 0x730   :  { %v11967_v26 = vpop.eup %11966 }
 0x731   :  { %v2630_v42 = vmul.f32 %v11967_v26, %v2614_v38 }
 0x732   :  { %v11969_v32 = vpop.eup %11968 }
 0x733   :  { %v2662_v13 = vadd.f32 %v2646_v3, %v2630_v42  ;;  %v2631_v14 = vmul.f32 %v11969_v32, %v2615_v9  ;;  %v11971_v30 = vpop.eup %11970 }
 0x734   :  { %v2616_v45 = vsub.f32 1.0, %v11971_v30  ;;  %v2648_v8 = vmul.f32 %v11971_v30, %v15481_v47 }
 0x735   :  { %v2687_v22 = vpack.c.bf16 %v2662_v13, %v2661_v4  ;;  %v2663_v18 = vadd.f32 %v2647_v52, %v2631_v14 }
 0x737   :  { %3071 = vmatmul.mubr.bf16.gmra.mrb[152].mxu1 %v2687_v22 }
 0x738   :  { %3080 = vmatprep.mubr.bf16.mxu1 %v15467_v46  ;;  %v11973_v11 = vpop.eup %11972 }
 0x739   :  { %v2632_v16 = vmul.f32 %v11973_v11, %v2616_v45 }
 0x73b   :  { %v2664_v21 = vadd.f32 %v2648_v8, %v2632_v16 }
 0x73d   :  { %v2688_v58 = vpack.c.bf16 %v2664_v21, %v2663_v18 }
 0x73f   :  { %3081 = vmatmul.mubr.bf16.gmra.mrb[156].mxu1 %v2688_v58 }
 0x7ce   :  { %v3012_v28 = vpop.f32.mrb[128].mxu1 }
 0x7cf   :  { %v3014_v56 = vpop.f32.mrb[129].mxu1  ;;  %v13809_v44 = vadd.f32 %v13805_v53, %v3012_v28 }
 0x7d0   :  { %v3104_v10 = vadd.f32 %v13802_v50, %v3014_v56  ;;  %v3016_v61 = vpop.f32.mrb[130].mxu1 }
 0x7d1   :  { %v13812_v6 = vadd.f32 %v13805_v53, %v3016_v61  ;;  %v3018_v33 = vpop.f32.mrb[131].mxu1 }
 0x7d2   :  { %3135 = vst [vmem:[#allocation14] sm:$0xff] %v3104_v10  ;;  %v3106_v35 = vadd.f32 %v13802_v50, %v3018_v33 }
 0x7d3   :  { %v13817_v34 = vpack.c.bf16 %v13812_v6, %v13809_v44 }
 0x7d4   :  { %3136 = vst [vmem:[#allocation14 + $0x18] sm:$0xff] %v3106_v35 }
 0x7d5   :  { %15484 = vst [vmem:[#allocation23_spill] sm:$0xff] %v13817_v34  ;;  %10285 = vmatprep.mubr.bf16.mxu0 %v13817_v34 }
 0x7d6   :  { %v3022_v20 = vpop.f32.mrb[132].mxu1 }
 0x7d7   :  { %v3024_v2 = vpop.f32.mrb[133].mxu1  ;;  %v13822_v43 = vadd.f32 %v13805_v53, %v3022_v20 }
 0x7d8   :  { %v3108_v29 = vadd.f32 %v13802_v50, %v3024_v2  ;;  %v3026_v7 = vpop.f32.mrb[134].mxu1 }
 0x7d9   :  { %v13825_v31 = vadd.f32 %v13805_v53, %v3026_v7  ;;  %v3028_v63 = vpop.f32.mrb[135].mxu1 }
 0x7da   :  { %3137 = vst [vmem:[#allocation14 + $0x30] sm:$0xff] %v3108_v29  ;;  %v3110_v62 = vadd.f32 %v13802_v50, %v3028_v63 }
 0x7db   :  { %v13830_v60 = vpack.c.bf16 %v13825_v31, %v13822_v43 }
 0x7dc   :  { %3138 = vst [vmem:[#allocation14 + $0x48] sm:$0xff] %v3110_v62 }
 0x7dd   :  { %15485 = vst [vmem:[#allocation31_spill] sm:$0xff] %v13830_v60  ;;  %10286 = vmatmul.mubr.bf16.vlgmr.msra.gmra.mrb[64].mxu0 %v13830_v60 }
 0x7e0   :  { %v3032_v24 = vpop.f32.mrb[136].mxu1 }
 0x7e1   :  { %v3034_v19 = vpop.f32.mrb[137].mxu1  ;;  %v13835_v0 = vadd.f32 %v13805_v53, %v3032_v24 }
 0x7e2   :  { %v3112_v1 = vadd.f32 %v13802_v50, %v3034_v19  ;;  %v3036_v37 = vpop.f32.mrb[138].mxu1  ;;  %v11390_v19 = vld [vmem:[#allocation2] sm:$0xff]  }
 0x7e3   :  { %v13838_v49 = vadd.f32 %v13805_v53, %v3036_v37  ;;  %v3038_v36 = vpop.f32.mrb[139].mxu1  ;;  %v11405_v37 = vld [vmem:[#allocation8 + $0x20] ss:$12 sps:$4 sm:$0xff]  }
 0x7e4   :  { %3139 = vst [vmem:[#allocation14 + $0x60] sm:$0xff] %v3112_v1  ;;  %v3114_v15 = vadd.f32 %v13802_v50, %v3038_v36  ;;  %v11401_v1 = vld [vmem:[#allocation8 + $0x8] ss:$12 sps:$4 sm:$0xff]   ;;  %v11413_v36 = vld [vmem:[#allocation8 + $0x50] ss:$12 sps:$4 sm:$0xff]  }
 0x7e5   :  { %v13843_v48 = vpack.c.bf16 %v13838_v49, %v13835_v0  ;;  %10333 = vmatprep.subr.bf16.mxu1 %v11401_v1 }
 0x7e6   :  { %3140 = vst [vmem:[#allocation14 + $0x78] sm:$0xff] %v3114_v15  ;;  %10334 = vmatpush3.bf16.msra.mxu1 %v11401_v1  ;;  %v11421_v15 = vld [vmem:[#allocation8 + $0x80] ss:$12 sps:$4 sm:$0xff]  }
 0x7e7   :  { %15486 = vst [vmem:[#allocation29_spill] sm:$0xff] %v13843_v48  ;;  %10289 = vmatprep.mubr.bf16.mxu0 %v13843_v48  ;;  %10335 = vmatprep.subr.bf16.mxu1 %v11405_v37  ;;  %v13922_v1 = vld [vmem:[#allocation8 + $0x34] ss:$12 sps:$4 sm:$0xff]  }
 0x7e8   :  { %v3042_v39 = vpop.f32.mrb[140].mxu1 }
 0x7e9   :  { %v3044_v17 = vpop.f32.mrb[141].mxu1  ;;  %v13848_v57 = vadd.f32 %v13805_v53, %v3042_v39  ;;  %v11425_v39 = vld [vmem:[#allocation8 + $0x98] ss:$12 sps:$4 sm:$0xff]  }
 0x7ea   :  { %v3116_v23 = vadd.f32 %v13802_v50, %v3044_v17  ;;  %v3046_v4 = vpop.f32.mrb[142].mxu1  ;;  %10336 = vmatpush3.bf16.msra.mxu1 %v11405_v37  ;;  %v11393_v37 = vld [vmem:[#allocation2 + $0x18] sm:$0xff]  }
 0x7eb   :  { %v13851_v27 = vadd.f32 %v13805_v53, %v3046_v4  ;;  %v3048_v59 = vpop.f32.mrb[143].mxu1 }
 0x7ec   :  { %3141 = vst [vmem:[#allocation14 + $0x90] sm:$0xff] %v3116_v23  ;;  %v3118_v38 = vadd.f32 %v13802_v50, %v3048_v59 }
 0x7ed   :  { %v13856_v26 = vpack.c.bf16 %v13851_v27, %v13848_v57 }
 0x7ee   :  { %3142 = vst [vmem:[#allocation14 + $0xa8] sm:$0xff] %v3118_v38 }
 0x7ef   :  { %15487 = vst [vmem:[#allocation24_spill] sm:$0xff] %v13856_v26  ;;  %10290 = vmatmul.mubr.bf16.gmra.mrb[68].mxu0 %v13856_v26 }
 0x7f8   :  { %v3052_v42 = vpop.f32.mrb[144].mxu1 }
 0x7f9   :  { %v3054_v5 = vpop.f32.mrb[145].mxu1  ;;  %v13861_v32 = vadd.f32 %v13805_v53, %v3052_v42 }
 0x7fa   :  { %v3120_v3 = vadd.f32 %v13802_v50, %v3054_v5  ;;  %v3056_v9 = vpop.f32.mrb[146].mxu1 }
 0x7fb   :  { %v13864_v13 = vadd.f32 %v13805_v53, %v3056_v9  ;;  %v3058_v14 = vpop.f32.mrb[147].mxu1 }
 0x7fc   :  { %3143 = vst [vmem:[#allocation14 + $0xc0] sm:$0xff] %v3120_v3  ;;  %v3122_v54 = vadd.f32 %v13802_v50, %v3058_v14 }
 0x7fd   :  { %v13869_v52 = vpack.c.bf16 %v13864_v13, %v13861_v32 }
 0x7fe   :  { %3144 = vst [vmem:[#allocation14 + $0xd8] sm:$0xff] %v3122_v54 }
 0x7ff   :  { %15488 = vst [vmem:[#allocation32_spill] sm:$0xff] %v13869_v52  ;;  %10293 = vmatprep.mubr.bf16.mxu0 %v13869_v52 }
 0x800   :  { %v3062_v30 = vpop.f32.mrb[148].mxu1 }
 0x801   :  { %v3064_v22 = vpop.f32.mrb[149].mxu1  ;;  %v13874_v11 = vadd.f32 %v13805_v53, %v3062_v30 }
 0x802   :  { %v3124_v18 = vadd.f32 %v13802_v50, %v3064_v22  ;;  %v3066_v45 = vpop.f32.mrb[150].mxu1 }
 0x803   :  { %v13877_v16 = vadd.f32 %v13805_v53, %v3066_v45  ;;  %v3068_v47 = vpop.f32.mrb[151].mxu1 }
 0x804   :  { %3145 = vst [vmem:[#allocation14 + $0xf0] sm:$0xff] %v3124_v18  ;;  %v3126_v8 = vadd.f32 %v13802_v50, %v3068_v47 }
 0x805   :  { %15489 = vst [vmem:[#allocation25_spill] sm:$0xff] %v13877_v16  ;;  %v13882_v21 = vpack.c.bf16 %v13877_v16, %v13874_v11 }
 0x806   :  { %3146 = vst [vmem:[#allocation14 + $0x108] sm:$0xff] %v3126_v8 }
 0x807   :  { %15490 = vst [vmem:[#allocation30_spill] sm:$0xff] %v13882_v21  ;;  %10294 = vmatmul.mubr.bf16.gmra.mrb[72].mxu0 %v13882_v21 }
 0x80a   :  { %v3072_v58 = vpop.f32.mrb[152].mxu1 }
 0x80b   :  { %v3074_v25 = vpop.f32.mrb[153].mxu1  ;;  %v13887_v12 = vadd.f32 %v13805_v53, %v3072_v58 }
 0x80c   :  { %v3128_v40 = vadd.f32 %v13802_v50, %v3074_v25  ;;  %v3076_v41 = vpop.f32.mrb[154].mxu1 }
 0x80d   :  { %15491 = vst [vmem:[#allocation26_spill] sm:$0xff] %v13887_v12  ;;  %v13890_v28 = vadd.f32 %v13805_v53, %v3076_v41  ;;  %v3078_v56 = vpop.f32.mrb[155].mxu1 }
 0x80e   :  { %3147 = vst [vmem:[#allocation14 + $0x120] sm:$0xff] %v3128_v40  ;;  %v3130_v10 = vadd.f32 %v13802_v50, %v3078_v56 }
 0x80f   :  { %15492 = vst [vmem:[#allocation27_spill] sm:$0xff] %v13890_v28  ;;  %v13895_v61 = vpack.c.bf16 %v13890_v28, %v13887_v12 }
 0x810   :  { %3148 = vst [vmem:[#allocation14 + $0x138] sm:$0xff] %v3130_v10 }
 0x811   :  { %15493 = vst [vmem:[#allocation28_spill] sm:$0xff] %v13895_v61  ;;  %10297 = vmatprep.mubr.bf16.mxu0 %v13895_v61 }
 0x812   :  { %v3082_v33 = vpop.f32.mrb[156].mxu1 }
 0x813   :  { %v3084_v35 = vpop.f32.mrb[157].mxu1  ;;  %v13900_v29 = vadd.f32 %v13805_v53, %v3082_v33 }
 0x814   :  { %v3132_v20 = vadd.f32 %v13802_v50, %v3084_v35  ;;  %v3086_v2 = vpop.f32.mrb[158].mxu1  ;;  %v13911_v35 = vld [vmem:[#allocation8 + $0x4] ss:$12 sps:$4 sm:$0xff]  }
 0x815   :  { %15494 = vst [vmem:[#allocation33_spill] sm:$0xff] %v13900_v29  ;;  %v13903_v7 = vadd.f32 %v13805_v53, %v3086_v2  ;;  %v3088_v63 = vpop.f32.mrb[159].mxu1  ;;  %v11409_v53 = vld [vmem:[#allocation8 + $0x38] ss:$12 sps:$4 sm:$0xff]   ;;  %v11392_v2 = vld [vmem:[#allocation2 + $0x10] sm:$0xff]  }
 0x816   :  { %3149 = vst [vmem:[#allocation14 + $0x150] sm:$0xff] %v3132_v20  ;;  %v3134_v62 = vadd.f32 %v13802_v50, %v3088_v63  ;;  %10337 = vmatprep.subr.bf16.mxu1 %v11409_v53  ;;  %v11417_v50 = vld [vmem:[#allocation8 + $0x68] ss:$12 sps:$4 sm:$0xff]   ;;  %v13913_v63 = vld [vmem:[#allocation8] ss:$12 sps:$4 sm:$0xff]  }
 0x817   :  { %15495 = vst [vmem:[#allocation34_spill] sm:$0xff] %v13903_v7  ;;  %v13908_v24 = vpack.c.bf16 %v13903_v7, %v13900_v29  ;;  %10338 = vmatpush3.bf16.msra.mxu1 %v11409_v53  ;;  %v11391_v20 = vld [vmem:[#allocation2 + $0x8] sm:$0xff]   ;;  %v11394_v53 = vld [vmem:[#allocation2 + $0x20] sm:$0xff]  }
 0x818   :  { %3150 = vst [vmem:[#allocation14 + $0x168] sm:$0xff] %v3134_v62  ;;  %10339 = vmatprep.subr.bf16.mxu1 %v11413_v36  ;;  %v13916_v62 = vld [vmem:[#allocation8 + $0x1c] ss:$12 sps:$4 sm:$0xff]  }
 0x819   :  { %15496 = vst [vmem:[#allocation35_spill] sm:$0xff] %v13908_v24  ;;  %10298 = vmatmul.mubr.bf16.gmra.mrb[76].mxu0 %v13908_v24 }
 0x81a   :  { %10317 = vmatprep.mubr.bf16.mxu0 %v11390_v19  ;;  %v13919_v19 = vld [vmem:[#allocation8 + $0x18] ss:$12 sps:$4 sm:$0xff]  }
 0x81b   :  { %10340 = vmatpush3.bf16.msra.mxu1 %v11413_v36  ;;  %v13925_v36 = vld [vmem:[#allocation8 + $0x30] ss:$12 sps:$4 sm:$0xff]  }
 0x81c   :  { %10341 = vmatprep.subr.bf16.mxu1 %v11417_v50 }
 0x81f   :  { %10342 = vmatpush3.bf16.msra.mxu1 %v11417_v50  ;;  %v13928_v50 = vld [vmem:[#allocation8 + $0x4c] ss:$12 sps:$4 sm:$0xff]  }
 0x820   :  { %10343 = vmatprep.subr.bf16.mxu1 %v11421_v15 }
 0x823   :  { %10344 = vmatpush3.bf16.msra.mxu1 %v11421_v15  ;;  %v13931_v15 = vld [vmem:[#allocation8 + $0x48] ss:$12 sps:$4 sm:$0xff]  }
 0x824   :  { %10345 = vmatprep.subr.bf16.mxu1 %v11425_v39 }
 0x827   :  { %10346 = vmatpush3.bf16.msra.mxu1 %v11425_v39  ;;  %v13934_v39 = vld [vmem:[#allocation8 + $0x64] ss:$12 sps:$4 sm:$0xff]  }
 0x8b0   :  { %v10287_v17 = vpop.f32.mrb[64].mxu0 }
 0x8b1   :  { %v3257_v23 = vpop.f32.mrb[65].mxu0 }
 0x8b2   :  { %v10288_v4 = vpop.f32.mrb[66].mxu0 }
 0x8b3   :  { %v3337_v59 = vpack.c.bf16 %v10288_v4, %v10287_v17  ;;  %v3260_v38 = vpop.f32.mrb[67].mxu0  ;;  %v11395_v17 = vld [vmem:[#allocation2 + $0x28] sm:$0xff]  }
 0x8b4   :  { %v3336_v42 = vpack.c.bf16 %v3260_v38, %v3257_v23  ;;  %v11396_v23 = vld [vmem:[#allocation2 + $0x30] sm:$0xff]   ;;  %v13937_v4 = vld [vmem:[#allocation8 + $0x60] ss:$12 sps:$4 sm:$0xff]   ;;  %v13943_v38 = vld [vmem:[#allocation8 + $0x78] ss:$12 sps:$4 sm:$0xff]  }
 0x8b6   :  { %10301 = vmatprep.subr.bf16.mxu0 %v3336_v42 }
 0x8b7   :  { %10302 = vmatpush3.bf16.msra.mxu0 %v3336_v42  ;;  %v13946_v42 = vld [vmem:[#allocation8 + $0x94] ss:$12 sps:$4 sm:$0xff]  }
 0x8b8   :  { %10303 = vmatprep.subr.bf16.mxu0 %v3337_v59 }
 0x8bb   :  { %10304 = vmatpush3.bf16.msra.mxu0 %v3337_v59  ;;  %v13940_v59 = vld [vmem:[#allocation8 + $0x7c] ss:$12 sps:$4 sm:$0xff]  }
 0x8c2   :  { %v10291_v5 = vpop.f32.mrb[68].mxu0 }
 0x8c3   :  { %v3273_v3 = vpop.f32.mrb[69].mxu0 }
 0x8c4   :  { %v10292_v9 = vpop.f32.mrb[70].mxu0 }
 0x8c5   :  { %v3339_v14 = vpack.c.bf16 %v10292_v9, %v10291_v5  ;;  %v3276_v54 = vpop.f32.mrb[71].mxu0  ;;  %v11397_v5 = vld [vmem:[#allocation2 + $0x38] sm:$0xff]  }
 0x8c6   :  { %v3338_v30 = vpack.c.bf16 %v3276_v54, %v3273_v3  ;;  %v13949_v3 = vld [vmem:[#allocation8 + $0x90] ss:$12 sps:$4 sm:$0xff]   ;;  %v13954_v9 = vld [vmem:[#allocation8 + $0xac] ss:$12 sps:$4 sm:$0xff]  }
 0x8c7   :  { %v11429_v54 = vld [vmem:[#allocation8 + $0xb0] ss:$12 sps:$4 sm:$0xff]  }
 0x8c8   :  { %10305 = vmatprep.subr.bf16.mxu0 %v3338_v30  ;;  %10347 = vmatprep.subr.bf16.mxu1 %v11429_v54 }
 0x8c9   :  { %10306 = vmatpush3.bf16.msra.mxu0 %v3338_v30  ;;  %10348 = vmatpush3.bf16.msra.mxu1 %v11429_v54  ;;  %v11433_v30 = vld [vmem:[#allocation10 + $0x8] ss:$12 sps:$4 sm:$0xff]   ;;  %v11440_v54 = vld [vmem:[#allocation10 + $0x30] ss:$12 sps:$4 sm:$0xff]  }
 0x8ca   :  { %10307 = vmatprep.subr.bf16.mxu0 %v3339_v14  ;;  %10365 = vmatprep.subr.bf16.mxu1 %v11433_v30 }
 0x8cd   :  { %10308 = vmatpush3.bf16.msra.mxu0 %v3339_v14  ;;  %v13956_v14 = vld [vmem:[#allocation8 + $0xa8] ss:$12 sps:$4 sm:$0xff]  }
 0x8da   :  { %v10295_v22 = vpop.f32.mrb[72].mxu0 }
 0x8db   :  { %v3289_v18 = vpop.f32.mrb[73].mxu0 }
 0x8dc   :  { %v10296_v45 = vpop.f32.mrb[74].mxu0 }
 0x8dd   :  { %v3341_v47 = vpack.c.bf16 %v10296_v45, %v10295_v22  ;;  %v3292_v8 = vpop.f32.mrb[75].mxu0  ;;  %v13960_v22 = vld [vmem:[#allocation10 + $0x4] ss:$12 sps:$4 sm:$0xff]  }
 0x8de   :  { %v3340_v58 = vpack.c.bf16 %v3292_v8, %v3289_v18 }
 0x8e0   :  { %10309 = vmatprep.subr.bf16.mxu0 %v3340_v58 }
 0x8e1   :  { %10310 = vmatpush3.bf16.msra.mxu0 %v3340_v58 }
 0x8e2   :  { %10311 = vmatprep.subr.bf16.mxu0 %v3341_v47 }
 0x8e5   :  { %10312 = vmatpush3.bf16.msra.mxu0 %v3341_v47 }
 0x8ec   :  { %v10299_v25 = vpop.f32.mrb[76].mxu0 }
 0x8ed   :  { %v3305_v40 = vpop.f32.mrb[77].mxu0 }
 0x8ee   :  { %v10300_v41 = vpop.f32.mrb[78].mxu0 }
 0x8ef   :  { %v3343_v56 = vpack.c.bf16 %v10300_v41, %v10299_v25  ;;  %v3308_v10 = vpop.f32.mrb[79].mxu0  ;;  %v11430_v25 = vld [vmem:[#allocation10] ss:$12 sps:$4 sm:$0xff]  }
 0x8f0   :  { %v3342_v33 = vpack.c.bf16 %v3308_v10, %v3305_v40  ;;  %v11434_v41 = vld [vmem:[#allocation10 + $0x20] ss:$12 sps:$4 sm:$0xff]   ;;  %v11435_v10 = vld [vmem:[#allocation10 + $0x18] ss:$12 sps:$4 sm:$0xff]  }
 0x8f2   :  { %10313 = vmatprep.subr.bf16.mxu0 %v3342_v33 }
 0x8f3   :  { %10314 = vmatpush3.bf16.msra.mxu0 %v3342_v33 }
 0x8f4   :  { %10315 = vmatprep.subr.bf16.mxu0 %v3343_v56 }
 0x8f7   :  { %10316 = vmatpush3.bf16.msra.mxu0 %v3343_v56  ;;  %v11437_v56 = vld [vmem:[#allocation10 + $0x1c] ss:$12 sps:$4 sm:$0xff]  }
 0x8f8   :  { %3674 = vmatprep.subr.bf16.mxu0 %v13911_v35 }
 0x8fa   :  { %10318 = vmatmul.mubr.bf16.vlgmr.msra.gmra.mrb[80].mxu0 %v11391_v20  ;;  %v11442_v20 = vld [vmem:[#allocation10 + $0x34] ss:$12 sps:$4 sm:$0xff]  }
 0x8fb   :  { %10321 = vmatprep.mubr.bf16.mxu0 %v11392_v2  ;;  %3675 = vmatpush1.bf16.msra.mxu0 %v13913_v63 }
 0x8fc   :  { %3676 = vmatprep.subr.bf16.mxu0 %v13916_v62 }
 0x8ff   :  { %3677 = vmatpush1.bf16.msra.mxu0 %v13919_v19 }
 0x900   :  { %3678 = vmatprep.subr.bf16.mxu0 %v13922_v1 }
 0x902   :  { %10322 = vmatmul.mubr.bf16.gmra.mrb[84].mxu0 %v11393_v37  ;;  %v11438_v37 = vld [vmem:[#allocation10 + $0x38] ss:$12 sps:$4 sm:$0xff]  }
 0x903   :  { %10325 = vmatprep.mubr.bf16.mxu0 %v11394_v53  ;;  %3679 = vmatpush1.bf16.msra.mxu0 %v13925_v36 }
 0x904   :  { %3680 = vmatprep.subr.bf16.mxu0 %v13928_v50 }
 0x907   :  { %3681 = vmatpush1.bf16.msra.mxu0 %v13931_v15 }
 0x908   :  { %3682 = vmatprep.subr.bf16.mxu0 %v13934_v39 }
 0x90a   :  { %10326 = vmatmul.mubr.bf16.gmra.mrb[88].mxu0 %v11395_v17 }
 0x90b   :  { %10329 = vmatprep.mubr.bf16.mxu0 %v11396_v23  ;;  %3683 = vmatpush1.bf16.msra.mxu0 %v13937_v4 }
 0x90c   :  { %3684 = vmatprep.subr.bf16.mxu0 %v13940_v59 }
 0x90f   :  { %3685 = vmatpush1.bf16.msra.mxu0 %v13943_v38 }
 0x910   :  { %3686 = vmatprep.subr.bf16.mxu0 %v13946_v42 }
 0x912   :  { %10330 = vmatmul.mubr.bf16.gmra.mrb[92].mxu0 %v11397_v5 }
 0x913   :  { %3687 = vmatpush1.bf16.msra.mxu0 %v13949_v3  ;;  %3706 = vmatprep.mubr.bf16.mxu0 %v15467_v46 }
 0x914   :  { %3688 = vmatprep.subr.bf16.mxu0 %v13954_v9 }
 0x917   :  { %3689 = vmatpush1.bf16.msra.mxu0 %v13956_v14 }
 0x918   :  { %4044 = vmatprep.subr.bf16.mxu0 %v13960_v22 }
 0x9cd   :  { %v10319_v18 = vpop.f32.mrb[80].mxu0 }
 0x9ce   :  { %v3426_v45 = vpop.f32.mrb[81].mxu0 }
 0x9cf   :  { %v10320_v47 = vpop.f32.mrb[82].mxu0 }
 0x9d0   :  { %v3522_v8 = vpack.c.bf16 %v10320_v47, %v10319_v18  ;;  %v3429_v58 = vpop.f32.mrb[83].mxu0  ;;  %v11439_v18 = vld [vmem:[#allocation10 + $0x50] ss:$12 sps:$4 sm:$0xff]   ;;  %v11445_v47 = vld [vmem:[#allocation10 + $0x48] ss:$12 sps:$4 sm:$0xff]  }
 0x9d1   :  { %v3521_v40 = vpack.c.bf16 %v3429_v58, %v3426_v45  ;;  %v11447_v45 = vld [vmem:[#allocation10 + $0x4c] ss:$12 sps:$4 sm:$0xff]  }
 0x9d3   :  { %3707 = vmatmul.mubr.bf16.vlgmr.msra.gmra.mrb[96].mxu0 %v3521_v40  ;;  %10349 = vmatprep.mubr.bf16.mxu1 %v3521_v40  ;;  %v11452_v40 = vld [vmem:[#allocation10 + $0x64] ss:$12 sps:$4 sm:$0xff]  }
 0x9d4   :  { %10350 = vmatmul.mubr.bf16.vlgmr.msra.gmra.mrb[160].mxu1 %v3522_v8  ;;  %4045 = vmatpush1.bf16.msra.mxu0 %v11430_v25  ;;  %v11443_v25 = vld [vmem:[#allocation10 + $0x68] ss:$12 sps:$4 sm:$0xff]  }
 0x9d5   :  { %v10323_v33 = vpop.f32.mrb[84].mxu0  ;;  %10366 = vmatpush3.bf16.msra.mxu1 %v11433_v30  ;;  %3716 = vmatprep.mubr.bf16.mxu0 %v15467_v46 }
 0x9d6   :  { %v3442_v2 = vpop.f32.mrb[85].mxu0  ;;  %10367 = vmatprep.subr.bf16.mxu1 %v11434_v41  ;;  %4046 = vmatprep.subr.bf16.mxu0 %v11437_v56 }
 0x9d7   :  { %v10324_v53 = vpop.f32.mrb[86].mxu0 }
 0x9d8   :  { %v3524_v17 = vpack.c.bf16 %v10324_v53, %v10323_v33  ;;  %v3445_v23 = vpop.f32.mrb[87].mxu0  ;;  %4047 = vmatpush1.bf16.msra.mxu0 %v11435_v10  ;;  %v11453_v53 = vld [vmem:[#allocation10 + $0x78] ss:$12 sps:$4 sm:$0xff]  }
 0x9d9   :  { %v3523_v5 = vpack.c.bf16 %v3445_v23, %v3442_v2  ;;  %10368 = vmatpush3.bf16.msra.mxu1 %v11434_v41  ;;  %4048 = vmatprep.subr.bf16.mxu0 %v11442_v20  ;;  %v11444_v20 = vld [vmem:[#allocation10 + $0x80] ss:$12 sps:$4 sm:$0xff]   ;;  %v11455_v2 = vld [vmem:[#allocation10 + $0x7c] ss:$12 sps:$4 sm:$0xff]  }
 0x9da   :  { %10369 = vmatprep.subr.bf16.mxu1 %v11438_v37 }
 0x9db   :  { %3717 = vmatmul.mubr.bf16.gmra.mrb[100].mxu0 %v3522_v8  ;;  %10353 = vmatprep.mubr.bf16.mxu1 %v3523_v5  ;;  %v11450_v8 = vld [vmem:[#allocation10 + $0x60] ss:$12 sps:$4 sm:$0xff]  }
 0x9dc   :  { %10354 = vmatmul.mubr.bf16.gmra.mrb[164].mxu1 %v3524_v17  ;;  %3726 = vmatprep.mubr.bf16.mxu0 %v15467_v46 }
 0x9dd   :  { %v10327_v30 = vpop.f32.mrb[88].mxu0  ;;  %10370 = vmatpush3.bf16.msra.mxu1 %v11438_v37  ;;  %4049 = vmatpush1.bf16.msra.mxu0 %v11440_v54  ;;  %v11448_v54 = vld [vmem:[#allocation10 + $0x98] ss:$12 sps:$4 sm:$0xff]  }
 0x9de   :  { %v3458_v58 = vpop.f32.mrb[89].mxu0  ;;  %10371 = vmatprep.subr.bf16.mxu1 %v11439_v18  ;;  %4050 = vmatprep.subr.bf16.mxu0 %v11447_v45 }
 0x9df   :  { %v10328_v41 = vpop.f32.mrb[90].mxu0 }
 0x9e0   :  { %v3526_v56 = vpack.c.bf16 %v10328_v41, %v10327_v30  ;;  %v3461_v10 = vpop.f32.mrb[91].mxu0  ;;  %v11459_v41 = vld [vmem:[#allocation10 + $0xa8] ss:$12 sps:$4 sm:$0xff]  }
 0x9e1   :  { %v3525_v33 = vpack.c.bf16 %v3461_v10, %v3458_v58  ;;  %10372 = vmatpush3.bf16.msra.mxu1 %v11439_v18  ;;  %4051 = vmatpush1.bf16.msra.mxu0 %v11445_v47  ;;  %v11458_v18 = vld [vmem:[#allocation10 + $0x94] ss:$12 sps:$4 sm:$0xff]  }
 0x9e2   :  { %10373 = vmatprep.subr.bf16.mxu1 %v11443_v25  ;;  %4052 = vmatprep.subr.bf16.mxu0 %v11452_v40  ;;  %v11456_v40 = vld [vmem:[#allocation10 + $0x90] ss:$12 sps:$4 sm:$0xff]  }
 0x9e3   :  { %3727 = vmatmul.mubr.bf16.gmra.mrb[104].mxu0 %v3523_v5  ;;  %10357 = vmatprep.mubr.bf16.mxu1 %v3525_v33  ;;  %v11449_v5 = vld [vmem:[#allocation10 + $0xb0] ss:$12 sps:$4 sm:$0xff]  }
 0x9e4   :  { %10358 = vmatmul.mubr.bf16.gmra.mrb[168].mxu1 %v3526_v56  ;;  %3736 = vmatprep.mubr.bf16.mxu0 %v15467_v46 }
 0x9e5   :  { %v10331_v37 = vpop.f32.mrb[92].mxu0  ;;  %10374 = vmatpush3.bf16.msra.mxu1 %v11443_v25  ;;  %4053 = vmatpush1.bf16.msra.mxu0 %v11450_v8  ;;  %v11461_v25 = vld [vmem:[#allocation10 + $0xac] ss:$12 sps:$4 sm:$0xff]  }
 0x9e6   :  { %v3474_v23 = vpop.f32.mrb[93].mxu0  ;;  %10375 = vmatprep.subr.bf16.mxu1 %v11444_v20  ;;  %4054 = vmatprep.subr.bf16.mxu0 %v11455_v2 }
 0x9e7   :  { %v10332_v45 = vpop.f32.mrb[94].mxu0 }
 0x9e8   :  { %v3528_v30 = vpack.c.bf16 %v10332_v45, %v10331_v37  ;;  %v3477_v47 = vpop.f32.mrb[95].mxu0 }
 0x9e9   :  { %v3527_v58 = vpack.c.bf16 %v3477_v47, %v3474_v23  ;;  %10376 = vmatpush3.bf16.msra.mxu1 %v11444_v20  ;;  %4055 = vmatpush1.bf16.msra.mxu0 %v11453_v53 }
 0x9ea   :  { %10377 = vmatprep.subr.bf16.mxu1 %v11448_v54  ;;  %4056 = vmatprep.subr.bf16.mxu0 %v11458_v18 }
 0x9eb   :  { %3737 = vmatmul.mubr.bf16.gmra.mrb[108].mxu0 %v3524_v17  ;;  %10361 = vmatprep.mubr.bf16.mxu1 %v3527_v58 }
 0x9ec   :  { %10362 = vmatmul.mubr.bf16.gmra.mrb[172].mxu1 %v3528_v30  ;;  %3746 = vmatprep.mubr.bf16.mxu0 %v15467_v46 }
 0x9ed   :  { %10378 = vmatpush3.bf16.msra.mxu1 %v11448_v54  ;;  %10381 = vmatprep.mubr.bf16.mxu1 %v13817_v34 }
 0x9ee   :  { %10379 = vmatprep.subr.bf16.mxu1 %v11449_v5  ;;  %4057 = vmatpush1.bf16.msra.mxu0 %v11456_v40 }
 0x9ef   :  { %4058 = vmatprep.subr.bf16.mxu0 %v11461_v25 }
 0x9f1   :  { %10380 = vmatpush3.bf16.msra.mxu1 %v11449_v5 }
 0x9f2   :  { %4059 = vmatpush1.bf16.msra.mxu0 %v11459_v41 }
 0x9f3   :  { %3747 = vmatmul.mubr.bf16.gmra.mrb[112].mxu0 %v3525_v33  ;;  %4895 = vmatprep.subr.bf16.mxu0 %v13911_v35  ;;  %v11462_v35 = vld [vmem:[#allocation7 + $0x40] sm:$0xff]  }
 0x9f4   :  { %10382 = vmatmul.mubr.bf16.vlgmr.msra.gmra.mrb[176].mxu1 %v13830_v60  ;;  %3756 = vmatprep.mubr.bf16.mxu0 %v15467_v46 }
 0x9f5   :  { %10385 = vmatprep.mubr.bf16.mxu1 %v13843_v48  ;;  %10397 = vmatprep.subr.bf16.mxu1 %v11462_v35 }
 0x9f6   :  { %10398 = vmatpush3.bf16.msra.mxu1 %v11462_v35 }
 0x9fb   :  { %3757 = vmatmul.mubr.bf16.gmra.mrb[116].mxu0 %v3526_v56 }
 0x9fc   :  { %10386 = vmatmul.mubr.bf16.gmra.mrb[180].mxu1 %v13856_v26  ;;  %3766 = vmatprep.mubr.bf16.mxu0 %v15467_v46 }
 0x9fd   :  { %10389 = vmatprep.mubr.bf16.mxu1 %v13869_v52 }
 0xa03   :  { %3767 = vmatmul.mubr.bf16.gmra.mrb[120].mxu0 %v3527_v58 }
 0xa04   :  { %10390 = vmatmul.mubr.bf16.gmra.mrb[184].mxu1 %v13882_v21  ;;  %3776 = vmatprep.mubr.bf16.mxu0 %v15467_v46 }
 0xa05   :  { %10393 = vmatprep.mubr.bf16.mxu1 %v13895_v61 }
 0xa0b   :  { %3777 = vmatmul.mubr.bf16.gmra.mrb[124].mxu0 %v3528_v30 }
 0xa0c   :  { %10394 = vmatmul.mubr.bf16.gmra.mrb[188].mxu1 %v13908_v24  ;;  %4076 = vmatprep.mubr.bf16.mxu0 %v15467_v46 }
 0xa13   :  { %4077 = vmatmul.mubr.bf16.vlgmr.msra.gmra.mrb[96].mxu0 %v13817_v34 }
 0xa14   :  { %4086 = vmatprep.mubr.bf16.mxu0 %v15467_v46  ;;  %4896 = vmatpush1.bf16.msra.mxu0 %v13913_v63  ;;  %v11463_v63 = vld [vmem:[#allocation7 + $0x48] sm:$0xff]  }
 0xa15   :  { %4897 = vmatprep.subr.bf16.mxu0 %v13916_v62  ;;  %10399 = vmatprep.subr.bf16.mxu1 %v11463_v63  ;;  %v11464_v62 = vld [vmem:[#allocation7 + $0x50] sm:$0xff]  }
 0xa16   :  { %10400 = vmatpush3.bf16.msra.mxu1 %v11463_v63 }
 0xa17   :  { %10401 = vmatprep.subr.bf16.mxu1 %v11464_v62 }
 0xa18   :  { %4898 = vmatpush1.bf16.msra.mxu0 %v13919_v19  ;;  %v11465_v19 = vld [vmem:[#allocation7 + $0x58] sm:$0xff]  }
 0xa19   :  { %4899 = vmatprep.subr.bf16.mxu0 %v13922_v1  ;;  %v11466_v1 = vld [vmem:[#allocation7 + $0x60] sm:$0xff]  }
 0xa1a   :  { %10402 = vmatpush3.bf16.msra.mxu1 %v11464_v62  ;;  %v3529_v62 = vld [vmem:[%s15397_s5] sm:$0x7] }
 0xa1b   :  { %4087 = vmatmul.mubr.bf16.gmra.mrb[100].mxu0 %v13830_v60  ;;  %10403 = vmatprep.subr.bf16.mxu1 %v11465_v19 }
 0xa1c   :  { %4096 = vmatprep.mubr.bf16.mxu0 %v15467_v46  ;;  %4900 = vmatpush1.bf16.msra.mxu0 %v13925_v36  ;;  %v11467_v36 = vld [vmem:[#allocation7 + $0x68] sm:$0xff]  }
 0xa1d   :  { %4901 = vmatprep.subr.bf16.mxu0 %v13928_v50  ;;  %v11468_v50 = vld [vmem:[#allocation7 + $0x70] sm:$0xff]  }
 0xa1e   :  { %10404 = vmatpush3.bf16.msra.mxu1 %v11465_v19 }
 0xa1f   :  { %10405 = vmatprep.subr.bf16.mxu1 %v11466_v1 }
 0xa20   :  { %4902 = vmatpush1.bf16.msra.mxu0 %v13931_v15 }
 0xa21   :  { %4903 = vmatprep.subr.bf16.mxu0 %v13934_v39 }
 0xa22   :  { %10406 = vmatpush3.bf16.msra.mxu1 %v11466_v1  ;;  %v14080_v1 = vrot.slane %v3529_v62, %v15483_v51 }
 0xa23   :  { %4097 = vmatmul.mubr.bf16.gmra.mrb[104].mxu0 %v13843_v48  ;;  %10407 = vmatprep.subr.bf16.mxu1 %v11467_v36 }
 0xa24   :  { %4106 = vmatprep.mubr.bf16.mxu0 %v15467_v46  ;;  %4904 = vmatpush1.bf16.msra.mxu0 %v13937_v4  ;;  %v11469_v4 = vld [vmem:[#allocation7 + $0x78] sm:$0xff]  }
 0xa25   :  { %4905 = vmatprep.subr.bf16.mxu0 %v13940_v59 }
 0xa26   :  { %10408 = vmatpush3.bf16.msra.mxu1 %v11467_v36  ;;  %v14083_v36 = vrot.slane %v3529_v62, %v15482_v55 }
 0xa27   :  { %10409 = vmatprep.subr.bf16.mxu1 %v11468_v50 }
 0xa28   :  { %4906 = vmatpush1.bf16.msra.mxu0 %v13943_v38 }
 0xa29   :  { %4907 = vmatprep.subr.bf16.mxu0 %v13946_v42 }
 0xa2a   :  { %10410 = vmatpush3.bf16.msra.mxu1 %v11468_v50 }
 0xa2b   :  { %4107 = vmatmul.mubr.bf16.gmra.mrb[108].mxu0 %v13856_v26  ;;  %10411 = vmatprep.subr.bf16.mxu1 %v11469_v4 }
 0xa2c   :  { %4116 = vmatprep.mubr.bf16.mxu0 %v15467_v46  ;;  %4908 = vmatpush1.bf16.msra.mxu0 %v13949_v3 }
 0xa2d   :  { %4909 = vmatprep.subr.bf16.mxu0 %v13954_v9 }
 0xa2e   :  { %10412 = vmatpush3.bf16.msra.mxu1 %v11469_v4 }
 0xa30   :  { %4910 = vmatpush1.bf16.msra.mxu0 %v13956_v14 }
 0xa31   :  { %5105 = vmatprep.subr.bf16.mxu0 %v13960_v22 }
 0xa33   :  { %4117 = vmatmul.mubr.bf16.gmra.mrb[112].mxu0 %v13869_v52 }
 0xa34   :  { %4126 = vmatprep.mubr.bf16.mxu0 %v15467_v46 }
 0xa3b   :  { %4127 = vmatmul.mubr.bf16.gmra.mrb[116].mxu0 %v13882_v21 }
 0xa3c   :  { %4136 = vmatprep.mubr.bf16.mxu0 %v15467_v46 }
 0xa43   :  { %4137 = vmatmul.mubr.bf16.gmra.mrb[120].mxu0 %v13895_v61 }
 0xa44   :  { %4146 = vmatprep.mubr.bf16.mxu0 %v15467_v46 }
 0xa4b   :  { %4147 = vmatmul.mubr.bf16.gmra.mrb[124].mxu0 %v13908_v24 }
 0xa4c   :  { %4927 = vmatprep.mubr.bf16.mxu0 %v15467_v46 }
 0xaa7   :  { %v14012_v15 = vpop.f32.mrb[160].mxu1 }
 0xaa8   :  { %v14014_v39 = vpop.f32.mrb[161].mxu1 }
 0xaa9   :  { %v14016_v59 = vpop.f32.mrb[162].mxu1 }
 0xaaa   :  { %v14018_v38 = vpop.f32.mrb[163].mxu1 }
 0xaaf   :  { %v14020_v42 = vpop.f32.mrb[164].mxu1 }
 0xab0   :  { %v14022_v3 = vpop.f32.mrb[165].mxu1 }
 0xab1   :  { %v14024_v9 = vpop.f32.mrb[166].mxu1 }
 0xab2   :  { %v14026_v14 = vpop.f32.mrb[167].mxu1 }
 0xab7   :  { %v14028_v22 = vpop.f32.mrb[168].mxu1 }
 0xab8   :  { %v14030_v17 = vpop.f32.mrb[169].mxu1 }
 0xab9   :  { %v14032_v56 = vpop.f32.mrb[170].mxu1 }
 0xaba   :  { %v14034_v10 = vpop.f32.mrb[171].mxu1 }
 0xabf   :  { %v14036_v33 = vpop.f32.mrb[172].mxu1 }
 0xac0   :  { %15497 = vst [vmem:[#allocation36_spill] sm:$0xff] %v14036_v33  ;;  %v14038_v8 = vpop.f32.mrb[173].mxu1 }
 0xac1   :  { %v14040_v20 = vpop.f32.mrb[174].mxu1 }
 0xac2   :  { %15498 = vst [vmem:[#allocation37_spill] sm:$0xff] %v14040_v20  ;;  %v14042_v2 = vpop.f32.mrb[175].mxu1 }
 0xac7   :  { %v14044_v37 = vpop.f32.mrb[176].mxu1 }
 0xac8   :  { %v14046_v53 = vpop.f32.mrb[177].mxu1 }
 0xac9   :  { %v14048_v23 = vpop.f32.mrb[178].mxu1 }
 0xaca   :  { %v14050_v54 = vpop.f32.mrb[179].mxu1 }
 0xacf   :  { %v14052_v18 = vpop.f32.mrb[180].mxu1 }
 0xad0   :  { %v14054_v45 = vpop.f32.mrb[181].mxu1 }
 0xad1   :  { %v14056_v30 = vpop.f32.mrb[182].mxu1 }
 0xad2   :  { %v14058_v47 = vpop.f32.mrb[183].mxu1 }
 0xad7   :  { %v14060_v58 = vpop.f32.mrb[184].mxu1 }
 0xad8   :  { %v14062_v5 = vpop.f32.mrb[185].mxu1 }
 0xad9   :  { %v14064_v40 = vpop.f32.mrb[186].mxu1 }
 0xada   :  { %v14066_v25 = vpop.f32.mrb[187].mxu1 }
 0xadf   :  { %v14068_v41 = vpop.f32.mrb[188].mxu1 }
 0xae0   :  { %15499 = vst [vmem:[#allocation38_spill] sm:$0xff] %v14068_v41  ;;  %v14070_v35 = vpop.f32.mrb[189].mxu1 }
 0xae1   :  { %v14072_v63 = vpop.f32.mrb[190].mxu1 }
 0xae2   :  { %15500 = vst [vmem:[#allocation39_spill] sm:$0xff] %v14072_v63  ;;  %v14077_v19 = vpop.f32.mrb[191].mxu1 }
 0xae6   :  { %v4078_v50 = vpop.f32.mrb[96].mxu0 }
 0xae7   :  { %v10845_v4 = vadd.f32 %v4078_v50, %v14080_v1  ;;  %v4080_v24 = vpop.f32.mrb[97].mxu0 }
 0xae8   :  { %v10846_v61 = vadd.f32 %v4080_v24, %v14083_v36  ;;  %v4082_v21 = vpop.f32.mrb[98].mxu0 }
 0xae9   :  { %v9355_v52 = vmul.f32 -1.442695, %v10845_v4  ;;  %v10847_v26 = vadd.f32 %v4082_v21, %v14080_v1  ;;  %v4084_v48 = vpop.f32.mrb[99].mxu0 }
 0xaea   :  { %v9371_v60 = vmul.f32 -1.442695, %v10846_v61  ;;  %v10848_v34 = vadd.f32 %v4084_v48, %v14083_v36 }
 0xaeb   :  { %11974 = vpow2.f32 %v9355_v52  ;;  %v9356_v51 = vmul.f32 -1.442695, %v10847_v26 }
 0xaec   :  { %11976 = vpow2.f32 %v9371_v60  ;;  %v9372_v55 = vmul.f32 -1.442695, %v10848_v34 }
 0xaed   :  { %11978 = vpow2.f32 %v9356_v51 }
 0xaee   :  { %v4088_v46 = vpop.f32.mrb[100].mxu0  ;;  %11980 = vpow2.f32 %v9372_v55 }
 0xaef   :  { %v10849_v7 = vadd.f32 %v4088_v46, %v14080_v1  ;;  %v4090_v50 = vpop.f32.mrb[101].mxu0 }
 0xaf0   :  { %v10850_v29 = vadd.f32 %v4090_v50, %v14083_v36  ;;  %v4092_v24 = vpop.f32.mrb[102].mxu0 }
 0xaf1   :  { %v9357_v28 = vmul.f32 -1.442695, %v10849_v7  ;;  %v10851_v4 = vadd.f32 %v4092_v24, %v14080_v1  ;;  %v4094_v21 = vpop.f32.mrb[103].mxu0 }
 0xaf2   :  { %v10852_v61 = vadd.f32 %v4094_v21, %v14083_v36  ;;  %v9373_v48 = vmul.f32 -1.442695, %v10850_v29 }
 0xaf3   :  { %11982 = vpow2.f32 %v9357_v28  ;;  %v9358_v26 = vmul.f32 -1.442695, %v10851_v4 }
 0xaf4   :  { %v9374_v51 = vmul.f32 -1.442695, %v10852_v61 }
 0xaf5   :  { %v11975_v60 = vpop.eup %11974  ;;  %11984 = vpow2.f32 %v9358_v26 }
 0xaf6   :  { %v11977_v34 = vpop.eup %11976  ;;  %v4318_v52 = vadd.f32 1.0, %v11975_v60  ;;  %v4098_v46 = vpop.f32.mrb[104].mxu0  ;;  %11986 = vpow2.f32 %v9373_v48 }
 0xaf7   :  { %v11979_v20 = vpop.eup %11978  ;;  %v10853_v50 = vadd.f32 %v4098_v46, %v14080_v1  ;;  %v4100_v7 = vpop.f32.mrb[105].mxu0  ;;  %v4430_v21 = vadd.f32 1.0, %v11977_v34 }
 0xaf8   :  { %11988 = vrcp.f32 %v4318_v52  ;;  %v4319_v24 = vadd.f32 1.0, %v11979_v20  ;;  %v10854_v55 = vadd.f32 %v4100_v7, %v14083_v36  ;;  %v4102_v12 = vpop.f32.mrb[106].mxu0  ;;  %v11981_v48 = vpop.eup %11980  ;;  %v15501_v20 = vld [vmem:[#allocation22_spill] sm:$0xff] }
 0xaf9   :  { %11990 = vpow2.f32 %v9374_v51  ;;  %v9359_v28 = vmul.f32 -1.442695, %v10853_v50  ;;  %v10855_v29 = vadd.f32 %v4102_v12, %v14080_v1  ;;  %v4104_v4 = vpop.f32.mrb[107].mxu0  ;;  %v14098_v63 = vrot.slane %v3529_v62, %v15501_v20  ;;  %v14103_v51 = vld [vmem:[%s15398_s6] ss:$0 sm:$0xff] }
 0xafa   :  { %11992 = vrcp.f32 %v4319_v24  ;;  %v10856_v61 = vadd.f32 %v4104_v4, %v14083_v36  ;;  %v9375_v26 = vmul.f32 -1.442695, %v10854_v55  ;;  %v4431_v7 = vadd.f32 1.0, %v11981_v48 }
 0xafb   :  { %v9360_v60 = vmul.f32 -1.442695, %v10855_v29  ;;  %11994 = vpow2.f32 %v9359_v28  ;;  %v4485_v4 = vadd.f32 %v14103_v51, %v14046_v53  ;;  %v3825_v53 = vadd.f32 %v14018_v38, %v14098_v63 }
 0xafc   :  { %11996 = vrcp.f32 %v4430_v21  ;;  %v9376_v52 = vmul.f32 -1.442695, %v10856_v61 }
 0xafd   :  { %v11983_v46 = vpop.eup %11982  ;;  %11998 = vpow2.f32 %v9360_v60 }
 0xafe   :  { %v4320_v12 = vadd.f32 1.0, %v11983_v46  ;;  %v4108_v34 = vpop.f32.mrb[108].mxu0  ;;  %12000 = vpow2.f32 %v9375_v26  ;;  %v3822_v26 = vadd.f32 %v14014_v39, %v14098_v63 }
 0xaff   :  { %v11985_v50 = vpop.eup %11984  ;;  %v10857_v24 = vadd.f32 %v4108_v34, %v14080_v1  ;;  %v4110_v55 = vpop.f32.mrb[109].mxu0  ;;  %v4486_v34 = vadd.f32 %v14103_v51, %v14050_v54 }
 0xb00   :  { %12002 = vrcp.f32 %v4320_v12  ;;  %v4321_v21 = vadd.f32 1.0, %v11985_v50  ;;  %v10858_v28 = vadd.f32 %v4110_v55, %v14083_v36  ;;  %v4112_v62 = vpop.f32.mrb[110].mxu0  ;;  %v11987_v29 = vpop.eup %11986 }
 0xb01   :  { %12004 = vpow2.f32 %v9376_v52  ;;  %v9361_v61 = vmul.f32 -1.442695, %v10857_v24  ;;  %v10859_v60 = vadd.f32 %v4112_v62, %v14080_v1  ;;  %v4114_v46 = vpop.f32.mrb[111].mxu0  ;;  %v4432_v52 = vadd.f32 1.0, %v11987_v29 }
 0xb02   :  { %v11989_v20 = vpop.eup %11988  ;;  %12006 = vrcp.f32 %v4321_v21  ;;  %v9377_v48 = vmul.f32 -1.442695, %v10858_v28  ;;  %v10860_v39 = vadd.f32 %v4114_v46, %v14083_v36 }
 0xb03   :  { %v11991_v12 = vpop.eup %11990  ;;  %v4501_v50 = vmul.f32 %v11989_v20, %v4485_v4  ;;  %12008 = vrcp.f32 %v4431_v7  ;;  %v9362_v55 = vmul.f32 -1.442695, %v10859_v60 }
 0xb04   :  { %v11993_v16 = vpop.eup %11992  ;;  %12010 = vpow2.f32 %v9361_v61  ;;  %v4433_v28 = vadd.f32 1.0, %v11991_v12  ;;  %v9378_v46 = vmul.f32 -1.442695, %v10860_v39  ;;  %v3830_v12 = vadd.f32 %v14012_v15, %v14098_v63 }
 0xb05   :  { %v4517_v24 = vadd.f32 %v4501_v50, %v3822_v26  ;;  %v4502_v62 = vmul.f32 %v11993_v16, %v4486_v34  ;;  %12012 = vpow2.f32 %v9377_v48  ;;  %v11995_v21 = vpop.eup %11994  ;;  %v4487_v16 = vadd.f32 %v14044_v37, %v14103_v51 }
 0xb06   :  { %12014 = vpow2.f32 %v9362_v55  ;;  %v4118_v33 = vpop.f32.mrb[112].mxu0  ;;  %v14117_v41 = vpop.eup %11996  ;;  %v4322_v20 = vadd.f32 1.0, %v11995_v21  ;;  %v4488_v55 = vadd.f32 %v14048_v23, %v14103_v51  ;;  %v14137_v23 = vadd.f32 %v14026_v14, %v14098_v63 }
 0xb07   :  { %12016 = vtanh.f32 %v4517_v24  ;;  %v4518_v54 = vadd.f32 %v4502_v62, %v3825_v53  ;;  %v10861_v7 = vadd.f32 %v4118_v33, %v14080_v1  ;;  %v4120_v4 = vpop.f32.mrb[113].mxu0  ;;  %v11999_v38 = vpop.eup %11998  ;;  %v3833_v33 = vadd.f32 %v14016_v59, %v14098_v63 }
 0xb08   :  { %12018 = vrcp.f32 %v4432_v52  ;;  %v4122_v29 = vpop.f32.mrb[114].mxu0  ;;  %v12001_v61 = vpop.eup %12000  ;;  %v4323_v60 = vadd.f32 1.0, %v11999_v38  ;;  %v14130_v52 = vadd.f32 %v14020_v42, %v14098_v63  ;;  %v3838_v24 = vadd.f32 %v14022_v3, %v14098_v63 }
 0xb09   :  { %12020 = vtanh.f32 %v4518_v54  ;;  %v4124_v26 = vpop.f32.mrb[115].mxu0  ;;  %v9363_v34 = vmul.f32 -1.442695, %v10861_v7  ;;  %v4434_v15 = vadd.f32 1.0, %v12001_v61  ;;  %v10862_v59 = vadd.f32 %v4120_v4, %v14083_v36 }
 0xb0a   :  { %v12003_v48 = vpop.eup %12002  ;;  %12022 = vrcp.f32 %v4322_v20  ;;  %v14141_v42 = vadd.f32 %v14052_v18, %v14103_v51  ;;  %v10863_v3 = vadd.f32 %v4122_v29, %v14080_v1  ;;  %v4581_v18 = vmul.f32 %v14117_v41, %v13809_v44 }
 0xb0b   :  { %v12005_v50 = vpop.eup %12004  ;;  %v4503_v53 = vmul.f32 %v12003_v48, %v4487_v16  ;;  %12024 = vrcp.f32 %v4433_v28 }
 0xb0c   :  { %v12007_v37 = vpop.eup %12006  ;;  %12026 = vrcp.f32 %v4323_v60  ;;  %v4435_v38 = vadd.f32 1.0, %v12005_v50  ;;  %v9364_v50 = vmul.f32 -1.442695, %v10863_v3  ;;  %v4490_v3 = vadd.f32 %v14103_v51, %v14058_v47 }
 0xb0d   :  { %v12009_v62 = vpop.eup %12008  ;;  %v4519_v39 = vadd.f32 %v4503_v53, %v3830_v12  ;;  %v4504_v21 = vmul.f32 %v12007_v37, %v4488_v55  ;;  %12028 = vpow2.f32 %v9378_v46  ;;  %v4549_v46 = vsub.f32 1.0, %v14117_v41 }
 0xb0e   :  { %v12011_v54 = vpop.eup %12010  ;;  %12030 = vpow2.f32 %v9363_v34  ;;  %v4128_v28 = vpop.f32.mrb[116].mxu0  ;;  %v9379_v12 = vmul.f32 -1.442695, %v10862_v59  ;;  %v4550_v55 = vsub.f32 1.0, %v12009_v62  ;;  %v10864_v53 = vadd.f32 %v4124_v26, %v14083_v36 }
 0xb0f   :  { %v12013_v20 = vpop.eup %12012  ;;  %12032 = vtanh.f32 %v4519_v39  ;;  %v4520_v7 = vadd.f32 %v4504_v21, %v3833_v33  ;;  %v4324_v61 = vadd.f32 1.0, %v12011_v54  ;;  %v4130_v16 = vpop.f32.mrb[117].mxu0  ;;  %v10865_v60 = vadd.f32 %v4128_v28, %v14080_v1 }
 0xb10   :  { %v12015_v4 = vpop.eup %12014  ;;  %12034 = vrcp.f32 %v4434_v15  ;;  %v4132_v14 = vpop.f32.mrb[118].mxu0  ;;  %v4489_v39 = vadd.f32 %v14103_v51, %v14054_v45  ;;  %v4436_v21 = vadd.f32 1.0, %v12013_v20  ;;  %v4582_v44 = vmul.f32 %v12009_v62, %v13812_v6 }
 0xb11   :  { %v12017_v48 = vpop.eup %12016  ;;  %12036 = vtanh.f32 %v4520_v7  ;;  %v4325_v29 = vadd.f32 1.0, %v12015_v4  ;;  %v4134_v34 = vpop.f32.mrb[119].mxu0  ;;  %v9365_v54 = vmul.f32 -1.442695, %v10865_v60  ;;  %v9380_v45 = vmul.f32 -1.442695, %v10864_v53 }
 0xb12   :  { %v12019_v33 = vpop.eup %12018  ;;  %12038 = vrcp.f32 %v4324_v61  ;;  %v4565_v37 = vmul.f32 %v12017_v48, %v4549_v46  ;;  %v10866_v61 = vadd.f32 %v4130_v16, %v14083_v36  ;;  %v10867_v20 = vadd.f32 %v4132_v14, %v14080_v1 }
 0xb13   :  { %v12021_v15 = vpop.eup %12020  ;;  %12040 = vrcp.f32 %v4435_v38  ;;  %v4492_v60 = vadd.f32 %v14056_v30, %v14103_v51 }
 0xb14   :  { %v12023_v41 = vpop.eup %12022  ;;  %12042 = vrcp.f32 %v4325_v29  ;;  %v4566_v59 = vmul.f32 %v12021_v15, %v4550_v55  ;;  %v14152_v28 = vadd.f32 %v4581_v18, %v4565_v37  ;;  %v4551_v29 = vsub.f32 1.0, %v12019_v33 }
 0xb15   :  { %v12025_v7 = vpop.eup %12024  ;;  %v4505_v26 = vmul.f32 %v12023_v41, %v4489_v39  ;;  %12044 = vpow2.f32 %v9379_v12  ;;  %v9381_v30 = vmul.f32 -1.442695, %v10866_v61  ;;  %v9366_v39 = vmul.f32 -1.442695, %v10867_v20 }
 0xb16   :  { %v12027_v4 = vpop.eup %12026  ;;  %12046 = vpow2.f32 %v9364_v50  ;;  %v4138_v6 = vpop.f32.mrb[120].mxu0  ;;  %v14158_v62 = vadd.f32 %v4582_v44, %v4566_v59  ;;  %v4552_v15 = vsub.f32 1.0, %v12025_v7  ;;  %v4583_v41 = vmul.f32 %v12019_v33, %v13822_v43 }
 0xb17   :  { %v12029_v38 = vpop.eup %12028  ;;  %v4521_v46 = vadd.f32 %v4505_v26, %v3838_v24  ;;  %v4506_v18 = vmul.f32 %v12027_v4, %v4490_v3  ;;  %12048 = vrcp.f32 %v4436_v21  ;;  %v4140_v47 = vpop.f32.mrb[121].mxu0  ;;  %v10869_v16 = vadd.f32 %v4138_v6, %v14080_v1 }
 0xb18   :  { %v12031_v48 = vpop.eup %12030  ;;  %12050 = vpow2.f32 %v9365_v54  ;;  %v4142_v12 = vpop.f32.mrb[122].mxu0  ;;  %v14165_v14 = vpack.c.bf16 %v14158_v62, %v14152_v28  ;;  %v10868_v21 = vadd.f32 %v4134_v34, %v14083_v36  ;;  %v4437_v54 = vadd.f32 1.0, %v12029_v38 }
 0xb19   :  { %v12033_v55 = vpop.eup %12032  ;;  %12052 = vtanh.f32 %v4521_v46  ;;  %v4522_v50 = vadd.f32 %v4506_v18, %v14137_v23  ;;  %v4326_v53 = vadd.f32 1.0, %v12031_v48  ;;  %v14168_v24 = vpop.f32.mrb[123].mxu0  ;;  %v4584_v23 = vmul.f32 %v12025_v7, %v13825_v31 }
 0xb1a   :  { %v12035_v37 = vpop.eup %12034  ;;  %12054 = vpow2.f32 %v9380_v45  ;;  %10413 = vmatprep.mubr.bf16.mxu1 %v14165_v14  ;;  %v4567_v59 = vmul.f32 %v12033_v55, %v4551_v29  ;;  %v9367_v26 = vmul.f32 -1.442695, %v10869_v16  ;;  %v10870_v34 = vadd.f32 %v4140_v47, %v14083_v36 }
 0xb1b   :  { %v12037_v44 = vpop.eup %12036  ;;  %12056 = vtanh.f32 %v4522_v50  ;;  %v9382_v43 = vmul.f32 -1.442695, %v10868_v21  ;;  %v3849_v31 = vadd.f32 %v14024_v9, %v14098_v63  ;;  %v10871_v47 = vadd.f32 %v4142_v12, %v14080_v1 }
 0xb1c   :  { %v12039_v3 = vpop.eup %12038  ;;  %12058 = vrcp.f32 %v4326_v53  ;;  %v4568_v61 = vmul.f32 %v12037_v44, %v4552_v15  ;;  %v14176_v20 = vadd.f32 %v4583_v41, %v4567_v59  ;;  %v4553_v15 = vsub.f32 1.0, %v12035_v37 }
 0xb1d   :  { %v12041_v4 = vpop.eup %12040  ;;  %v4507_v45 = vmul.f32 %v12039_v3, %v14141_v42  ;;  %12060 = vpow2.f32 %v9381_v30  ;;  %v9383_v30 = vmul.f32 -1.442695, %v10870_v34  ;;  %v4585_v44 = vmul.f32 %v12035_v37, %v13835_v0 }
 0xb1e   :  { %v12043_v6 = vpop.eup %12042  ;;  %12062 = vpow2.f32 %v9366_v39  ;;  %v4148_v33 = vpop.f32.mrb[124].mxu0  ;;  %v14178_v38 = vadd.f32 %v4584_v23, %v4568_v61  ;;  %v4554_v59 = vsub.f32 1.0, %v12041_v4  ;;  %v4586_v61 = vmul.f32 %v12041_v4, %v13838_v49 }
 0xb1f   :  { %v12045_v46 = vpop.eup %12044  ;;  %v4523_v7 = vadd.f32 %v4507_v45, %v14130_v52  ;;  %v4508_v18 = vmul.f32 %v12043_v6, %v4492_v60  ;;  %12064 = vrcp.f32 %v4437_v54  ;;  %v4150_v42 = vpop.f32.mrb[125].mxu0  ;;  %v10873_v60 = vadd.f32 %v4148_v33, %v14080_v1 }
 0xb20   :  { %v12047_v48 = vpop.eup %12046  ;;  %12066 = vpow2.f32 %v9367_v26  ;;  %v4152_v29 = vpop.f32.mrb[126].mxu0  ;;  %v14186_v16 = vpack.c.bf16 %v14178_v38, %v14176_v20  ;;  %v4438_v39 = vadd.f32 1.0, %v12045_v46  ;;  %v9368_v54 = vmul.f32 -1.442695, %v10871_v47 }
 0xb21   :  { %v12049_v55 = vpop.eup %12048  ;;  %12068 = vtanh.f32 %v4523_v7  ;;  %v4524_v50 = vadd.f32 %v4508_v18, %v3849_v31  ;;  %v4327_v53 = vadd.f32 1.0, %v12047_v48  ;;  %v14188_v9 = vpop.f32.mrb[127].mxu0  ;;  %v4493_v26 = vadd.f32 %v14103_v51, %v14062_v5 }
 0xb22   :  { %v12051_v52 = vpop.eup %12050  ;;  %12070 = vpow2.f32 %v9382_v43  ;;  %10414 = vmatmul.mubr.bf16.vlgmr.msra.gmra.mrb[192].mxu1 %v14186_v16  ;;  %v9369_v34 = vmul.f32 -1.442695, %v10873_v60  ;;  %v3854_v0 = vadd.f32 %v14030_v17, %v14098_v63  ;;  %v10872_v46 = vadd.f32 %v14168_v24, %v14083_v36 }
 0xb23   :  { %v12053_v12 = vpop.eup %12052  ;;  %12072 = vtanh.f32 %v4524_v50  ;;  %v4328_v21 = vadd.f32 1.0, %v12051_v52  ;;  %v10874_v5 = vadd.f32 %v4150_v42, %v14083_v36  ;;  %v10875_v47 = vadd.f32 %v4152_v29, %v14080_v1 }
 0xb24   :  { %v12055_v41 = vpop.eup %12054  ;;  %12074 = vrcp.f32 %v4327_v53  ;;  %v4569_v3 = vmul.f32 %v12053_v12, %v4553_v15  ;;  %v4555_v53 = vsub.f32 1.0, %v12049_v55  ;;  %v9384_v42 = vmul.f32 -1.442695, %v10872_v46 }
 0xb25   :  { %v12057_v23 = vpop.eup %12056  ;;  %12076 = vpow2.f32 %v9383_v30  ;;  %v4439_v18 = vadd.f32 1.0, %v12055_v41  ;;  %v4587_v29 = vmul.f32 %v12049_v55, %v13848_v57  ;;  %v9370_v41 = vmul.f32 -1.442695, %v10875_v47 }
 0xb26   :  { %v12059_v45 = vpop.eup %12058  ;;  %12078 = vrcp.f32 %v4328_v21  ;;  %v4570_v6 = vmul.f32 %v12057_v23, %v4554_v59  ;;  %v14196_v43 = vadd.f32 %v4585_v44, %v4569_v3  ;;  %v4494_v21 = vadd.f32 %v14103_v51, %v14066_v25 }
 0xb27   :  { %v12061_v33 = vpop.eup %12060  ;;  %v4509_v37 = vmul.f32 %v12059_v45, %v4493_v26  ;;  %12080 = vrcp.f32 %v4438_v39  ;;  %v9385_v44 = vmul.f32 -1.442695, %v10874_v5  ;;  %v4495_v57 = vadd.f32 %v14060_v58, %v14103_v51 }
 0xb28   :  { %v12063_v31 = vpop.eup %12062  ;;  %12082 = vpow2.f32 %v9368_v54  ;;  %v14203_v49 = vadd.f32 %v4586_v61, %v4570_v6  ;;  %v4440_v30 = vadd.f32 1.0, %v12061_v33  ;;  %v3857_v61 = vadd.f32 %v14034_v10, %v14098_v63 }
 0xb29   :  { %v12065_v4 = vpop.eup %12064  ;;  %v4525_v7 = vadd.f32 %v4509_v37, %v3854_v0  ;;  %v4329_v48 = vadd.f32 1.0, %v12063_v31  ;;  %12084 = vpow2.f32 %v9369_v34  ;;  %v3862_v45 = vadd.f32 %v14028_v22, %v14098_v63 }
 0xb2a   :  { %v12067_v50 = vpop.eup %12066  ;;  %v14208_v17 = vpack.c.bf16 %v14203_v49, %v14196_v43  ;;  %v4556_v15 = vsub.f32 1.0, %v12065_v4  ;;  %v4588_v3 = vmul.f32 %v12065_v4, %v13851_v27  ;;  %v10876_v10 = vadd.f32 %v14188_v9, %v14083_v36 }
 0xb2b   :  { %v12069_v24 = vpop.eup %12068  ;;  %12086 = vtanh.f32 %v4525_v7  ;;  %v4330_v52 = vadd.f32 1.0, %v12067_v50 }
 0xb2c   :  { %v12071_v60 = vpop.eup %12070  ;;  %12088 = vrcp.f32 %v4329_v48  ;;  %10417 = vmatprep.mubr.bf16.mxu1 %v14208_v17  ;;  %v4571_v12 = vmul.f32 %v12069_v24, %v4555_v53  ;;  %v9386_v48 = vmul.f32 -1.442695, %v10876_v10  ;;  %v3873_v10 = vadd.f32 %v14042_v2, %v14098_v63 }
 0xb2d   :  { %v12073_v39 = vpop.eup %12072  ;;  %12090 = vrcp.f32 %v4439_v18  ;;  %v4441_v34 = vadd.f32 1.0, %v12071_v60  ;;  %v4496_v18 = vadd.f32 %v14064_v40, %v14103_v51 }
 0xb2e   :  { %v12075_v54 = vpop.eup %12074  ;;  %12092 = vrcp.f32 %v4330_v52  ;;  %v4572_v59 = vmul.f32 %v12073_v39, %v4556_v15  ;;  %v14215_v23 = vadd.f32 %v4587_v29, %v4571_v12  ;;  %v4497_v52 = vadd.f32 %v14103_v51, %v14070_v35 }
 0xb2f   :  { %v12077_v26 = vpop.eup %12076  ;;  %v4510_v55 = vmul.f32 %v12075_v54, %v4494_v21  ;;  %12094 = vrcp.f32 %v4440_v30  ;;  %v3865_v30 = vadd.f32 %v14032_v56, %v14098_v63  ;;  %v3870_v12 = vadd.f32 %v14038_v8, %v14098_v63 }
 0xb30   :  { %v12079_v25 = vpop.eup %12078  ;;  %12096 = vpow2.f32 %v9384_v42  ;;  %v14223_v6 = vadd.f32 %v4588_v3, %v4572_v59  ;;  %v4442_v22 = vadd.f32 1.0, %v12077_v26  ;;  %v4498_v8 = vadd.f32 %v14103_v51, %v14077_v19 }
 0xb31   :  { %v12081_v27 = vpop.eup %12080  ;;  %v4526_v33 = vadd.f32 %v4510_v55, %v3857_v61  ;;  %v4511_v0 = vmul.f32 %v12079_v25, %v4495_v57  ;;  %12098 = vpow2.f32 %v9370_v41 }
 0xb32   :  { %v12083_v37 = vpop.eup %12082  ;;  %12100 = vpow2.f32 %v9385_v44  ;;  %v14229_v58 = vpack.c.bf16 %v14223_v6, %v14215_v23  ;;  %v4557_v4 = vsub.f32 1.0, %v12081_v27  ;;  %v4589_v53 = vmul.f32 %v12081_v27, %v13861_v32 }
 0xb33   :  { %12102 = vtanh.f32 %v4526_v33  ;;  %v4527_v46 = vadd.f32 %v4511_v0, %v3862_v45  ;;  %v4331_v31 = vadd.f32 1.0, %v12083_v37  ;;  %v12085_v5 = vpop.eup %12084  ;;  %v15502_v37 = vld [vmem:[#allocation38_spill] sm:$0xff] }
 0xb34   :  { %12104 = vrcp.f32 %v4441_v34  ;;  %10418 = vmatmul.mubr.bf16.gmra.mrb[196].mxu1 %v14229_v58  ;;  %v4332_v9 = vadd.f32 1.0, %v12085_v5 }
 0xb35   :  { %v12087_v7 = vpop.eup %12086  ;;  %12106 = vtanh.f32 %v4527_v46 }
 0xb36   :  { %v12089_v47 = vpop.eup %12088  ;;  %12108 = vrcp.f32 %v4331_v31  ;;  %v4573_v50 = vmul.f32 %v12087_v7, %v4557_v4  ;;  %v15503_v4 = vld [vmem:[#allocation36_spill] sm:$0xff] }
 0xb37   :  { %v12091_v24 = vpop.eup %12090  ;;  %v4512_v42 = vmul.f32 %v12089_v47, %v4496_v18  ;;  %12110 = vrcp.f32 %v4442_v22 }
 0xb38   :  { %v12093_v60 = vpop.eup %12092  ;;  %12112 = vrcp.f32 %v4332_v9  ;;  %v14239_v40 = vadd.f32 %v4589_v53, %v4573_v50  ;;  %v4558_v35 = vsub.f32 1.0, %v12091_v24  ;;  %v4590_v61 = vmul.f32 %v12091_v24, %v13864_v13  ;;  %v15504_v53 = vld [vmem:[#allocation25_spill] sm:$0xff] }
 0xb39   :  { %v12095_v15 = vpop.eup %12094  ;;  %v4528_v29 = vadd.f32 %v4512_v42, %v3865_v30  ;;  %v4513_v39 = vmul.f32 %v12093_v60, %v4497_v52  ;;  %12114 = vpow2.f32 %v9386_v48  ;;  %v4499_v13 = vadd.f32 %v15502_v37, %v14103_v51  ;;  %v15505_v42 = vld [vmem:[#allocation39_spill] sm:$0xff] }
 0xb3a   :  { %v12097_v32 = vpop.eup %12096  ;;  %v4559_v57 = vsub.f32 1.0, %v12095_v15  ;;  %v4591_v33 = vmul.f32 %v12095_v15, %v13874_v11  ;;  %v3878_v11 = vadd.f32 %v15503_v4, %v14098_v63  ;;  %v4500_v60 = vadd.f32 %v15505_v42, %v14103_v51  ;;  %v15514_v4 = vld [vmem:[#allocation34_spill] sm:$0xff] }
 0xb3b   :  { %v12099_v21 = vpop.eup %12098  ;;  %12116 = vtanh.f32 %v4528_v29  ;;  %v4529_v56 = vadd.f32 %v4513_v39, %v3870_v12  ;;  %v4443_v59 = vadd.f32 1.0, %v12097_v32  ;;  %v15507_v29 = vld [vmem:[#allocation26_spill] sm:$0xff] }
 0xb3c   :  { %v12101_v44 = vpop.eup %12100  ;;  %v4333_v41 = vadd.f32 1.0, %v12099_v21  ;;  %v15508_v21 = vld [vmem:[#allocation37_spill] sm:$0xff] }
 0xb3d   :  { %v12103_v54 = vpop.eup %12102  ;;  %12118 = vtanh.f32 %v4529_v56  ;;  %v4444_v25 = vadd.f32 1.0, %v12101_v44  ;;  %v3881_v56 = vadd.f32 %v15508_v21, %v14098_v63 }
 0xb3e   :  { %v12105_v3 = vpop.eup %12104  ;;  %v4574_v26 = vmul.f32 %v12103_v54, %v4558_v35  ;;  %12120 = vrcp.f32 %v4333_v41 }
 0xb3f   :  { %v12107_v55 = vpop.eup %12106  ;;  %12122 = vrcp.f32 %v4443_v59  ;;  %v4560_v2 = vsub.f32 1.0, %v12105_v3  ;;  %v4592_v24 = vmul.f32 %v12105_v3, %v15504_v53 }
 0xb40   :  { %v12109_v45 = vpop.eup %12108  ;;  %v14246_v34 = vadd.f32 %v4590_v61, %v4574_v26  ;;  %v4575_v27 = vmul.f32 %v12107_v55, %v4559_v57  ;;  %12124 = vrcp.f32 %v4444_v25  ;;  %v15510_v57 = vld [vmem:[#allocation27_spill] sm:$0xff] }
 0xb41   :  { %v12111_v0 = vpop.eup %12110  ;;  %v4514_v46 = vmul.f32 %v12109_v45, %v4498_v8 }
 0xb42   :  { %v12113_v22 = vpop.eup %12112  ;;  %v14255_v19 = vpack.c.bf16 %v14246_v34, %v14239_v40  ;;  %v14257_v31 = vadd.f32 %v4591_v33, %v4575_v27  ;;  %v4561_v30 = vsub.f32 1.0, %v12111_v0  ;;  %v4593_v39 = vmul.f32 %v12111_v0, %v15507_v29  ;;  %v15512_v33 = vld [vmem:[#allocation33_spill] sm:$0xff] }
 0xb43   :  { %v12115_v5 = vpop.eup %12114  ;;  %v4530_v7 = vadd.f32 %v4514_v46, %v3873_v10  ;;  %v4515_v18 = vmul.f32 %v12113_v22, %v4499_v13 }
 0xb44   :  { %10421 = vmatprep.mubr.bf16.mxu1 %v14255_v19  ;;  %v4445_v47 = vadd.f32 1.0, %v12115_v5 }
 0xb45   :  { %v12117_v9 = vpop.eup %12116  ;;  %12126 = vtanh.f32 %v4530_v7  ;;  %v4531_v48 = vadd.f32 %v4515_v18, %v3878_v11 }
 0xb46   :  { %v4576_v50 = vmul.f32 %v12117_v9, %v4560_v2  ;;  %v12670_v2 = vld [vmem:[#allocation2] sm:$0xff]  }
 0xb47   :  { %v12119_v52 = vpop.eup %12118  ;;  %12128 = vtanh.f32 %v4531_v48 }
 0xb48   :  { %v14265_v15 = vadd.f32 %v4592_v24, %v4576_v50  ;;  %v4577_v12 = vmul.f32 %v12119_v52, %v4561_v30  ;;  %v12121_v32 = vpop.eup %12120  ;;  %12130 = vrcp.f32 %v4445_v47 }
 0xb49   :  { %v4516_v44 = vmul.f32 %v12121_v32, %v4500_v60  ;;  %v12123_v54 = vpop.eup %12122 }
 0xb4a   :  { %15506 = vst [vmem:[#allocation38_spill] sm:$0xff] %v14265_v15  ;;  %v14272_v41 = vpack.c.bf16 %v14265_v15, %v14257_v31  ;;  %v14274_v35 = vadd.f32 %v4593_v39, %v4577_v12  ;;  %v12125_v51 = vpop.eup %12124  ;;  %v4562_v3 = vsub.f32 1.0, %v12123_v54  ;;  %v4594_v55 = vmul.f32 %v12123_v54, %v15510_v57 }
 0xb4b   :  { %v4532_v59 = vadd.f32 %v4516_v44, %v3881_v56  ;;  %v4563_v8 = vsub.f32 1.0, %v12125_v51  ;;  %v4595_v0 = vmul.f32 %v12125_v51, %v15512_v33  ;;  %v12675_v33 = vld [vmem:[#allocation8 + $0x38] ss:$12 sps:$4 sm:$0xff]  }
 0xb4c   :  { %15509 = vst [vmem:[#allocation36_spill] sm:$0xff] %v14274_v35  ;;  %10422 = vmatmul.mubr.bf16.gmra.mrb[200].mxu1 %v14272_v41 }
 0xb4d   :  { %12132 = vtanh.f32 %v4532_v59 }
 0xb4f   :  { %v12127_v26 = vpop.eup %12126 }
 0xb50   :  { %v4578_v61 = vmul.f32 %v12127_v26, %v4562_v3 }
 0xb51   :  { %v12129_v25 = vpop.eup %12128 }
 0xb52   :  { %v14278_v45 = vadd.f32 %v4594_v55, %v4578_v61  ;;  %v4579_v27 = vmul.f32 %v12129_v25, %v4563_v8  ;;  %v12131_v10 = vpop.eup %12130  ;;  %v12671_v55 = vld [vmem:[#allocation8 + $0x8] ss:$12 sps:$4 sm:$0xff]  }
 0xb53   :  { %v4564_v46 = vsub.f32 1.0, %v12131_v10  ;;  %v4596_v11 = vmul.f32 %v12131_v10, %v15514_v4  ;;  %v12672_v8 = vld [vmem:[#allocation2 + $0x8] sm:$0xff]   ;;  %v12673_v25 = vld [vmem:[#allocation2 + $0x10] sm:$0xff]   ;;  %v12677_v10 = vld [vmem:[#allocation2 + $0x20] sm:$0xff]  }
 0xb54   :  { %15511 = vst [vmem:[#allocation25_spill] sm:$0xff] %v14278_v45  ;;  %v14283_v37 = vpack.c.bf16 %v14278_v45, %v14274_v35  ;;  %v14285_v13 = vadd.f32 %v4595_v0, %v4579_v27  ;;  %v12674_v27 = vld [vmem:[#allocation8 + $0x20] ss:$12 sps:$4 sm:$0xff]   ;;  %v12676_v0 = vld [vmem:[#allocation2 + $0x18] sm:$0xff]   ;;  %v12681_v4 = vld [vmem:[#allocation2 + $0x30] sm:$0xff]  }
 0xb56   :  { %15513 = vst [vmem:[#allocation39_spill] sm:$0xff] %v14285_v13  ;;  %10425 = vmatprep.mubr.bf16.mxu1 %v14283_v37 }
 0xb57   :  { %v12133_v22 = vpop.eup %12132 }
 0xb58   :  { %v4580_v5 = vmul.f32 %v12133_v22, %v4564_v46  ;;  %v12678_v46 = vld [vmem:[#allocation8 + $0x50] ss:$12 sps:$4 sm:$0xff]   ;;  %v12679_v22 = vld [vmem:[#allocation8 + $0x68] ss:$12 sps:$4 sm:$0xff]  }
 0xb5a   :  { %v14289_v7 = vadd.f32 %v4596_v11, %v4580_v5  ;;  %v12680_v5 = vld [vmem:[#allocation2 + $0x28] sm:$0xff]  }
 0xb5b   :  { %v12682_v11 = vld [vmem:[#allocation8 + $0x80] ss:$12 sps:$4 sm:$0xff]  }
 0xb5c   :  { %15515 = vst [vmem:[#allocation26_spill] sm:$0xff] %v14289_v7  ;;  %v14293_v18 = vpack.c.bf16 %v14289_v7, %v14285_v13 }
 0xb5e   :  { %10426 = vmatmul.mubr.bf16.gmra.mrb[204].mxu1 %v14293_v18 }
 0xb5f   :  { %10445 = vmatprep.mubr.bf16.mxu1 %v12670_v2  ;;  %v12683_v2 = vld [vmem:[#allocation8 + $0x98] ss:$12 sps:$4 sm:$0xff]  }
 0xbf5   :  { %v10415_v9 = vpop.f32.mrb[192].mxu1 }
 0xbf6   :  { %v4719_v48 = vpop.f32.mrb[193].mxu1 }
 0xbf7   :  { %v10416_v47 = vpop.f32.mrb[194].mxu1 }
 0xbf8   :  { %v4783_v50 = vpack.c.bf16 %v10416_v47, %v10415_v9  ;;  %v4722_v53 = vpop.f32.mrb[195].mxu1  ;;  %v12684_v9 = vld [vmem:[#allocation2 + $0x38] sm:$0xff]   ;;  %v12686_v47 = vld [vmem:[#allocation10 + $0x8] ss:$12 sps:$4 sm:$0xff]  }
 0xbf9   :  { %v4782_v24 = vpack.c.bf16 %v4722_v53, %v4719_v48  ;;  %v12685_v48 = vld [vmem:[#allocation8 + $0xb0] ss:$12 sps:$4 sm:$0xff]  }
 0xbfb   :  { %10429 = vmatprep.subr.bf16.mxu1 %v4782_v24 }
 0xbfc   :  { %10430 = vmatpush3.bf16.msra.mxu1 %v4782_v24 }
 0xbfd   :  { %10431 = vmatprep.subr.bf16.mxu1 %v4783_v50 }
 0xc00   :  { %10432 = vmatpush3.bf16.msra.mxu1 %v4783_v50 }
 0xc07   :  { %v10419_v30 = vpop.f32.mrb[196].mxu1 }
 0xc08   :  { %v4735_v52 = vpop.f32.mrb[197].mxu1 }
 0xc09   :  { %v10420_v42 = vpop.f32.mrb[198].mxu1 }
 0xc0a   :  { %v4785_v60 = vpack.c.bf16 %v10420_v42, %v10419_v30  ;;  %v4738_v12 = vpop.f32.mrb[199].mxu1 }
 0xc0b   :  { %v4784_v29 = vpack.c.bf16 %v4738_v12, %v4735_v52 }
 0xc0d   :  { %10433 = vmatprep.subr.bf16.mxu1 %v4784_v29 }
 0xc0e   :  { %10434 = vmatpush3.bf16.msra.mxu1 %v4784_v29  ;;  %v15516_v29 = vmov 0  }
 0xc0f   :  { %10435 = vmatprep.subr.bf16.mxu1 %v4785_v60 }
 0xc12   :  { %10436 = vmatpush3.bf16.msra.mxu1 %v4785_v60  ;;  %v12687_v60 = vld [vmem:[#allocation10] ss:$12 sps:$4 sm:$0xff]  }
 0xc1f   :  { %v10423_v39 = vpop.f32.mrb[200].mxu1 }
 0xc20   :  { %v4751_v32 = vpop.f32.mrb[201].mxu1 }
 0xc21   :  { %v10424_v21 = vpop.f32.mrb[202].mxu1 }
 0xc22   :  { %v4787_v56 = vpack.c.bf16 %v10424_v21, %v10423_v39  ;;  %v4754_v44 = vpop.f32.mrb[203].mxu1  ;;  %v12689_v21 = vld [vmem:[#allocation10 + $0x1c] ss:$12 sps:$4 sm:$0xff]  }
 0xc23   :  { %v4786_v54 = vpack.c.bf16 %v4754_v44, %v4751_v32  ;;  %v12688_v32 = vld [vmem:[#allocation10 + $0x20] ss:$12 sps:$4 sm:$0xff]  }
 0xc25   :  { %10437 = vmatprep.subr.bf16.mxu1 %v4786_v54 }
 0xc26   :  { %10438 = vmatpush3.bf16.msra.mxu1 %v4786_v54 }
 0xc27   :  { %10439 = vmatprep.subr.bf16.mxu1 %v4787_v56 }
 0xc2a   :  { %10440 = vmatpush3.bf16.msra.mxu1 %v4787_v56 }
 0xc31   :  { %v10427_v59 = vpop.f32.mrb[204].mxu1 }
 0xc32   :  { %v4767_v51 = vpop.f32.mrb[205].mxu1 }
 0xc33   :  { %v10428_v3 = vpop.f32.mrb[206].mxu1 }
 0xc34   :  { %v4789_v26 = vpack.c.bf16 %v10428_v3, %v10427_v59  ;;  %v4770_v61 = vpop.f32.mrb[207].mxu1  ;;  %v12690_v59 = vld [vmem:[#allocation10 + $0x18] ss:$12 sps:$4 sm:$0xff]   ;;  %v12691_v3 = vld [vmem:[#allocation10 + $0x34] ss:$12 sps:$4 sm:$0xff]  }
 0xc35   :  { %v4788_v57 = vpack.c.bf16 %v4770_v61, %v4767_v51 }
 0xc37   :  { %10441 = vmatprep.subr.bf16.mxu1 %v4788_v57 }
 0xc38   :  { %10442 = vmatpush3.bf16.msra.mxu1 %v4788_v57  ;;  %v12693_v57 = vld [vmem:[#allocation10 + $0x30] ss:$12 sps:$4 sm:$0xff]  }
 0xc39   :  { %10443 = vmatprep.subr.bf16.mxu1 %v4789_v26 }
 0xc3c   :  { %10444 = vmatpush3.bf16.msra.mxu1 %v4789_v26  ;;  %v12692_v26 = vld [vmem:[#allocation10 + $0x38] ss:$12 sps:$4 sm:$0xff]  }
 0xc3d   :  { %10461 = vmatprep.subr.bf16.mxu1 %v12671_v55 }
 0xc3f   :  { %10446 = vmatmul.mubr.bf16.vlgmr.msra.gmra.mrb[208].mxu1 %v12672_v8  ;;  %v12694_v8 = vld [vmem:[#allocation10 + $0x50] ss:$12 sps:$4 sm:$0xff]  }
 0xc40   :  { %10449 = vmatprep.mubr.bf16.mxu1 %v12673_v25  ;;  %10462 = vmatpush3.bf16.msra.mxu1 %v12671_v55  ;;  %v12695_v25 = vld [vmem:[#allocation10 + $0x4c] ss:$12 sps:$4 sm:$0xff]  }
 0xc41   :  { %10463 = vmatprep.subr.bf16.mxu1 %v12674_v27 }
 0xc44   :  { %10464 = vmatpush3.bf16.msra.mxu1 %v12674_v27 }
 0xc45   :  { %10465 = vmatprep.subr.bf16.mxu1 %v12675_v33 }
 0xc47   :  { %10450 = vmatmul.mubr.bf16.gmra.mrb[212].mxu1 %v12676_v0 }
 0xc48   :  { %10453 = vmatprep.mubr.bf16.mxu1 %v12677_v10  ;;  %10466 = vmatpush3.bf16.msra.mxu1 %v12675_v33 }
 0xc49   :  { %10467 = vmatprep.subr.bf16.mxu1 %v12678_v46 }
 0xc4c   :  { %10468 = vmatpush3.bf16.msra.mxu1 %v12678_v46  ;;  %v12696_v46 = vld [vmem:[#allocation10 + $0x48] ss:$12 sps:$4 sm:$0xff]  }
 0xc4d   :  { %10469 = vmatprep.subr.bf16.mxu1 %v12679_v22 }
 0xc4f   :  { %10454 = vmatmul.mubr.bf16.gmra.mrb[216].mxu1 %v12680_v5  ;;  %v12698_v5 = vld [vmem:[#allocation10 + $0x64] ss:$12 sps:$4 sm:$0xff]  }
 0xc50   :  { %10457 = vmatprep.mubr.bf16.mxu1 %v12681_v4  ;;  %10470 = vmatpush3.bf16.msra.mxu1 %v12679_v22  ;;  %v12697_v22 = vld [vmem:[#allocation10 + $0x68] ss:$12 sps:$4 sm:$0xff]  }
 0xc51   :  { %10471 = vmatprep.subr.bf16.mxu1 %v12682_v11 }
 0xc54   :  { %10472 = vmatpush3.bf16.msra.mxu1 %v12682_v11  ;;  %v12699_v11 = vld [vmem:[#allocation10 + $0x60] ss:$12 sps:$4 sm:$0xff]  }
 0xc55   :  { %10473 = vmatprep.subr.bf16.mxu1 %v12683_v2 }
 0xc57   :  { %10458 = vmatmul.mubr.bf16.gmra.mrb[220].mxu1 %v12684_v9  ;;  %v12700_v9 = vld [vmem:[#allocation10 + $0x80] ss:$12 sps:$4 sm:$0xff]  }
 0xc58   :  { %10474 = vmatpush3.bf16.msra.mxu1 %v12683_v2 }
 0xc59   :  { %10475 = vmatprep.subr.bf16.mxu1 %v12685_v48 }
 0xc5c   :  { %10476 = vmatpush3.bf16.msra.mxu1 %v12685_v48  ;;  %v12701_v48 = vld [vmem:[#allocation10 + $0x7c] ss:$12 sps:$4 sm:$0xff]  }
 0xc5d   :  { %10493 = vmatprep.subr.bf16.mxu1 %v12686_v47 }
 0xd12   :  { %v10447_v50 = vpop.f32.mrb[208].mxu1 }
 0xd13   :  { %v4824_v53 = vpop.f32.mrb[209].mxu1 }
 0xd14   :  { %v10448_v24 = vpop.f32.mrb[210].mxu1 }
 0xd15   :  { %v4888_v30 = vpack.c.bf16 %v10448_v24, %v10447_v50  ;;  %v4827_v52 = vpop.f32.mrb[211].mxu1 }
 0xd16   :  { %v4887_v42 = vpack.c.bf16 %v4827_v52, %v4824_v53  ;;  %v12703_v52 = vld [vmem:[#allocation10 + $0x98] ss:$12 sps:$4 sm:$0xff]  }
 0xd18   :  { %4928 = vmatmul.mubr.bf16.vlgmr.msra.gmra.mrb[128].mxu0 %v4887_v42  ;;  %10477 = vmatprep.mubr.bf16.mxu1 %v4887_v42  ;;  %v12704_v42 = vld [vmem:[#allocation10 + $0x94] ss:$12 sps:$4 sm:$0xff]  }
 0xd19   :  { %10478 = vmatmul.mubr.bf16.vlgmr.msra.gmra.mrb[224].mxu1 %v4888_v30  ;;  %5106 = vmatpush1.bf16.msra.mxu0 %v12687_v60  ;;  %v12705_v60 = vld [vmem:[#allocation10 + $0xb0] ss:$12 sps:$4 sm:$0xff]  }
 0xd1a   :  { %v10451_v12 = vpop.f32.mrb[212].mxu1  ;;  %10494 = vmatpush3.bf16.msra.mxu1 %v12686_v47  ;;  %4937 = vmatprep.mubr.bf16.mxu0 %v15516_v29 }
 0xd1b   :  { %v4840_v39 = vpop.f32.mrb[213].mxu1  ;;  %10495 = vmatprep.subr.bf16.mxu1 %v12688_v32  ;;  %5107 = vmatprep.subr.bf16.mxu0 %v12689_v21  ;;  %v11470_v21 = vld [vmem:[#allocation13] ss:$8 sps:$4 sm:$0xff]  }
 0xd1c   :  { %v10452_v56 = vpop.f32.mrb[214].mxu1 }
 0xd1d   :  { %v4890_v44 = vpack.c.bf16 %v10452_v56, %v10451_v12  ;;  %v4843_v54 = vpop.f32.mrb[215].mxu1  ;;  %5108 = vmatpush1.bf16.msra.mxu0 %v12690_v59  ;;  %v11472_v12 = vld [vmem:[#allocation13 + $0x4] ss:$8 sps:$4 sm:$0xff]   ;;  %v11475_v56 = vld [vmem:[#allocation13 + $0x14] ss:$8 sps:$4 sm:$0xff]  }
 0xd1e   :  { %v4889_v51 = vpack.c.bf16 %v4843_v54, %v4840_v39  ;;  %10496 = vmatpush3.bf16.msra.mxu1 %v12688_v32  ;;  %5109 = vmatprep.subr.bf16.mxu0 %v12691_v3  ;;  %v12706_v39 = vld [vmem:[#allocation10 + $0x90] ss:$12 sps:$4 sm:$0xff]   ;;  %v12707_v32 = vld [vmem:[#allocation10 + $0xac] ss:$12 sps:$4 sm:$0xff]  }
 0xd1f   :  { %10497 = vmatprep.subr.bf16.mxu1 %v12692_v26  ;;  %v11473_v54 = vld [vmem:[#allocation13 + $0x10] ss:$8 sps:$4 sm:$0xff]   ;;  %v11478_v59 = vld [vmem:[#allocation13 + $0x24] ss:$8 sps:$4 sm:$0xff]   ;;  %v11481_v3 = vld [vmem:[#allocation13 + $0x34] ss:$8 sps:$4 sm:$0xff]  }
 0xd20   :  { %4938 = vmatmul.mubr.bf16.gmra.mrb[132].mxu0 %v4888_v30  ;;  %10481 = vmatprep.mubr.bf16.mxu1 %v4889_v51  ;;  %v12702_v30 = vld [vmem:[#allocation10 + $0x78] ss:$12 sps:$4 sm:$0xff]  }
 0xd21   :  { %10482 = vmatmul.mubr.bf16.gmra.mrb[228].mxu1 %v4890_v44  ;;  %4947 = vmatprep.mubr.bf16.mxu0 %v15516_v29 }
 0xd22   :  { %v10455_v61 = vpop.f32.mrb[216].mxu1  ;;  %10498 = vmatpush3.bf16.msra.mxu1 %v12692_v26  ;;  %5110 = vmatpush1.bf16.msra.mxu0 %v12693_v57  ;;  %v11479_v26 = vld [vmem:[#allocation13 + $0x30] ss:$8 sps:$4 sm:$0xff]   ;;  %v11482_v57 = vld [vmem:[#allocation13 + $0x40] ss:$8 sps:$4 sm:$0xff]  }
 0xd23   :  { %v4856_v55 = vpop.f32.mrb[217].mxu1  ;;  %10499 = vmatprep.subr.bf16.mxu1 %v12694_v8  ;;  %5111 = vmatprep.subr.bf16.mxu0 %v12695_v25  ;;  %v11490_v25 = vld [vmem:[#allocation13 + $0x64] ss:$8 sps:$4 sm:$0xff]  }
 0xd24   :  { %v10456_v27 = vpop.f32.mrb[218].mxu1 }
 0xd25   :  { %v14298_v33 = vpack.c.bf16 %v10456_v27, %v10455_v61  ;;  %v4859_v0 = vpop.f32.mrb[219].mxu1  ;;  %v11484_v61 = vld [vmem:[#allocation13 + $0x44] ss:$8 sps:$4 sm:$0xff]   ;;  %v11488_v27 = vld [vmem:[#allocation13 + $0x60] ss:$8 sps:$4 sm:$0xff]  }
 0xd26   :  { %v4891_v10 = vpack.c.bf16 %v4859_v0, %v4856_v55  ;;  %10500 = vmatpush3.bf16.msra.mxu1 %v12694_v8  ;;  %5112 = vmatpush1.bf16.msra.mxu0 %v12696_v46  ;;  %v11487_v55 = vld [vmem:[#allocation13 + $0x54] ss:$8 sps:$4 sm:$0xff]   ;;  %v11485_v8 = vld [vmem:[#allocation13 + $0x50] ss:$8 sps:$4 sm:$0xff]  }
 0xd27   :  { %10501 = vmatprep.subr.bf16.mxu1 %v12697_v22  ;;  %5113 = vmatprep.subr.bf16.mxu0 %v12698_v5  ;;  %v11491_v0 = vld [vmem:[#allocation13 + $0x70] ss:$8 sps:$4 sm:$0xff]   ;;  %v11496_v5 = vld [vmem:[#allocation11 + $0x4] ss:$8 sps:$4 sm:$0xff]  }
 0xd28   :  { %4948 = vmatmul.mubr.bf16.gmra.mrb[136].mxu0 %v4889_v51  ;;  %10485 = vmatprep.mubr.bf16.mxu1 %v4891_v10  ;;  %v11476_v51 = vld [vmem:[#allocation13 + $0x20] ss:$8 sps:$4 sm:$0xff]   ;;  %v15518_v46 = vld [vmem:[#allocation31_spill] sm:$0xff] }
 0xd29   :  { %10486 = vmatmul.mubr.bf16.gmra.mrb[232].mxu1 %v14298_v33  ;;  %4957 = vmatprep.mubr.bf16.mxu0 %v15516_v29 }
 0xd2a   :  { %v10459_v4 = vpop.f32.mrb[220].mxu1  ;;  %10502 = vmatpush3.bf16.msra.mxu1 %v12697_v22  ;;  %5114 = vmatpush1.bf16.msra.mxu0 %v12699_v11  ;;  %v15519_v22 = vld [vmem:[#allocation29_spill] sm:$0xff]  ;;  %v11499_v11 = vld [vmem:[#allocation11 + $0x14] ss:$8 sps:$4 sm:$0xff]  }
 0xd2b   :  { %v4872_v2 = vpop.f32.mrb[221].mxu1  ;;  %10503 = vmatprep.subr.bf16.mxu1 %v12700_v9  ;;  %5115 = vmatprep.subr.bf16.mxu0 %v12701_v48  ;;  %v11503_v48 = vld [vmem:[#allocation11 + $0x30] ss:$8 sps:$4 sm:$0xff]  }
 0xd2c   :  { %v10460_v47 = vpop.f32.mrb[222].mxu1 }
 0xd2d   :  { %v14302_v50 = vpack.c.bf16 %v10460_v47, %v10459_v4  ;;  %v4875_v53 = vpop.f32.mrb[223].mxu1  ;;  %v11497_v4 = vld [vmem:[#allocation11 + $0x10] ss:$8 sps:$4 sm:$0xff]   ;;  %v11506_v47 = vld [vmem:[#allocation11 + $0x40] ss:$8 sps:$4 sm:$0xff]  }
 0xd2e   :  { %v4893_v24 = vpack.c.bf16 %v4875_v53, %v4872_v2  ;;  %10504 = vmatpush3.bf16.msra.mxu1 %v12700_v9  ;;  %5116 = vmatpush1.bf16.msra.mxu0 %v12702_v30  ;;  %v11500_v2 = vld [vmem:[#allocation11 + $0x20] ss:$8 sps:$4 sm:$0xff]   ;;  %v11505_v9 = vld [vmem:[#allocation11 + $0x34] ss:$8 sps:$4 sm:$0xff]   ;;  %v11509_v53 = vld [vmem:[#allocation11 + $0x50] ss:$8 sps:$4 sm:$0xff]  }
 0xd2f   :  { %10505 = vmatprep.subr.bf16.mxu1 %v12703_v52  ;;  %5117 = vmatprep.subr.bf16.mxu0 %v12704_v42  ;;  %v11512_v30 = vld [vmem:[#allocation11 + $0x60] ss:$8 sps:$4 sm:$0xff]   ;;  %v11515_v42 = vld [vmem:[#allocation11 + $0x70] ss:$8 sps:$4 sm:$0xff]  }
 0xd30   :  { %4958 = vmatmul.mubr.bf16.gmra.mrb[140].mxu0 %v4890_v44  ;;  %10489 = vmatprep.mubr.bf16.mxu1 %v4893_v24  ;;  %v12708_v44 = vld [vmem:[#allocation10 + $0xa8] ss:$12 sps:$4 sm:$0xff]  }
 0xd31   :  { %10490 = vmatmul.mubr.bf16.gmra.mrb[236].mxu1 %v14302_v50  ;;  %4967 = vmatprep.mubr.bf16.mxu0 %v15516_v29 }
 0xd32   :  { %10506 = vmatpush3.bf16.msra.mxu1 %v12703_v52  ;;  %10509 = vmatprep.mubr.bf16.mxu1 %v14165_v14  ;;  %v11517_v52 = vld [vmem:[#allocation11 + $0x74] ss:$8 sps:$4 sm:$0xff]  }
 0xd33   :  { %10507 = vmatprep.subr.bf16.mxu1 %v12705_v60  ;;  %5118 = vmatpush1.bf16.msra.mxu0 %v12706_v39 }
 0xd34   :  { %5119 = vmatprep.subr.bf16.mxu0 %v12707_v32 }
 0xd36   :  { %10508 = vmatpush3.bf16.msra.mxu1 %v12705_v60 }
 0xd37   :  { %5787 = vmatprep.subr.bf16.mxu1 %v11472_v12  ;;  %5120 = vmatpush1.bf16.msra.mxu0 %v12708_v44 }
 0xd38   :  { %4968 = vmatmul.mubr.bf16.gmra.mrb[144].mxu0 %v4891_v10  ;;  %v15517_v10 = vld [vmem:[#allocation23_spill] sm:$0xff] }
 0xd39   :  { %10510 = vmatmul.mubr.bf16.vlgmr.msra.gmra.mrb[240].mxu1 %v14186_v16  ;;  %4977 = vmatprep.mubr.bf16.mxu0 %v15516_v29 }
 0xd3a   :  { %10513 = vmatprep.mubr.bf16.mxu1 %v14208_v17  ;;  %5788 = vmatpush1.bf16.msra.mxu1 %v11470_v21 }
 0xd3b   :  { %5789 = vmatprep.subr.bf16.mxu1 %v11475_v56 }
 0xd3e   :  { %5790 = vmatpush1.bf16.msra.mxu1 %v11473_v54 }
 0xd3f   :  { %5791 = vmatprep.subr.bf16.mxu1 %v11478_v59 }
 0xd40   :  { %4978 = vmatmul.mubr.bf16.gmra.mrb[148].mxu0 %v14298_v33  ;;  %v11493_v33 = vld [vmem:[#allocation13 + $0x74] ss:$8 sps:$4 sm:$0xff]  }
 0xd41   :  { %10514 = vmatmul.mubr.bf16.gmra.mrb[244].mxu1 %v14229_v58  ;;  %4987 = vmatprep.mubr.bf16.mxu0 %v15516_v29 }
 0xd42   :  { %10517 = vmatprep.mubr.bf16.mxu1 %v14255_v19  ;;  %5792 = vmatpush1.bf16.msra.mxu1 %v11476_v51 }
 0xd43   :  { %5793 = vmatprep.subr.bf16.mxu1 %v11481_v3 }
 0xd46   :  { %5794 = vmatpush1.bf16.msra.mxu1 %v11479_v26 }
 0xd47   :  { %5795 = vmatprep.subr.bf16.mxu1 %v11484_v61 }
 0xd48   :  { %4988 = vmatmul.mubr.bf16.gmra.mrb[152].mxu0 %v4893_v24  ;;  %v11514_v24 = vld [vmem:[#allocation11 + $0x64] ss:$8 sps:$4 sm:$0xff]  }
 0xd49   :  { %10518 = vmatmul.mubr.bf16.gmra.mrb[248].mxu1 %v14272_v41  ;;  %4997 = vmatprep.mubr.bf16.mxu0 %v15516_v29 }
 0xd4a   :  { %10521 = vmatprep.mubr.bf16.mxu1 %v14283_v37  ;;  %5796 = vmatpush1.bf16.msra.mxu1 %v11482_v57 }
 0xd4b   :  { %5797 = vmatprep.subr.bf16.mxu1 %v11487_v55 }
 0xd4e   :  { %5798 = vmatpush1.bf16.msra.mxu1 %v11485_v8 }
 0xd4f   :  { %5799 = vmatprep.subr.bf16.mxu1 %v11490_v25 }
 0xd50   :  { %4998 = vmatmul.mubr.bf16.gmra.mrb[156].mxu0 %v14302_v50  ;;  %v11511_v50 = vld [vmem:[#allocation11 + $0x54] ss:$8 sps:$4 sm:$0xff]  }
 0xd51   :  { %10522 = vmatmul.mubr.bf16.gmra.mrb[252].mxu1 %v14293_v18  ;;  %5137 = vmatprep.mubr.bf16.mxu0 %v15516_v29 }
 0xd52   :  { %5800 = vmatpush1.bf16.msra.mxu1 %v11488_v27  ;;  %5819 = vmatprep.mubr.bf16.mxu1 %v15516_v29 }
 0xd53   :  { %5801 = vmatprep.subr.bf16.mxu1 %v11493_v33 }
 0xd56   :  { %5802 = vmatpush1.bf16.msra.mxu1 %v11491_v0 }
 0xd57   :  { %5980 = vmatprep.subr.bf16.mxu1 %v11496_v5  ;;  %v11518_v5 = vld [vmem:[#allocation7] sm:$0xff]  }
 0xd58   :  { %5138 = vmatmul.mubr.bf16.vlgmr.msra.gmra.mrb[128].mxu0 %v14165_v14  ;;  %v15520_v14 = vld [vmem:[#allocation24_spill] sm:$0xff]  ;;  %10525 = vmatprep.subr.bf16.mxu0 %v11518_v5 }
 0xd59   :  { %5820 = vmatmul.mubr.bf16.vlgmr.msra.gmra.mrb[0].mxu1 %v15517_v10  ;;  %5147 = vmatprep.mubr.bf16.mxu0 %v15516_v29 }
 0xd5a   :  { %5829 = vmatprep.mubr.bf16.mxu1 %v15516_v29  ;;  %10526 = vmatpush3.bf16.msra.mxu0 %v11518_v5 }
 0xd60   :  { %5148 = vmatmul.mubr.bf16.gmra.mrb[132].mxu0 %v14186_v16  ;;  %v15521_v16 = vld [vmem:[#allocation32_spill] sm:$0xff] }
 0xd61   :  { %5830 = vmatmul.mubr.bf16.gmra.mrb[4].mxu1 %v15518_v46  ;;  %5157 = vmatprep.mubr.bf16.mxu0 %v15516_v29 }
 0xd62   :  { %5839 = vmatprep.mubr.bf16.mxu1 %v15516_v29 }
 0xd68   :  { %5158 = vmatmul.mubr.bf16.gmra.mrb[136].mxu0 %v14208_v17  ;;  %v15522_v17 = vld [vmem:[#allocation30_spill] sm:$0xff] }
 0xd69   :  { %5840 = vmatmul.mubr.bf16.gmra.mrb[8].mxu1 %v15519_v22  ;;  %5167 = vmatprep.mubr.bf16.mxu0 %v15516_v29 }
 0xd6a   :  { %5849 = vmatprep.mubr.bf16.mxu1 %v15516_v29 }
 0xd70   :  { %5168 = vmatmul.mubr.bf16.gmra.mrb[140].mxu0 %v14229_v58  ;;  %v15523_v58 = vld [vmem:[#allocation28_spill] sm:$0xff] }
 0xd71   :  { %5850 = vmatmul.mubr.bf16.gmra.mrb[12].mxu1 %v15520_v14  ;;  %5177 = vmatprep.mubr.bf16.mxu0 %v15516_v29 }
 0xd72   :  { %5859 = vmatprep.mubr.bf16.mxu1 %v15516_v29 }
 0xd78   :  { %5178 = vmatmul.mubr.bf16.gmra.mrb[144].mxu0 %v14255_v19  ;;  %v15524_v19 = vld [vmem:[#allocation35_spill] sm:$0xff] }
 0xd79   :  { %5860 = vmatmul.mubr.bf16.gmra.mrb[16].mxu1 %v15521_v16  ;;  %5187 = vmatprep.mubr.bf16.mxu0 %v15516_v29 }
 0xd7a   :  { %5869 = vmatprep.mubr.bf16.mxu1 %v15516_v29 }
 0xd80   :  { %5188 = vmatmul.mubr.bf16.gmra.mrb[148].mxu0 %v14272_v41  ;;  %v11494_v41 = vld [vmem:[#allocation11] ss:$8 sps:$4 sm:$0xff]  }
 0xd81   :  { %5870 = vmatmul.mubr.bf16.gmra.mrb[20].mxu1 %v15522_v17  ;;  %5197 = vmatprep.mubr.bf16.mxu0 %v15516_v29 }
 0xd82   :  { %5879 = vmatprep.mubr.bf16.mxu1 %v15516_v29  ;;  %5981 = vmatpush1.bf16.msra.mxu1 %v11494_v41 }
 0xd83   :  { %5982 = vmatprep.subr.bf16.mxu1 %v11499_v11 }
 0xd86   :  { %5983 = vmatpush1.bf16.msra.mxu1 %v11497_v4  ;;  %v11519_v4 = vld [vmem:[#allocation7 + $0x8] sm:$0xff]  }
 0xd87   :  { %10527 = vmatprep.subr.bf16.mxu0 %v11519_v4 }
 0xd88   :  { %5198 = vmatmul.mubr.bf16.gmra.mrb[152].mxu0 %v14283_v37  ;;  %v11502_v37 = vld [vmem:[#allocation11 + $0x24] ss:$8 sps:$4 sm:$0xff]  }
 0xd89   :  { %5880 = vmatmul.mubr.bf16.gmra.mrb[24].mxu1 %v15523_v58  ;;  %5207 = vmatprep.mubr.bf16.mxu0 %v15516_v29 }
 0xd8a   :  { %5889 = vmatprep.mubr.bf16.mxu1 %v15516_v29  ;;  %5984 = vmatprep.subr.bf16.mxu1 %v11502_v37 }
 0xd8b   :  { %5985 = vmatpush1.bf16.msra.mxu1 %v11500_v2  ;;  %10528 = vmatpush3.bf16.msra.mxu0 %v11519_v4  ;;  %v11522_v4 = vld [vmem:[#allocation7 + $0x20] sm:$0xff]  }
 0xd8c   :  { %5986 = vmatprep.subr.bf16.mxu1 %v11505_v9  ;;  %v11520_v9 = vld [vmem:[#allocation7 + $0x10] sm:$0xff]  }
 0xd8d   :  { %10529 = vmatprep.subr.bf16.mxu0 %v11520_v9 }
 0xd8f   :  { %5987 = vmatpush1.bf16.msra.mxu1 %v11503_v48  ;;  %10530 = vmatpush3.bf16.msra.mxu0 %v11520_v9 }
 0xd90   :  { %5208 = vmatmul.mubr.bf16.gmra.mrb[156].mxu0 %v14293_v18  ;;  %v11508_v18 = vld [vmem:[#allocation11 + $0x44] ss:$8 sps:$4 sm:$0xff]  }
 0xd91   :  { %5890 = vmatmul.mubr.bf16.gmra.mrb[28].mxu1 %v15524_v19  ;;  %5988 = vmatprep.subr.bf16.mxu1 %v11508_v18 }
 0xd92   :  { %6012 = vmatprep.mubr.bf16.mxu1 %v15516_v29 }
 0xd93   :  { %5989 = vmatpush1.bf16.msra.mxu1 %v11506_v47 }
 0xd94   :  { %5990 = vmatprep.subr.bf16.mxu1 %v11511_v50  ;;  %v11521_v50 = vld [vmem:[#allocation7 + $0x18] sm:$0xff]  }
 0xd95   :  { %10531 = vmatprep.subr.bf16.mxu0 %v11521_v50 }
 0xd96   :  { %10532 = vmatpush3.bf16.msra.mxu0 %v11521_v50 }
 0xd97   :  { %5991 = vmatpush1.bf16.msra.mxu1 %v11509_v53  ;;  %10533 = vmatprep.subr.bf16.mxu0 %v11522_v4 }
 0xd98   :  { %5992 = vmatprep.subr.bf16.mxu1 %v11514_v24 }
 0xd9a   :  { %10534 = vmatpush3.bf16.msra.mxu0 %v11522_v4 }
 0xd9b   :  { %5993 = vmatpush1.bf16.msra.mxu1 %v11512_v30 }
 0xd9c   :  { %5994 = vmatprep.subr.bf16.mxu1 %v11517_v52 }
 0xd9f   :  { %5995 = vmatpush1.bf16.msra.mxu1 %v11515_v42 }
 0xdec   :  { %v14352_v60 = vpop.f32.mrb[224].mxu1 }
 0xded   :  { %v14354_v12 = vpop.f32.mrb[225].mxu1 }
 0xdee   :  { %v14356_v39 = vpop.f32.mrb[226].mxu1 }
 0xdef   :  { %v14358_v32 = vpop.f32.mrb[227].mxu1 }
 0xdf4   :  { %v14360_v21 = vpop.f32.mrb[228].mxu1 }
 0xdf5   :  { %v14362_v56 = vpop.f32.mrb[229].mxu1 }
 0xdf6   :  { %v14364_v44 = vpop.f32.mrb[230].mxu1 }
 0xdf7   :  { %v14366_v54 = vpop.f32.mrb[231].mxu1 }
 0xdfc   :  { %v14368_v59 = vpop.f32.mrb[232].mxu1 }
 0xdfd   :  { %v14370_v51 = vpop.f32.mrb[233].mxu1 }
 0xdfe   :  { %v14372_v3 = vpop.f32.mrb[234].mxu1 }
 0xdff   :  { %v14374_v26 = vpop.f32.mrb[235].mxu1 }
 0xe04   :  { %v14376_v61 = vpop.f32.mrb[236].mxu1 }
 0xe05   :  { %15525 = vst [vmem:[#allocation37_spill] sm:$0xff] %v14376_v61  ;;  %v14378_v57 = vpop.f32.mrb[237].mxu1 }
 0xe06   :  { %v14380_v55 = vpop.f32.mrb[238].mxu1 }
 0xe07   :  { %15526 = vst [vmem:[#allocation27_spill] sm:$0xff] %v14380_v55  ;;  %v14382_v8 = vpop.f32.mrb[239].mxu1 }
 0xe08   :  { %15527 = vst [vmem:[#allocation33_spill] sm:$0xff] %v14382_v8 }
 0xe0c   :  { %v14384_v25 = vpop.f32.mrb[240].mxu1 }
 0xe0d   :  { %v14386_v27 = vpop.f32.mrb[241].mxu1 }
 0xe0e   :  { %v14388_v33 = vpop.f32.mrb[242].mxu1 }
 0xe0f   :  { %v14390_v0 = vpop.f32.mrb[243].mxu1 }
 0xe14   :  { %v14392_v10 = vpop.f32.mrb[244].mxu1 }
 0xe15   :  { %v14394_v46 = vpop.f32.mrb[245].mxu1 }
 0xe16   :  { %v14396_v22 = vpop.f32.mrb[246].mxu1 }
 0xe17   :  { %v14398_v14 = vpop.f32.mrb[247].mxu1 }
 0xe1c   :  { %v14400_v16 = vpop.f32.mrb[248].mxu1 }
 0xe1d   :  { %v14402_v17 = vpop.f32.mrb[249].mxu1 }
 0xe1e   :  { %v14404_v58 = vpop.f32.mrb[250].mxu1 }
 0xe1f   :  { %v14406_v19 = vpop.f32.mrb[251].mxu1 }
 0xe24   :  { %v14408_v41 = vpop.f32.mrb[252].mxu1 }
 0xe25   :  { %15528 = vst [vmem:[#allocation34_spill] sm:$0xff] %v14408_v41  ;;  %v14410_v11 = vpop.f32.mrb[253].mxu1 }
 0xe26   :  { %v14412_v37 = vpop.f32.mrb[254].mxu1 }
 0xe27   :  { %15529 = vst [vmem:[#allocation23_spill] sm:$0xff] %v14412_v37  ;;  %v14414_v2 = vpop.f32.mrb[255].mxu1 }
 0xe2b   :  { %v5139_v48 = vpop.f32.mrb[128].mxu0 }
 0xe2c   :  { %v10877_v18 = vadd.f32 %v5139_v48, %v14080_v1  ;;  %v5141_v47 = vpop.f32.mrb[129].mxu0 }
 0xe2d   :  { %v10878_v53 = vadd.f32 %v5141_v47, %v14083_v36  ;;  %v5143_v24 = vpop.f32.mrb[130].mxu0 }
 0xe2e   :  { %v9396_v30 = vmul.f32 -1.442695, %v10877_v18  ;;  %v10879_v52 = vadd.f32 %v5143_v24, %v14080_v1  ;;  %v5145_v42 = vpop.f32.mrb[131].mxu0 }
 0xe2f   :  { %v9412_v7 = vmul.f32 -1.442695, %v10878_v53  ;;  %v10880_v13 = vadd.f32 %v5145_v42, %v14083_v36 }
 0xe30   :  { %12134 = vpow2.f32 %v9396_v30  ;;  %v9397_v5 = vmul.f32 -1.442695, %v10879_v52 }
 0xe31   :  { %12136 = vpow2.f32 %v9412_v7  ;;  %v9413_v48 = vmul.f32 -1.442695, %v10880_v13 }
 0xe32   :  { %12138 = vpow2.f32 %v9397_v5 }
 0xe33   :  { %v5149_v45 = vpop.f32.mrb[132].mxu0  ;;  %12140 = vpow2.f32 %v9413_v48 }
 0xe34   :  { %v10881_v47 = vadd.f32 %v5149_v45, %v14080_v1  ;;  %v5151_v55 = vpop.f32.mrb[133].mxu0 }
 0xe35   :  { %v10882_v18 = vadd.f32 %v5151_v55, %v14083_v36  ;;  %v5153_v24 = vpop.f32.mrb[134].mxu0 }
 0xe36   :  { %v9398_v53 = vmul.f32 -1.442695, %v10881_v47  ;;  %v10883_v42 = vadd.f32 %v5153_v24, %v14080_v1  ;;  %v5155_v9 = vpop.f32.mrb[135].mxu0 }
 0xe37   :  { %v10884_v30 = vadd.f32 %v5155_v9, %v14083_v36  ;;  %v9414_v7 = vmul.f32 -1.442695, %v10882_v18 }
 0xe38   :  { %12142 = vpow2.f32 %v9398_v53  ;;  %v9399_v13 = vmul.f32 -1.442695, %v10883_v42 }
 0xe39   :  { %v9415_v50 = vmul.f32 -1.442695, %v10884_v30 }
 0xe3a   :  { %v12135_v52 = vpop.eup %12134  ;;  %12144 = vpow2.f32 %v9399_v13 }
 0xe3b   :  { %v12137_v45 = vpop.eup %12136  ;;  %v5379_v5 = vadd.f32 1.0, %v12135_v52  ;;  %v5159_v35 = vpop.f32.mrb[136].mxu0  ;;  %12146 = vpow2.f32 %v9414_v7 }
 0xe3c   :  { %v12139_v37 = vpop.eup %12138  ;;  %v10885_v55 = vadd.f32 %v5159_v35, %v14080_v1  ;;  %v5161_v47 = vpop.f32.mrb[137].mxu0  ;;  %v5491_v4 = vadd.f32 1.0, %v12137_v45 }
 0xe3d   :  { %12148 = vrcp.f32 %v5379_v5  ;;  %v5380_v24 = vadd.f32 1.0, %v12139_v37  ;;  %v10886_v48 = vadd.f32 %v5161_v47, %v14083_v36  ;;  %v5163_v9 = vpop.f32.mrb[138].mxu0  ;;  %v12141_v7 = vpop.eup %12140 }
 0xe3e   :  { %12150 = vpow2.f32 %v9415_v50  ;;  %v9400_v18 = vmul.f32 -1.442695, %v10885_v55  ;;  %v10887_v53 = vadd.f32 %v5163_v9, %v14080_v1  ;;  %v5165_v42 = vpop.f32.mrb[139].mxu0  ;;  %v5492_v45 = vadd.f32 1.0, %v12141_v7 }
 0xe3f   :  { %12152 = vrcp.f32 %v5380_v24  ;;  %v10888_v30 = vadd.f32 %v5165_v42, %v14083_v36  ;;  %v9416_v13 = vmul.f32 -1.442695, %v10886_v48 }
 0xe40   :  { %v9401_v52 = vmul.f32 -1.442695, %v10887_v53  ;;  %12154 = vpow2.f32 %v9400_v18 }
 0xe41   :  { %12156 = vrcp.f32 %v5491_v4  ;;  %v9417_v5 = vmul.f32 -1.442695, %v10888_v30  ;;  %v14433_v4 = vld [vmem:[%s15398_s6] ss:$0 sm:$0xff] }
 0xe42   :  { %v12143_v35 = vpop.eup %12142  ;;  %12158 = vpow2.f32 %v9401_v52  ;;  %v5539_v18 = vadd.f32 %v14433_v4, %v14386_v27  ;;  %v5046_v27 = vadd.f32 %v14358_v32, %v14098_v63 }
 0xe43   :  { %v5381_v37 = vadd.f32 1.0, %v12143_v35  ;;  %v5169_v47 = vpop.f32.mrb[140].mxu0  ;;  %12160 = vpow2.f32 %v9416_v13 }
 0xe44   :  { %v12145_v15 = vpop.eup %12144  ;;  %v10889_v50 = vadd.f32 %v5169_v47, %v14080_v1  ;;  %v5171_v55 = vpop.f32.mrb[141].mxu0 }
 0xe45   :  { %12162 = vrcp.f32 %v5381_v37  ;;  %v5382_v24 = vadd.f32 1.0, %v12145_v15  ;;  %v10890_v9 = vadd.f32 %v5171_v55, %v14083_v36  ;;  %v5173_v48 = vpop.f32.mrb[142].mxu0  ;;  %v12147_v53 = vpop.eup %12146  ;;  %v5043_v15 = vadd.f32 %v14354_v12, %v14098_v63 }
 0xe46   :  { %12164 = vpow2.f32 %v9417_v5  ;;  %v9402_v42 = vmul.f32 -1.442695, %v10889_v50  ;;  %v10891_v30 = vadd.f32 %v5173_v48, %v14080_v1  ;;  %v5175_v13 = vpop.f32.mrb[143].mxu0  ;;  %v5540_v37 = vadd.f32 %v14433_v4, %v14390_v0 }
 0xe47   :  { %v12149_v52 = vpop.eup %12148  ;;  %12166 = vrcp.f32 %v5382_v24  ;;  %v9418_v7 = vmul.f32 -1.442695, %v10890_v9  ;;  %v5493_v5 = vadd.f32 1.0, %v12147_v53  ;;  %v10892_v12 = vadd.f32 %v5175_v13, %v14083_v36 }
 0xe48   :  { %v12151_v35 = vpop.eup %12150  ;;  %v5555_v47 = vmul.f32 %v12149_v52, %v5539_v18  ;;  %12168 = vrcp.f32 %v5492_v45  ;;  %v9403_v55 = vmul.f32 -1.442695, %v10891_v30 }
 0xe49   :  { %v12153_v61 = vpop.eup %12152  ;;  %12170 = vpow2.f32 %v9402_v42  ;;  %v5494_v9 = vadd.f32 1.0, %v12151_v35  ;;  %v9419_v13 = vmul.f32 -1.442695, %v10892_v12  ;;  %v5051_v35 = vadd.f32 %v14352_v60, %v14098_v63 }
 0xe4a   :  { %v5571_v50 = vadd.f32 %v5555_v47, %v5043_v15  ;;  %v5556_v48 = vmul.f32 %v12153_v61, %v5540_v37  ;;  %12172 = vpow2.f32 %v9418_v7  ;;  %v12155_v24 = vpop.eup %12154  ;;  %v5541_v61 = vadd.f32 %v14433_v4, %v14384_v25 }
 0xe4b   :  { %12174 = vpow2.f32 %v9403_v55  ;;  %v5179_v41 = vpop.f32.mrb[144].mxu0  ;;  %v12157_v8 = vpop.eup %12156  ;;  %v5383_v45 = vadd.f32 1.0, %v12155_v24  ;;  %v5542_v55 = vadd.f32 %v14433_v4, %v14388_v33  ;;  %v14463_v33 = vadd.f32 %v14366_v54, %v14098_v63 }
 0xe4c   :  { %12176 = vtanh.f32 %v5571_v50  ;;  %v5572_v0 = vadd.f32 %v5556_v48, %v5046_v27  ;;  %v10893_v18 = vadd.f32 %v5179_v41, %v14080_v1  ;;  %v5181_v30 = vpop.f32.mrb[145].mxu0  ;;  %v12159_v52 = vpop.eup %12158  ;;  %v5054_v41 = vadd.f32 %v14356_v39, %v14098_v63 }
 0xe4d   :  { %12178 = vrcp.f32 %v5493_v5  ;;  %v5183_v32 = vpop.f32.mrb[146].mxu0  ;;  %v12161_v53 = vpop.eup %12160  ;;  %v5384_v42 = vadd.f32 1.0, %v12159_v52  ;;  %v14456_v5 = vadd.f32 %v14360_v21, %v14098_v63  ;;  %v5059_v50 = vadd.f32 %v14362_v56, %v14098_v63 }
 0xe4e   :  { %12180 = vtanh.f32 %v5572_v0  ;;  %v5185_v15 = vpop.f32.mrb[147].mxu0  ;;  %v9404_v37 = vmul.f32 -1.442695, %v10893_v18  ;;  %v5495_v60 = vadd.f32 1.0, %v12161_v53  ;;  %v10894_v39 = vadd.f32 %v5181_v30, %v14083_v36 }
 0xe4f   :  { %v12163_v7 = vpop.eup %12162  ;;  %12182 = vrcp.f32 %v5383_v45  ;;  %v5543_v21 = vadd.f32 %v14433_v4, %v14394_v46  ;;  %v5603_v30 = vsub.f32 1.0, %v12157_v8 }
 0xe50   :  { %v12165_v47 = vpop.eup %12164  ;;  %v5557_v27 = vmul.f32 %v12163_v7, %v5541_v61  ;;  %12184 = vrcp.f32 %v5494_v9  ;;  %v10895_v9 = vadd.f32 %v5183_v32, %v14080_v1  ;;  %v9420_v32 = vmul.f32 -1.442695, %v10894_v39 }
 0xe51   :  { %v12167_v25 = vpop.eup %12166  ;;  %12186 = vrcp.f32 %v5384_v42  ;;  %v5496_v52 = vadd.f32 1.0, %v12165_v47 }
 0xe52   :  { %v12169_v48 = vpop.eup %12168  ;;  %v5573_v12 = vadd.f32 %v5557_v27, %v5051_v35  ;;  %v5558_v24 = vmul.f32 %v12167_v25, %v5542_v55  ;;  %12188 = vpow2.f32 %v9419_v13  ;;  %v5635_v13 = vmul.f32 %v12157_v8, %v14152_v28 }
 0xe53   :  { %v12171_v0 = vpop.eup %12170  ;;  %12190 = vpow2.f32 %v9404_v37  ;;  %v5189_v56 = vpop.f32.mrb[148].mxu0  ;;  %v5604_v46 = vsub.f32 1.0, %v12169_v48  ;;  %v9405_v47 = vmul.f32 -1.442695, %v10895_v9  ;;  %v5544_v28 = vadd.f32 %v14433_v4, %v14398_v14 }
 0xe54   :  { %v12173_v45 = vpop.eup %12172  ;;  %12192 = vtanh.f32 %v5573_v12  ;;  %v5574_v18 = vadd.f32 %v5558_v24, %v5054_v41  ;;  %v5385_v53 = vadd.f32 1.0, %v12171_v0  ;;  %v5191_v61 = vpop.f32.mrb[149].mxu0  ;;  %v10897_v54 = vadd.f32 %v5189_v56, %v14080_v1 }
 0xe55   :  { %v12175_v42 = vpop.eup %12174  ;;  %12194 = vrcp.f32 %v5495_v60  ;;  %v5193_v7 = vpop.f32.mrb[150].mxu0  ;;  %v10896_v41 = vadd.f32 %v5185_v15, %v14083_v36  ;;  %v5636_v8 = vmul.f32 %v12169_v48, %v14158_v62  ;;  %v5497_v60 = vadd.f32 1.0, %v12173_v45 }
 0xe56   :  { %v12177_v35 = vpop.eup %12176  ;;  %12196 = vtanh.f32 %v5574_v18  ;;  %v5386_v37 = vadd.f32 1.0, %v12175_v42  ;;  %v5195_v55 = vpop.f32.mrb[151].mxu0  ;;  %v9406_v39 = vmul.f32 -1.442695, %v10897_v54  ;;  %v10898_v9 = vadd.f32 %v5191_v61, %v14083_v36 }
 0xe57   :  { %v12179_v27 = vpop.eup %12178  ;;  %v5619_v25 = vmul.f32 %v12177_v35, %v5603_v30  ;;  %12198 = vrcp.f32 %v5385_v53  ;;  %v9421_v35 = vmul.f32 -1.442695, %v10896_v41  ;;  %v10899_v14 = vadd.f32 %v5193_v7, %v14080_v1 }
 0xe58   :  { %v12181_v12 = vpop.eup %12180  ;;  %12200 = vrcp.f32 %v5496_v52  ;;  %v5605_v42 = vsub.f32 1.0, %v12179_v27  ;;  %v5637_v45 = vmul.f32 %v12179_v27, %v14176_v20  ;;  %v9422_v41 = vmul.f32 -1.442695, %v10898_v9 }
 0xe59   :  { %v12183_v24 = vpop.eup %12182  ;;  %v5651_v0 = vadd.f32 %v5635_v13, %v5619_v25  ;;  %v5620_v56 = vmul.f32 %v12181_v12, %v5604_v46  ;;  %12202 = vrcp.f32 %v5386_v37  ;;  %v9407_v27 = vmul.f32 -1.442695, %v10899_v14 }
 0xe5a   :  { %v12185_v18 = vpop.eup %12184  ;;  %v5559_v30 = vmul.f32 %v12183_v24, %v5543_v21  ;;  %12204 = vpow2.f32 %v9420_v32  ;;  %v5070_v14 = vadd.f32 %v14364_v44, %v14098_v63 }
 0xe5b   :  { %v12187_v15 = vpop.eup %12186  ;;  %v5652_v53 = vadd.f32 %v5636_v8, %v5620_v56  ;;  %12206 = vpow2.f32 %v9405_v47  ;;  %v5199_v62 = vpop.f32.mrb[152].mxu0  ;;  %v5606_v21 = vsub.f32 1.0, %v12185_v18  ;;  %v5638_v24 = vmul.f32 %v12185_v18, %v14178_v38 }
 0xe5c   :  { %v12189_v48 = vpop.eup %12188  ;;  %v5575_v52 = vadd.f32 %v5559_v30, %v5059_v50  ;;  %v5560_v13 = vmul.f32 %v12187_v15, %v5544_v28  ;;  %12208 = vrcp.f32 %v5497_v60  ;;  %v5201_v54 = vpop.f32.mrb[153].mxu0  ;;  %v10901_v61 = vadd.f32 %v5199_v62, %v14080_v1 }
 0xe5d   :  { %v12191_v46 = vpop.eup %12190  ;;  %v5683_v37 = vpack.c.bf16 %v5652_v53, %v5651_v0  ;;  %12210 = vpow2.f32 %v9406_v39  ;;  %v5203_v32 = vpop.f32.mrb[154].mxu0  ;;  %v10900_v28 = vadd.f32 %v5195_v55, %v14083_v36  ;;  %v5545_v60 = vadd.f32 %v14433_v4, %v14392_v10 }
 0xe5e   :  { %v12193_v25 = vpop.eup %12192  ;;  %12212 = vtanh.f32 %v5575_v52  ;;  %v5576_v47 = vadd.f32 %v5560_v13, %v14463_v33  ;;  %v5387_v7 = vadd.f32 1.0, %v12191_v46  ;;  %v14479_v12 = vpop.f32.mrb[155].mxu0  ;;  %v5498_v0 = vadd.f32 1.0, %v12189_v48 }
 0xe5f   :  { %v12195_v20 = vpop.eup %12194  ;;  %v5621_v50 = vmul.f32 %v12193_v25, %v5605_v42  ;;  %12214 = vpow2.f32 %v9421_v35  ;;  %6013 = vmatmul.mubr.bf16.vlgmr.msra.gmra.mrb[0].mxu1 %v5683_v37  ;;  %v9408_v42 = vmul.f32 -1.442695, %v10901_v61  ;;  %v5546_v55 = vadd.f32 %v14433_v4, %v14396_v22 }
 0xe60   :  { %v12197_v8 = vpop.eup %12196  ;;  %12216 = vtanh.f32 %v5576_v47  ;;  %6022 = vmatprep.mubr.bf16.mxu1 %v15516_v29  ;;  %v10902_v15 = vadd.f32 %v5201_v54, %v14083_v36  ;;  %v9423_v38 = vmul.f32 -1.442695, %v10900_v28  ;;  %v10903_v13 = vadd.f32 %v5203_v32, %v14080_v1 }
 0xe61   :  { %v12199_v33 = vpop.eup %12198  ;;  %v5653_v56 = vadd.f32 %v5637_v45, %v5621_v50  ;;  %v5622_v39 = vmul.f32 %v12197_v8, %v5606_v21  ;;  %12218 = vrcp.f32 %v5387_v7  ;;  %v5607_v44 = vsub.f32 1.0, %v12195_v20 }
 0xe62   :  { %v12201_v30 = vpop.eup %12200  ;;  %v5561_v9 = vmul.f32 %v12199_v33, %v5545_v60  ;;  %12220 = vpow2.f32 %v9422_v41  ;;  %v9424_v61 = vmul.f32 -1.442695, %v10902_v15  ;;  %v5639_v41 = vmul.f32 %v12195_v20, %v14196_v43 }
 0xe63   :  { %v12203_v10 = vpop.eup %12202  ;;  %v5654_v53 = vadd.f32 %v5638_v24, %v5622_v39  ;;  %12222 = vpow2.f32 %v9407_v27  ;;  %v5209_v18 = vpop.f32.mrb[156].mxu0  ;;  %v5608_v8 = vsub.f32 1.0, %v12201_v30  ;;  %v9409_v60 = vmul.f32 -1.442695, %v10903_v13 }
 0xe64   :  { %v12205_v35 = vpop.eup %12204  ;;  %v5577_v62 = vadd.f32 %v5561_v9, %v14456_v5  ;;  %v5562_v48 = vmul.f32 %v12203_v10, %v5546_v55  ;;  %12224 = vrcp.f32 %v5498_v0  ;;  %v5211_v45 = vpop.f32.mrb[157].mxu0  ;;  %v10905_v5 = vadd.f32 %v5209_v18, %v14080_v1 }
 0xe65   :  { %v12207_v52 = vpop.eup %12206  ;;  %v5684_v22 = vpack.c.bf16 %v5654_v53, %v5653_v56  ;;  %12226 = vpow2.f32 %v9408_v42  ;;  %v5213_v54 = vpop.f32.mrb[158].mxu0  ;;  %v5499_v50 = vadd.f32 1.0, %v12205_v35  ;;  %v5547_v0 = vadd.f32 %v14433_v4, %v14402_v17 }
 0xe66   :  { %v12209_v46 = vpop.eup %12208  ;;  %12228 = vtanh.f32 %v5577_v62  ;;  %v5578_v37 = vadd.f32 %v5562_v48, %v5070_v14  ;;  %v5388_v21 = vadd.f32 1.0, %v12207_v52  ;;  %v14493_v25 = vpop.f32.mrb[159].mxu0  ;;  %v5640_v33 = vmul.f32 %v12201_v30, %v14203_v49 }
 0xe67   :  { %v12211_v47 = vpop.eup %12210  ;;  %12230 = vpow2.f32 %v9423_v38  ;;  %6023 = vmatmul.mubr.bf16.gmra.mrb[4].mxu1 %v5684_v22  ;;  %v9410_v20 = vmul.f32 -1.442695, %v10905_v5  ;;  %v5075_v55 = vadd.f32 %v14370_v51, %v14098_v63  ;;  %v10904_v15 = vadd.f32 %v14479_v12, %v14083_v36 }
 0xe68   :  { %v12213_v7 = vpop.eup %12212  ;;  %12232 = vtanh.f32 %v5578_v37  ;;  %v5389_v32 = vadd.f32 1.0, %v12211_v47  ;;  %6032 = vmatprep.mubr.bf16.mxu1 %v15516_v29  ;;  %v10907_v18 = vadd.f32 %v5213_v54, %v14080_v1  ;;  %v5609_v62 = vsub.f32 1.0, %v12209_v46 }
 0xe69   :  { %v12215_v27 = vpop.eup %12214  ;;  %v5623_v28 = vmul.f32 %v12213_v7, %v5607_v44  ;;  %12234 = vrcp.f32 %v5388_v21  ;;  %v10906_v51 = vadd.f32 %v5211_v45, %v14083_v36  ;;  %v9425_v12 = vmul.f32 -1.442695, %v10904_v15 }
 0xe6a   :  { %v12217_v24 = vpop.eup %12216  ;;  %12236 = vpow2.f32 %v9424_v61  ;;  %v5500_v30 = vadd.f32 1.0, %v12215_v27  ;;  %v5641_v21 = vmul.f32 %v12209_v46, %v14215_v23  ;;  %v5548_v1 = vadd.f32 %v14433_v4, %v14406_v19 }
 0xe6b   :  { %v12219_v56 = vpop.eup %12218  ;;  %v5655_v39 = vadd.f32 %v5639_v41, %v5623_v28  ;;  %v5624_v43 = vmul.f32 %v12217_v24, %v5608_v8  ;;  %12238 = vrcp.f32 %v5389_v32  ;;  %v9411_v45 = vmul.f32 -1.442695, %v10907_v18 }
 0xe6c   :  { %v12221_v42 = vpop.eup %12220  ;;  %v5563_v9 = vmul.f32 %v12219_v56, %v5547_v0  ;;  %12240 = vrcp.f32 %v5499_v50  ;;  %v9426_v41 = vmul.f32 -1.442695, %v10906_v51  ;;  %v5078_v23 = vadd.f32 %v14374_v26, %v14098_v63 }
 0xe6d   :  { %v12223_v10 = vpop.eup %12222  ;;  %v5656_v53 = vadd.f32 %v5640_v33, %v5624_v43  ;;  %12242 = vpow2.f32 %v9409_v60  ;;  %v5501_v52 = vadd.f32 1.0, %v12221_v42  ;;  %v5549_v46 = vadd.f32 %v14433_v4, %v14400_v16 }
 0xe6e   :  { %v12225_v17 = vpop.eup %12224  ;;  %v5579_v49 = vadd.f32 %v5563_v9, %v5075_v55  ;;  %v5390_v38 = vadd.f32 1.0, %v12223_v10  ;;  %12244 = vpow2.f32 %v9410_v20  ;;  %v10908_v0 = vadd.f32 %v14493_v25, %v14083_v36 }
 0xe6f   :  { %v12227_v35 = vpop.eup %12226  ;;  %v5685_v14 = vpack.c.bf16 %v5656_v53, %v5655_v39  ;;  %v5610_v61 = vsub.f32 1.0, %v12225_v17  ;;  %v5642_v54 = vmul.f32 %v12225_v17, %v14223_v6  ;;  %v5083_v6 = vadd.f32 %v14368_v59, %v14098_v63 }
 0xe70   :  { %v12229_v48 = vpop.eup %12228  ;;  %12246 = vtanh.f32 %v5579_v49  ;;  %v5391_v22 = vadd.f32 1.0, %v12227_v35  ;;  %v5550_v42 = vadd.f32 %v14433_v4, %v14404_v58  ;;  %v9427_v9 = vmul.f32 -1.442695, %v10908_v0 }
 0xe71   :  { %v12231_v13 = vpop.eup %12230  ;;  %v5625_v37 = vmul.f32 %v12229_v48, %v5609_v62  ;;  %12248 = vrcp.f32 %v5390_v38  ;;  %6033 = vmatmul.mubr.bf16.gmra.mrb[8].mxu1 %v5685_v14  ;;  %v5086_v53 = vadd.f32 %v14372_v3, %v14098_v63  ;;  %v5551_v17 = vadd.f32 %v14433_v4, %v14410_v11 }
 0xe72   :  { %v12233_v47 = vpop.eup %12232  ;;  %12250 = vrcp.f32 %v5500_v30  ;;  %6042 = vmatprep.mubr.bf16.mxu1 %v15516_v29  ;;  %v5502_v28 = vadd.f32 1.0, %v12231_v13  ;;  %v5091_v18 = vadd.f32 %v14378_v57, %v14098_v63  ;;  %v5552_v57 = vadd.f32 %v14433_v4, %v14414_v2 }
 0xe73   :  { %v12235_v44 = vpop.eup %12234  ;;  %v5657_v5 = vadd.f32 %v5641_v21, %v5625_v37  ;;  %v5626_v7 = vmul.f32 %v12233_v47, %v5610_v61  ;;  %12252 = vrcp.f32 %v5391_v22 }
 0xe74   :  { %v12237_v50 = vpop.eup %12236  ;;  %v5564_v32 = vmul.f32 %v12235_v44, %v5548_v1  ;;  %12254 = vrcp.f32 %v5501_v52 }
 0xe75   :  { %v12239_v19 = vpop.eup %12238  ;;  %v5658_v27 = vadd.f32 %v5642_v54, %v5626_v7  ;;  %12256 = vpow2.f32 %v9425_v12  ;;  %v5503_v56 = vadd.f32 1.0, %v12237_v50  ;;  %v15530_v7 = vld [vmem:[#allocation33_spill] sm:$0xff]  ;;  %v15531_v50 = vld [vmem:[#allocation34_spill] sm:$0xff] }
 0xe76   :  { %v12241_v8 = vpop.eup %12240  ;;  %v5580_v60 = vadd.f32 %v5564_v32, %v5078_v23  ;;  %v5565_v24 = vmul.f32 %v12239_v19, %v5549_v46  ;;  %12258 = vpow2.f32 %v9411_v45  ;;  %v5553_v23 = vadd.f32 %v14433_v4, %v15531_v50 }
 0xe77   :  { %v12243_v26 = vpop.eup %12242  ;;  %v5686_v33 = vpack.c.bf16 %v5658_v27, %v5657_v5  ;;  %12260 = vpow2.f32 %v9426_v41  ;;  %v5611_v20 = vsub.f32 1.0, %v12241_v8  ;;  %v5643_v15 = vmul.f32 %v12241_v8, %v14239_v40 }
 0xe78   :  { %12262 = vtanh.f32 %v5580_v60  ;;  %v5581_v16 = vadd.f32 %v5565_v24, %v5083_v6  ;;  %v5392_v39 = vadd.f32 1.0, %v12243_v26  ;;  %v12245_v43 = vpop.eup %12244  ;;  %v5094_v41 = vadd.f32 %v15530_v7, %v14098_v63  ;;  %v15532_v6 = vld [vmem:[#allocation37_spill] sm:$0xff]  ;;  %v15533_v26 = vld [vmem:[#allocation38_spill] sm:$0xff] }
 0xe79   :  { %12264 = vrcp.f32 %v5502_v28  ;;  %6043 = vmatmul.mubr.bf16.gmra.mrb[12].mxu1 %v5686_v33  ;;  %v5393_v55 = vadd.f32 1.0, %v12245_v43  ;;  %v5099_v27 = vadd.f32 %v15532_v6, %v14098_v63  ;;  %v15534_v43 = vld [vmem:[#allocation23_spill] sm:$0xff] }
 0xe7a   :  { %v12247_v59 = vpop.eup %12246  ;;  %12266 = vtanh.f32 %v5581_v16  ;;  %6052 = vmatprep.mubr.bf16.mxu1 %v15516_v29 }
 0xe7b   :  { %v12249_v36 = vpop.eup %12248  ;;  %v5627_v25 = vmul.f32 %v12247_v59, %v5611_v20  ;;  %12268 = vrcp.f32 %v5392_v39  ;;  %v5554_v20 = vadd.f32 %v14433_v4, %v15534_v43 }
 0xe7c   :  { %v12251_v10 = vpop.eup %12250  ;;  %v5566_v49 = vmul.f32 %v12249_v36, %v5550_v42  ;;  %12270 = vrcp.f32 %v5503_v56 }
 0xe7d   :  { %v12253_v58 = vpop.eup %12252  ;;  %v5659_v30 = vadd.f32 %v5643_v15, %v5627_v25  ;;  %12272 = vrcp.f32 %v5393_v55  ;;  %v5612_v48 = vsub.f32 1.0, %v12251_v10  ;;  %v5644_v37 = vmul.f32 %v12251_v10, %v14246_v34  ;;  %v15535_v55 = vld [vmem:[#allocation36_spill] sm:$0xff]  ;;  %v15536_v25 = vld [vmem:[#allocation27_spill] sm:$0xff] }
 0xe7e   :  { %v12255_v38 = vpop.eup %12254  ;;  %v5582_v35 = vadd.f32 %v5566_v49, %v5086_v53  ;;  %v5567_v14 = vmul.f32 %v12253_v58, %v5551_v17  ;;  %12274 = vpow2.f32 %v9427_v9  ;;  %v5102_v15 = vadd.f32 %v15536_v25, %v14098_v63 }
 0xe7f   :  { %v12257_v40 = vpop.eup %12256  ;;  %v5613_v21 = vsub.f32 1.0, %v12255_v38  ;;  %v5645_v44 = vmul.f32 %v12255_v38, %v14257_v31 }
 0xe80   :  { %v12259_v62 = vpop.eup %12258  ;;  %12276 = vtanh.f32 %v5582_v35  ;;  %v5583_v51 = vadd.f32 %v5567_v14, %v5091_v18  ;;  %v5504_v22 = vadd.f32 1.0, %v12257_v40  ;;  %v15537_v35 = vld [vmem:[#allocation25_spill] sm:$0xff] }
 0xe81   :  { %v12261_v3 = vpop.eup %12260  ;;  %v5394_v52 = vadd.f32 1.0, %v12259_v62 }
 0xe82   :  { %v12263_v11 = vpop.eup %12262  ;;  %12278 = vtanh.f32 %v5583_v51  ;;  %v5505_v47 = vadd.f32 1.0, %v12261_v3  ;;  %v15538_v3 = vld [vmem:[#allocation39_spill] sm:$0xff] }
 0xe83   :  { %v12265_v12 = vpop.eup %12264  ;;  %v5628_v13 = vmul.f32 %v12263_v11, %v5612_v48  ;;  %12280 = vrcp.f32 %v5394_v52 }
 0xe84   :  { %v12267_v61 = vpop.eup %12266  ;;  %12282 = vrcp.f32 %v5504_v22  ;;  %v5614_v31 = vsub.f32 1.0, %v12265_v12  ;;  %v5646_v33 = vmul.f32 %v12265_v12, %v15533_v26 }
 0xe85   :  { %v12269_v1 = vpop.eup %12268  ;;  %v5660_v54 = vadd.f32 %v5644_v37, %v5628_v13  ;;  %v5629_v45 = vmul.f32 %v12267_v61, %v5613_v21  ;;  %12284 = vrcp.f32 %v5505_v47  ;;  %v15539_v21 = vld [vmem:[#allocation26_spill] sm:$0xff] }
 0xe86   :  { %v12271_v5 = vpop.eup %12270  ;;  %v5568_v34 = vmul.f32 %v12269_v1, %v5552_v57  ;;  %v11523_v1 = vld [vmem:[#allocation7 + $0x28] sm:$0xff]  }
 0xe87   :  { %v12273_v46 = vpop.eup %12272  ;;  %v5687_v32 = vpack.c.bf16 %v5660_v54, %v5659_v30  ;;  %v5661_v19 = vadd.f32 %v5645_v44, %v5629_v45  ;;  %v5615_v16 = vsub.f32 1.0, %v12271_v5  ;;  %v5647_v9 = vmul.f32 %v12271_v5, %v15535_v55  ;;  %v11524_v54 = vld [vmem:[#allocation7 + $0x30] sm:$0xff]   ;;  %10535 = vmatprep.subr.bf16.mxu0 %v11523_v1  ;;  %v11525_v45 = vld [vmem:[#allocation7 + $0x38] sm:$0xff]   ;;  %v6093_v44 = vld [vmem:[%s15401_s9] sm:$0x3] }
 0xe88   :  { %v12275_v2 = vpop.eup %12274  ;;  %v5584_v28 = vadd.f32 %v5568_v34, %v5094_v41  ;;  %v5569_v8 = vmul.f32 %v12273_v46, %v5553_v23  ;;  %10536 = vmatpush3.bf16.msra.mxu0 %v11523_v1  ;;  %v15540_v5 = vld [vmem:[#allocation21_spill] sm:$0xff]  ;;  %v15541_v41 = vld [vmem:[#allocation20_spill] sm:$0xff] }
 0xe89   :  { %6053 = vmatmul.mubr.bf16.gmra.mrb[16].mxu1 %v5687_v32  ;;  %v5506_v56 = vadd.f32 1.0, %v12275_v2  ;;  %10537 = vmatprep.subr.bf16.mxu0 %v11524_v54  ;;  %v14556_v7 = vrot.slane %v6093_v44, %v15540_v5  ;;  %v14559_v50 = vrot.slane %v6093_v44, %v15541_v41 }
 0xe8a   :  { %v12277_v60 = vpop.eup %12276  ;;  %12286 = vtanh.f32 %v5584_v28  ;;  %v5585_v24 = vadd.f32 %v5569_v8, %v5099_v27  ;;  %6062 = vmatprep.mubr.bf16.mxu1 %v15516_v29 }
 0xe8b   :  { %v5630_v0 = vmul.f32 %v12277_v60, %v5614_v31 }
 0xe8c   :  { %v12279_v39 = vpop.eup %12278  ;;  %12288 = vtanh.f32 %v5585_v24  ;;  %10538 = vmatpush3.bf16.msra.mxu0 %v11524_v54 }
 0xe8d   :  { %v5662_v59 = vadd.f32 %v5646_v33, %v5630_v0  ;;  %v5631_v42 = vmul.f32 %v12279_v39, %v5615_v16  ;;  %v12281_v36 = vpop.eup %12280  ;;  %12290 = vrcp.f32 %v5506_v56  ;;  %10539 = vmatprep.subr.bf16.mxu0 %v11525_v45 }
 0xe8e   :  { %v5570_v17 = vmul.f32 %v12281_v36, %v5554_v20  ;;  %v12283_v49 = vpop.eup %12282 }
 0xe8f   :  { %v5688_v10 = vpack.c.bf16 %v5662_v59, %v5661_v19  ;;  %v5663_v53 = vadd.f32 %v5647_v9, %v5631_v42  ;;  %v12285_v30 = vpop.eup %12284  ;;  %v5616_v38 = vsub.f32 1.0, %v12283_v49  ;;  %v5648_v14 = vmul.f32 %v12283_v49, %v15537_v35 }
 0xe90   :  { %v5586_v58 = vadd.f32 %v5570_v17, %v5102_v15  ;;  %v5617_v40 = vsub.f32 1.0, %v12285_v30  ;;  %v5649_v48 = vmul.f32 %v12285_v30, %v15538_v3  ;;  %10540 = vmatpush3.bf16.msra.mxu0 %v11525_v45 }
 0xe91   :  { %6063 = vmatmul.mubr.bf16.gmra.mrb[20].mxu1 %v5688_v10 }
 0xe92   :  { %6072 = vmatprep.mubr.bf16.mxu1 %v15516_v29  ;;  %12292 = vtanh.f32 %v5586_v58 }
 0xe94   :  { %v12287_v4 = vpop.eup %12286 }
 0xe95   :  { %v5632_v18 = vmul.f32 %v12287_v4, %v5616_v38 }
 0xe96   :  { %v12289_v62 = vpop.eup %12288 }
 0xe97   :  { %v5664_v51 = vadd.f32 %v5648_v14, %v5632_v18  ;;  %v5633_v63 = vmul.f32 %v12289_v62, %v5617_v40  ;;  %v12291_v52 = vpop.eup %12290 }
 0xe98   :  { %v5618_v12 = vsub.f32 1.0, %v12291_v52  ;;  %v5650_v61 = vmul.f32 %v12291_v52, %v15539_v21 }
 0xe99   :  { %v5689_v11 = vpack.c.bf16 %v5664_v51, %v5663_v53  ;;  %v5665_v22 = vadd.f32 %v5649_v48, %v5633_v63 }
 0xe9b   :  { %6073 = vmatmul.mubr.bf16.gmra.mrb[24].mxu1 %v5689_v11 }
 0xe9c   :  { %6082 = vmatprep.mubr.bf16.mxu1 %v15516_v29  ;;  %v12293_v13 = vpop.eup %12292 }
 0xe9d   :  { %v5634_v37 = vmul.f32 %v12293_v13, %v5618_v12 }
 0xe9f   :  { %v5666_v57 = vadd.f32 %v5650_v61, %v5634_v37 }
 0xea1   :  { %v5690_v47 = vpack.c.bf16 %v5666_v57, %v5665_v22 }
 0xea3   :  { %6083 = vmatmul.mubr.bf16.gmra.mrb[28].mxu1 %v5690_v47 }
 0xf32   :  { %v6014_v23 = vpop.f32.mrb[0].mxu1 }
 0xf33   :  { %v6016_v34 = vpop.f32.mrb[1].mxu1  ;;  %v14563_v19 = vadd.f32 %v14559_v50, %v6014_v23 }
 0xf34   :  { %v6106_v46 = vadd.f32 %v14556_v7, %v6016_v34  ;;  %v6018_v32 = vpop.f32.mrb[2].mxu1 }
 0xf35   :  { %v14566_v2 = vadd.f32 %v14559_v50, %v6018_v32  ;;  %v6020_v6 = vpop.f32.mrb[3].mxu1 }
 0xf36   :  { %6137 = vst [vmem:[#allocation14 + $0x8] sm:$0xff] %v6106_v46  ;;  %v6108_v27 = vadd.f32 %v14556_v7, %v6020_v6 }
 0xf37   :  { %v14571_v28 = vpack.c.bf16 %v14566_v2, %v14563_v19 }
 0xf38   :  { %6138 = vst [vmem:[#allocation14 + $0x20] sm:$0xff] %v6108_v27 }
 0xf39   :  { %15542 = vst [vmem:[#allocation31_spill] sm:$0xff] %v14571_v28  ;;  %10541 = vmatprep.mubr.bf16.mxu0 %v14571_v28 }
 0xf3a   :  { %v6024_v8 = vpop.f32.mrb[4].mxu1 }
 0xf3b   :  { %v6026_v31 = vpop.f32.mrb[5].mxu1  ;;  %v14576_v0 = vadd.f32 %v14559_v50, %v6024_v8 }
 0xf3c   :  { %v6110_v60 = vadd.f32 %v14556_v7, %v6026_v31  ;;  %v6028_v24 = vpop.f32.mrb[6].mxu1 }
 0xf3d   :  { %v14579_v26 = vadd.f32 %v14559_v50, %v6028_v24  ;;  %v6030_v33 = vpop.f32.mrb[7].mxu1 }
 0xf3e   :  { %6139 = vst [vmem:[#allocation14 + $0x38] sm:$0xff] %v6110_v60  ;;  %v6112_v16 = vadd.f32 %v14556_v7, %v6030_v33 }
 0xf3f   :  { %v14584_v56 = vpack.c.bf16 %v14579_v26, %v14576_v0 }
 0xf40   :  { %6140 = vst [vmem:[#allocation14 + $0x50] sm:$0xff] %v6112_v16 }
 0xf41   :  { %15543 = vst [vmem:[#allocation29_spill] sm:$0xff] %v14584_v56  ;;  %10542 = vmatmul.mubr.bf16.vlgmr.msra.gmra.mrb[160].mxu0 %v14584_v56 }
 0xf44   :  { %v6034_v39 = vpop.f32.mrb[8].mxu1 }
 0xf45   :  { %v6036_v43 = vpop.f32.mrb[9].mxu1  ;;  %v14589_v42 = vadd.f32 %v14559_v50, %v6034_v39 }
 0xf46   :  { %v6114_v20 = vadd.f32 %v14556_v7, %v6036_v43  ;;  %v6038_v59 = vpop.f32.mrb[10].mxu1  ;;  %v11526_v43 = vld [vmem:[#allocation2] sm:$0xff]  }
 0xf47   :  { %v14592_v55 = vadd.f32 %v14559_v50, %v6038_v59  ;;  %v6040_v9 = vpop.f32.mrb[11].mxu1  ;;  %v11541_v59 = vld [vmem:[#allocation8 + $0x20] ss:$12 sps:$4 sm:$0xff]  }
 0xf48   :  { %6141 = vst [vmem:[#allocation14 + $0x68] sm:$0xff] %v6114_v20  ;;  %v6116_v36 = vadd.f32 %v14556_v7, %v6040_v9  ;;  %v11537_v20 = vld [vmem:[#allocation8 + $0x8] ss:$12 sps:$4 sm:$0xff]   ;;  %v11549_v9 = vld [vmem:[#allocation8 + $0x50] ss:$12 sps:$4 sm:$0xff]  }
 0xf49   :  { %v14597_v25 = vpack.c.bf16 %v14592_v55, %v14589_v42  ;;  %10589 = vmatprep.subr.bf16.mxu1 %v11537_v20 }
 0xf4a   :  { %6142 = vst [vmem:[#allocation14 + $0x80] sm:$0xff] %v6116_v36  ;;  %10590 = vmatpush3.bf16.msra.mxu1 %v11537_v20  ;;  %v11557_v36 = vld [vmem:[#allocation8 + $0x80] ss:$12 sps:$4 sm:$0xff]  }
 0xf4b   :  { %15544 = vst [vmem:[#allocation24_spill] sm:$0xff] %v14597_v25  ;;  %10545 = vmatprep.mubr.bf16.mxu0 %v14597_v25  ;;  %10591 = vmatprep.subr.bf16.mxu1 %v11541_v59  ;;  %v14676_v20 = vld [vmem:[#allocation8 + $0x34] ss:$12 sps:$4 sm:$0xff]  }
 0xf4c   :  { %v6044_v15 = vpop.f32.mrb[12].mxu1 }
 0xf4d   :  { %v6046_v10 = vpop.f32.mrb[13].mxu1  ;;  %v14602_v49 = vadd.f32 %v14559_v50, %v6044_v15  ;;  %v11561_v15 = vld [vmem:[#allocation8 + $0x98] ss:$12 sps:$4 sm:$0xff]  }
 0xf4e   :  { %v6118_v53 = vadd.f32 %v14556_v7, %v6046_v10  ;;  %v6048_v17 = vpop.f32.mrb[14].mxu1  ;;  %10592 = vmatpush3.bf16.msra.mxu1 %v11541_v59  ;;  %v11529_v59 = vld [vmem:[#allocation2 + $0x18] sm:$0xff]  }
 0xf4f   :  { %v14605_v58 = vadd.f32 %v14559_v50, %v6048_v17  ;;  %v6050_v30 = vpop.f32.mrb[15].mxu1 }
 0xf50   :  { %6143 = vst [vmem:[#allocation14 + $0x98] sm:$0xff] %v6118_v53  ;;  %v6120_v38 = vadd.f32 %v14556_v7, %v6050_v30 }
 0xf51   :  { %v14610_v4 = vpack.c.bf16 %v14605_v58, %v14602_v49 }
 0xf52   :  { %6144 = vst [vmem:[#allocation14 + $0xb0] sm:$0xff] %v6120_v38 }
 0xf53   :  { %15545 = vst [vmem:[#allocation32_spill] sm:$0xff] %v14610_v4  ;;  %10546 = vmatmul.mubr.bf16.gmra.mrb[164].mxu0 %v14610_v4 }
 0xf5c   :  { %v6054_v18 = vpop.f32.mrb[16].mxu1 }
 0xf5d   :  { %v6056_v35 = vpop.f32.mrb[17].mxu1  ;;  %v14615_v62 = vadd.f32 %v14559_v50, %v6054_v18 }
 0xf5e   :  { %v6122_v14 = vadd.f32 %v14556_v7, %v6056_v35  ;;  %v6058_v40 = vpop.f32.mrb[18].mxu1 }
 0xf5f   :  { %v14618_v51 = vadd.f32 %v14559_v50, %v6058_v40  ;;  %v6060_v63 = vpop.f32.mrb[19].mxu1 }
 0xf60   :  { %6145 = vst [vmem:[#allocation14 + $0xc8] sm:$0xff] %v6122_v14  ;;  %v6124_v3 = vadd.f32 %v14556_v7, %v6060_v63 }
 0xf61   :  { %v14623_v48 = vpack.c.bf16 %v14618_v51, %v14615_v62 }
 0xf62   :  { %6146 = vst [vmem:[#allocation14 + $0xe0] sm:$0xff] %v6124_v3 }
 0xf63   :  { %15546 = vst [vmem:[#allocation30_spill] sm:$0xff] %v14623_v48  ;;  %10549 = vmatprep.mubr.bf16.mxu0 %v14623_v48 }
 0xf64   :  { %v6064_v52 = vpop.f32.mrb[20].mxu1 }
 0xf65   :  { %v6066_v11 = vpop.f32.mrb[21].mxu1  ;;  %v14628_v13 = vadd.f32 %v14559_v50, %v6064_v52 }
 0xf66   :  { %v6126_v22 = vadd.f32 %v14556_v7, %v6066_v11  ;;  %v6068_v12 = vpop.f32.mrb[22].mxu1 }
 0xf67   :  { %v14631_v37 = vadd.f32 %v14559_v50, %v6068_v12  ;;  %v6070_v21 = vpop.f32.mrb[23].mxu1 }
 0xf68   :  { %6147 = vst [vmem:[#allocation14 + $0xf8] sm:$0xff] %v6126_v22  ;;  %v6128_v61 = vadd.f32 %v14556_v7, %v6070_v21 }
 0xf69   :  { %15547 = vst [vmem:[#allocation28_spill] sm:$0xff] %v14631_v37  ;;  %v14636_v57 = vpack.c.bf16 %v14631_v37, %v14628_v13 }
 0xf6a   :  { %6148 = vst [vmem:[#allocation14 + $0x110] sm:$0xff] %v6128_v61 }
 0xf6b   :  { %15548 = vst [vmem:[#allocation35_spill] sm:$0xff] %v14636_v57  ;;  %10550 = vmatmul.mubr.bf16.gmra.mrb[168].mxu0 %v14636_v57 }
 0xf6e   :  { %v6074_v47 = vpop.f32.mrb[24].mxu1 }
 0xf6f   :  { %v6076_v1 = vpop.f32.mrb[25].mxu1  ;;  %v14641_v44 = vadd.f32 %v14559_v50, %v6074_v47 }
 0xf70   :  { %v6130_v54 = vadd.f32 %v14556_v7, %v6076_v1  ;;  %v6078_v45 = vpop.f32.mrb[26].mxu1 }
 0xf71   :  { %15549 = vst [vmem:[#allocation33_spill] sm:$0xff] %v14641_v44  ;;  %v14644_v23 = vadd.f32 %v14559_v50, %v6078_v45  ;;  %v6080_v34 = vpop.f32.mrb[27].mxu1 }
 0xf72   :  { %6149 = vst [vmem:[#allocation14 + $0x128] sm:$0xff] %v6130_v54  ;;  %v6132_v46 = vadd.f32 %v14556_v7, %v6080_v34 }
 0xf73   :  { %15550 = vst [vmem:[#allocation34_spill] sm:$0xff] %v14644_v23  ;;  %v14649_v32 = vpack.c.bf16 %v14644_v23, %v14641_v44 }
 0xf74   :  { %6150 = vst [vmem:[#allocation14 + $0x140] sm:$0xff] %v6132_v46 }
 0xf75   :  { %15551 = vst [vmem:[#allocation37_spill] sm:$0xff] %v14649_v32  ;;  %10553 = vmatprep.mubr.bf16.mxu0 %v14649_v32 }
 0xf76   :  { %v6084_v6 = vpop.f32.mrb[28].mxu1 }
 0xf77   :  { %v6086_v27 = vpop.f32.mrb[29].mxu1  ;;  %v14654_v60 = vadd.f32 %v14559_v50, %v6084_v6 }
 0xf78   :  { %v6134_v8 = vadd.f32 %v14556_v7, %v6086_v27  ;;  %v6088_v31 = vpop.f32.mrb[30].mxu1  ;;  %v14665_v27 = vld [vmem:[#allocation8 + $0x4] ss:$12 sps:$4 sm:$0xff]  }
 0xf79   :  { %15552 = vst [vmem:[#allocation38_spill] sm:$0xff] %v14654_v60  ;;  %v14657_v24 = vadd.f32 %v14559_v50, %v6088_v31  ;;  %v6090_v33 = vpop.f32.mrb[31].mxu1  ;;  %v11545_v50 = vld [vmem:[#allocation8 + $0x38] ss:$12 sps:$4 sm:$0xff]   ;;  %v11528_v31 = vld [vmem:[#allocation2 + $0x10] sm:$0xff]  }
 0xf7a   :  { %6151 = vst [vmem:[#allocation14 + $0x158] sm:$0xff] %v6134_v8  ;;  %v6136_v16 = vadd.f32 %v14556_v7, %v6090_v33  ;;  %10593 = vmatprep.subr.bf16.mxu1 %v11545_v50  ;;  %v11553_v7 = vld [vmem:[#allocation8 + $0x68] ss:$12 sps:$4 sm:$0xff]   ;;  %v14667_v33 = vld [vmem:[#allocation8] ss:$12 sps:$4 sm:$0xff]  }
 0xf7b   :  { %15553 = vst [vmem:[#allocation23_spill] sm:$0xff] %v14657_v24  ;;  %v14662_v39 = vpack.c.bf16 %v14657_v24, %v14654_v60  ;;  %10594 = vmatpush3.bf16.msra.mxu1 %v11545_v50  ;;  %v11527_v8 = vld [vmem:[#allocation2 + $0x8] sm:$0xff]   ;;  %v11530_v50 = vld [vmem:[#allocation2 + $0x20] sm:$0xff]  }
 0xf7c   :  { %6152 = vst [vmem:[#allocation14 + $0x170] sm:$0xff] %v6136_v16  ;;  %10595 = vmatprep.subr.bf16.mxu1 %v11549_v9  ;;  %v14670_v16 = vld [vmem:[#allocation8 + $0x1c] ss:$12 sps:$4 sm:$0xff]  }
 0xf7d   :  { %15554 = vst [vmem:[#allocation36_spill] sm:$0xff] %v14662_v39  ;;  %10554 = vmatmul.mubr.bf16.gmra.mrb[172].mxu0 %v14662_v39 }
 0xf7e   :  { %10573 = vmatprep.mubr.bf16.mxu0 %v11526_v43  ;;  %v14673_v43 = vld [vmem:[#allocation8 + $0x18] ss:$12 sps:$4 sm:$0xff]  }
 0xf7f   :  { %10596 = vmatpush3.bf16.msra.mxu1 %v11549_v9  ;;  %v14679_v9 = vld [vmem:[#allocation8 + $0x30] ss:$12 sps:$4 sm:$0xff]  }
 0xf80   :  { %10597 = vmatprep.subr.bf16.mxu1 %v11553_v7 }
 0xf83   :  { %10598 = vmatpush3.bf16.msra.mxu1 %v11553_v7  ;;  %v14682_v7 = vld [vmem:[#allocation8 + $0x4c] ss:$12 sps:$4 sm:$0xff]  }
 0xf84   :  { %10599 = vmatprep.subr.bf16.mxu1 %v11557_v36 }
 0xf87   :  { %10600 = vmatpush3.bf16.msra.mxu1 %v11557_v36  ;;  %v14685_v36 = vld [vmem:[#allocation8 + $0x48] ss:$12 sps:$4 sm:$0xff]  }
 0xf88   :  { %10601 = vmatprep.subr.bf16.mxu1 %v11561_v15 }
 0xf8b   :  { %10602 = vmatpush3.bf16.msra.mxu1 %v11561_v15  ;;  %v14688_v15 = vld [vmem:[#allocation8 + $0x64] ss:$12 sps:$4 sm:$0xff]  }
0x1014   :  { %v10543_v10 = vpop.f32.mrb[160].mxu0 }
0x1015   :  { %v6259_v53 = vpop.f32.mrb[161].mxu0 }
0x1016   :  { %v10544_v17 = vpop.f32.mrb[162].mxu0 }
0x1017   :  { %v6339_v30 = vpack.c.bf16 %v10544_v17, %v10543_v10  ;;  %v6262_v38 = vpop.f32.mrb[163].mxu0  ;;  %v11531_v10 = vld [vmem:[#allocation2 + $0x28] sm:$0xff]  }
0x1018   :  { %v6338_v18 = vpack.c.bf16 %v6262_v38, %v6259_v53  ;;  %v11532_v53 = vld [vmem:[#allocation2 + $0x30] sm:$0xff]   ;;  %v14691_v17 = vld [vmem:[#allocation8 + $0x60] ss:$12 sps:$4 sm:$0xff]   ;;  %v14697_v38 = vld [vmem:[#allocation8 + $0x78] ss:$12 sps:$4 sm:$0xff]  }
0x101a   :  { %10557 = vmatprep.subr.bf16.mxu0 %v6338_v18 }
0x101b   :  { %10558 = vmatpush3.bf16.msra.mxu0 %v6338_v18  ;;  %v14700_v18 = vld [vmem:[#allocation8 + $0x94] ss:$12 sps:$4 sm:$0xff]  }
0x101c   :  { %10559 = vmatprep.subr.bf16.mxu0 %v6339_v30 }
0x101f   :  { %10560 = vmatpush3.bf16.msra.mxu0 %v6339_v30  ;;  %v14694_v30 = vld [vmem:[#allocation8 + $0x7c] ss:$12 sps:$4 sm:$0xff]  }
0x1026   :  { %v10547_v35 = vpop.f32.mrb[164].mxu0 }
0x1027   :  { %v6275_v14 = vpop.f32.mrb[165].mxu0 }
0x1028   :  { %v10548_v40 = vpop.f32.mrb[166].mxu0 }
0x1029   :  { %v6341_v63 = vpack.c.bf16 %v10548_v40, %v10547_v35  ;;  %v6278_v3 = vpop.f32.mrb[167].mxu0  ;;  %v11533_v35 = vld [vmem:[#allocation2 + $0x38] sm:$0xff]  }
0x102a   :  { %v6340_v52 = vpack.c.bf16 %v6278_v3, %v6275_v14  ;;  %v14703_v14 = vld [vmem:[#allocation8 + $0x90] ss:$12 sps:$4 sm:$0xff]   ;;  %v14708_v40 = vld [vmem:[#allocation8 + $0xac] ss:$12 sps:$4 sm:$0xff]  }
0x102b   :  { %v11565_v3 = vld [vmem:[#allocation8 + $0xb0] ss:$12 sps:$4 sm:$0xff]  }
0x102c   :  { %10561 = vmatprep.subr.bf16.mxu0 %v6340_v52  ;;  %10603 = vmatprep.subr.bf16.mxu1 %v11565_v3 }
0x102d   :  { %10562 = vmatpush3.bf16.msra.mxu0 %v6340_v52  ;;  %10604 = vmatpush3.bf16.msra.mxu1 %v11565_v3  ;;  %v11569_v52 = vld [vmem:[#allocation10 + $0x8] ss:$12 sps:$4 sm:$0xff]   ;;  %v11576_v3 = vld [vmem:[#allocation10 + $0x30] ss:$12 sps:$4 sm:$0xff]  }
0x102e   :  { %10563 = vmatprep.subr.bf16.mxu0 %v6341_v63  ;;  %10621 = vmatprep.subr.bf16.mxu1 %v11569_v52 }
0x1031   :  { %10564 = vmatpush3.bf16.msra.mxu0 %v6341_v63  ;;  %v14710_v63 = vld [vmem:[#allocation8 + $0xa8] ss:$12 sps:$4 sm:$0xff]  }
0x103e   :  { %v10551_v11 = vpop.f32.mrb[168].mxu0 }
0x103f   :  { %v6291_v22 = vpop.f32.mrb[169].mxu0 }
0x1040   :  { %v10552_v12 = vpop.f32.mrb[170].mxu0 }
0x1041   :  { %v6343_v21 = vpack.c.bf16 %v10552_v12, %v10551_v11  ;;  %v6294_v61 = vpop.f32.mrb[171].mxu0  ;;  %v14714_v11 = vld [vmem:[#allocation10 + $0x4] ss:$12 sps:$4 sm:$0xff]  }
0x1042   :  { %v6342_v47 = vpack.c.bf16 %v6294_v61, %v6291_v22 }
0x1044   :  { %10565 = vmatprep.subr.bf16.mxu0 %v6342_v47 }
0x1045   :  { %10566 = vmatpush3.bf16.msra.mxu0 %v6342_v47 }
0x1046   :  { %10567 = vmatprep.subr.bf16.mxu0 %v6343_v21 }
0x1049   :  { %10568 = vmatpush3.bf16.msra.mxu0 %v6343_v21 }
0x1050   :  { %v10555_v1 = vpop.f32.mrb[172].mxu0 }
0x1051   :  { %v6307_v54 = vpop.f32.mrb[173].mxu0 }
0x1052   :  { %v10556_v45 = vpop.f32.mrb[174].mxu0 }
0x1053   :  { %v6345_v34 = vpack.c.bf16 %v10556_v45, %v10555_v1  ;;  %v6310_v46 = vpop.f32.mrb[175].mxu0  ;;  %v11566_v1 = vld [vmem:[#allocation10] ss:$12 sps:$4 sm:$0xff]  }
0x1054   :  { %v6344_v6 = vpack.c.bf16 %v6310_v46, %v6307_v54  ;;  %v11570_v45 = vld [vmem:[#allocation10 + $0x20] ss:$12 sps:$4 sm:$0xff]   ;;  %v11571_v46 = vld [vmem:[#allocation10 + $0x18] ss:$12 sps:$4 sm:$0xff]  }
0x1056   :  { %10569 = vmatprep.subr.bf16.mxu0 %v6344_v6 }
0x1057   :  { %10570 = vmatpush3.bf16.msra.mxu0 %v6344_v6 }
0x1058   :  { %10571 = vmatprep.subr.bf16.mxu0 %v6345_v34 }
0x105b   :  { %10572 = vmatpush3.bf16.msra.mxu0 %v6345_v34  ;;  %v11573_v34 = vld [vmem:[#allocation10 + $0x1c] ss:$12 sps:$4 sm:$0xff]  }
0x105c   :  { %6676 = vmatprep.subr.bf16.mxu0 %v14665_v27 }
0x105e   :  { %10574 = vmatmul.mubr.bf16.vlgmr.msra.gmra.mrb[176].mxu0 %v11527_v8  ;;  %v11578_v8 = vld [vmem:[#allocation10 + $0x34] ss:$12 sps:$4 sm:$0xff]  }
0x105f   :  { %10577 = vmatprep.mubr.bf16.mxu0 %v11528_v31  ;;  %6677 = vmatpush1.bf16.msra.mxu0 %v14667_v33 }
0x1060   :  { %6678 = vmatprep.subr.bf16.mxu0 %v14670_v16 }
0x1063   :  { %6679 = vmatpush1.bf16.msra.mxu0 %v14673_v43 }
0x1064   :  { %6680 = vmatprep.subr.bf16.mxu0 %v14676_v20 }
0x1066   :  { %10578 = vmatmul.mubr.bf16.gmra.mrb[180].mxu0 %v11529_v59  ;;  %v11574_v59 = vld [vmem:[#allocation10 + $0x38] ss:$12 sps:$4 sm:$0xff]  }
0x1067   :  { %10581 = vmatprep.mubr.bf16.mxu0 %v11530_v50  ;;  %6681 = vmatpush1.bf16.msra.mxu0 %v14679_v9 }
0x1068   :  { %6682 = vmatprep.subr.bf16.mxu0 %v14682_v7 }
0x106b   :  { %6683 = vmatpush1.bf16.msra.mxu0 %v14685_v36 }
0x106c   :  { %6684 = vmatprep.subr.bf16.mxu0 %v14688_v15 }
0x106e   :  { %10582 = vmatmul.mubr.bf16.gmra.mrb[184].mxu0 %v11531_v10 }
0x106f   :  { %10585 = vmatprep.mubr.bf16.mxu0 %v11532_v53  ;;  %6685 = vmatpush1.bf16.msra.mxu0 %v14691_v17 }
0x1070   :  { %6686 = vmatprep.subr.bf16.mxu0 %v14694_v30 }
0x1073   :  { %6687 = vmatpush1.bf16.msra.mxu0 %v14697_v38 }
0x1074   :  { %6688 = vmatprep.subr.bf16.mxu0 %v14700_v18 }
0x1076   :  { %10586 = vmatmul.mubr.bf16.gmra.mrb[188].mxu0 %v11533_v35 }
0x1077   :  { %6689 = vmatpush1.bf16.msra.mxu0 %v14703_v14  ;;  %6708 = vmatprep.mubr.bf16.mxu0 %v15516_v29 }
0x1078   :  { %6690 = vmatprep.subr.bf16.mxu0 %v14708_v40 }
0x107b   :  { %6691 = vmatpush1.bf16.msra.mxu0 %v14710_v63 }
0x107c   :  { %7046 = vmatprep.subr.bf16.mxu0 %v14714_v11 }
0x1131   :  { %v10575_v22 = vpop.f32.mrb[176].mxu0 }
0x1132   :  { %v6428_v12 = vpop.f32.mrb[177].mxu0 }
0x1133   :  { %v10576_v21 = vpop.f32.mrb[178].mxu0 }
0x1134   :  { %v6524_v61 = vpack.c.bf16 %v10576_v21, %v10575_v22  ;;  %v6431_v47 = vpop.f32.mrb[179].mxu0  ;;  %v11575_v22 = vld [vmem:[#allocation10 + $0x50] ss:$12 sps:$4 sm:$0xff]   ;;  %v11581_v21 = vld [vmem:[#allocation10 + $0x48] ss:$12 sps:$4 sm:$0xff]  }
0x1135   :  { %v6523_v54 = vpack.c.bf16 %v6431_v47, %v6428_v12  ;;  %v11583_v12 = vld [vmem:[#allocation10 + $0x4c] ss:$12 sps:$4 sm:$0xff]  }
0x1137   :  { %6709 = vmatmul.mubr.bf16.vlgmr.msra.gmra.mrb[192].mxu0 %v6523_v54  ;;  %10605 = vmatprep.mubr.bf16.mxu1 %v6523_v54  ;;  %v11588_v54 = vld [vmem:[#allocation10 + $0x64] ss:$12 sps:$4 sm:$0xff]  }
0x1138   :  { %10606 = vmatmul.mubr.bf16.vlgmr.msra.gmra.mrb[32].mxu1 %v6524_v61  ;;  %7047 = vmatpush1.bf16.msra.mxu0 %v11566_v1  ;;  %v11579_v1 = vld [vmem:[#allocation10 + $0x68] ss:$12 sps:$4 sm:$0xff]  }
0x1139   :  { %v10579_v6 = vpop.f32.mrb[180].mxu0  ;;  %10622 = vmatpush3.bf16.msra.mxu1 %v11569_v52  ;;  %6718 = vmatprep.mubr.bf16.mxu0 %v15516_v29 }
0x113a   :  { %v6444_v31 = vpop.f32.mrb[181].mxu0  ;;  %10623 = vmatprep.subr.bf16.mxu1 %v11570_v45  ;;  %7048 = vmatprep.subr.bf16.mxu0 %v11573_v34 }
0x113b   :  { %v10580_v50 = vpop.f32.mrb[182].mxu0 }
0x113c   :  { %v6526_v10 = vpack.c.bf16 %v10580_v50, %v10579_v6  ;;  %v6447_v53 = vpop.f32.mrb[183].mxu0  ;;  %7049 = vmatpush1.bf16.msra.mxu0 %v11571_v46  ;;  %v11589_v50 = vld [vmem:[#allocation10 + $0x78] ss:$12 sps:$4 sm:$0xff]  }
0x113d   :  { %v6525_v35 = vpack.c.bf16 %v6447_v53, %v6444_v31  ;;  %10624 = vmatpush3.bf16.msra.mxu1 %v11570_v45  ;;  %7050 = vmatprep.subr.bf16.mxu0 %v11578_v8  ;;  %v11580_v8 = vld [vmem:[#allocation10 + $0x80] ss:$12 sps:$4 sm:$0xff]   ;;  %v11591_v31 = vld [vmem:[#allocation10 + $0x7c] ss:$12 sps:$4 sm:$0xff]  }
0x113e   :  { %10625 = vmatprep.subr.bf16.mxu1 %v11574_v59 }
0x113f   :  { %6719 = vmatmul.mubr.bf16.gmra.mrb[196].mxu0 %v6524_v61  ;;  %10609 = vmatprep.mubr.bf16.mxu1 %v6525_v35  ;;  %v11586_v61 = vld [vmem:[#allocation10 + $0x60] ss:$12 sps:$4 sm:$0xff]  }
0x1140   :  { %10610 = vmatmul.mubr.bf16.gmra.mrb[36].mxu1 %v6526_v10  ;;  %6728 = vmatprep.mubr.bf16.mxu0 %v15516_v29 }
0x1141   :  { %v10583_v52 = vpop.f32.mrb[184].mxu0  ;;  %10626 = vmatpush3.bf16.msra.mxu1 %v11574_v59  ;;  %7051 = vmatpush1.bf16.msra.mxu0 %v11576_v3  ;;  %v11584_v3 = vld [vmem:[#allocation10 + $0x98] ss:$12 sps:$4 sm:$0xff]  }
0x1142   :  { %v6460_v47 = vpop.f32.mrb[185].mxu0  ;;  %10627 = vmatprep.subr.bf16.mxu1 %v11575_v22  ;;  %7052 = vmatprep.subr.bf16.mxu0 %v11583_v12 }
0x1143   :  { %v10584_v45 = vpop.f32.mrb[186].mxu0 }
0x1144   :  { %v6528_v34 = vpack.c.bf16 %v10584_v45, %v10583_v52  ;;  %v6463_v46 = vpop.f32.mrb[187].mxu0  ;;  %v11595_v45 = vld [vmem:[#allocation10 + $0xa8] ss:$12 sps:$4 sm:$0xff]  }
0x1145   :  { %v6527_v6 = vpack.c.bf16 %v6463_v46, %v6460_v47  ;;  %10628 = vmatpush3.bf16.msra.mxu1 %v11575_v22  ;;  %7053 = vmatpush1.bf16.msra.mxu0 %v11581_v21  ;;  %v11594_v22 = vld [vmem:[#allocation10 + $0x94] ss:$12 sps:$4 sm:$0xff]  }
0x1146   :  { %10629 = vmatprep.subr.bf16.mxu1 %v11579_v1  ;;  %7054 = vmatprep.subr.bf16.mxu0 %v11588_v54  ;;  %v11592_v54 = vld [vmem:[#allocation10 + $0x90] ss:$12 sps:$4 sm:$0xff]  }
0x1147   :  { %6729 = vmatmul.mubr.bf16.gmra.mrb[200].mxu0 %v6525_v35  ;;  %10613 = vmatprep.mubr.bf16.mxu1 %v6527_v6  ;;  %v11585_v35 = vld [vmem:[#allocation10 + $0xb0] ss:$12 sps:$4 sm:$0xff]  }
0x1148   :  { %10614 = vmatmul.mubr.bf16.gmra.mrb[40].mxu1 %v6528_v34  ;;  %6738 = vmatprep.mubr.bf16.mxu0 %v15516_v29 }
0x1149   :  { %v10587_v59 = vpop.f32.mrb[188].mxu0  ;;  %10630 = vmatpush3.bf16.msra.mxu1 %v11579_v1  ;;  %7055 = vmatpush1.bf16.msra.mxu0 %v11586_v61  ;;  %v11597_v1 = vld [vmem:[#allocation10 + $0xac] ss:$12 sps:$4 sm:$0xff]  }
0x114a   :  { %v6476_v53 = vpop.f32.mrb[189].mxu0  ;;  %10631 = vmatprep.subr.bf16.mxu1 %v11580_v8  ;;  %7056 = vmatprep.subr.bf16.mxu0 %v11591_v31 }
0x114b   :  { %v10588_v12 = vpop.f32.mrb[190].mxu0 }
0x114c   :  { %v6530_v52 = vpack.c.bf16 %v10588_v12, %v10587_v59  ;;  %v6479_v21 = vpop.f32.mrb[191].mxu0 }
0x114d   :  { %v6529_v47 = vpack.c.bf16 %v6479_v21, %v6476_v53  ;;  %10632 = vmatpush3.bf16.msra.mxu1 %v11580_v8  ;;  %7057 = vmatpush1.bf16.msra.mxu0 %v11589_v50 }
0x114e   :  { %10633 = vmatprep.subr.bf16.mxu1 %v11584_v3  ;;  %7058 = vmatprep.subr.bf16.mxu0 %v11594_v22 }
0x114f   :  { %6739 = vmatmul.mubr.bf16.gmra.mrb[204].mxu0 %v6526_v10  ;;  %10617 = vmatprep.mubr.bf16.mxu1 %v6529_v47 }
0x1150   :  { %10618 = vmatmul.mubr.bf16.gmra.mrb[44].mxu1 %v6530_v52  ;;  %6748 = vmatprep.mubr.bf16.mxu0 %v15516_v29 }
0x1151   :  { %10634 = vmatpush3.bf16.msra.mxu1 %v11584_v3  ;;  %10637 = vmatprep.mubr.bf16.mxu1 %v14571_v28 }
0x1152   :  { %10635 = vmatprep.subr.bf16.mxu1 %v11585_v35  ;;  %7059 = vmatpush1.bf16.msra.mxu0 %v11592_v54 }
0x1153   :  { %7060 = vmatprep.subr.bf16.mxu0 %v11597_v1 }
0x1155   :  { %10636 = vmatpush3.bf16.msra.mxu1 %v11585_v35 }
0x1156   :  { %7061 = vmatpush1.bf16.msra.mxu0 %v11595_v45 }
0x1157   :  { %6749 = vmatmul.mubr.bf16.gmra.mrb[208].mxu0 %v6527_v6  ;;  %7897 = vmatprep.subr.bf16.mxu0 %v14665_v27  ;;  %v11598_v27 = vld [vmem:[#allocation7 + $0x40] sm:$0xff]  }
0x1158   :  { %10638 = vmatmul.mubr.bf16.vlgmr.msra.gmra.mrb[48].mxu1 %v14584_v56  ;;  %6758 = vmatprep.mubr.bf16.mxu0 %v15516_v29 }
0x1159   :  { %10641 = vmatprep.mubr.bf16.mxu1 %v14597_v25  ;;  %10653 = vmatprep.subr.bf16.mxu1 %v11598_v27 }
0x115a   :  { %10654 = vmatpush3.bf16.msra.mxu1 %v11598_v27 }
0x115f   :  { %6759 = vmatmul.mubr.bf16.gmra.mrb[212].mxu0 %v6528_v34 }
0x1160   :  { %10642 = vmatmul.mubr.bf16.gmra.mrb[52].mxu1 %v14610_v4  ;;  %6768 = vmatprep.mubr.bf16.mxu0 %v15516_v29 }
0x1161   :  { %10645 = vmatprep.mubr.bf16.mxu1 %v14623_v48 }
0x1167   :  { %6769 = vmatmul.mubr.bf16.gmra.mrb[216].mxu0 %v6529_v47 }
0x1168   :  { %10646 = vmatmul.mubr.bf16.gmra.mrb[56].mxu1 %v14636_v57  ;;  %6778 = vmatprep.mubr.bf16.mxu0 %v15516_v29 }
0x1169   :  { %10649 = vmatprep.mubr.bf16.mxu1 %v14649_v32 }
0x116f   :  { %6779 = vmatmul.mubr.bf16.gmra.mrb[220].mxu0 %v6530_v52 }
0x1170   :  { %10650 = vmatmul.mubr.bf16.gmra.mrb[60].mxu1 %v14662_v39  ;;  %7078 = vmatprep.mubr.bf16.mxu0 %v15516_v29 }
0x1177   :  { %7079 = vmatmul.mubr.bf16.vlgmr.msra.gmra.mrb[192].mxu0 %v14571_v28 }
0x1178   :  { %7088 = vmatprep.mubr.bf16.mxu0 %v15516_v29  ;;  %7898 = vmatpush1.bf16.msra.mxu0 %v14667_v33  ;;  %v11599_v33 = vld [vmem:[#allocation7 + $0x48] sm:$0xff]  }
0x1179   :  { %7899 = vmatprep.subr.bf16.mxu0 %v14670_v16  ;;  %10655 = vmatprep.subr.bf16.mxu1 %v11599_v33  ;;  %v11600_v16 = vld [vmem:[#allocation7 + $0x50] sm:$0xff]  }
0x117a   :  { %10656 = vmatpush3.bf16.msra.mxu1 %v11599_v33 }
0x117b   :  { %10657 = vmatprep.subr.bf16.mxu1 %v11600_v16 }
0x117c   :  { %7900 = vmatpush1.bf16.msra.mxu0 %v14673_v43  ;;  %v11601_v43 = vld [vmem:[#allocation7 + $0x58] sm:$0xff]  }
0x117d   :  { %7901 = vmatprep.subr.bf16.mxu0 %v14676_v20  ;;  %v11602_v20 = vld [vmem:[#allocation7 + $0x60] sm:$0xff]  }
0x117e   :  { %10658 = vmatpush3.bf16.msra.mxu1 %v11600_v16  ;;  %v6531_v16 = vld [vmem:[%s15397_s5] sm:$0x7] }
0x117f   :  { %7089 = vmatmul.mubr.bf16.gmra.mrb[196].mxu0 %v14584_v56  ;;  %10659 = vmatprep.subr.bf16.mxu1 %v11601_v43 }
0x1180   :  { %7098 = vmatprep.mubr.bf16.mxu0 %v15516_v29  ;;  %7902 = vmatpush1.bf16.msra.mxu0 %v14679_v9  ;;  %v11603_v9 = vld [vmem:[#allocation7 + $0x68] sm:$0xff]  }
0x1181   :  { %7903 = vmatprep.subr.bf16.mxu0 %v14682_v7  ;;  %v11604_v7 = vld [vmem:[#allocation7 + $0x70] sm:$0xff]  }
0x1182   :  { %10660 = vmatpush3.bf16.msra.mxu1 %v11601_v43 }
0x1183   :  { %10661 = vmatprep.subr.bf16.mxu1 %v11602_v20 }
0x1184   :  { %7904 = vmatpush1.bf16.msra.mxu0 %v14685_v36 }
0x1185   :  { %7905 = vmatprep.subr.bf16.mxu0 %v14688_v15 }
0x1186   :  { %10662 = vmatpush3.bf16.msra.mxu1 %v11602_v20  ;;  %v14834_v20 = vrot.slane %v6531_v16, %v15541_v41 }
0x1187   :  { %7099 = vmatmul.mubr.bf16.gmra.mrb[200].mxu0 %v14597_v25  ;;  %10663 = vmatprep.subr.bf16.mxu1 %v11603_v9 }
0x1188   :  { %7108 = vmatprep.mubr.bf16.mxu0 %v15516_v29  ;;  %7906 = vmatpush1.bf16.msra.mxu0 %v14691_v17  ;;  %v11605_v17 = vld [vmem:[#allocation7 + $0x78] sm:$0xff]  }
0x1189   :  { %7907 = vmatprep.subr.bf16.mxu0 %v14694_v30 }
0x118a   :  { %10664 = vmatpush3.bf16.msra.mxu1 %v11603_v9  ;;  %v14837_v9 = vrot.slane %v6531_v16, %v15540_v5 }
0x118b   :  { %10665 = vmatprep.subr.bf16.mxu1 %v11604_v7 }
0x118c   :  { %7908 = vmatpush1.bf16.msra.mxu0 %v14697_v38 }
0x118d   :  { %7909 = vmatprep.subr.bf16.mxu0 %v14700_v18 }
0x118e   :  { %10666 = vmatpush3.bf16.msra.mxu1 %v11604_v7 }
0x118f   :  { %7109 = vmatmul.mubr.bf16.gmra.mrb[204].mxu0 %v14610_v4  ;;  %10667 = vmatprep.subr.bf16.mxu1 %v11605_v17 }
0x1190   :  { %7118 = vmatprep.mubr.bf16.mxu0 %v15516_v29  ;;  %7910 = vmatpush1.bf16.msra.mxu0 %v14703_v14 }
0x1191   :  { %7911 = vmatprep.subr.bf16.mxu0 %v14708_v40 }
0x1192   :  { %10668 = vmatpush3.bf16.msra.mxu1 %v11605_v17 }
0x1194   :  { %7912 = vmatpush1.bf16.msra.mxu0 %v14710_v63 }
0x1195   :  { %8107 = vmatprep.subr.bf16.mxu0 %v14714_v11 }
0x1197   :  { %7119 = vmatmul.mubr.bf16.gmra.mrb[208].mxu0 %v14623_v48 }
0x1198   :  { %7128 = vmatprep.mubr.bf16.mxu0 %v15516_v29 }
0x119f   :  { %7129 = vmatmul.mubr.bf16.gmra.mrb[212].mxu0 %v14636_v57 }
0x11a0   :  { %7138 = vmatprep.mubr.bf16.mxu0 %v15516_v29 }
0x11a7   :  { %7139 = vmatmul.mubr.bf16.gmra.mrb[216].mxu0 %v14649_v32 }
0x11a8   :  { %7148 = vmatprep.mubr.bf16.mxu0 %v15516_v29 }
0x11af   :  { %7149 = vmatmul.mubr.bf16.gmra.mrb[220].mxu0 %v14662_v39 }
0x11b0   :  { %7929 = vmatprep.mubr.bf16.mxu0 %v15516_v29 }
0x120b   :  { %v14766_v36 = vpop.f32.mrb[32].mxu1 }
0x120c   :  { %v14768_v15 = vpop.f32.mrb[33].mxu1 }
0x120d   :  { %v14770_v30 = vpop.f32.mrb[34].mxu1 }
0x120e   :  { %v14772_v38 = vpop.f32.mrb[35].mxu1 }
0x1213   :  { %v14774_v18 = vpop.f32.mrb[36].mxu1 }
0x1214   :  { %v14776_v14 = vpop.f32.mrb[37].mxu1 }
0x1215   :  { %v14778_v40 = vpop.f32.mrb[38].mxu1 }
0x1216   :  { %v14780_v63 = vpop.f32.mrb[39].mxu1 }
0x121b   :  { %v14782_v11 = vpop.f32.mrb[40].mxu1 }
0x121c   :  { %v14784_v10 = vpop.f32.mrb[41].mxu1 }
0x121d   :  { %v14786_v34 = vpop.f32.mrb[42].mxu1 }
0x121e   :  { %v14788_v46 = vpop.f32.mrb[43].mxu1 }
0x1223   :  { %v14790_v6 = vpop.f32.mrb[44].mxu1 }
0x1224   :  { %15555 = vst [vmem:[#allocation27_spill] sm:$0xff] %v14790_v6  ;;  %v14792_v61 = vpop.f32.mrb[45].mxu1 }
0x1225   :  { %v14794_v8 = vpop.f32.mrb[46].mxu1 }
0x1226   :  { %15556 = vst [vmem:[#allocation25_spill] sm:$0xff] %v14794_v8  ;;  %v14796_v31 = vpop.f32.mrb[47].mxu1 }
0x122b   :  { %v14798_v59 = vpop.f32.mrb[48].mxu1 }
0x122c   :  { %v14800_v50 = vpop.f32.mrb[49].mxu1 }
0x122d   :  { %v14802_v53 = vpop.f32.mrb[50].mxu1 }
0x122e   :  { %v14804_v3 = vpop.f32.mrb[51].mxu1 }
0x1233   :  { %v14806_v22 = vpop.f32.mrb[52].mxu1 }
0x1234   :  { %v14808_v12 = vpop.f32.mrb[53].mxu1 }
0x1235   :  { %v14810_v52 = vpop.f32.mrb[54].mxu1 }
0x1236   :  { %v14812_v21 = vpop.f32.mrb[55].mxu1 }
0x123b   :  { %v14814_v47 = vpop.f32.mrb[56].mxu1 }
0x123c   :  { %v14816_v35 = vpop.f32.mrb[57].mxu1 }
0x123d   :  { %v14818_v54 = vpop.f32.mrb[58].mxu1 }
0x123e   :  { %v14820_v1 = vpop.f32.mrb[59].mxu1 }
0x1243   :  { %v14822_v45 = vpop.f32.mrb[60].mxu1 }
0x1244   :  { %15557 = vst [vmem:[#allocation39_spill] sm:$0xff] %v14822_v45  ;;  %v14824_v27 = vpop.f32.mrb[61].mxu1 }
0x1245   :  { %v14826_v33 = vpop.f32.mrb[62].mxu1 }
0x1246   :  { %15558 = vst [vmem:[#allocation26_spill] sm:$0xff] %v14826_v33  ;;  %v14831_v43 = vpop.f32.mrb[63].mxu1 }
0x124a   :  { %v7080_v7 = vpop.f32.mrb[192].mxu0 }
0x124b   :  { %v10909_v17 = vadd.f32 %v7080_v7, %v14834_v20  ;;  %v7082_v39 = vpop.f32.mrb[193].mxu0 }
0x124c   :  { %v10910_v32 = vadd.f32 %v7082_v39, %v14837_v9  ;;  %v7084_v57 = vpop.f32.mrb[194].mxu0 }
0x124d   :  { %v9524_v48 = vmul.f32 -1.442695, %v10909_v17  ;;  %v10911_v4 = vadd.f32 %v7084_v57, %v14834_v20  ;;  %v7086_v25 = vpop.f32.mrb[195].mxu0 }
0x124e   :  { %v9540_v56 = vmul.f32 -1.442695, %v10910_v32  ;;  %v10912_v28 = vadd.f32 %v7086_v25, %v14837_v9 }
0x124f   :  { %12294 = vpow2.f32 %v9524_v48  ;;  %v9525_v41 = vmul.f32 -1.442695, %v10911_v4 }
0x1250   :  { %12296 = vpow2.f32 %v9540_v56  ;;  %v9541_v5 = vmul.f32 -1.442695, %v10912_v28 }
0x1251   :  { %12298 = vpow2.f32 %v9525_v41 }
0x1252   :  { %v7090_v29 = vpop.f32.mrb[196].mxu0  ;;  %12300 = vpow2.f32 %v9541_v5 }
0x1253   :  { %v10913_v24 = vadd.f32 %v7090_v29, %v14834_v20  ;;  %v7092_v7 = vpop.f32.mrb[197].mxu0 }
0x1254   :  { %v10914_v60 = vadd.f32 %v7092_v7, %v14837_v9  ;;  %v7094_v39 = vpop.f32.mrb[198].mxu0 }
0x1255   :  { %v9526_v23 = vmul.f32 -1.442695, %v10913_v24  ;;  %v10915_v17 = vadd.f32 %v7094_v39, %v14834_v20  ;;  %v7096_v57 = vpop.f32.mrb[199].mxu0 }
0x1256   :  { %v10916_v32 = vadd.f32 %v7096_v57, %v14837_v9  ;;  %v9542_v25 = vmul.f32 -1.442695, %v10914_v60 }
0x1257   :  { %12302 = vpow2.f32 %v9526_v23  ;;  %v9527_v4 = vmul.f32 -1.442695, %v10915_v17 }
0x1258   :  { %v9543_v28 = vmul.f32 -1.442695, %v10916_v32 }
0x1259   :  { %v12295_v56 = vpop.eup %12294  ;;  %12304 = vpow2.f32 %v9527_v4 }
0x125a   :  { %v12297_v48 = vpop.eup %12296  ;;  %v7320_v41 = vadd.f32 1.0, %v12295_v56  ;;  %v7100_v29 = vpop.f32.mrb[200].mxu0  ;;  %12306 = vpow2.f32 %v9542_v25 }
0x125b   :  { %v12299_v8 = vpop.eup %12298  ;;  %v10917_v7 = vadd.f32 %v7100_v29, %v14834_v20  ;;  %v7102_v24 = vpop.f32.mrb[201].mxu0  ;;  %v7432_v57 = vadd.f32 1.0, %v12297_v48 }
0x125c   :  { %12308 = vrcp.f32 %v7320_v41  ;;  %v7321_v39 = vadd.f32 1.0, %v12299_v8  ;;  %v10918_v5 = vadd.f32 %v7102_v24, %v14837_v9  ;;  %v7104_v44 = vpop.f32.mrb[202].mxu0  ;;  %v12301_v25 = vpop.eup %12300  ;;  %v15559_v8 = vld [vmem:[#allocation22_spill] sm:$0xff] }
0x125d   :  { %12310 = vpow2.f32 %v9543_v28  ;;  %v9528_v23 = vmul.f32 -1.442695, %v10917_v7  ;;  %v10919_v60 = vadd.f32 %v7104_v44, %v14834_v20  ;;  %v7106_v17 = vpop.f32.mrb[203].mxu0  ;;  %v14852_v33 = vrot.slane %v6531_v16, %v15559_v8  ;;  %v14857_v28 = vld [vmem:[%s15398_s6] ss:$0 sm:$0xff] }
0x125e   :  { %12312 = vrcp.f32 %v7321_v39  ;;  %v10920_v32 = vadd.f32 %v7106_v17, %v14837_v9  ;;  %v9544_v4 = vmul.f32 -1.442695, %v10918_v5  ;;  %v7433_v24 = vadd.f32 1.0, %v12301_v25 }
0x125f   :  { %v9529_v56 = vmul.f32 -1.442695, %v10919_v60  ;;  %12314 = vpow2.f32 %v9528_v23  ;;  %v7487_v17 = vadd.f32 %v14857_v28, %v14800_v50  ;;  %v6827_v50 = vadd.f32 %v14772_v38, %v14852_v33 }
0x1260   :  { %12316 = vrcp.f32 %v7432_v57  ;;  %v9545_v41 = vmul.f32 -1.442695, %v10920_v32 }
0x1261   :  { %v12303_v29 = vpop.eup %12302  ;;  %12318 = vpow2.f32 %v9529_v56 }
0x1262   :  { %v7322_v44 = vadd.f32 1.0, %v12303_v29  ;;  %v7110_v48 = vpop.f32.mrb[204].mxu0  ;;  %12320 = vpow2.f32 %v9544_v4  ;;  %v6824_v4 = vadd.f32 %v14768_v15, %v14852_v33 }
0x1263   :  { %v12305_v7 = vpop.eup %12304  ;;  %v10921_v39 = vadd.f32 %v7110_v48, %v14834_v20  ;;  %v7112_v5 = vpop.f32.mrb[205].mxu0  ;;  %v7488_v48 = vadd.f32 %v14857_v28, %v14804_v3 }
0x1264   :  { %12322 = vrcp.f32 %v7322_v44  ;;  %v7323_v57 = vadd.f32 1.0, %v12305_v7  ;;  %v10922_v23 = vadd.f32 %v7112_v5, %v14837_v9  ;;  %v7114_v16 = vpop.f32.mrb[206].mxu0  ;;  %v12307_v60 = vpop.eup %12306 }
0x1265   :  { %12324 = vpow2.f32 %v9545_v41  ;;  %v9530_v32 = vmul.f32 -1.442695, %v10921_v39  ;;  %v10923_v56 = vadd.f32 %v7114_v16, %v14834_v20  ;;  %v7116_v29 = vpop.f32.mrb[207].mxu0  ;;  %v7434_v41 = vadd.f32 1.0, %v12307_v60 }
0x1266   :  { %v12309_v8 = vpop.eup %12308  ;;  %12326 = vrcp.f32 %v7323_v57  ;;  %v9546_v25 = vmul.f32 -1.442695, %v10922_v23  ;;  %v10924_v15 = vadd.f32 %v7116_v29, %v14837_v9 }
0x1267   :  { %v12311_v44 = vpop.eup %12310  ;;  %v7503_v7 = vmul.f32 %v12309_v8, %v7487_v17  ;;  %12328 = vrcp.f32 %v7433_v24  ;;  %v9531_v5 = vmul.f32 -1.442695, %v10923_v56 }
0x1268   :  { %v12313_v37 = vpop.eup %12312  ;;  %12330 = vpow2.f32 %v9530_v32  ;;  %v7435_v23 = vadd.f32 1.0, %v12311_v44  ;;  %v9547_v8 = vmul.f32 -1.442695, %v10924_v15  ;;  %v6832_v44 = vadd.f32 %v14766_v36, %v14852_v33 }
0x1269   :  { %v7519_v39 = vadd.f32 %v7503_v7, %v6824_v4  ;;  %v7504_v16 = vmul.f32 %v12313_v37, %v7488_v48  ;;  %12332 = vpow2.f32 %v9546_v25  ;;  %v12315_v57 = vpop.eup %12314  ;;  %v7489_v37 = vadd.f32 %v14798_v59, %v14857_v28 }
0x126a   :  { %12334 = vpow2.f32 %v9531_v5  ;;  %v7120_v6 = vpop.f32.mrb[208].mxu0  ;;  %v14871_v45 = vpop.eup %12316  ;;  %v7324_v24 = vadd.f32 1.0, %v12315_v57  ;;  %v7490_v5 = vadd.f32 %v14802_v53, %v14857_v28  ;;  %v14891_v53 = vadd.f32 %v14780_v63, %v14852_v33 }
0x126b   :  { %12336 = vtanh.f32 %v7519_v39  ;;  %v7520_v3 = vadd.f32 %v7504_v16, %v6827_v50  ;;  %v10925_v17 = vadd.f32 %v7120_v6, %v14834_v20  ;;  %v7122_v56 = vpop.f32.mrb[209].mxu0  ;;  %v12319_v38 = vpop.eup %12318  ;;  %v6835_v6 = vadd.f32 %v14770_v30, %v14852_v33 }
0x126c   :  { %12338 = vrcp.f32 %v7434_v41  ;;  %v7124_v60 = vpop.f32.mrb[210].mxu0  ;;  %v12321_v32 = vpop.eup %12320  ;;  %v7325_v29 = vadd.f32 1.0, %v12319_v38  ;;  %v14884_v41 = vadd.f32 %v14774_v18, %v14852_v33  ;;  %v6840_v39 = vadd.f32 %v14776_v14, %v14852_v33 }
0x126d   :  { %12340 = vtanh.f32 %v7520_v3  ;;  %v7126_v4 = vpop.f32.mrb[211].mxu0  ;;  %v9532_v48 = vmul.f32 -1.442695, %v10925_v17  ;;  %v7436_v36 = vadd.f32 1.0, %v12321_v32  ;;  %v10926_v30 = vadd.f32 %v7122_v56, %v14837_v9 }
0x126e   :  { %v12323_v25 = vpop.eup %12322  ;;  %12342 = vrcp.f32 %v7324_v24  ;;  %v7491_v18 = vadd.f32 %v14857_v28, %v14808_v12  ;;  %v7551_v63 = vsub.f32 1.0, %v14871_v45  ;;  %v7583_v12 = vmul.f32 %v14871_v45, %v14563_v19 }
0x126f   :  { %v12325_v7 = vpop.eup %12324  ;;  %v7505_v50 = vmul.f32 %v12323_v25, %v7489_v37  ;;  %12344 = vrcp.f32 %v7435_v23  ;;  %v10927_v23 = vadd.f32 %v7124_v60, %v14834_v20 }
0x1270   :  { %v12327_v59 = vpop.eup %12326  ;;  %12346 = vrcp.f32 %v7325_v29  ;;  %v7437_v38 = vadd.f32 1.0, %v12325_v7 }
0x1271   :  { %v12329_v16 = vpop.eup %12328  ;;  %v7521_v15 = vadd.f32 %v7505_v50, %v6832_v44  ;;  %v7506_v57 = vmul.f32 %v12327_v59, %v7490_v5  ;;  %12348 = vpow2.f32 %v9547_v8  ;;  %v9548_v44 = vmul.f32 -1.442695, %v10926_v30 }
0x1272   :  { %v12331_v3 = vpop.eup %12330  ;;  %12350 = vpow2.f32 %v9532_v48  ;;  %v7130_v14 = vpop.f32.mrb[212].mxu0  ;;  %v7552_v5 = vsub.f32 1.0, %v12329_v16  ;;  %v9533_v7 = vmul.f32 -1.442695, %v10927_v23  ;;  %v10928_v50 = vadd.f32 %v7126_v4, %v14837_v9 }
0x1273   :  { %v12333_v24 = vpop.eup %12332  ;;  %12352 = vtanh.f32 %v7521_v15  ;;  %v7522_v17 = vadd.f32 %v7506_v57, %v6835_v6  ;;  %v7326_v32 = vadd.f32 1.0, %v12331_v3  ;;  %v7132_v37 = vpop.f32.mrb[213].mxu0  ;;  %v10929_v56 = vadd.f32 %v7130_v14, %v14834_v20 }
0x1274   :  { %v12335_v29 = vpop.eup %12334  ;;  %12354 = vrcp.f32 %v7436_v36  ;;  %v7134_v8 = vpop.f32.mrb[214].mxu0  ;;  %v7492_v15 = vadd.f32 %v14857_v28, %v14812_v21  ;;  %v7438_v57 = vadd.f32 1.0, %v12333_v24  ;;  %v7584_v19 = vmul.f32 %v12329_v16, %v14566_v2 }
0x1275   :  { %v12337_v25 = vpop.eup %12336  ;;  %12356 = vtanh.f32 %v7522_v17  ;;  %v7327_v60 = vadd.f32 1.0, %v12335_v29  ;;  %v7136_v48 = vpop.f32.mrb[215].mxu0  ;;  %v9534_v3 = vmul.f32 -1.442695, %v10929_v56  ;;  %v10930_v4 = vadd.f32 %v7132_v37, %v14837_v9 }
0x1276   :  { %v12339_v6 = vpop.eup %12338  ;;  %12358 = vrcp.f32 %v7326_v32  ;;  %v7567_v59 = vmul.f32 %v12337_v25, %v7551_v63  ;;  %v9549_v63 = vmul.f32 -1.442695, %v10928_v50  ;;  %v10931_v21 = vadd.f32 %v7134_v8, %v14834_v20 }
0x1277   :  { %v12341_v36 = vpop.eup %12340  ;;  %12360 = vrcp.f32 %v7437_v38  ;;  %v7553_v32 = vsub.f32 1.0, %v12339_v6  ;;  %v7585_v16 = vmul.f32 %v12339_v6, %v14576_v0  ;;  %v9550_v0 = vmul.f32 -1.442695, %v10930_v4 }
0x1278   :  { %v12343_v45 = vpop.eup %12342  ;;  %12362 = vrcp.f32 %v7327_v60  ;;  %v7568_v30 = vmul.f32 %v12341_v36, %v7552_v5  ;;  %v14904_v14 = vadd.f32 %v7583_v12, %v7567_v59  ;;  %v9535_v36 = vmul.f32 -1.442695, %v10931_v21 }
0x1279   :  { %v12345_v17 = vpop.eup %12344  ;;  %v7507_v23 = vmul.f32 %v12343_v45, %v7491_v18  ;;  %12364 = vpow2.f32 %v9548_v44 }
0x127a   :  { %v12347_v29 = vpop.eup %12346  ;;  %12366 = vpow2.f32 %v9533_v7  ;;  %v7140_v24 = vpop.f32.mrb[216].mxu0  ;;  %v14908_v38 = vadd.f32 %v7584_v19, %v7568_v30  ;;  %v7554_v18 = vsub.f32 1.0, %v12345_v17  ;;  %v7493_v19 = vadd.f32 %v14806_v22, %v14857_v28 }
0x127b   :  { %v12349_v2 = vpop.eup %12348  ;;  %v7523_v56 = vadd.f32 %v7507_v23, %v6840_v39  ;;  %v7508_v12 = vmul.f32 %v12347_v29, %v7492_v15  ;;  %12368 = vrcp.f32 %v7438_v57  ;;  %v7142_v25 = vpop.f32.mrb[217].mxu0  ;;  %v10933_v37 = vadd.f32 %v7140_v24, %v14834_v20 }
0x127c   :  { %v12351_v60 = vpop.eup %12350  ;;  %12370 = vpow2.f32 %v9534_v3  ;;  %v7144_v44 = vpop.f32.mrb[218].mxu0  ;;  %v14914_v5 = vpack.c.bf16 %v14908_v38, %v14904_v14  ;;  %v10932_v15 = vadd.f32 %v7136_v48, %v14837_v9  ;;  %v7586_v45 = vmul.f32 %v12345_v17, %v14579_v26 }
0x127d   :  { %v12353_v8 = vpop.eup %12352  ;;  %12372 = vtanh.f32 %v7523_v56  ;;  %v7524_v7 = vadd.f32 %v7508_v12, %v14891_v53  ;;  %v7328_v50 = vadd.f32 1.0, %v12351_v60  ;;  %v14917_v39 = vpop.f32.mrb[219].mxu0  ;;  %v7439_v53 = vadd.f32 1.0, %v12349_v2 }
0x127e   :  { %v12355_v6 = vpop.eup %12354  ;;  %v7569_v59 = vmul.f32 %v12353_v8, %v7553_v32  ;;  %12374 = vpow2.f32 %v9549_v63  ;;  %10669 = vmatprep.mubr.bf16.mxu1 %v14914_v5  ;;  %v9536_v32 = vmul.f32 -1.442695, %v10933_v37  ;;  %v7494_v48 = vadd.f32 %v14810_v52, %v14857_v28 }
0x127f   :  { %v12357_v57 = vpop.eup %12356  ;;  %12376 = vtanh.f32 %v7524_v7  ;;  %v10934_v63 = vadd.f32 %v7142_v25, %v14837_v9  ;;  %v9551_v26 = vmul.f32 -1.442695, %v10932_v15  ;;  %v6851_v2 = vadd.f32 %v14778_v40, %v14852_v33 }
0x1280   :  { %v12359_v3 = vpop.eup %12358  ;;  %v14924_v30 = vadd.f32 %v7585_v16, %v7569_v59  ;;  %v7570_v23 = vmul.f32 %v12357_v57, %v7554_v18  ;;  %12378 = vrcp.f32 %v7328_v50  ;;  %v10935_v25 = vadd.f32 %v7144_v44, %v14834_v20 }
0x1281   :  { %v12361_v4 = vpop.eup %12360  ;;  %v7509_v29 = vmul.f32 %v12359_v3, %v7493_v19  ;;  %12380 = vpow2.f32 %v9550_v0  ;;  %v9552_v50 = vmul.f32 -1.442695, %v10934_v63  ;;  %v7555_v59 = vsub.f32 1.0, %v12355_v6 }
0x1282   :  { %v12363_v21 = vpop.eup %12362  ;;  %v14929_v22 = vadd.f32 %v7586_v45, %v7570_v23  ;;  %12382 = vpow2.f32 %v9535_v36  ;;  %v7150_v17 = vpop.f32.mrb[220].mxu0  ;;  %v7587_v44 = vmul.f32 %v12355_v6, %v14589_v42  ;;  %v9537_v45 = vmul.f32 -1.442695, %v10935_v25 }
0x1283   :  { %v12365_v24 = vpop.eup %12364  ;;  %v7525_v16 = vadd.f32 %v7509_v29, %v14884_v41  ;;  %v7510_v56 = vmul.f32 %v12363_v21, %v7494_v48  ;;  %12384 = vrcp.f32 %v7439_v53  ;;  %v7152_v12 = vpop.f32.mrb[221].mxu0  ;;  %v10937_v0 = vadd.f32 %v7150_v17, %v14834_v20 }
0x1284   :  { %v12367_v52 = vpop.eup %12366  ;;  %v14936_v60 = vpack.c.bf16 %v14929_v22, %v14924_v30  ;;  %12386 = vpow2.f32 %v9536_v32  ;;  %v7154_v18 = vpop.f32.mrb[222].mxu0  ;;  %v7440_v15 = vadd.f32 1.0, %v12365_v24  ;;  %v7556_v53 = vsub.f32 1.0, %v12361_v4 }
0x1285   :  { %v12369_v37 = vpop.eup %12368  ;;  %12388 = vtanh.f32 %v7525_v16  ;;  %v7526_v8 = vadd.f32 %v7510_v56, %v6851_v2  ;;  %v7329_v7 = vadd.f32 1.0, %v12367_v52  ;;  %v14939_v40 = vpop.f32.mrb[223].mxu0  ;;  %v7495_v32 = vadd.f32 %v14857_v28, %v14816_v35 }
0x1286   :  { %v12371_v41 = vpop.eup %12370  ;;  %12390 = vpow2.f32 %v9551_v26  ;;  %10670 = vmatmul.mubr.bf16.vlgmr.msra.gmra.mrb[64].mxu1 %v14936_v60  ;;  %v7588_v48 = vmul.f32 %v12361_v4, %v14592_v55  ;;  %v9538_v63 = vmul.f32 -1.442695, %v10937_v0  ;;  %v6856_v42 = vadd.f32 %v14784_v10, %v14852_v33 }
0x1287   :  { %v12373_v36 = vpop.eup %12372  ;;  %12392 = vtanh.f32 %v7526_v8  ;;  %v7330_v57 = vadd.f32 1.0, %v12371_v41  ;;  %v10936_v24 = vadd.f32 %v14917_v39, %v14837_v9  ;;  %v10939_v52 = vadd.f32 %v7154_v18, %v14834_v20 }
0x1288   :  { %v12375_v19 = vpop.eup %12374  ;;  %12394 = vrcp.f32 %v7329_v7  ;;  %v7571_v3 = vmul.f32 %v12373_v36, %v7555_v59  ;;  %v7557_v8 = vsub.f32 1.0, %v12369_v37  ;;  %v10938_v10 = vadd.f32 %v7152_v12, %v14837_v9 }
0x1289   :  { %v12377_v23 = vpop.eup %12376  ;;  %12396 = vpow2.f32 %v9552_v50  ;;  %v7441_v16 = vadd.f32 1.0, %v12375_v19  ;;  %v9553_v0 = vmul.f32 -1.442695, %v10936_v24  ;;  %v7496_v12 = vadd.f32 %v14857_v28, %v14820_v1 }
0x128a   :  { %v12379_v29 = vpop.eup %12378  ;;  %12398 = vrcp.f32 %v7330_v57  ;;  %v7572_v21 = vmul.f32 %v12377_v23, %v7556_v53  ;;  %v14947_v26 = vadd.f32 %v7587_v44, %v7571_v3  ;;  %v9539_v19 = vmul.f32 -1.442695, %v10939_v52 }
0x128b   :  { %v12381_v17 = vpop.eup %12380  ;;  %v7511_v6 = vmul.f32 %v12379_v29, %v7495_v32  ;;  %12400 = vrcp.f32 %v7440_v15  ;;  %v7589_v15 = vmul.f32 %v12369_v37, %v14602_v49  ;;  %v9554_v23 = vmul.f32 -1.442695, %v10938_v10 }
0x128c   :  { %v12383_v2 = vpop.eup %12382  ;;  %12402 = vpow2.f32 %v9537_v45  ;;  %v14953_v35 = vadd.f32 %v7588_v48, %v7572_v21  ;;  %v7442_v50 = vadd.f32 1.0, %v12381_v17  ;;  %v6859_v49 = vadd.f32 %v14788_v46, %v14852_v33 }
0x128d   :  { %v12385_v55 = vpop.eup %12384  ;;  %v7527_v4 = vadd.f32 %v7511_v6, %v6856_v42  ;;  %v7331_v56 = vadd.f32 1.0, %v12383_v2  ;;  %12404 = vpow2.f32 %v9538_v63  ;;  %v7497_v37 = vadd.f32 %v14814_v47, %v14857_v28 }
0x128e   :  { %v12387_v25 = vpop.eup %12386  ;;  %v14959_v7 = vpack.c.bf16 %v14953_v35, %v14947_v26  ;;  %v7558_v57 = vsub.f32 1.0, %v12385_v55  ;;  %v7590_v44 = vmul.f32 %v12385_v55, %v14605_v58  ;;  %v6864_v58 = vadd.f32 %v14782_v11, %v14852_v33 }
0x128f   :  { %v12389_v39 = vpop.eup %12388  ;;  %12406 = vtanh.f32 %v7527_v4  ;;  %v7332_v41 = vadd.f32 1.0, %v12387_v25  ;;  %v10940_v46 = vadd.f32 %v14939_v40, %v14837_v9 }
0x1290   :  { %v12391_v59 = vpop.eup %12390  ;;  %v7573_v36 = vmul.f32 %v12389_v39, %v7557_v8  ;;  %12408 = vrcp.f32 %v7331_v56  ;;  %10673 = vmatprep.mubr.bf16.mxu1 %v14959_v7  ;;  %v7498_v56 = vadd.f32 %v14818_v54, %v14857_v28 }
0x1291   :  { %v12393_v18 = vpop.eup %12392  ;;  %12410 = vrcp.f32 %v7441_v16  ;;  %v7443_v63 = vadd.f32 1.0, %v12391_v59  ;;  %v9555_v52 = vmul.f32 -1.442695, %v10940_v46  ;;  %v6875_v46 = vadd.f32 %v14796_v31, %v14852_v33 }
0x1292   :  { %v12395_v45 = vpop.eup %12394  ;;  %v14966_v53 = vadd.f32 %v7589_v15, %v7573_v36  ;;  %v7574_v3 = vmul.f32 %v12393_v18, %v7558_v57  ;;  %12412 = vrcp.f32 %v7332_v41  ;;  %v7499_v41 = vadd.f32 %v14857_v28, %v14824_v27 }
0x1293   :  { %v12397_v32 = vpop.eup %12396  ;;  %v7512_v48 = vmul.f32 %v12395_v45, %v7496_v12  ;;  %12414 = vrcp.f32 %v7442_v50  ;;  %v6867_v50 = vadd.f32 %v14786_v34, %v14852_v33  ;;  %v6872_v15 = vadd.f32 %v14792_v61, %v14852_v33 }
0x1294   :  { %v12399_v1 = vpop.eup %12398  ;;  %v14974_v29 = vadd.f32 %v7590_v44, %v7574_v3  ;;  %12416 = vpow2.f32 %v9553_v0  ;;  %v7444_v11 = vadd.f32 1.0, %v12397_v32  ;;  %v7500_v61 = vadd.f32 %v14857_v28, %v14831_v43 }
0x1295   :  { %v12401_v21 = vpop.eup %12400  ;;  %v7528_v17 = vadd.f32 %v7512_v48, %v6859_v49  ;;  %v7513_v42 = vmul.f32 %v12399_v1, %v7497_v37  ;;  %12418 = vpow2.f32 %v9539_v19 }
0x1296   :  { %v12403_v6 = vpop.eup %12402  ;;  %v14980_v47 = vpack.c.bf16 %v14974_v29, %v14966_v53  ;;  %12420 = vpow2.f32 %v9554_v23  ;;  %v7559_v4 = vsub.f32 1.0, %v12401_v21  ;;  %v7591_v10 = vmul.f32 %v12401_v21, %v14615_v62 }
0x1297   :  { %12422 = vtanh.f32 %v7528_v17  ;;  %v7529_v24 = vadd.f32 %v7513_v42, %v6864_v58  ;;  %v7333_v2 = vadd.f32 1.0, %v12403_v6  ;;  %v12405_v55 = vpop.eup %12404  ;;  %v15560_v6 = vld [vmem:[#allocation39_spill] sm:$0xff] }
0x1298   :  { %12424 = vrcp.f32 %v7443_v63  ;;  %10674 = vmatmul.mubr.bf16.gmra.mrb[68].mxu1 %v14980_v47  ;;  %v7334_v40 = vadd.f32 1.0, %v12405_v55 }
0x1299   :  { %v12407_v16 = vpop.eup %12406  ;;  %12426 = vtanh.f32 %v7529_v24  ;;  %v7501_v24 = vadd.f32 %v15560_v6, %v14857_v28 }
0x129a   :  { %v12409_v25 = vpop.eup %12408  ;;  %12428 = vrcp.f32 %v7333_v2  ;;  %v7575_v8 = vmul.f32 %v12407_v16, %v7559_v4 }
0x129b   :  { %v12411_v39 = vpop.eup %12410  ;;  %v7514_v0 = vmul.f32 %v12409_v25, %v7498_v56  ;;  %12430 = vrcp.f32 %v7444_v11 }
0x129c   :  { %v12413_v59 = vpop.eup %12412  ;;  %12432 = vrcp.f32 %v7334_v40  ;;  %v14990_v54 = vadd.f32 %v7591_v10, %v7575_v8  ;;  %v7560_v27 = vsub.f32 1.0, %v12411_v39  ;;  %v7592_v37 = vmul.f32 %v12411_v39, %v14618_v51  ;;  %v15562_v8 = vld [vmem:[#allocation28_spill] sm:$0xff] }
0x129d   :  { %v12415_v36 = vpop.eup %12414  ;;  %v7530_v57 = vadd.f32 %v7514_v0, %v6867_v50  ;;  %v7515_v18 = vmul.f32 %v12413_v59, %v7499_v41  ;;  %12434 = vpow2.f32 %v9555_v52  ;;  %v15563_v0 = vld [vmem:[#allocation26_spill] sm:$0xff] }
0x129e   :  { %v12417_v62 = vpop.eup %12416  ;;  %v7561_v32 = vsub.f32 1.0, %v12415_v36  ;;  %v7593_v21 = vmul.f32 %v12415_v36, %v14628_v13  ;;  %v15561_v13 = vld [vmem:[#allocation27_spill] sm:$0xff]  ;;  %v7502_v59 = vadd.f32 %v15563_v0, %v14857_v28 }
0x129f   :  { %v12419_v12 = vpop.eup %12418  ;;  %12436 = vtanh.f32 %v7530_v57  ;;  %v7531_v34 = vadd.f32 %v7515_v18, %v6872_v15  ;;  %v7445_v3 = vadd.f32 1.0, %v12417_v62  ;;  %v6880_v4 = vadd.f32 %v15561_v13, %v14852_v33  ;;  %v15565_v57 = vld [vmem:[#allocation33_spill] sm:$0xff]  ;;  %v15572_v13 = vld [vmem:[#allocation23_spill] sm:$0xff] }
0x12a0   :  { %v12421_v44 = vpop.eup %12420  ;;  %v7335_v19 = vadd.f32 1.0, %v12419_v12  ;;  %v15566_v12 = vld [vmem:[#allocation25_spill] sm:$0xff] }
0x12a1   :  { %v12423_v45 = vpop.eup %12422  ;;  %12438 = vtanh.f32 %v7531_v34  ;;  %v7446_v1 = vadd.f32 1.0, %v12421_v44  ;;  %v6883_v34 = vadd.f32 %v15566_v12, %v14852_v33 }
0x12a2   :  { %v12425_v23 = vpop.eup %12424  ;;  %v7576_v49 = vmul.f32 %v12423_v45, %v7560_v27  ;;  %12440 = vrcp.f32 %v7335_v19 }
0x12a3   :  { %v12427_v48 = vpop.eup %12426  ;;  %12442 = vrcp.f32 %v7445_v3  ;;  %v7562_v31 = vsub.f32 1.0, %v12425_v23  ;;  %v7594_v10 = vmul.f32 %v12425_v23, %v15562_v8 }
0x12a4   :  { %v12429_v58 = vpop.eup %12428  ;;  %v7577_v63 = vmul.f32 %v12427_v48, %v7561_v32  ;;  %v14998_v17 = vadd.f32 %v7592_v37, %v7576_v49  ;;  %12444 = vrcp.f32 %v7446_v1  ;;  %v15568_v48 = vld [vmem:[#allocation34_spill] sm:$0xff] }
0x12a5   :  { %v12431_v42 = vpop.eup %12430  ;;  %v7516_v51 = vmul.f32 %v12429_v58, %v7500_v61 }
0x12a6   :  { %v12433_v11 = vpop.eup %12432  ;;  %v15004_v2 = vadd.f32 %v7593_v21, %v7577_v63  ;;  %v15008_v43 = vpack.c.bf16 %v14998_v17, %v14990_v54  ;;  %v7563_v50 = vsub.f32 1.0, %v12431_v42  ;;  %v7595_v18 = vmul.f32 %v12431_v42, %v15565_v57  ;;  %v15569_v63 = vld [vmem:[#allocation38_spill] sm:$0xff] }
0x12a7   :  { %v12435_v55 = vpop.eup %12434  ;;  %v7532_v16 = vadd.f32 %v7516_v51, %v6875_v46  ;;  %v7517_v56 = vmul.f32 %v12433_v11, %v7501_v24 }
0x12a8   :  { %10677 = vmatprep.mubr.bf16.mxu1 %v15008_v43  ;;  %v7447_v39 = vadd.f32 1.0, %v12435_v55 }
0x12a9   :  { %v12437_v40 = vpop.eup %12436  ;;  %12446 = vtanh.f32 %v7532_v16  ;;  %v7533_v52 = vadd.f32 %v7517_v56, %v6880_v4 }
0x12aa   :  { %v7578_v25 = vmul.f32 %v12437_v40, %v7562_v31  ;;  %v12710_v31 = vld [vmem:[#allocation2] sm:$0xff]  }
0x12ab   :  { %v12439_v41 = vpop.eup %12438  ;;  %12448 = vtanh.f32 %v7533_v52 }
0x12ac   :  { %v15016_v36 = vadd.f32 %v7594_v10, %v7578_v25  ;;  %v7579_v15 = vmul.f32 %v12439_v41, %v7563_v50  ;;  %v12441_v62 = vpop.eup %12440  ;;  %12450 = vrcp.f32 %v7447_v39 }
0x12ad   :  { %v7518_v19 = vmul.f32 %v12441_v62, %v7502_v59  ;;  %v12443_v45 = vpop.eup %12442 }
0x12ae   :  { %15564 = vst [vmem:[#allocation20_spill] sm:$0xff] %v15016_v36  ;;  %v15023_v44 = vpack.c.bf16 %v15016_v36, %v15004_v2  ;;  %v15025_v27 = vadd.f32 %v7595_v18, %v7579_v15  ;;  %v12445_v28 = vpop.eup %12444  ;;  %v7564_v23 = vsub.f32 1.0, %v12443_v45  ;;  %v7596_v61 = vmul.f32 %v12443_v45, %v15568_v48  ;;  %v12711_v48 = vld [vmem:[#allocation8 + $0x8] ss:$12 sps:$4 sm:$0xff]  }
0x12af   :  { %v7534_v3 = vadd.f32 %v7518_v19, %v6883_v34  ;;  %v7565_v49 = vsub.f32 1.0, %v12445_v28  ;;  %v7597_v21 = vmul.f32 %v12445_v28, %v15569_v63  ;;  %v12715_v63 = vld [vmem:[#allocation8 + $0x38] ss:$12 sps:$4 sm:$0xff]  }
0x12b0   :  { %15567 = vst [vmem:[#allocation22_spill] sm:$0xff] %v15025_v27  ;;  %10678 = vmatmul.mubr.bf16.gmra.mrb[72].mxu1 %v15023_v44 }
0x12b1   :  { %12452 = vtanh.f32 %v7534_v3 }
0x12b3   :  { %v12447_v32 = vpop.eup %12446 }
0x12b4   :  { %v7580_v37 = vmul.f32 %v12447_v32, %v7564_v23 }
0x12b5   :  { %v12449_v1 = vpop.eup %12448 }
0x12b6   :  { %v7581_v58 = vmul.f32 %v12449_v1, %v7565_v49  ;;  %v15030_v42 = vadd.f32 %v7596_v61, %v7580_v37  ;;  %v12451_v46 = vpop.eup %12450  ;;  %v12712_v61 = vld [vmem:[#allocation2 + $0x8] sm:$0xff]   ;;  %v12713_v1 = vld [vmem:[#allocation2 + $0x10] sm:$0xff]  }
0x12b7   :  { %v7566_v51 = vsub.f32 1.0, %v12451_v46  ;;  %v7598_v4 = vmul.f32 %v12451_v46, %v15572_v13  ;;  %v12717_v46 = vld [vmem:[#allocation2 + $0x20] sm:$0xff]   ;;  %v12721_v13 = vld [vmem:[#allocation2 + $0x30] sm:$0xff]  }
0x12b8   :  { %15570 = vst [vmem:[#allocation39_spill] sm:$0xff] %v15030_v42  ;;  %v15032_v6 = vadd.f32 %v7597_v21, %v7581_v58  ;;  %v15036_v24 = vpack.c.bf16 %v15030_v42, %v15025_v27  ;;  %v12714_v58 = vld [vmem:[#allocation8 + $0x20] ss:$12 sps:$4 sm:$0xff]   ;;  %v12716_v21 = vld [vmem:[#allocation2 + $0x18] sm:$0xff]  }
0x12ba   :  { %15571 = vst [vmem:[#allocation27_spill] sm:$0xff] %v15032_v6  ;;  %10681 = vmatprep.mubr.bf16.mxu1 %v15036_v24 }
0x12bb   :  { %v12453_v11 = vpop.eup %12452 }
0x12bc   :  { %v7582_v55 = vmul.f32 %v12453_v11, %v7566_v51  ;;  %v12718_v51 = vld [vmem:[#allocation8 + $0x50] ss:$12 sps:$4 sm:$0xff]   ;;  %v12719_v11 = vld [vmem:[#allocation8 + $0x68] ss:$12 sps:$4 sm:$0xff]  }
0x12be   :  { %v15040_v16 = vadd.f32 %v7598_v4, %v7582_v55  ;;  %v12720_v55 = vld [vmem:[#allocation2 + $0x28] sm:$0xff]  }
0x12bf   :  { %v12722_v4 = vld [vmem:[#allocation8 + $0x80] ss:$12 sps:$4 sm:$0xff]  }
0x12c0   :  { %15573 = vst [vmem:[#allocation28_spill] sm:$0xff] %v15040_v16  ;;  %v15044_v56 = vpack.c.bf16 %v15040_v16, %v15032_v6 }
0x12c2   :  { %10682 = vmatmul.mubr.bf16.gmra.mrb[76].mxu1 %v15044_v56 }
0x12c3   :  { %10701 = vmatprep.mubr.bf16.mxu1 %v12710_v31  ;;  %v12723_v31 = vld [vmem:[#allocation8 + $0x98] ss:$12 sps:$4 sm:$0xff]  }
0x1359   :  { %v10671_v40 = vpop.f32.mrb[64].mxu1 }
0x135a   :  { %v7721_v52 = vpop.f32.mrb[65].mxu1 }
0x135b   :  { %v10672_v25 = vpop.f32.mrb[66].mxu1 }
0x135c   :  { %v7785_v8 = vpack.c.bf16 %v10672_v25, %v10671_v40  ;;  %v7724_v10 = vpop.f32.mrb[67].mxu1  ;;  %v12724_v40 = vld [vmem:[#allocation2 + $0x38] sm:$0xff]   ;;  %v12726_v25 = vld [vmem:[#allocation10 + $0x8] ss:$12 sps:$4 sm:$0xff]  }
0x135d   :  { %v7784_v39 = vpack.c.bf16 %v7724_v10, %v7721_v52  ;;  %v12725_v52 = vld [vmem:[#allocation8 + $0xb0] ss:$12 sps:$4 sm:$0xff]  }
0x135f   :  { %10685 = vmatprep.subr.bf16.mxu1 %v7784_v39 }
0x1360   :  { %10686 = vmatpush3.bf16.msra.mxu1 %v7784_v39 }
0x1361   :  { %10687 = vmatprep.subr.bf16.mxu1 %v7785_v8 }
0x1364   :  { %10688 = vmatpush3.bf16.msra.mxu1 %v7785_v8 }
0x136b   :  { %v10675_v50 = vpop.f32.mrb[68].mxu1 }
0x136c   :  { %v7737_v41 = vpop.f32.mrb[69].mxu1 }
0x136d   :  { %v10676_v0 = vpop.f32.mrb[70].mxu1 }
0x136e   :  { %v7787_v59 = vpack.c.bf16 %v10676_v0, %v10675_v50  ;;  %v7740_v15 = vpop.f32.mrb[71].mxu1 }
0x136f   :  { %v7786_v57 = vpack.c.bf16 %v7740_v15, %v7737_v41 }
0x1371   :  { %10689 = vmatprep.subr.bf16.mxu1 %v7786_v57 }
0x1372   :  { %10690 = vmatpush3.bf16.msra.mxu1 %v7786_v57  ;;  %v15574_v57 = vmov 0  }
0x1373   :  { %10691 = vmatprep.subr.bf16.mxu1 %v7787_v59 }
0x1376   :  { %10692 = vmatpush3.bf16.msra.mxu1 %v7787_v59  ;;  %v12727_v59 = vld [vmem:[#allocation10] ss:$12 sps:$4 sm:$0xff]  }
0x1383   :  { %v10679_v18 = vpop.f32.mrb[72].mxu1 }
0x1384   :  { %v7753_v62 = vpop.f32.mrb[73].mxu1 }
0x1385   :  { %v10680_v12 = vpop.f32.mrb[74].mxu1 }
0x1386   :  { %v7789_v34 = vpack.c.bf16 %v10680_v12, %v10679_v18  ;;  %v7756_v19 = vpop.f32.mrb[75].mxu1  ;;  %v12729_v12 = vld [vmem:[#allocation10 + $0x1c] ss:$12 sps:$4 sm:$0xff]  }
0x1387   :  { %v7788_v45 = vpack.c.bf16 %v7756_v19, %v7753_v62  ;;  %v12728_v62 = vld [vmem:[#allocation10 + $0x20] ss:$12 sps:$4 sm:$0xff]  }
0x1389   :  { %10693 = vmatprep.subr.bf16.mxu1 %v7788_v45 }
0x138a   :  { %10694 = vmatpush3.bf16.msra.mxu1 %v7788_v45 }
0x138b   :  { %10695 = vmatprep.subr.bf16.mxu1 %v7789_v34 }
0x138e   :  { %10696 = vmatpush3.bf16.msra.mxu1 %v7789_v34 }
0x1395   :  { %v10683_v3 = vpop.f32.mrb[76].mxu1 }
0x1396   :  { %v7769_v28 = vpop.f32.mrb[77].mxu1 }
0x1397   :  { %v10684_v23 = vpop.f32.mrb[78].mxu1 }
0x1398   :  { %v7791_v32 = vpack.c.bf16 %v10684_v23, %v10683_v3  ;;  %v7772_v49 = vpop.f32.mrb[79].mxu1  ;;  %v12730_v3 = vld [vmem:[#allocation10 + $0x18] ss:$12 sps:$4 sm:$0xff]   ;;  %v12731_v23 = vld [vmem:[#allocation10 + $0x34] ss:$12 sps:$4 sm:$0xff]  }
0x1399   :  { %v7790_v37 = vpack.c.bf16 %v7772_v49, %v7769_v28 }
0x139b   :  { %10697 = vmatprep.subr.bf16.mxu1 %v7790_v37 }
0x139c   :  { %10698 = vmatpush3.bf16.msra.mxu1 %v7790_v37  ;;  %v12733_v37 = vld [vmem:[#allocation10 + $0x30] ss:$12 sps:$4 sm:$0xff]  }
0x139d   :  { %10699 = vmatprep.subr.bf16.mxu1 %v7791_v32 }
0x13a0   :  { %10700 = vmatpush3.bf16.msra.mxu1 %v7791_v32  ;;  %v12732_v32 = vld [vmem:[#allocation10 + $0x38] ss:$12 sps:$4 sm:$0xff]  }
0x13a1   :  { %10717 = vmatprep.subr.bf16.mxu1 %v12711_v48 }
0x13a3   :  { %10702 = vmatmul.mubr.bf16.vlgmr.msra.gmra.mrb[80].mxu1 %v12712_v61  ;;  %v12734_v61 = vld [vmem:[#allocation10 + $0x50] ss:$12 sps:$4 sm:$0xff]  }
0x13a4   :  { %10705 = vmatprep.mubr.bf16.mxu1 %v12713_v1  ;;  %10718 = vmatpush3.bf16.msra.mxu1 %v12711_v48  ;;  %v12735_v1 = vld [vmem:[#allocation10 + $0x4c] ss:$12 sps:$4 sm:$0xff]  }
0x13a5   :  { %10719 = vmatprep.subr.bf16.mxu1 %v12714_v58 }
0x13a8   :  { %10720 = vmatpush3.bf16.msra.mxu1 %v12714_v58 }
0x13a9   :  { %10721 = vmatprep.subr.bf16.mxu1 %v12715_v63 }
0x13ab   :  { %10706 = vmatmul.mubr.bf16.gmra.mrb[84].mxu1 %v12716_v21 }
0x13ac   :  { %10709 = vmatprep.mubr.bf16.mxu1 %v12717_v46  ;;  %10722 = vmatpush3.bf16.msra.mxu1 %v12715_v63 }
0x13ad   :  { %10723 = vmatprep.subr.bf16.mxu1 %v12718_v51 }
0x13b0   :  { %10724 = vmatpush3.bf16.msra.mxu1 %v12718_v51  ;;  %v12736_v51 = vld [vmem:[#allocation10 + $0x48] ss:$12 sps:$4 sm:$0xff]  }
0x13b1   :  { %10725 = vmatprep.subr.bf16.mxu1 %v12719_v11 }
0x13b3   :  { %10710 = vmatmul.mubr.bf16.gmra.mrb[88].mxu1 %v12720_v55  ;;  %v12738_v55 = vld [vmem:[#allocation10 + $0x64] ss:$12 sps:$4 sm:$0xff]  }
0x13b4   :  { %10713 = vmatprep.mubr.bf16.mxu1 %v12721_v13  ;;  %10726 = vmatpush3.bf16.msra.mxu1 %v12719_v11  ;;  %v12737_v11 = vld [vmem:[#allocation10 + $0x68] ss:$12 sps:$4 sm:$0xff]  }
0x13b5   :  { %10727 = vmatprep.subr.bf16.mxu1 %v12722_v4 }
0x13b8   :  { %10728 = vmatpush3.bf16.msra.mxu1 %v12722_v4  ;;  %v12739_v4 = vld [vmem:[#allocation10 + $0x60] ss:$12 sps:$4 sm:$0xff]  }
0x13b9   :  { %10729 = vmatprep.subr.bf16.mxu1 %v12723_v31 }
0x13bb   :  { %10714 = vmatmul.mubr.bf16.gmra.mrb[92].mxu1 %v12724_v40  ;;  %v12740_v40 = vld [vmem:[#allocation10 + $0x80] ss:$12 sps:$4 sm:$0xff]  }
0x13bc   :  { %10730 = vmatpush3.bf16.msra.mxu1 %v12723_v31 }
0x13bd   :  { %10731 = vmatprep.subr.bf16.mxu1 %v12725_v52 }
0x13c0   :  { %10732 = vmatpush3.bf16.msra.mxu1 %v12725_v52  ;;  %v12741_v52 = vld [vmem:[#allocation10 + $0x7c] ss:$12 sps:$4 sm:$0xff]  }
0x13c1   :  { %10749 = vmatprep.subr.bf16.mxu1 %v12726_v25 }
0x1476   :  { %v10703_v8 = vpop.f32.mrb[80].mxu1 }
0x1477   :  { %v7826_v10 = vpop.f32.mrb[81].mxu1 }
0x1478   :  { %v10704_v39 = vpop.f32.mrb[82].mxu1 }
0x1479   :  { %v7890_v50 = vpack.c.bf16 %v10704_v39, %v10703_v8  ;;  %v7829_v41 = vpop.f32.mrb[83].mxu1 }
0x147a   :  { %v7889_v0 = vpack.c.bf16 %v7829_v41, %v7826_v10  ;;  %v12743_v41 = vld [vmem:[#allocation10 + $0x98] ss:$12 sps:$4 sm:$0xff]  }
0x147c   :  { %7930 = vmatmul.mubr.bf16.vlgmr.msra.gmra.mrb[224].mxu0 %v7889_v0  ;;  %10733 = vmatprep.mubr.bf16.mxu1 %v7889_v0  ;;  %v12744_v0 = vld [vmem:[#allocation10 + $0x94] ss:$12 sps:$4 sm:$0xff]  }
0x147d   :  { %10734 = vmatmul.mubr.bf16.vlgmr.msra.gmra.mrb[96].mxu1 %v7890_v50  ;;  %8108 = vmatpush1.bf16.msra.mxu0 %v12727_v59  ;;  %v12745_v59 = vld [vmem:[#allocation10 + $0xb0] ss:$12 sps:$4 sm:$0xff]  }
0x147e   :  { %v10707_v15 = vpop.f32.mrb[84].mxu1  ;;  %10750 = vmatpush3.bf16.msra.mxu1 %v12726_v25  ;;  %7939 = vmatprep.mubr.bf16.mxu0 %v15574_v57 }
0x147f   :  { %v7842_v18 = vpop.f32.mrb[85].mxu1  ;;  %10751 = vmatprep.subr.bf16.mxu1 %v12728_v62  ;;  %8109 = vmatprep.subr.bf16.mxu0 %v12729_v12  ;;  %v11606_v12 = vld [vmem:[#allocation13] ss:$8 sps:$4 sm:$0xff]  }
0x1480   :  { %v10708_v34 = vpop.f32.mrb[86].mxu1 }
0x1481   :  { %v7892_v19 = vpack.c.bf16 %v10708_v34, %v10707_v15  ;;  %v7845_v45 = vpop.f32.mrb[87].mxu1  ;;  %8110 = vmatpush1.bf16.msra.mxu0 %v12730_v3  ;;  %v11608_v15 = vld [vmem:[#allocation13 + $0x4] ss:$8 sps:$4 sm:$0xff]   ;;  %v11611_v34 = vld [vmem:[#allocation13 + $0x14] ss:$8 sps:$4 sm:$0xff]  }
0x1482   :  { %v7891_v28 = vpack.c.bf16 %v7845_v45, %v7842_v18  ;;  %10752 = vmatpush3.bf16.msra.mxu1 %v12728_v62  ;;  %8111 = vmatprep.subr.bf16.mxu0 %v12731_v23  ;;  %v12746_v18 = vld [vmem:[#allocation10 + $0x90] ss:$12 sps:$4 sm:$0xff]   ;;  %v12747_v62 = vld [vmem:[#allocation10 + $0xac] ss:$12 sps:$4 sm:$0xff]  }
0x1483   :  { %10753 = vmatprep.subr.bf16.mxu1 %v12732_v32  ;;  %v11609_v45 = vld [vmem:[#allocation13 + $0x10] ss:$8 sps:$4 sm:$0xff]   ;;  %v11614_v3 = vld [vmem:[#allocation13 + $0x24] ss:$8 sps:$4 sm:$0xff]   ;;  %v11617_v23 = vld [vmem:[#allocation13 + $0x34] ss:$8 sps:$4 sm:$0xff]  }
0x1484   :  { %7940 = vmatmul.mubr.bf16.gmra.mrb[228].mxu0 %v7890_v50  ;;  %10737 = vmatprep.mubr.bf16.mxu1 %v7891_v28  ;;  %v12742_v50 = vld [vmem:[#allocation10 + $0x78] ss:$12 sps:$4 sm:$0xff]  }
0x1485   :  { %10738 = vmatmul.mubr.bf16.gmra.mrb[100].mxu1 %v7892_v19  ;;  %7949 = vmatprep.mubr.bf16.mxu0 %v15574_v57 }
0x1486   :  { %v10711_v49 = vpop.f32.mrb[88].mxu1  ;;  %10754 = vmatpush3.bf16.msra.mxu1 %v12732_v32  ;;  %8112 = vmatpush1.bf16.msra.mxu0 %v12733_v37  ;;  %v11615_v32 = vld [vmem:[#allocation13 + $0x30] ss:$8 sps:$4 sm:$0xff]   ;;  %v11618_v37 = vld [vmem:[#allocation13 + $0x40] ss:$8 sps:$4 sm:$0xff]  }
0x1487   :  { %v7858_v48 = vpop.f32.mrb[89].mxu1  ;;  %10755 = vmatprep.subr.bf16.mxu1 %v12734_v61  ;;  %8113 = vmatprep.subr.bf16.mxu0 %v12735_v1  ;;  %v11626_v1 = vld [vmem:[#allocation13 + $0x64] ss:$8 sps:$4 sm:$0xff]  }
0x1488   :  { %v10712_v58 = vpop.f32.mrb[90].mxu1 }
0x1489   :  { %v15049_v63 = vpack.c.bf16 %v10712_v58, %v10711_v49  ;;  %v7861_v21 = vpop.f32.mrb[91].mxu1  ;;  %v11620_v49 = vld [vmem:[#allocation13 + $0x44] ss:$8 sps:$4 sm:$0xff]   ;;  %v11624_v58 = vld [vmem:[#allocation13 + $0x60] ss:$8 sps:$4 sm:$0xff]  }
0x148a   :  { %v7893_v46 = vpack.c.bf16 %v7861_v21, %v7858_v48  ;;  %10756 = vmatpush3.bf16.msra.mxu1 %v12734_v61  ;;  %8114 = vmatpush1.bf16.msra.mxu0 %v12736_v51  ;;  %v11623_v48 = vld [vmem:[#allocation13 + $0x54] ss:$8 sps:$4 sm:$0xff]   ;;  %v11621_v61 = vld [vmem:[#allocation13 + $0x50] ss:$8 sps:$4 sm:$0xff]   ;;  %v15576_v51 = vld [vmem:[#allocation29_spill] sm:$0xff] }
0x148b   :  { %10757 = vmatprep.subr.bf16.mxu1 %v12737_v11  ;;  %8115 = vmatprep.subr.bf16.mxu0 %v12738_v55  ;;  %v11627_v21 = vld [vmem:[#allocation13 + $0x70] ss:$8 sps:$4 sm:$0xff]   ;;  %v11632_v55 = vld [vmem:[#allocation11 + $0x4] ss:$8 sps:$4 sm:$0xff]  }
0x148c   :  { %7950 = vmatmul.mubr.bf16.gmra.mrb[232].mxu0 %v7891_v28  ;;  %10741 = vmatprep.mubr.bf16.mxu1 %v7893_v46  ;;  %v11612_v28 = vld [vmem:[#allocation13 + $0x20] ss:$8 sps:$4 sm:$0xff]  }
0x148d   :  { %10742 = vmatmul.mubr.bf16.gmra.mrb[104].mxu1 %v15049_v63  ;;  %7959 = vmatprep.mubr.bf16.mxu0 %v15574_v57 }
0x148e   :  { %v10715_v13 = vpop.f32.mrb[92].mxu1  ;;  %10758 = vmatpush3.bf16.msra.mxu1 %v12737_v11  ;;  %8116 = vmatpush1.bf16.msra.mxu0 %v12739_v4  ;;  %v15577_v11 = vld [vmem:[#allocation24_spill] sm:$0xff]  ;;  %v11635_v4 = vld [vmem:[#allocation11 + $0x14] ss:$8 sps:$4 sm:$0xff]  }
0x148f   :  { %v7874_v31 = vpop.f32.mrb[93].mxu1  ;;  %10759 = vmatprep.subr.bf16.mxu1 %v12740_v40  ;;  %8117 = vmatprep.subr.bf16.mxu0 %v12741_v52  ;;  %v11639_v52 = vld [vmem:[#allocation11 + $0x30] ss:$8 sps:$4 sm:$0xff]  }
0x1490   :  { %v10716_v25 = vpop.f32.mrb[94].mxu1 }
0x1491   :  { %v15053_v8 = vpack.c.bf16 %v10716_v25, %v10715_v13  ;;  %v7877_v10 = vpop.f32.mrb[95].mxu1  ;;  %v11633_v13 = vld [vmem:[#allocation11 + $0x10] ss:$8 sps:$4 sm:$0xff]   ;;  %v11642_v25 = vld [vmem:[#allocation11 + $0x40] ss:$8 sps:$4 sm:$0xff]  }
0x1492   :  { %v7895_v39 = vpack.c.bf16 %v7877_v10, %v7874_v31  ;;  %10760 = vmatpush3.bf16.msra.mxu1 %v12740_v40  ;;  %8118 = vmatpush1.bf16.msra.mxu0 %v12742_v50  ;;  %v11636_v31 = vld [vmem:[#allocation11 + $0x20] ss:$8 sps:$4 sm:$0xff]   ;;  %v11641_v40 = vld [vmem:[#allocation11 + $0x34] ss:$8 sps:$4 sm:$0xff]   ;;  %v11645_v10 = vld [vmem:[#allocation11 + $0x50] ss:$8 sps:$4 sm:$0xff]  }
0x1493   :  { %10761 = vmatprep.subr.bf16.mxu1 %v12743_v41  ;;  %8119 = vmatprep.subr.bf16.mxu0 %v12744_v0  ;;  %v11648_v50 = vld [vmem:[#allocation11 + $0x60] ss:$8 sps:$4 sm:$0xff]   ;;  %v11651_v0 = vld [vmem:[#allocation11 + $0x70] ss:$8 sps:$4 sm:$0xff]  }
0x1494   :  { %7960 = vmatmul.mubr.bf16.gmra.mrb[236].mxu0 %v7892_v19  ;;  %10745 = vmatprep.mubr.bf16.mxu1 %v7895_v39  ;;  %v12748_v19 = vld [vmem:[#allocation10 + $0xa8] ss:$12 sps:$4 sm:$0xff]  }
0x1495   :  { %10746 = vmatmul.mubr.bf16.gmra.mrb[108].mxu1 %v15053_v8  ;;  %7969 = vmatprep.mubr.bf16.mxu0 %v15574_v57 }
0x1496   :  { %10762 = vmatpush3.bf16.msra.mxu1 %v12743_v41  ;;  %10765 = vmatprep.mubr.bf16.mxu1 %v14914_v5  ;;  %v11653_v41 = vld [vmem:[#allocation11 + $0x74] ss:$8 sps:$4 sm:$0xff]  }
0x1497   :  { %10763 = vmatprep.subr.bf16.mxu1 %v12745_v59  ;;  %8120 = vmatpush1.bf16.msra.mxu0 %v12746_v18 }
0x1498   :  { %8121 = vmatprep.subr.bf16.mxu0 %v12747_v62 }
0x149a   :  { %10764 = vmatpush3.bf16.msra.mxu1 %v12745_v59 }
0x149b   :  { %8789 = vmatprep.subr.bf16.mxu1 %v11608_v15  ;;  %8122 = vmatpush1.bf16.msra.mxu0 %v12748_v19 }
0x149c   :  { %7970 = vmatmul.mubr.bf16.gmra.mrb[240].mxu0 %v7893_v46  ;;  %v15575_v46 = vld [vmem:[#allocation31_spill] sm:$0xff]  ;;  %8966 = vmatprep.subr.bf16.mxu0 %v11632_v55 }
0x149d   :  { %10766 = vmatmul.mubr.bf16.vlgmr.msra.gmra.mrb[112].mxu1 %v14936_v60  ;;  %7979 = vmatprep.mubr.bf16.mxu0 %v15574_v57 }
0x149e   :  { %10769 = vmatprep.mubr.bf16.mxu1 %v14959_v7  ;;  %8790 = vmatpush1.bf16.msra.mxu1 %v11606_v12 }
0x149f   :  { %8791 = vmatprep.subr.bf16.mxu1 %v11611_v34 }
0x14a2   :  { %8792 = vmatpush1.bf16.msra.mxu1 %v11609_v45 }
0x14a3   :  { %8793 = vmatprep.subr.bf16.mxu1 %v11614_v3 }
0x14a4   :  { %7980 = vmatmul.mubr.bf16.gmra.mrb[244].mxu0 %v15049_v63  ;;  %v11629_v63 = vld [vmem:[#allocation13 + $0x74] ss:$8 sps:$4 sm:$0xff]  }
0x14a5   :  { %10770 = vmatmul.mubr.bf16.gmra.mrb[116].mxu1 %v14980_v47  ;;  %7989 = vmatprep.mubr.bf16.mxu0 %v15574_v57 }
0x14a6   :  { %10773 = vmatprep.mubr.bf16.mxu1 %v15008_v43  ;;  %8794 = vmatpush1.bf16.msra.mxu1 %v11612_v28 }
0x14a7   :  { %8795 = vmatprep.subr.bf16.mxu1 %v11617_v23 }
0x14aa   :  { %8796 = vmatpush1.bf16.msra.mxu1 %v11615_v32 }
0x14ab   :  { %8797 = vmatprep.subr.bf16.mxu1 %v11620_v49 }
0x14ac   :  { %7990 = vmatmul.mubr.bf16.gmra.mrb[248].mxu0 %v7895_v39  ;;  %v11650_v39 = vld [vmem:[#allocation11 + $0x64] ss:$8 sps:$4 sm:$0xff]  }
0x14ad   :  { %10774 = vmatmul.mubr.bf16.gmra.mrb[120].mxu1 %v15023_v44  ;;  %7999 = vmatprep.mubr.bf16.mxu0 %v15574_v57 }
0x14ae   :  { %10777 = vmatprep.mubr.bf16.mxu1 %v15036_v24  ;;  %8798 = vmatpush1.bf16.msra.mxu1 %v11618_v37 }
0x14af   :  { %8799 = vmatprep.subr.bf16.mxu1 %v11623_v48 }
0x14b2   :  { %8800 = vmatpush1.bf16.msra.mxu1 %v11621_v61 }
0x14b3   :  { %8801 = vmatprep.subr.bf16.mxu1 %v11626_v1 }
0x14b4   :  { %8000 = vmatmul.mubr.bf16.gmra.mrb[252].mxu0 %v15053_v8  ;;  %v11647_v8 = vld [vmem:[#allocation11 + $0x54] ss:$8 sps:$4 sm:$0xff]  }
0x14b5   :  { %10778 = vmatmul.mubr.bf16.gmra.mrb[124].mxu1 %v15044_v56  ;;  %8139 = vmatprep.mubr.bf16.mxu0 %v15574_v57 }
0x14b6   :  { %8802 = vmatpush1.bf16.msra.mxu1 %v11624_v58  ;;  %8821 = vmatprep.mubr.bf16.mxu1 %v15574_v57 }
0x14b7   :  { %8803 = vmatprep.subr.bf16.mxu1 %v11629_v63 }
0x14ba   :  { %8804 = vmatpush1.bf16.msra.mxu1 %v11627_v21 }
0x14bc   :  { %8140 = vmatmul.mubr.bf16.vlgmr.msra.gmra.mrb[224].mxu0 %v14914_v5  ;;  %v15578_v5 = vld [vmem:[#allocation32_spill] sm:$0xff] }
0x14bd   :  { %8822 = vmatmul.mubr.bf16.vlgmr.msra.gmra.mrb[128].mxu1 %v15575_v46  ;;  %8149 = vmatprep.mubr.bf16.mxu0 %v15574_v57 }
0x14be   :  { %8829 = vmatprep.mubr.bf16.mxu1 %v15574_v57 }
0x14c4   :  { %8150 = vmatmul.mubr.bf16.gmra.mrb[228].mxu0 %v14936_v60  ;;  %v15579_v60 = vld [vmem:[#allocation30_spill] sm:$0xff] }
0x14c5   :  { %8830 = vmatmul.mubr.bf16.gmra.mrb[132].mxu1 %v15576_v51  ;;  %8159 = vmatprep.mubr.bf16.mxu0 %v15574_v57 }
0x14c6   :  { %8837 = vmatprep.mubr.bf16.mxu1 %v15574_v57 }
0x14cc   :  { %8160 = vmatmul.mubr.bf16.gmra.mrb[232].mxu0 %v14959_v7  ;;  %v15580_v7 = vld [vmem:[#allocation35_spill] sm:$0xff] }
0x14cd   :  { %8838 = vmatmul.mubr.bf16.gmra.mrb[136].mxu1 %v15577_v11  ;;  %8169 = vmatprep.mubr.bf16.mxu0 %v15574_v57 }
0x14ce   :  { %8845 = vmatprep.mubr.bf16.mxu1 %v15574_v57 }
0x14d4   :  { %8170 = vmatmul.mubr.bf16.gmra.mrb[236].mxu0 %v14980_v47  ;;  %v15581_v47 = vld [vmem:[#allocation37_spill] sm:$0xff] }
0x14d5   :  { %8846 = vmatmul.mubr.bf16.gmra.mrb[140].mxu1 %v15578_v5  ;;  %8179 = vmatprep.mubr.bf16.mxu0 %v15574_v57 }
0x14d6   :  { %8853 = vmatprep.mubr.bf16.mxu1 %v15574_v57 }
0x14dc   :  { %8180 = vmatmul.mubr.bf16.gmra.mrb[240].mxu0 %v15008_v43  ;;  %v15582_v43 = vld [vmem:[#allocation36_spill] sm:$0xff] }
0x14dd   :  { %8854 = vmatmul.mubr.bf16.gmra.mrb[144].mxu1 %v15579_v60  ;;  %8189 = vmatprep.mubr.bf16.mxu0 %v15574_v57 }
0x14de   :  { %8861 = vmatprep.mubr.bf16.mxu1 %v15574_v57 }
0x14e4   :  { %8190 = vmatmul.mubr.bf16.gmra.mrb[244].mxu0 %v15023_v44  ;;  %v11630_v44 = vld [vmem:[#allocation11] ss:$8 sps:$4 sm:$0xff]  }
0x14e5   :  { %8862 = vmatmul.mubr.bf16.gmra.mrb[148].mxu1 %v15580_v7  ;;  %8199 = vmatprep.mubr.bf16.mxu0 %v15574_v57 }
0x14e6   :  { %8869 = vmatprep.mubr.bf16.mxu1 %v15574_v57  ;;  %8967 = vmatpush1.bf16.msra.mxu0 %v11630_v44 }
0x14e7   :  { %8968 = vmatprep.subr.bf16.mxu0 %v11635_v4 }
0x14ea   :  { %8969 = vmatpush1.bf16.msra.mxu0 %v11633_v13 }
0x14ec   :  { %8200 = vmatmul.mubr.bf16.gmra.mrb[248].mxu0 %v15036_v24  ;;  %v11638_v24 = vld [vmem:[#allocation11 + $0x24] ss:$8 sps:$4 sm:$0xff]  }
0x14ed   :  { %8870 = vmatmul.mubr.bf16.gmra.mrb[152].mxu1 %v15581_v47  ;;  %8209 = vmatprep.mubr.bf16.mxu0 %v15574_v57 }
0x14ee   :  { %8877 = vmatprep.mubr.bf16.mxu1 %v15574_v57  ;;  %8970 = vmatprep.subr.bf16.mxu0 %v11638_v24 }
0x14ef   :  { %8971 = vmatpush1.bf16.msra.mxu0 %v11636_v31 }
0x14f0   :  { %8972 = vmatprep.subr.bf16.mxu0 %v11641_v40 }
0x14f3   :  { %8973 = vmatpush1.bf16.msra.mxu0 %v11639_v52 }
0x14f4   :  { %8210 = vmatmul.mubr.bf16.gmra.mrb[252].mxu0 %v15044_v56  ;;  %v11644_v56 = vld [vmem:[#allocation11 + $0x44] ss:$8 sps:$4 sm:$0xff]  }
0x14f5   :  { %8878 = vmatmul.mubr.bf16.gmra.mrb[156].mxu1 %v15582_v43  ;;  %8998 = vmatprep.mubr.bf16.mxu0 %v15574_v57 }
0x14f6   :  { %8974 = vmatprep.subr.bf16.mxu0 %v11644_v56 }
0x14f7   :  { %8975 = vmatpush1.bf16.msra.mxu0 %v11642_v25 }
0x14f8   :  { %8976 = vmatprep.subr.bf16.mxu0 %v11647_v8 }
0x14fb   :  { %8977 = vmatpush1.bf16.msra.mxu0 %v11645_v10 }
0x14fc   :  { %8978 = vmatprep.subr.bf16.mxu0 %v11650_v39 }
0x14ff   :  { %8979 = vmatpush1.bf16.msra.mxu0 %v11648_v50 }
0x1500   :  { %8980 = vmatprep.subr.bf16.mxu0 %v11653_v41 }
0x1503   :  { %8981 = vmatpush1.bf16.msra.mxu0 %v11651_v0 }
0x1550   :  { %v15103_v59 = vpop.f32.mrb[96].mxu1 }
0x1551   :  { %v15105_v15 = vpop.f32.mrb[97].mxu1 }
0x1552   :  { %v15107_v18 = vpop.f32.mrb[98].mxu1 }
0x1553   :  { %v15109_v62 = vpop.f32.mrb[99].mxu1 }
0x1558   :  { %v15111_v12 = vpop.f32.mrb[100].mxu1 }
0x1559   :  { %v15113_v34 = vpop.f32.mrb[101].mxu1 }
0x155a   :  { %v15115_v19 = vpop.f32.mrb[102].mxu1 }
0x155b   :  { %v15117_v45 = vpop.f32.mrb[103].mxu1 }
0x1560   :  { %v15119_v3 = vpop.f32.mrb[104].mxu1 }
0x1561   :  { %v15121_v28 = vpop.f32.mrb[105].mxu1 }
0x1562   :  { %v15123_v23 = vpop.f32.mrb[106].mxu1 }
0x1563   :  { %v15125_v32 = vpop.f32.mrb[107].mxu1 }
0x1568   :  { %v15127_v49 = vpop.f32.mrb[108].mxu1 }
0x1569   :  { %15583 = vst [vmem:[#allocation26_spill] sm:$0xff] %v15127_v49  ;;  %v15129_v37 = vpop.f32.mrb[109].mxu1 }
0x156a   :  { %v15131_v48 = vpop.f32.mrb[110].mxu1 }
0x156b   :  { %15584 = vst [vmem:[#allocation33_spill] sm:$0xff] %v15131_v48  ;;  %v15133_v61 = vpop.f32.mrb[111].mxu1 }
0x156c   :  { %15585 = vst [vmem:[#allocation25_spill] sm:$0xff] %v15133_v61 }
0x1570   :  { %v15135_v1 = vpop.f32.mrb[112].mxu1 }
0x1571   :  { %v15137_v58 = vpop.f32.mrb[113].mxu1 }
0x1572   :  { %v15139_v63 = vpop.f32.mrb[114].mxu1 }
0x1573   :  { %v15141_v21 = vpop.f32.mrb[115].mxu1 }
0x1578   :  { %v15143_v46 = vpop.f32.mrb[116].mxu1 }
0x1579   :  { %v15145_v51 = vpop.f32.mrb[117].mxu1 }
0x157a   :  { %v15147_v11 = vpop.f32.mrb[118].mxu1 }
0x157b   :  { %v15149_v5 = vpop.f32.mrb[119].mxu1 }
0x1580   :  { %v15151_v60 = vpop.f32.mrb[120].mxu1 }
0x1581   :  { %v15153_v7 = vpop.f32.mrb[121].mxu1 }
0x1582   :  { %v15155_v47 = vpop.f32.mrb[122].mxu1 }
0x1583   :  { %v15157_v43 = vpop.f32.mrb[123].mxu1 }
0x1588   :  { %v15159_v44 = vpop.f32.mrb[124].mxu1 }
0x1589   :  { %15586 = vst [vmem:[#allocation34_spill] sm:$0xff] %v15159_v44  ;;  %v15161_v55 = vpop.f32.mrb[125].mxu1 }
0x158a   :  { %v15163_v13 = vpop.f32.mrb[126].mxu1 }
0x158b   :  { %15587 = vst [vmem:[#allocation38_spill] sm:$0xff] %v15163_v13  ;;  %v15165_v4 = vpop.f32.mrb[127].mxu1 }
0x158f   :  { %v8141_v24 = vpop.f32.mrb[224].mxu0 }
0x1590   :  { %v10941_v31 = vadd.f32 %v8141_v24, %v14834_v20  ;;  %v8143_v40 = vpop.f32.mrb[225].mxu0  ;;  %v8823_v52 = vpop.f32.mrb[128].mxu1 }
0x1591   :  { %v10942_v56 = vadd.f32 %v8143_v40, %v14837_v9  ;;  %v8145_v25 = vpop.f32.mrb[226].mxu0  ;;  %v15169_v8 = vpop.f32.mrb[129].mxu1 }
0x1592   :  { %15588 = vst [vmem:[#allocation23_spill] sm:$0xff] %v15169_v8  ;;  %v9565_v10 = vmul.f32 -1.442695, %v10941_v31  ;;  %v10943_v39 = vadd.f32 %v8145_v25, %v14834_v20  ;;  %v8147_v50 = vpop.f32.mrb[227].mxu0  ;;  %v8826_v41 = vpop.f32.mrb[130].mxu1 }
0x1593   :  { %v9581_v0 = vmul.f32 -1.442695, %v10942_v56  ;;  %v10944_v16 = vadd.f32 %v8147_v50, %v14837_v9  ;;  %v15173_v6 = vpop.f32.mrb[131].mxu1 }
0x1594   :  { %15589 = vst [vmem:[#allocation31_spill] sm:$0xff] %v15173_v6  ;;  %12454 = vpow2.f32 %v9565_v10  ;;  %v9566_v42 = vmul.f32 -1.442695, %v10943_v39 }
0x1595   :  { %12456 = vpow2.f32 %v9581_v0  ;;  %v9582_v24 = vmul.f32 -1.442695, %v10944_v16 }
0x1596   :  { %12458 = vpow2.f32 %v9566_v42 }
0x1597   :  { %v8151_v52 = vpop.f32.mrb[228].mxu0  ;;  %12460 = vpow2.f32 %v9582_v24 }
0x1598   :  { %v10945_v40 = vadd.f32 %v8151_v52, %v14834_v20  ;;  %v8153_v48 = vpop.f32.mrb[229].mxu0  ;;  %v8831_v8 = vpop.f32.mrb[132].mxu1 }
0x1599   :  { %v10946_v31 = vadd.f32 %v8153_v48, %v14837_v9  ;;  %v8155_v25 = vpop.f32.mrb[230].mxu0  ;;  %v15177_v27 = vpop.f32.mrb[133].mxu1 }
0x159a   :  { %15590 = vst [vmem:[#allocation29_spill] sm:$0xff] %v15177_v27  ;;  %v9567_v56 = vmul.f32 -1.442695, %v10945_v40  ;;  %v10947_v50 = vadd.f32 %v8155_v25, %v14834_v20  ;;  %v8157_v41 = vpop.f32.mrb[231].mxu0  ;;  %v8834_v6 = vpop.f32.mrb[134].mxu1 }
0x159b   :  { %v10948_v10 = vadd.f32 %v8157_v41, %v14837_v9  ;;  %v15181_v42 = vpop.f32.mrb[135].mxu1  ;;  %v9583_v16 = vmul.f32 -1.442695, %v10946_v31 }
0x159c   :  { %15591 = vst [vmem:[#allocation24_spill] sm:$0xff] %v15181_v42  ;;  %12462 = vpow2.f32 %v9567_v56  ;;  %v9568_v39 = vmul.f32 -1.442695, %v10947_v50 }
0x159d   :  { %v9584_v8 = vmul.f32 -1.442695, %v10948_v10 }
0x159e   :  { %v12455_v0 = vpop.eup %12454  ;;  %12464 = vpow2.f32 %v9568_v39 }
0x159f   :  { %v12457_v48 = vpop.eup %12456  ;;  %v8381_v52 = vadd.f32 1.0, %v12455_v0  ;;  %v8161_v13 = vpop.f32.mrb[232].mxu0  ;;  %12466 = vpow2.f32 %v9583_v16 }
0x15a0   :  { %v12459_v27 = vpop.eup %12458  ;;  %v10949_v40 = vadd.f32 %v8161_v13, %v14834_v20  ;;  %v8163_v25 = vpop.f32.mrb[233].mxu0  ;;  %v8493_v31 = vadd.f32 1.0, %v12457_v48 }
0x15a1   :  { %v8839_v6 = vpop.f32.mrb[136].mxu1  ;;  %12468 = vrcp.f32 %v8381_v52  ;;  %v8382_v24 = vadd.f32 1.0, %v12459_v27  ;;  %v10950_v41 = vadd.f32 %v8163_v25, %v14837_v9  ;;  %v8165_v42 = vpop.f32.mrb[234].mxu0 }
0x15a2   :  { %v15185_v56 = vpop.f32.mrb[137].mxu1  ;;  %12470 = vpow2.f32 %v9584_v8  ;;  %v9569_v50 = vmul.f32 -1.442695, %v10949_v40  ;;  %v10951_v10 = vadd.f32 %v8165_v42, %v14834_v20  ;;  %v8167_v39 = vpop.f32.mrb[235].mxu0 }
0x15a3   :  { %15592 = vst [vmem:[#allocation32_spill] sm:$0xff] %v15185_v56  ;;  %v8842_v0 = vpop.f32.mrb[138].mxu1  ;;  %12472 = vrcp.f32 %v8382_v24  ;;  %v10952_v16 = vadd.f32 %v8167_v39, %v14837_v9  ;;  %v9585_v6 = vmul.f32 -1.442695, %v10950_v41  ;;  %v12461_v27 = vpop.eup %12460 }
0x15a4   :  { %v15189_v13 = vpop.f32.mrb[139].mxu1  ;;  %v9570_v52 = vmul.f32 -1.442695, %v10951_v10  ;;  %12474 = vpow2.f32 %v9569_v50  ;;  %v8494_v40 = vadd.f32 1.0, %v12461_v27 }
0x15a5   :  { %15593 = vst [vmem:[#allocation30_spill] sm:$0xff] %v15189_v13  ;;  %12476 = vrcp.f32 %v8493_v31  ;;  %v9586_v36 = vmul.f32 -1.442695, %v10952_v16  ;;  %v15198_v31 = vld [vmem:[%s15398_s6] ss:$0 sm:$0xff] }
0x15a6   :  { %v12463_v25 = vpop.eup %12462  ;;  %12478 = vpow2.f32 %v9570_v52  ;;  %v8541_v16 = vadd.f32 %v15198_v31, %v15137_v58 }
0x15a7   :  { %v8383_v56 = vadd.f32 1.0, %v12463_v25  ;;  %v8171_v8 = vpop.f32.mrb[236].mxu0  ;;  %12480 = vpow2.f32 %v9585_v6 }
0x15a8   :  { %v12465_v48 = vpop.eup %12464  ;;  %v10953_v42 = vadd.f32 %v8171_v8, %v14834_v20  ;;  %v8173_v24 = vpop.f32.mrb[237].mxu0  ;;  %v8045_v8 = vadd.f32 %v15105_v15, %v14852_v33 }
0x15a9   :  { %v8847_v0 = vpop.f32.mrb[140].mxu1  ;;  %12482 = vrcp.f32 %v8383_v56  ;;  %v8384_v39 = vadd.f32 1.0, %v12465_v48  ;;  %v10954_v41 = vadd.f32 %v8173_v24, %v14837_v9  ;;  %v8175_v10 = vpop.f32.mrb[238].mxu0 }
0x15aa   :  { %v15193_v13 = vpop.f32.mrb[141].mxu1  ;;  %v12467_v50 = vpop.eup %12466  ;;  %12484 = vpow2.f32 %v9586_v36  ;;  %v9571_v6 = vmul.f32 -1.442695, %v10953_v42  ;;  %v10955_v52 = vadd.f32 %v8175_v10, %v14834_v20  ;;  %v8048_v42 = vadd.f32 %v15109_v62, %v14852_v33 }
0x15ab   :  { %15594 = vst [vmem:[#allocation35_spill] sm:$0xff] %v15193_v13  ;;  %v8177_v56 = vpop.f32.mrb[239].mxu0  ;;  %v8850_v27 = vpop.f32.mrb[142].mxu1  ;;  %12486 = vrcp.f32 %v8384_v39  ;;  %v9587_v48 = vmul.f32 -1.442695, %v10954_v41  ;;  %v8542_v13 = vadd.f32 %v15198_v31, %v15141_v21  ;;  %v8495_v10 = vadd.f32 1.0, %v12467_v50 }
0x15ac   :  { %v12469_v25 = vpop.eup %12468  ;;  %v15205_v24 = vpop.f32.mrb[143].mxu1  ;;  %12488 = vrcp.f32 %v8494_v40  ;;  %v9572_v36 = vmul.f32 -1.442695, %v10955_v52  ;;  %v10956_v15 = vadd.f32 %v8177_v56, %v14837_v9  ;;  %v8543_v56 = vadd.f32 %v15198_v31, %v15135_v1 }
0x15ad   :  { %15595 = vst [vmem:[#allocation37_spill] sm:$0xff] %v15205_v24  ;;  %v12471_v0 = vpop.eup %12470  ;;  %v8557_v49 = vmul.f32 %v12469_v25, %v8541_v16  ;;  %12490 = vpow2.f32 %v9571_v6  ;;  %v8544_v1 = vadd.f32 %v15198_v31, %v15139_v63 }
0x15ae   :  { %v12473_v58 = vpop.eup %12472  ;;  %12492 = vpow2.f32 %v9587_v48  ;;  %v8496_v41 = vadd.f32 1.0, %v12471_v0 }
0x15af   :  { %v8573_v27 = vadd.f32 %v8557_v49, %v8045_v8  ;;  %v8558_v44 = vmul.f32 %v12473_v58, %v8542_v13  ;;  %v12475_v39 = vpop.eup %12474  ;;  %12494 = vpow2.f32 %v9572_v36  ;;  %v8181_v24 = vpop.f32.mrb[240].mxu0  ;;  %v9588_v8 = vmul.f32 -1.442695, %v10956_v15 }
0x15b0   :  { %v15212_v61 = vpop.eup %12476  ;;  %v8385_v40 = vadd.f32 1.0, %v12475_v39  ;;  %v10957_v16 = vadd.f32 %v8181_v24, %v14834_v20  ;;  %v8183_v52 = vpop.f32.mrb[241].mxu0  ;;  %v8053_v24 = vadd.f32 %v15103_v59, %v14852_v33  ;;  %v15229_v39 = vadd.f32 %v15111_v12, %v14852_v33 }
0x15b1   :  { %12496 = vtanh.f32 %v8573_v27  ;;  %v8574_v21 = vadd.f32 %v8558_v44, %v8048_v42  ;;  %v8855_v62 = vpop.f32.mrb[144].mxu1  ;;  %v12479_v50 = vpop.eup %12478  ;;  %v15233_v59 = vadd.f32 %v15113_v34, %v14852_v33  ;;  %v8545_v12 = vadd.f32 %v15198_v31, %v15145_v51 }
0x15b2   :  { %12498 = vrcp.f32 %v8495_v10  ;;  %v8185_v49 = vpop.f32.mrb[242].mxu0  ;;  %v15215_v13 = vpop.f32.mrb[145].mxu1  ;;  %v8386_v25 = vadd.f32 1.0, %v12479_v50  ;;  %v9573_v36 = vmul.f32 -1.442695, %v10957_v16  ;;  %v8056_v10 = vadd.f32 %v15107_v18, %v14852_v33 }
0x15b3   :  { %15596 = vst [vmem:[#allocation36_spill] sm:$0xff] %v15215_v13  ;;  %v12481_v6 = vpop.eup %12480  ;;  %12500 = vtanh.f32 %v8574_v21  ;;  %v8187_v48 = vpop.f32.mrb[243].mxu0  ;;  %v10958_v18 = vadd.f32 %v8183_v52, %v14837_v9  ;;  %v10959_v34 = vadd.f32 %v8185_v49, %v14834_v20 }
0x15b4   :  { %v8858_v0 = vpop.f32.mrb[146].mxu1  ;;  %v12483_v44 = vpop.eup %12482  ;;  %12502 = vrcp.f32 %v8385_v40  ;;  %v8497_v21 = vadd.f32 1.0, %v12481_v6 }
0x15b5   :  { %v15221_v58 = vpop.f32.mrb[147].mxu1  ;;  %v12485_v42 = vpop.eup %12484  ;;  %v8559_v27 = vmul.f32 %v12483_v44, %v8543_v56  ;;  %12504 = vrcp.f32 %v8496_v41  ;;  %v15238_v41 = vadd.f32 %v15117_v45, %v14852_v33  ;;  %v8637_v45 = vmul.f32 %v15212_v61, %v14904_v14 }
0x15b6   :  { %15597 = vst [vmem:[#allocation40_spill] sm:$0xff] %v15221_v58  ;;  %v12487_v15 = vpop.eup %12486  ;;  %12506 = vrcp.f32 %v8386_v25  ;;  %v8498_v25 = vadd.f32 1.0, %v12485_v42  ;;  %v9589_v42 = vmul.f32 -1.442695, %v10958_v18  ;;  %v10960_v58 = vadd.f32 %v8187_v48, %v14837_v9 }
0x15b7   :  { %v12489_v40 = vpop.eup %12488  ;;  %v8575_v16 = vadd.f32 %v8559_v27, %v8053_v24  ;;  %v8560_v62 = vmul.f32 %v12487_v15, %v8544_v1  ;;  %12508 = vpow2.f32 %v9588_v8  ;;  %v8191_v50 = vpop.f32.mrb[244].mxu0  ;;  %v8605_v24 = vsub.f32 1.0, %v15212_v61 }
0x15b8   :  { %v12491_v63 = vpop.eup %12490  ;;  %12510 = vpow2.f32 %v9573_v36  ;;  %v8193_v8 = vpop.f32.mrb[245].mxu0  ;;  %v10961_v51 = vadd.f32 %v8191_v50, %v14834_v20  ;;  %v8606_v27 = vsub.f32 1.0, %v12489_v40  ;;  %v8638_v50 = vmul.f32 %v12489_v40, %v14908_v38 }
0x15b9   :  { %v12493_v6 = vpop.eup %12492  ;;  %12512 = vtanh.f32 %v8575_v16  ;;  %v8576_v56 = vadd.f32 %v8560_v62, %v8056_v10  ;;  %v8387_v0 = vadd.f32 1.0, %v12491_v63  ;;  %v8863_v44 = vpop.f32.mrb[148].mxu1  ;;  %v10962_v48 = vadd.f32 %v8193_v8, %v14837_v9 }
0x15ba   :  { %v12495_v52 = vpop.eup %12494  ;;  %12514 = vrcp.f32 %v8497_v21  ;;  %v8195_v36 = vpop.f32.mrb[246].mxu0  ;;  %v9574_v44 = vmul.f32 -1.442695, %v10959_v34  ;;  %v8546_v21 = vadd.f32 %v15198_v31, %v15149_v5  ;;  %v9590_v13 = vmul.f32 -1.442695, %v10960_v58 }
0x15bb   :  { %v15247_v1 = vpop.f32.mrb[149].mxu1  ;;  %v12497_v49 = vpop.eup %12496  ;;  %12516 = vtanh.f32 %v8576_v56  ;;  %v8388_v10 = vadd.f32 1.0, %v12495_v52  ;;  %v8499_v56 = vadd.f32 1.0, %v12493_v6  ;;  %v10963_v5 = vadd.f32 %v8195_v36, %v14834_v20 }
0x15bc   :  { %15598 = vst [vmem:[#allocation41_spill] sm:$0xff] %v15247_v1  ;;  %v8197_v15 = vpop.f32.mrb[247].mxu0  ;;  %v8866_v16 = vpop.f32.mrb[150].mxu1  ;;  %v8621_v63 = vmul.f32 %v12497_v49, %v8605_v24  ;;  %12518 = vrcp.f32 %v8387_v0 }
0x15bd   :  { %v12499_v62 = vpop.eup %12498  ;;  %v15250_v14 = vpop.f32.mrb[151].mxu1  ;;  %12520 = vrcp.f32 %v8498_v25  ;;  %v9575_v16 = vmul.f32 -1.442695, %v10961_v51 }
0x15be   :  { %15599 = vst [vmem:[#allocation42_spill] sm:$0xff] %v15250_v14  ;;  %v12501_v61 = vpop.eup %12500  ;;  %v8653_v18 = vadd.f32 %v8637_v45, %v8621_v63  ;;  %12522 = vrcp.f32 %v8388_v10  ;;  %v8607_v0 = vsub.f32 1.0, %v12499_v62  ;;  %v8639_v6 = vmul.f32 %v12499_v62, %v14924_v30 }
0x15bf   :  { %v12503_v52 = vpop.eup %12502  ;;  %v8622_v1 = vmul.f32 %v12501_v61, %v8606_v27  ;;  %12524 = vpow2.f32 %v9589_v42  ;;  %v8201_v38 = vpop.f32.mrb[248].mxu0  ;;  %v9591_v62 = vmul.f32 -1.442695, %v10962_v48 }
0x15c0   :  { %v12505_v24 = vpop.eup %12504  ;;  %v8561_v34 = vmul.f32 %v12503_v52, %v8545_v12  ;;  %12526 = vpow2.f32 %v9574_v44  ;;  %v8203_v51 = vpop.f32.mrb[249].mxu0  ;;  %v10965_v8 = vadd.f32 %v8201_v38, %v14834_v20 }
0x15c1   :  { %v12507_v49 = vpop.eup %12506  ;;  %v8654_v14 = vadd.f32 %v8638_v50, %v8622_v1  ;;  %12528 = vrcp.f32 %v8499_v56  ;;  %v8871_v27 = vpop.f32.mrb[152].mxu1  ;;  %v8608_v42 = vsub.f32 1.0, %v12505_v24  ;;  %v10964_v50 = vadd.f32 %v8197_v15, %v14837_v9 }
0x15c2   :  { %v12509_v40 = vpop.eup %12508  ;;  %v8577_v25 = vadd.f32 %v8561_v34, %v15233_v59  ;;  %v8562_v45 = vmul.f32 %v12507_v49, %v8546_v21  ;;  %12530 = vpow2.f32 %v9575_v16  ;;  %v8205_v1 = vpop.f32.mrb[250].mxu0  ;;  %v8548_v15 = vadd.f32 %v15198_v31, %v15147_v11 }
0x15c3   :  { %v12511_v12 = vpop.eup %12510  ;;  %v8685_v10 = vpack.c.bf16 %v8654_v14, %v8653_v18  ;;  %v15260_v58 = vpop.f32.mrb[153].mxu1  ;;  %v9576_v14 = vmul.f32 -1.442695, %v10963_v5  ;;  %v8547_v18 = vadd.f32 %v15198_v31, %v15143_v46  ;;  %v8500_v16 = vadd.f32 1.0, %v12509_v40 }
0x15c4   :  { %v12513_v36 = vpop.eup %12512  ;;  %12532 = vtanh.f32 %v8577_v25  ;;  %v8578_v63 = vadd.f32 %v8562_v45, %v15238_v41  ;;  %v8389_v30 = vadd.f32 1.0, %v12511_v12  ;;  %v15263_v59 = vpop.f32.mrb[251].mxu0  ;;  %v8640_v41 = vmul.f32 %v12505_v24, %v14929_v22 }
0x15c5   :  { %v8874_v44 = vpop.f32.mrb[154].mxu1  ;;  %v12515_v61 = vpop.eup %12514  ;;  %v8623_v21 = vmul.f32 %v12513_v36, %v8607_v0  ;;  %12534 = vpow2.f32 %v9590_v13  ;;  %8999 = vmatmul.mubr.bf16.vlgmr.msra.gmra.mrb[0].mxu0 %v8685_v10  ;;  %v9577_v13 = vmul.f32 -1.442695, %v10965_v8  ;;  %v10966_v38 = vadd.f32 %v8203_v51, %v14837_v9 }
0x15c6   :  { %v15266_v56 = vpop.f32.mrb[155].mxu1  ;;  %v12517_v52 = vpop.eup %12516  ;;  %12536 = vtanh.f32 %v8578_v63  ;;  %9006 = vmatprep.mubr.bf16.mxu0 %v15574_v57  ;;  %v9592_v22 = vmul.f32 -1.442695, %v10964_v50  ;;  %v10967_v51 = vadd.f32 %v8205_v1, %v14834_v20 }
0x15c7   :  { %v12519_v34 = vpop.eup %12518  ;;  %v8655_v48 = vadd.f32 %v8639_v6, %v8623_v21  ;;  %v8624_v0 = vmul.f32 %v12517_v52, %v8608_v42  ;;  %12538 = vrcp.f32 %v8389_v30  ;;  %v8211_v24 = vpop.f32.mrb[252].mxu0  ;;  %v8072_v6 = vadd.f32 %v15115_v19, %v14852_v33 }
0x15c8   :  { %v12521_v49 = vpop.eup %12520  ;;  %v8563_v5 = vmul.f32 %v12519_v34, %v8547_v18  ;;  %12540 = vpow2.f32 %v9591_v62  ;;  %v8213_v12 = vpop.f32.mrb[253].mxu0  ;;  %v9593_v44 = vmul.f32 -1.442695, %v10966_v38  ;;  %v10969_v50 = vadd.f32 %v8211_v24, %v14834_v20 }
0x15c9   :  { %v12523_v46 = vpop.eup %12522  ;;  %v8656_v25 = vadd.f32 %v8640_v41, %v8624_v0  ;;  %12542 = vpow2.f32 %v9576_v14  ;;  %v8879_v10 = vpop.f32.mrb[156].mxu1  ;;  %v8609_v14 = vsub.f32 1.0, %v12515_v61  ;;  %v8641_v18 = vmul.f32 %v12515_v61, %v14947_v26 }
0x15ca   :  { %v12525_v40 = vpop.eup %12524  ;;  %v8579_v45 = vadd.f32 %v8563_v5, %v15229_v39  ;;  %v8564_v27 = vmul.f32 %v12523_v46, %v8548_v15  ;;  %12544 = vrcp.f32 %v8500_v16  ;;  %v8215_v8 = vpop.f32.mrb[254].mxu0  ;;  %v8610_v0 = vsub.f32 1.0, %v12521_v49 }
0x15cb   :  { %v12527_v11 = vpop.eup %12526  ;;  %v8686_v42 = vpack.c.bf16 %v8656_v25, %v8655_v48  ;;  %12546 = vpow2.f32 %v9577_v13  ;;  %v15279_v36 = vpop.f32.mrb[157].mxu1  ;;  %v8501_v41 = vadd.f32 1.0, %v12525_v40  ;;  %v9578_v13 = vmul.f32 -1.442695, %v10967_v51 }
0x15cc   :  { %v12529_v63 = vpop.eup %12528  ;;  %12548 = vtanh.f32 %v8579_v45  ;;  %v8580_v30 = vadd.f32 %v8564_v27, %v8072_v6  ;;  %v8390_v62 = vadd.f32 1.0, %v12527_v11  ;;  %v15281_v19 = vpop.f32.mrb[255].mxu0  ;;  %v8549_v5 = vadd.f32 %v15198_v31, %v15153_v7 }
0x15cd   :  { %v8882_v39 = vpop.f32.mrb[158].mxu1  ;;  %v12531_v21 = vpop.eup %12530  ;;  %12550 = vpow2.f32 %v9592_v22  ;;  %9007 = vmatmul.mubr.bf16.gmra.mrb[4].mxu0 %v8686_v42  ;;  %v8642_v38 = vmul.f32 %v12521_v49, %v14953_v35  ;;  %v9579_v61 = vmul.f32 -1.442695, %v10969_v50  ;;  %v8077_v24 = vadd.f32 %v15121_v28, %v14852_v33 }
0x15ce   :  { %v15284_v52 = vpop.f32.mrb[159].mxu1  ;;  %v12533_v1 = vpop.eup %12532  ;;  %12552 = vtanh.f32 %v8580_v30  ;;  %v8391_v16 = vadd.f32 1.0, %v12531_v21  ;;  %9014 = vmatprep.mubr.bf16.mxu0 %v15574_v57  ;;  %v10968_v6 = vadd.f32 %v15263_v59, %v14837_v9  ;;  %v10971_v11 = vadd.f32 %v8215_v8, %v14834_v20 }
0x15cf   :  { %v12535_v34 = vpop.eup %12534  ;;  %v8625_v48 = vmul.f32 %v12533_v1, %v8609_v14  ;;  %12554 = vrcp.f32 %v8390_v62  ;;  %v8611_v30 = vsub.f32 1.0, %v12529_v63  ;;  %v10970_v28 = vadd.f32 %v8213_v12, %v14837_v9 }
0x15d0   :  { %v12537_v15 = vpop.eup %12536  ;;  %12556 = vpow2.f32 %v9593_v44  ;;  %v8502_v49 = vadd.f32 1.0, %v12535_v34  ;;  %v9594_v59 = vmul.f32 -1.442695, %v10968_v6  ;;  %v8643_v50 = vmul.f32 %v12529_v63, %v14966_v53 }
0x15d1   :  { %v12539_v46 = vpop.eup %12538  ;;  %v8657_v25 = vadd.f32 %v8641_v18, %v8625_v48  ;;  %v8626_v26 = vmul.f32 %v12537_v15, %v8610_v0  ;;  %12558 = vrcp.f32 %v8391_v16  ;;  %v8550_v20 = vadd.f32 %v15198_v31, %v15157_v43 }
0x15d2   :  { %v12541_v22 = vpop.eup %12540  ;;  %v8565_v40 = vmul.f32 %v12539_v46, %v8549_v5  ;;  %12560 = vrcp.f32 %v8501_v41  ;;  %v9580_v12 = vmul.f32 -1.442695, %v10971_v11  ;;  %v9595_v48 = vmul.f32 -1.442695, %v10970_v28 }
0x15d3   :  { %v12543_v45 = vpop.eup %12542  ;;  %v8658_v27 = vadd.f32 %v8642_v38, %v8626_v26  ;;  %12562 = vpow2.f32 %v9578_v13  ;;  %v8503_v44 = vadd.f32 1.0, %v12541_v22  ;;  %v8080_v53 = vadd.f32 %v15125_v32, %v14852_v33 }
0x15d4   :  { %v12545_v7 = vpop.eup %12544  ;;  %v8581_v35 = vadd.f32 %v8565_v40, %v8077_v24  ;;  %v8392_v10 = vadd.f32 1.0, %v12543_v45  ;;  %12564 = vpow2.f32 %v9579_v61  ;;  %v8551_v63 = vadd.f32 %v15198_v31, %v15151_v60 }
0x15d5   :  { %v12547_v42 = vpop.eup %12546  ;;  %v8687_v51 = vpack.c.bf16 %v8658_v27, %v8657_v25  ;;  %v8612_v1 = vsub.f32 1.0, %v12545_v7  ;;  %v8644_v8 = vmul.f32 %v12545_v7, %v14974_v29  ;;  %v8085_v29 = vadd.f32 %v15119_v3, %v14852_v33 }
0x15d6   :  { %v12549_v62 = vpop.eup %12548  ;;  %12566 = vtanh.f32 %v8581_v35  ;;  %v8393_v39 = vadd.f32 1.0, %v12547_v42  ;;  %v10972_v26 = vadd.f32 %v15281_v19, %v14837_v9  ;;  %v8552_v45 = vadd.f32 %v15198_v31, %v15155_v47 }
0x15d7   :  { %v12551_v21 = vpop.eup %12550  ;;  %v8627_v14 = vmul.f32 %v12549_v62, %v8611_v30  ;;  %12568 = vrcp.f32 %v8392_v10  ;;  %9015 = vmatmul.mubr.bf16.gmra.mrb[8].mxu0 %v8687_v51  ;;  %v8088_v10 = vadd.f32 %v15123_v23, %v14852_v33  ;;  %v8553_v11 = vadd.f32 %v15198_v31, %v15161_v55 }
0x15d8   :  { %v12553_v18 = vpop.eup %12552  ;;  %12570 = vrcp.f32 %v8502_v49  ;;  %9022 = vmatprep.mubr.bf16.mxu0 %v15574_v57  ;;  %v8504_v5 = vadd.f32 1.0, %v12551_v21  ;;  %v9596_v7 = vmul.f32 -1.442695, %v10972_v26  ;;  %v8093_v28 = vadd.f32 %v15129_v37, %v14852_v33 }
0x15d9   :  { %v12555_v41 = vpop.eup %12554  ;;  %v8659_v16 = vadd.f32 %v8643_v50, %v8627_v14  ;;  %v8628_v34 = vmul.f32 %v12553_v18, %v8612_v1  ;;  %12572 = vrcp.f32 %v8393_v39  ;;  %v8554_v37 = vadd.f32 %v15198_v31, %v15165_v4 }
0x15da   :  { %v12557_v0 = vpop.eup %12556  ;;  %v8566_v13 = vmul.f32 %v12555_v41, %v8550_v20  ;;  %12574 = vrcp.f32 %v8503_v44 }
0x15db   :  { %v12559_v43 = vpop.eup %12558  ;;  %v8660_v15 = vadd.f32 %v8644_v8, %v8628_v34  ;;  %12576 = vpow2.f32 %v9594_v59  ;;  %v8505_v22 = vadd.f32 1.0, %v12557_v0 }
0x15dc   :  { %v12561_v38 = vpop.eup %12560  ;;  %v8582_v46 = vadd.f32 %v8566_v13, %v8080_v53  ;;  %v8567_v25 = vmul.f32 %v12559_v43, %v8551_v63  ;;  %12578 = vpow2.f32 %v9580_v12  ;;  %v15600_v63 = vld [vmem:[#allocation25_spill] sm:$0xff]  ;;  %v15601_v43 = vld [vmem:[#allocation34_spill] sm:$0xff] }
0x15dd   :  { %v12563_v32 = vpop.eup %12562  ;;  %v8688_v61 = vpack.c.bf16 %v8660_v15, %v8659_v16  ;;  %12580 = vpow2.f32 %v9595_v48  ;;  %v8613_v6 = vsub.f32 1.0, %v12561_v38  ;;  %v8645_v35 = vmul.f32 %v12561_v38, %v14990_v54 }
0x15de   :  { %12582 = vtanh.f32 %v8582_v46  ;;  %v8583_v60 = vadd.f32 %v8567_v25, %v8085_v29  ;;  %v8394_v24 = vadd.f32 1.0, %v12563_v32  ;;  %v12565_v40 = vpop.eup %12564  ;;  %v8096_v13 = vadd.f32 %v15600_v63, %v14852_v33  ;;  %v15602_v46 = vld [vmem:[#allocation26_spill] sm:$0xff] }
0x15df   :  { %12584 = vrcp.f32 %v8504_v5  ;;  %9023 = vmatmul.mubr.bf16.gmra.mrb[12].mxu0 %v8688_v61  ;;  %v8395_v27 = vadd.f32 1.0, %v12565_v40  ;;  %v8555_v29 = vadd.f32 %v15198_v31, %v15601_v43  ;;  %v8101_v25 = vadd.f32 %v15602_v46, %v14852_v33 }
0x15e0   :  { %v12567_v3 = vpop.eup %12566  ;;  %12586 = vtanh.f32 %v8583_v60  ;;  %9030 = vmatprep.mubr.bf16.mxu0 %v15574_v57 }
0x15e1   :  { %v12569_v9 = vpop.eup %12568  ;;  %v8629_v19 = vmul.f32 %v12567_v3, %v8613_v6  ;;  %12588 = vrcp.f32 %v8394_v24  ;;  %v15603_v24 = vld [vmem:[#allocation20_spill] sm:$0xff] }
0x15e2   :  { %v12571_v49 = vpop.eup %12570  ;;  %v8568_v42 = vmul.f32 %v12569_v9, %v8552_v45  ;;  %12590 = vrcp.f32 %v8505_v22 }
0x15e3   :  { %v12573_v47 = vpop.eup %12572  ;;  %v8661_v51 = vadd.f32 %v8645_v35, %v8629_v19  ;;  %12592 = vrcp.f32 %v8395_v27  ;;  %v8614_v21 = vsub.f32 1.0, %v12571_v49  ;;  %v8646_v20 = vmul.f32 %v12571_v49, %v14998_v17  ;;  %v15604_v27 = vld [vmem:[#allocation38_spill] sm:$0xff] }
0x15e4   :  { %v12575_v30 = vpop.eup %12574  ;;  %v8584_v62 = vadd.f32 %v8568_v42, %v8088_v10  ;;  %v8569_v44 = vmul.f32 %v12573_v47, %v8553_v11  ;;  %12594 = vpow2.f32 %v9596_v7  ;;  %v8556_v7 = vadd.f32 %v15198_v31, %v15604_v27  ;;  %v15605_v35 = vld [vmem:[#allocation22_spill] sm:$0xff]  ;;  %v15606_v11 = vld [vmem:[#allocation33_spill] sm:$0xff] }
0x15e5   :  { %v12577_v54 = vpop.eup %12576  ;;  %v8615_v8 = vsub.f32 1.0, %v12575_v30  ;;  %v8647_v0 = vmul.f32 %v12575_v30, %v15004_v2  ;;  %v8104_v42 = vadd.f32 %v15606_v11, %v14852_v33 }
0x15e6   :  { %v12579_v39 = vpop.eup %12578  ;;  %12596 = vtanh.f32 %v8584_v62  ;;  %v8585_v59 = vadd.f32 %v8569_v44, %v8093_v28  ;;  %v8506_v50 = vadd.f32 1.0, %v12577_v54 }
0x15e7   :  { %v12581_v23 = vpop.eup %12580  ;;  %v8396_v14 = vadd.f32 1.0, %v12579_v39 }
0x15e8   :  { %v12583_v55 = vpop.eup %12582  ;;  %12598 = vtanh.f32 %v8585_v59  ;;  %v8507_v41 = vadd.f32 1.0, %v12581_v23  ;;  %v15607_v59 = vld [vmem:[#allocation39_spill] sm:$0xff] }
0x15e9   :  { %v12585_v1 = vpop.eup %12584  ;;  %v8630_v18 = vmul.f32 %v12583_v55, %v8614_v21  ;;  %12600 = vrcp.f32 %v8396_v14 }
0x15ea   :  { %v12587_v12 = vpop.eup %12586  ;;  %12602 = vrcp.f32 %v8506_v50  ;;  %v8616_v2 = vsub.f32 1.0, %v12585_v1  ;;  %v8648_v40 = vmul.f32 %v12585_v1, %v15603_v24  ;;  %v15608_v50 = vld [vmem:[#allocation27_spill] sm:$0xff] }
0x15eb   :  { %v12589_v16 = vpop.eup %12588  ;;  %v8662_v34 = vadd.f32 %v8646_v20, %v8630_v18  ;;  %v8631_v48 = vmul.f32 %v12587_v12, %v8615_v8  ;;  %12604 = vrcp.f32 %v8507_v41 }
0x15ec   :  { %v12591_v53 = vpop.eup %12590  ;;  %v8570_v17 = vmul.f32 %v12589_v16, %v8554_v37  ;;  %v15609_v16 = vld [vmem:[#allocation28_spill] sm:$0xff] }
0x15ed   :  { %v12593_v15 = vpop.eup %12592  ;;  %v8689_v5 = vpack.c.bf16 %v8662_v34, %v8661_v51  ;;  %v8663_v38 = vadd.f32 %v8647_v0, %v8631_v48  ;;  %v8617_v6 = vsub.f32 1.0, %v12591_v53  ;;  %v8649_v49 = vmul.f32 %v12591_v53, %v15605_v35  ;;  %v9063_v53 = vld [vmem:[%s15401_s9] sm:$0x3]  ;;  %s12950_s9 = smov [#allocation14]  }
0x15ee   :  { %v12595_v4 = vpop.eup %12594  ;;  %v8586_v26 = vadd.f32 %v8570_v17, %v8096_v13  ;;  %v8571_v32 = vmul.f32 %v12593_v15, %v8555_v29  ;;  %v15610_v13 = vld [vmem:[#allocation21_spill] sm:$0xff]  ;;  %v15611_v17 = vld [vmem:[#allocation23_spill] sm:$0xff]  ;;  %s9107_s0 = sshll.u32 %s12950_s9, 4  ;;  %s9108_s0 = int_to_ptr.vmem [resolvable:$true] %s9107_s0 }
0x15ef   :  { %9031 = vmatmul.mubr.bf16.gmra.mrb[16].mxu0 %v8689_v5  ;;  %v8508_v3 = vadd.f32 1.0, %v12595_v4  ;;  %v15346_v43 = vrot.slane %v9063_v53, %v15610_v13  ;;  %v15612_v4 = vld [vmem:[#allocation31_spill] sm:$0xff]  ;;  %v15622_v53 = vld [vmem:[#allocation42_spill] sm:$0xff]  ;;  %s12904_s25 = scalar_lea.vmem %s9108_s0, 6144  ;;  %p12909_p1 = scmp.lt.s32.totalorder %s9108_s0, %s9108_s0 }
0x15f0   :  { %v12597_v61 = vpop.eup %12596  ;;  %12606 = vtanh.f32 %v8586_v26  ;;  %v8587_v60 = vadd.f32 %v8571_v32, %v8101_v25  ;;  %9038 = vmatprep.mubr.bf16.mxu0 %v15574_v57  ;;  %p12905_p0 = scmp.ne.s32.totalorder %s9108_s0, %s12904_s25  ;;  %p12910_p2 = scmp.lt.s32.totalorder %s12904_s25, %s12904_s25 }
0x15f1   :  { %v8632_v22 = vmul.f32 %v12597_v61, %v8616_v2  ;;  %v15613_v2 = vld [vmem:[#allocation29_spill] sm:$0xff] }
0x15f2   :  { %v12599_v45 = vpop.eup %12598  ;;  %12608 = vtanh.f32 %v8587_v60  ;;  %p12911_p3 = por %p12910_p2, %p12909_p1 }
0x15f3   :  { %v8664_v9 = vadd.f32 %v8648_v40, %v8632_v22  ;;  %v8633_v19 = vmul.f32 %v12599_v45, %v8617_v6  ;;  %v12601_v10 = vpop.eup %12600  ;;  %12610 = vrcp.f32 %v8508_v3  ;;  %v15614_v40 = vld [vmem:[#allocation24_spill] sm:$0xff] }
0x15f4   :  { %v8572_v30 = vmul.f32 %v12601_v10, %v8556_v7  ;;  %v12603_v28 = vpop.eup %12602  ;;  %v15615_v7 = vld [vmem:[#allocation32_spill] sm:$0xff]  ;;  %v15616_v10 = vld [vmem:[#allocation30_spill] sm:$0xff]  ;;  %p12912_p4 = pnand %p12911_p3, %p12905_p0 }
0x15f5   :  { %v8690_v47 = vpack.c.bf16 %v8664_v9, %v8663_v38  ;;  %v8665_v51 = vadd.f32 %v8649_v49, %v8633_v19  ;;  %v12605_v44 = vpop.eup %12604  ;;  %v8618_v54 = vsub.f32 1.0, %v12603_v28  ;;  %v8650_v23 = vmul.f32 %v12603_v28, %v15607_v59 }
0x15f6   :  { %v8588_v62 = vadd.f32 %v8572_v30, %v8104_v42  ;;  %v8619_v21 = vsub.f32 1.0, %v12605_v44  ;;  %v8651_v1 = vmul.f32 %v12605_v44, %v15608_v50  ;;  %v15617_v30 = vld [vmem:[#allocation35_spill] sm:$0xff] }
0x15f7   :  { %9039 = vmatmul.mubr.bf16.gmra.mrb[20].mxu0 %v8690_v47 }
0x15f8   :  { %9046 = vmatprep.mubr.bf16.mxu0 %v15574_v57  ;;  %12612 = vtanh.f32 %v8588_v62 }
0x15fa   :  { %v12607_v31 = vpop.eup %12606 }
0x15fb   :  { %v8634_v39 = vmul.f32 %v12607_v31, %v8618_v54  ;;  %v15618_v31 = vld [vmem:[#allocation37_spill] sm:$0xff] }
0x15fc   :  { %v12609_v14 = vpop.eup %12608 }
0x15fd   :  { %v8666_v55 = vadd.f32 %v8650_v23, %v8634_v39  ;;  %v8635_v33 = vmul.f32 %v12609_v14, %v8619_v21  ;;  %v12611_v18 = vpop.eup %12610  ;;  %v15619_v14 = vld [vmem:[#allocation36_spill] sm:$0xff] }
0x15fe   :  { %v8620_v12 = vsub.f32 1.0, %v12611_v18  ;;  %v8652_v34 = vmul.f32 %v12611_v18, %v15609_v16  ;;  %v15620_v18 = vld [vmem:[#allocation40_spill] sm:$0xff] }
0x15ff   :  { %v8691_v20 = vpack.c.bf16 %v8666_v55, %v8665_v51  ;;  %v8667_v8 = vadd.f32 %v8651_v1, %v8635_v33 }
0x1601   :  { %9047 = vmatmul.mubr.bf16.gmra.mrb[24].mxu0 %v8691_v20 }
0x1602   :  { %9054 = vmatprep.mubr.bf16.mxu0 %v15574_v57  ;;  %v12613_v37 = vpop.eup %12612 }
0x1603   :  { %v8636_v41 = vmul.f32 %v12613_v37, %v8620_v12 }
0x1605   :  { %v8668_v48 = vadd.f32 %v8652_v34, %v8636_v41  ;;  %v15621_v41 = vld [vmem:[#allocation41_spill] sm:$0xff] }
0x1607   :  { %v8692_v0 = vpack.c.bf16 %v8668_v48, %v8667_v8 }
0x1609   :  { %9055 = vmatmul.mubr.bf16.gmra.mrb[28].mxu0 %v8692_v0 }
0x1698   :  { %v9000_v63 = vpop.f32.mrb[0].mxu0 }
0x1699   :  { %v9001_v29 = vpop.f32.mrb[1].mxu0 }
0x169a   :  { %v9002_v15 = vadd.f32 %v9001_v29, %v15611_v17  ;;  %v9003_v5 = vpop.f32.mrb[2].mxu0 }
0x169b   :  { %v9004_v57 = vpop.f32.mrb[3].mxu0 }
0x169c   :  { %v9070_v38 = vadd.f32 %v15346_v43, %v9002_v15  ;;  %v9005_v46 = vadd.f32 %v9004_v57, %v15612_v4 }
0x169e   :  { %9086 = vst [vmem:[#allocation14 + $0x10] sm:$0xff] %v9070_v38  ;;  %v9071_v25 = vadd.f32 %v15346_v43, %v9005_v46 }
0x16a0   :  { %9087 = vst [vmem:[#allocation14 + $0x28] sm:$0xff] %v9071_v25  ;;  %v9008_v26 = vpop.f32.mrb[4].mxu0 }
0x16a1   :  { %v9009_v32 = vpop.f32.mrb[5].mxu0 }
0x16a2   :  { %v9010_v61 = vadd.f32 %v9009_v32, %v15613_v2  ;;  %v9011_v60 = vpop.f32.mrb[6].mxu0 }
0x16a3   :  { %v9012_v22 = vpop.f32.mrb[7].mxu0 }
0x16a4   :  { %v9072_v24 = vadd.f32 %v15346_v43, %v9010_v61  ;;  %v9013_v6 = vadd.f32 %v9012_v22, %v15614_v40 }
0x16a6   :  { %9088 = vst [vmem:[#allocation14 + $0x40] sm:$0xff] %v9072_v24  ;;  %v9073_v3 = vadd.f32 %v15346_v43, %v9013_v6 }
0x16a8   :  { %9089 = vst [vmem:[#allocation14 + $0x58] sm:$0xff] %v9073_v3 }
0x16aa   :  { %v9016_v45 = vpop.f32.mrb[8].mxu0 }
0x16ab   :  { %v9017_v27 = vpop.f32.mrb[9].mxu0 }
0x16ac   :  { %v9018_v9 = vadd.f32 %v9017_v27, %v15615_v7  ;;  %v9019_v19 = vpop.f32.mrb[10].mxu0 }
0x16ad   :  { %v9020_v35 = vpop.f32.mrb[11].mxu0 }
0x16ae   :  { %v9074_v49 = vadd.f32 %v15346_v43, %v9018_v9  ;;  %v9021_v11 = vadd.f32 %v9020_v35, %v15616_v10 }
0x16b0   :  { %9090 = vst [vmem:[#allocation14 + $0x70] sm:$0xff] %v9074_v49  ;;  %v9075_v42 = vadd.f32 %v15346_v43, %v9021_v11 }
0x16b2   :  { %9091 = vst [vmem:[#allocation14 + $0x88] sm:$0xff] %v9075_v42  ;;  %v9024_v47 = vpop.f32.mrb[12].mxu0 }
0x16b3   :  { %v9025_v51 = vpop.f32.mrb[13].mxu0 }
0x16b4   :  { %v9026_v28 = vadd.f32 %v9025_v51, %v15617_v30  ;;  %v9027_v62 = vpop.f32.mrb[14].mxu0 }
0x16b5   :  { %v9028_v44 = vpop.f32.mrb[15].mxu0 }
0x16b6   :  { %v9076_v54 = vadd.f32 %v15346_v43, %v9026_v28  ;;  %v9029_v39 = vadd.f32 %v9028_v44, %v15618_v31 }
0x16b8   :  { %9092 = vst [vmem:[#allocation14 + $0xa0] sm:$0xff] %v9076_v54  ;;  %v9077_v59 = vadd.f32 %v15346_v43, %v9029_v39 }
0x16ba   :  { %9093 = vst [vmem:[#allocation14 + $0xb8] sm:$0xff] %v9077_v59 }
0x16c2   :  { %v9032_v23 = vpop.f32.mrb[16].mxu0 }
0x16c3   :  { %v9033_v21 = vpop.f32.mrb[17].mxu0 }
0x16c4   :  { %v9034_v55 = vadd.f32 %v9033_v21, %v15619_v14  ;;  %v9035_v33 = vpop.f32.mrb[18].mxu0 }
0x16c5   :  { %v9036_v50 = vpop.f32.mrb[19].mxu0 }
0x16c6   :  { %v9078_v1 = vadd.f32 %v15346_v43, %v9034_v55  ;;  %v9037_v20 = vadd.f32 %v9036_v50, %v15620_v18 }
0x16c8   :  { %9094 = vst [vmem:[#allocation14 + $0xd0] sm:$0xff] %v9078_v1  ;;  %v9079_v8 = vadd.f32 %v15346_v43, %v9037_v20 }
0x16ca   :  { %9095 = vst [vmem:[#allocation14 + $0xe8] sm:$0xff] %v9079_v8  ;;  %v9040_v12 = vpop.f32.mrb[20].mxu0 }
0x16cb   :  { %v9041_v37 = vpop.f32.mrb[21].mxu0 }
0x16cc   :  { %v9042_v16 = vadd.f32 %v9041_v37, %v15621_v41  ;;  %v9043_v34 = vpop.f32.mrb[22].mxu0 }
0x16cd   :  { %v9044_v48 = vpop.f32.mrb[23].mxu0 }
0x16ce   :  { %v9080_v0 = vadd.f32 %v15346_v43, %v9042_v16  ;;  %v9045_v63 = vadd.f32 %v9044_v48, %v15622_v53 }
0x16d0   :  { %9096 = vst [vmem:[#allocation14 + $0x100] sm:$0xff] %v9080_v0  ;;  %v9081_v13 = vadd.f32 %v15346_v43, %v9045_v63 }
0x16d2   :  { %9097 = vst [vmem:[#allocation14 + $0x118] sm:$0xff] %v9081_v13 }
0x16d4   :  { %v9048_v29 = vpop.f32.mrb[24].mxu0 }
0x16d5   :  { %v9049_v17 = vpop.f32.mrb[25].mxu0 }
0x16d6   :  { %v9050_v15 = vadd.f32 %v9049_v17, %v15260_v58  ;;  %v9051_v5 = vpop.f32.mrb[26].mxu0 }
0x16d7   :  { %v9052_v57 = vpop.f32.mrb[27].mxu0 }
0x16d8   :  { %v9082_v38 = vadd.f32 %v15346_v43, %v9050_v15  ;;  %v9053_v4 = vadd.f32 %v9052_v57, %v15266_v56 }
0x16da   :  { %9098 = vst [vmem:[#allocation14 + $0x130] sm:$0xff] %v9082_v38  ;;  %v9083_v46 = vadd.f32 %v15346_v43, %v9053_v4 }
0x16dc   :  { %9099 = vst [vmem:[#allocation14 + $0x148] sm:$0xff] %v9083_v46  ;;  %v9056_v25 = vpop.f32.mrb[28].mxu0 }
0x16dd   :  { %v9057_v26 = vpop.f32.mrb[29].mxu0 }
0x16de   :  { %v9058_v32 = vadd.f32 %v9057_v26, %v15279_v36  ;;  %v9059_v2 = vpop.f32.mrb[30].mxu0 }
0x16df   :  { %v9060_v61 = vpop.f32.mrb[31].mxu0 }
0x16e0   :  { %v9084_v58 = vadd.f32 %v15346_v43, %v9058_v32  ;;  %v9061_v60 = vadd.f32 %v9060_v61, %v15284_v52 }
0x16e2   :  { %9100 = vst [vmem:[#allocation14 + $0x160] sm:$0xff] %v9084_v58  ;;  %v9085_v56 = vadd.f32 %v15346_v43, %v9061_v60 }
0x16e4   :  { %9101 = vst [vmem:[#allocation14 + $0x178] sm:$0xff] %v9085_v56 }
0x16e5   :  { %12915 = shalt.err (!%p12912_p4)
}
0x16e6   :  { %s12916_s1 = scalar_lea.hbm %s15402_s10, 6144 }
0x16e7   :  { %p12917_p5 = scmp.ne.s32.totalorder %s15402_s10, %s12916_s1  ;;  %p12920_p6 = scmp.lt.u32.totalorder %s12916_s1, %s15402_s10 }
0x16e9   :  { %p12922_p7 = pnand %p12920_p6, %p12917_p5 }
0x16eb   :  { %12925 = shalt.err (!%p12922_p7)
}
0x16ec   :  { %s12951_s3 = smov 384   ;;  %s12952_s26 = smov 24  }
0x16ed   :  { %9113 = dma.vmem_to_hbm [thread:$0]  %s9108_s0, 6144, %s15402_s10, [#allocation4], %s12951_s3, %s12951_s3, %s12952_s26  }
0x16ee   :  { %12934 = dma.done.wait [#allocation4], 6144  }
0x16ef   :  { %12935 = vsyncadd [#allocation4], 4294961152 }
0x16f0   :  { %9117 = vsyncpa [#allocation3], 1 }
0x16f1   :  { %9118 = vsyncpa [#allocation6], 1 }
0x16f2   :  { %9119 = vsyncpa [#allocation9], 1 }
0x16f3   :  { %9120 = vsyncpa [#allocation12], 1 }
0x16f4   :  { %9121 = vsyncpa [#allocation4], 1 }

</bundles_post_ra>
